<compile_context>
chip_gen: v6e
topology: v6e:2x2x1
jax: 0.10.0
libtpu: 0.0.40
codegen_flags: <defaults>
</compile_context>

<pallas_src>
import functools

import jax
import jax.numpy as jnp
from jax.experimental import pallas as pl
from jax.experimental.pallas import tpu as pltpu


def conv3d_relu_kernel(x_ref, w_ref, b_ref, o_ref, *, kd, kh, kw, d_out, h_out, w_out):
    """One grid step computes the full output volume of one batch element.

    x_ref : (1, Dp, Hp, Wp, Cin)          padded, channels-last input for batch n
    w_ref : (KD*KH*KW, Cout, Cin)         one (Cout, Cin) matrix per kernel tap
    b_ref : (Cout, 1)
    o_ref : (1, Cout, D_out*H_out*W_out)  lane-dense output (last dim = 512 here)
    """
    cout = w_ref.shape[1]
    cin = w_ref.shape[2]
    m = d_out * h_out * w_out

    # Lane-dense f32 accumulator: (Cout, M).  With Cout=8, M=512 this is 4 vregs.
    acc = jnp.zeros((cout, m), jnp.float32)

    t = 0
    for i in range(kd):          # static tap loops -> fully unrolled, static slices
        for j in range(kh):
            for k in range(kw):
                # (D_out, H_out, W_out, Cin) window; collapse leading dims (free:
                # W_out == 8 == f32 sublane tile) into (M, Cin).
                patch = x_ref[0, i:i + d_out, j:j + h_out, k:k + w_out, :]
                p2 = patch.reshape(m, cin)
                # (Cout, Cin) x (M, Cin)^T -> (Cout, M): minor-minor contraction
                # (same MXU pattern as q @ k^T); output columns are lane-dense.
                acc = acc + jax.lax.dot_general(
                    w_ref[t], p2,
                    dimension_numbers=(((1,), (1,)), ((), ())),
                    preferred_element_type=jnp.float32)
                t += 1

    acc = acc + b_ref[...]            # (Cout, 1) broadcast along lanes
    acc = jnp.maximum(acc, 0.0)       # fused ReLU
    o_ref[...] = acc.reshape(1, cout, m).astype(o_ref.dtype)


def conv_block_3d(x_ncdhw, weight_oidhw, bias, *, padding=1):
    """Forward of ConvBlock3D: ReLU(Conv3d(x)) with stride=1, padding=`padding`."""
    N, Cin, D, H, W = x_ncdhw.shape
    Cout, _, KD, KH, KW = weight_oidhw.shape
    p = padding

    # NCDHW -> NDHWC (channels on the lane axis), pad spatially.
    x = jnp.transpose(x_ncdhw, (0, 2, 3, 4, 1)).astype(jnp.float32)
    xp = jnp.pad(x, ((0, 0), (p, p), (p, p), (p, p), (0, 0)))
    Dp, Hp, Wp = D + 2 * p, H + 2 * p, W + 2 * p
    D_out, H_out, W_out = Dp - KD + 1, Hp - KH + 1, Wp - KW + 1
    M = D_out * H_out * W_out

    # (Cout, Cin, KD, KH, KW) -> (KD*KH*KW, Cout, Cin): one small matrix per tap,
    # tap order (i, j, k) matches the kernel's loop order.
    w_taps = jnp.transpose(weight_oidhw, (2, 3, 4, 0, 1)).reshape(
        KD * KH * KW, Cout, Cin).astype(jnp.float32)
    b2 = bias.reshape(Cout, 1).astype(jnp.float32)

    kernel = functools.partial(
        conv3d_relu_kernel,
        kd=KD, kh=KH, kw=KW, d_out=D_out, h_out=H_out, w_out=W_out)

    out_flat = pl.pallas_call(
        kernel,
        out_shape=jax.ShapeDtypeStruct((N, Cout, M), jnp.float32),
        grid=(N,),
        in_specs=[
            # Full padded volume of one batch element resident per step (~16 KiB here).
            # TODO: depth-blocked halo window for large volumes (v7x VMEM budget).
            pl.BlockSpec((1, Dp, Hp, Wp, Cin), lambda n: (n, 0, 0, 0, 0)),
            pl.BlockSpec((KD * KH * KW, Cout, Cin), lambda n: (0, 0, 0)),
            pl.BlockSpec((Cout, 1), lambda n: (0, 0)),
        ],
        # Lane-dense output block: last dim M = 512 (multiple of 128) -> unmasked
        # stores and a single dense writeback DMA per batch element.
        out_specs=pl.BlockSpec((1, Cout, M), lambda n: (n, 0, 0)),
        compiler_params=pltpu.CompilerParams(
            dimension_semantics=("parallel",),       # batch steps are independent
            vmem_limit_bytes=32 * 1024 * 1024),
    )(xp, w_taps, b2)

    # (N, Cout, D*H*W) -> (N, Cout, D, H, W): pure reshape, already NCDHW order.
    return out_flat.reshape(N, Cout, D_out, H_out, W_out)


def _reference(x_ncdhw, weight_oidhw, bias, *, padding=1):
    y = jax.lax.conv_general_dilated(
        x_ncdhw, weight_oidhw,
        window_strides=(1, 1, 1),
        padding=((padding, padding),) * 3,
        dimension_numbers=("NCDHW", "OIDHW", "NCDHW"))
    y = y + bias.reshape(1, -1, 1, 1, 1)
    return jnp.maximum(y, 0.0)


if __name__ == "__main__":
    # Module config: ConvBlock3D(in_channels=4, out_channels=8,
    #                            kernel_size=3, stride=1, padding=1)
    N, Cin, D, H, W = 2, 4, 8, 8, 8
    Cout, K, P = 8, 3, 1

    key = jax.random.PRNGKey(0)
    kx, kw, kb = jax.random.split(key, 3)
    x = jax.random.normal(kx, (N, Cin, D, H, W), dtype=jnp.float32)
    # Synthetic parameters with nn.Conv3d shapes: weight (Cout,Cin,KD,KH,KW), bias (Cout,)
    weight = jax.random.normal(kw, (Cout, Cin, K, K, K), dtype=jnp.float32) * 0.1
    bias = jax.random.normal(kb, (Cout,), dtype=jnp.float32) * 0.1

    out = conv_block_3d(x, weight, bias, padding=P)
    out = jax.block_until_ready(out)

    ref = _reference(x, weight, bias, padding=P)
    assert out.shape == (N, Cout, D, H, W), out.shape
    if not jnp.allclose(out, ref, rtol=1e-4, atol=1e-4):
        raise AssertionError("Pallas conv3d+relu mismatch vs lax reference")

    print("KERNEL_OK")
</pallas_src>

<mosaic_0001>
module attributes {stable_mosaic.version = 11 : i64} {
  func.func @conv3d_relu_kernel(%arg0: i32, %arg1: memref<1x10x10x10x4xf32, #tpu.memory_space<vmem>>, %arg2: memref<27x8x4xf32, #tpu.memory_space<vmem>>, %arg3: memref<8x1xf32, #tpu.memory_space<vmem>>, %arg4: memref<1x8x512xf32, #tpu.memory_space<vmem>>) attributes {dimension_semantics = [#tpu.dimension_semantics<parallel>], iteration_bounds = array<i64: 2>, scalar_prefetch = 0 : i64, scratch_operands = 0 : i64, tpu.core_type = #tpu.core_type<tc>, window_params = [{transform_indices = @transform_0, window_bounds = array<i64: 1, 10, 10, 10, 4>}, {pipeline_mode = #tpu.pipeline_mode<synchronous>, transform_indices = @transform_1, window_bounds = array<i64: 27, 8, 4>}, {pipeline_mode = #tpu.pipeline_mode<synchronous>, transform_indices = @transform_2, window_bounds = array<i64: 8, 1>}, {transform_indices = @transform_3, window_bounds = array<i64: 1, 8, 512>}]} {
    %cst = arith.constant 0.000000e+00 : f32
    %0 = vector.broadcast %cst : f32 to vector<8x512xf32>
    %c0 = arith.constant 0 : index
    %c0_0 = arith.constant 0 : index
    %c0_1 = arith.constant 0 : index
    %c0_2 = arith.constant 0 : index
    %c0_3 = arith.constant 0 : index
    %1 = vector.load %arg1[%c0, %c0_0, %c0_1, %c0_2, %c0_3] : memref<1x10x10x10x4xf32, #tpu.memory_space<vmem>>, vector<1x8x8x8x4xf32>
    %2 = vector.shape_cast %1 : vector<1x8x8x8x4xf32> to vector<8x8x8x4xf32>
    %3 = vector.shape_cast %2 : vector<8x8x8x4xf32> to vector<512x4xf32>
    %c0_4 = arith.constant 0 : index
    %c0_5 = arith.constant 0 : index
    %c0_6 = arith.constant 0 : index
    %4 = vector.load %arg2[%c0_4, %c0_5, %c0_6] : memref<27x8x4xf32, #tpu.memory_space<vmem>>, vector<1x8x4xf32>
    %5 = vector.shape_cast %4 : vector<1x8x4xf32> to vector<8x4xf32>
    %cst_7 = arith.constant dense<0.000000e+00> : vector<8x512xf32>
    %6 = tpu.matmul %5, %3, %cst_7 {dimension_numbers = #tpu.dot_dimension_numbers<[1], [1], [0], [0], [0, 0, 1, 0], [], []>} : vector<8x4xf32>, vector<512x4xf32>, vector<8x512xf32> -> vector<8x512xf32>
    %7 = arith.addf %0, %6 : vector<8x512xf32>
    %c0_8 = arith.constant 0 : index
    %c0_9 = arith.constant 0 : index
    %c0_10 = arith.constant 0 : index
    %c1 = arith.constant 1 : index
    %c0_11 = arith.constant 0 : index
    %8 = vector.load %arg1[%c0_8, %c0_9, %c0_10, %c1, %c0_11] : memref<1x10x10x10x4xf32, #tpu.memory_space<vmem>>, vector<1x8x8x8x4xf32>
    %9 = vector.shape_cast %8 : vector<1x8x8x8x4xf32> to vector<8x8x8x4xf32>
    %10 = vector.shape_cast %9 : vector<8x8x8x4xf32> to vector<512x4xf32>
    %c1_12 = arith.constant 1 : index
    %c0_13 = arith.constant 0 : index
    %c0_14 = arith.constant 0 : index
    %11 = vector.load %arg2[%c1_12, %c0_13, %c0_14] : memref<27x8x4xf32, #tpu.memory_space<vmem>>, vector<1x8x4xf32>
    %12 = vector.shape_cast %11 : vector<1x8x4xf32> to vector<8x4xf32>
    %cst_15 = arith.constant dense<0.000000e+00> : vector<8x512xf32>
    %13 = tpu.matmul %12, %10, %cst_15 {dimension_numbers = #tpu.dot_dimension_numbers<[1], [1], [0], [0], [0, 0, 1, 0], [], []>} : vector<8x4xf32>, vector<512x4xf32>, vector<8x512xf32> -> vector<8x512xf32>
    %14 = arith.addf %7, %13 : vector<8x512xf32>
    %c0_16 = arith.constant 0 : index
    %c0_17 = arith.constant 0 : index
    %c0_18 = arith.constant 0 : index
    %c2 = arith.constant 2 : index
    %c0_19 = arith.constant 0 : index
    %15 = vector.load %arg1[%c0_16, %c0_17, %c0_18, %c2, %c0_19] : memref<1x10x10x10x4xf32, #tpu.memory_space<vmem>>, vector<1x8x8x8x4xf32>
    %16 = vector.shape_cast %15 : vector<1x8x8x8x4xf32> to vector<8x8x8x4xf32>
    %17 = vector.shape_cast %16 : vector<8x8x8x4xf32> to vector<512x4xf32>
    %c2_20 = arith.constant 2 : index
    %c0_21 = arith.constant 0 : index
    %c0_22 = arith.constant 0 : index
    %18 = vector.load %arg2[%c2_20, %c0_21, %c0_22] : memref<27x8x4xf32, #tpu.memory_space<vmem>>, vector<1x8x4xf32>
    %19 = vector.shape_cast %18 : vector<1x8x4xf32> to vector<8x4xf32>
    %cst_23 = arith.constant dense<0.000000e+00> : vector<8x512xf32>
    %20 = tpu.matmul %19, %17, %cst_23 {dimension_numbers = #tpu.dot_dimension_numbers<[1], [1], [0], [0], [0, 0, 1, 0], [], []>} : vector<8x4xf32>, vector<512x4xf32>, vector<8x512xf32> -> vector<8x512xf32>
    %21 = arith.addf %14, %20 : vector<8x512xf32>
    %c0_24 = arith.constant 0 : index
    %c0_25 = arith.constant 0 : index
    %c1_26 = arith.constant 1 : index
    %c0_27 = arith.constant 0 : index
    %c0_28 = arith.constant 0 : index
    %22 = vector.load %arg1[%c0_24, %c0_25, %c1_26, %c0_27, %c0_28] : memref<1x10x10x10x4xf32, #tpu.memory_space<vmem>>, vector<1x8x8x8x4xf32>
    %23 = vector.shape_cast %22 : vector<1x8x8x8x4xf32> to vector<8x8x8x4xf32>
    %24 = vector.shape_cast %23 : vector<8x8x8x4xf32> to vector<512x4xf32>
    %c3 = arith.constant 3 : index
    %c0_29 = arith.constant 0 : index
    %c0_30 = arith.constant 0 : index
    %25 = vector.load %arg2[%c3, %c0_29, %c0_30] : memref<27x8x4xf32, #tpu.memory_space<vmem>>, vector<1x8x4xf32>
    %26 = vector.shape_cast %25 : vector<1x8x4xf32> to vector<8x4xf32>
    %cst_31 = arith.constant dense<0.000000e+00> : vector<8x512xf32>
    %27 = tpu.matmul %26, %24, %cst_31 {dimension_numbers = #tpu.dot_dimension_numbers<[1], [1], [0], [0], [0, 0, 1, 0], [], []>} : vector<8x4xf32>, vector<512x4xf32>, vector<8x512xf32> -> vector<8x512xf32>
    %28 = arith.addf %21, %27 : vector<8x512xf32>
    %c0_32 = arith.constant 0 : index
    %c0_33 = arith.constant 0 : index
    %c1_34 = arith.constant 1 : index
    %c1_35 = arith.constant 1 : index
    %c0_36 = arith.constant 0 : index
    %29 = vector.load %arg1[%c0_32, %c0_33, %c1_34, %c1_35, %c0_36] : memref<1x10x10x10x4xf32, #tpu.memory_space<vmem>>, vector<1x8x8x8x4xf32>
    %30 = vector.shape_cast %29 : vector<1x8x8x8x4xf32> to vector<8x8x8x4xf32>
    %31 = vector.shape_cast %30 : vector<8x8x8x4xf32> to vector<512x4xf32>
    %c4 = arith.constant 4 : index
    %c0_37 = arith.constant 0 : index
    %c0_38 = arith.constant 0 : index
    %32 = vector.load %arg2[%c4, %c0_37, %c0_38] : memref<27x8x4xf32, #tpu.memory_space<vmem>>, vector<1x8x4xf32>
    %33 = vector.shape_cast %32 : vector<1x8x4xf32> to vector<8x4xf32>
    %cst_39 = arith.constant dense<0.000000e+00> : vector<8x512xf32>
    %34 = tpu.matmul %33, %31, %cst_39 {dimension_numbers = #tpu.dot_dimension_numbers<[1], [1], [0], [0], [0, 0, 1, 0], [], []>} : vector<8x4xf32>, vector<512x4xf32>, vector<8x512xf32> -> vector<8x512xf32>
    %35 = arith.addf %28, %34 : vector<8x512xf32>
    %c0_40 = arith.constant 0 : index
    %c0_41 = arith.constant 0 : index
    %c1_42 = arith.constant 1 : index
    %c2_43 = arith.constant 2 : index
    %c0_44 = arith.constant 0 : index
    %36 = vector.load %arg1[%c0_40, %c0_41, %c1_42, %c2_43, %c0_44] : memref<1x10x10x10x4xf32, #tpu.memory_space<vmem>>, vector<1x8x8x8x4xf32>
    %37 = vector.shape_cast %36 : vector<1x8x8x8x4xf32> to vector<8x8x8x4xf32>
    %38 = vector.shape_cast %37 : vector<8x8x8x4xf32> to vector<512x4xf32>
    %c5 = arith.constant 5 : index
    %c0_45 = arith.constant 0 : index
    %c0_46 = arith.constant 0 : index
    %39 = vector.load %arg2[%c5, %c0_45, %c0_46] : memref<27x8x4xf32, #tpu.memory_space<vmem>>, vector<1x8x4xf32>
    %40 = vector.shape_cast %39 : vector<1x8x4xf32> to vector<8x4xf32>
    %cst_47 = arith.constant dense<0.000000e+00> : vector<8x512xf32>
    %41 = tpu.matmul %40, %38, %cst_47 {dimension_numbers = #tpu.dot_dimension_numbers<[1], [1], [0], [0], [0, 0, 1, 0], [], []>} : vector<8x4xf32>, vector<512x4xf32>, vector<8x512xf32> -> vector<8x512xf32>
    %42 = arith.addf %35, %41 : vector<8x512xf32>
    %c0_48 = arith.constant 0 : index
    %c0_49 = arith.constant 0 : index
    %c2_50 = arith.constant 2 : index
    %c0_51 = arith.constant 0 : index
    %c0_52 = arith.constant 0 : index
    %43 = vector.load %arg1[%c0_48, %c0_49, %c2_50, %c0_51, %c0_52] : memref<1x10x10x10x4xf32, #tpu.memory_space<vmem>>, vector<1x8x8x8x4xf32>
    %44 = vector.shape_cast %43 : vector<1x8x8x8x4xf32> to vector<8x8x8x4xf32>
    %45 = vector.shape_cast %44 : vector<8x8x8x4xf32> to vector<512x4xf32>
    %c6 = arith.constant 6 : index
    %c0_53 = arith.constant 0 : index
    %c0_54 = arith.constant 0 : index
    %46 = vector.load %arg2[%c6, %c0_53, %c0_54] : memref<27x8x4xf32, #tpu.memory_space<vmem>>, vector<1x8x4xf32>
    %47 = vector.shape_cast %46 : vector<1x8x4xf32> to vector<8x4xf32>
    %cst_55 = arith.constant dense<0.000000e+00> : vector<8x512xf32>
    %48 = tpu.matmul %47, %45, %cst_55 {dimension_numbers = #tpu.dot_dimension_numbers<[1], [1], [0], [0], [0, 0, 1, 0], [], []>} : vector<8x4xf32>, vector<512x4xf32>, vector<8x512xf32> -> vector<8x512xf32>
    %49 = arith.addf %42, %48 : vector<8x512xf32>
    %c0_56 = arith.constant 0 : index
    %c0_57 = arith.constant 0 : index
    %c2_58 = arith.constant 2 : index
    %c1_59 = arith.constant 1 : index
    %c0_60 = arith.constant 0 : index
    %50 = vector.load %arg1[%c0_56, %c0_57, %c2_58, %c1_59, %c0_60] : memref<1x10x10x10x4xf32, #tpu.memory_space<vmem>>, vector<1x8x8x8x4xf32>
    %51 = vector.shape_cast %50 : vector<1x8x8x8x4xf32> to vector<8x8x8x4xf32>
    %52 = vector.shape_cast %51 : vector<8x8x8x4xf32> to vector<512x4xf32>
    %c7 = arith.constant 7 : index
    %c0_61 = arith.constant 0 : index
    %c0_62 = arith.constant 0 : index
    %53 = vector.load %arg2[%c7, %c0_61, %c0_62] : memref<27x8x4xf32, #tpu.memory_space<vmem>>, vector<1x8x4xf32>
    %54 = vector.shape_cast %53 : vector<1x8x4xf32> to vector<8x4xf32>
    %cst_63 = arith.constant dense<0.000000e+00> : vector<8x512xf32>
    %55 = tpu.matmul %54, %52, %cst_63 {dimension_numbers = #tpu.dot_dimension_numbers<[1], [1], [0], [0], [0, 0, 1, 0], [], []>} : vector<8x4xf32>, vector<512x4xf32>, vector<8x512xf32> -> vector<8x512xf32>
    %56 = arith.addf %49, %55 : vector<8x512xf32>
    %c0_64 = arith.constant 0 : index
    %c0_65 = arith.constant 0 : index
    %c2_66 = arith.constant 2 : index
    %c2_67 = arith.constant 2 : index
    %c0_68 = arith.constant 0 : index
    %57 = vector.load %arg1[%c0_64, %c0_65, %c2_66, %c2_67, %c0_68] : memref<1x10x10x10x4xf32, #tpu.memory_space<vmem>>, vector<1x8x8x8x4xf32>
    %58 = vector.shape_cast %57 : vector<1x8x8x8x4xf32> to vector<8x8x8x4xf32>
    %59 = vector.shape_cast %58 : vector<8x8x8x4xf32> to vector<512x4xf32>
    %c8 = arith.constant 8 : index
    %c0_69 = arith.constant 0 : index
    %c0_70 = arith.constant 0 : index
    %60 = vector.load %arg2[%c8, %c0_69, %c0_70] : memref<27x8x4xf32, #tpu.memory_space<vmem>>, vector<1x8x4xf32>
    %61 = vector.shape_cast %60 : vector<1x8x4xf32> to vector<8x4xf32>
    %cst_71 = arith.constant dense<0.000000e+00> : vector<8x512xf32>
    %62 = tpu.matmul %61, %59, %cst_71 {dimension_numbers = #tpu.dot_dimension_numbers<[1], [1], [0], [0], [0, 0, 1, 0], [], []>} : vector<8x4xf32>, vector<512x4xf32>, vector<8x512xf32> -> vector<8x512xf32>
    %63 = arith.addf %56, %62 : vector<8x512xf32>
    %c0_72 = arith.constant 0 : index
    %c1_73 = arith.constant 1 : index
    %c0_74 = arith.constant 0 : index
    %c0_75 = arith.constant 0 : index
    %c0_76 = arith.constant 0 : index
    %64 = vector.load %arg1[%c0_72, %c1_73, %c0_74, %c0_75, %c0_76] : memref<1x10x10x10x4xf32, #tpu.memory_space<vmem>>, vector<1x8x8x8x4xf32>
    %65 = vector.shape_cast %64 : vector<1x8x8x8x4xf32> to vector<8x8x8x4xf32>
    %66 = vector.shape_cast %65 : vector<8x8x8x4xf32> to vector<512x4xf32>
    %c9 = arith.constant 9 : index
    %c0_77 = arith.constant 0 : index
    %c0_78 = arith.constant 0 : index
    %67 = vector.load %arg2[%c9, %c0_77, %c0_78] : memref<27x8x4xf32, #tpu.memory_space<vmem>>, vector<1x8x4xf32>
    %68 = vector.shape_cast %67 : vector<1x8x4xf32> to vector<8x4xf32>
    %cst_79 = arith.constant dense<0.000000e+00> : vector<8x512xf32>
    %69 = tpu.matmul %68, %66, %cst_79 {dimension_numbers = #tpu.dot_dimension_numbers<[1], [1], [0], [0], [0, 0, 1, 0], [], []>} : vector<8x4xf32>, vector<512x4xf32>, vector<8x512xf32> -> vector<8x512xf32>
    %70 = arith.addf %63, %69 : vector<8x512xf32>
    %c0_80 = arith.constant 0 : index
    %c1_81 = arith.constant 1 : index
    %c0_82 = arith.constant 0 : index
    %c1_83 = arith.constant 1 : index
    %c0_84 = arith.constant 0 : index
    %71 = vector.load %arg1[%c0_80, %c1_81, %c0_82, %c1_83, %c0_84] : memref<1x10x10x10x4xf32, #tpu.memory_space<vmem>>, vector<1x8x8x8x4xf32>
    %72 = vector.shape_cast %71 : vector<1x8x8x8x4xf32> to vector<8x8x8x4xf32>
    %73 = vector.shape_cast %72 : vector<8x8x8x4xf32> to vector<512x4xf32>
    %c10 = arith.constant 10 : index
    %c0_85 = arith.constant 0 : index
    %c0_86 = arith.constant 0 : index
    %74 = vector.load %arg2[%c10, %c0_85, %c0_86] : memref<27x8x4xf32, #tpu.memory_space<vmem>>, vector<1x8x4xf32>
    %75 = vector.shape_cast %74 : vector<1x8x4xf32> to vector<8x4xf32>
    %cst_87 = arith.constant dense<0.000000e+00> : vector<8x512xf32>
    %76 = tpu.matmul %75, %73, %cst_87 {dimension_numbers = #tpu.dot_dimension_numbers<[1], [1], [0], [0], [0, 0, 1, 0], [], []>} : vector<8x4xf32>, vector<512x4xf32>, vector<8x512xf32> -> vector<8x512xf32>
    %77 = arith.addf %70, %76 : vector<8x512xf32>
    %c0_88 = arith.constant 0 : index
    %c1_89 = arith.constant 1 : index
    %c0_90 = arith.constant 0 : index
    %c2_91 = arith.constant 2 : index
    %c0_92 = arith.constant 0 : index
    %78 = vector.load %arg1[%c0_88, %c1_89, %c0_90, %c2_91, %c0_92] : memref<1x10x10x10x4xf32, #tpu.memory_space<vmem>>, vector<1x8x8x8x4xf32>
    %79 = vector.shape_cast %78 : vector<1x8x8x8x4xf32> to vector<8x8x8x4xf32>
    %80 = vector.shape_cast %79 : vector<8x8x8x4xf32> to vector<512x4xf32>
    %c11 = arith.constant 11 : index
    %c0_93 = arith.constant 0 : index
    %c0_94 = arith.constant 0 : index
    %81 = vector.load %arg2[%c11, %c0_93, %c0_94] : memref<27x8x4xf32, #tpu.memory_space<vmem>>, vector<1x8x4xf32>
    %82 = vector.shape_cast %81 : vector<1x8x4xf32> to vector<8x4xf32>
    %cst_95 = arith.constant dense<0.000000e+00> : vector<8x512xf32>
    %83 = tpu.matmul %82, %80, %cst_95 {dimension_numbers = #tpu.dot_dimension_numbers<[1], [1], [0], [0], [0, 0, 1, 0], [], []>} : vector<8x4xf32>, vector<512x4xf32>, vector<8x512xf32> -> vector<8x512xf32>
    %84 = arith.addf %77, %83 : vector<8x512xf32>
    %c0_96 = arith.constant 0 : index
    %c1_97 = arith.constant 1 : index
    %c1_98 = arith.constant 1 : index
    %c0_99 = arith.constant 0 : index
    %c0_100 = arith.constant 0 : index
    %85 = vector.load %arg1[%c0_96, %c1_97, %c1_98, %c0_99, %c0_100] : memref<1x10x10x10x4xf32, #tpu.memory_space<vmem>>, vector<1x8x8x8x4xf32>
    %86 = vector.shape_cast %85 : vector<1x8x8x8x4xf32> to vector<8x8x8x4xf32>
    %87 = vector.shape_cast %86 : vector<8x8x8x4xf32> to vector<512x4xf32>
    %c12 = arith.constant 12 : index
    %c0_101 = arith.constant 0 : index
    %c0_102 = arith.constant 0 : index
    %88 = vector.load %arg2[%c12, %c0_101, %c0_102] : memref<27x8x4xf32, #tpu.memory_space<vmem>>, vector<1x8x4xf32>
    %89 = vector.shape_cast %88 : vector<1x8x4xf32> to vector<8x4xf32>
    %cst_103 = arith.constant dense<0.000000e+00> : vector<8x512xf32>
    %90 = tpu.matmul %89, %87, %cst_103 {dimension_numbers = #tpu.dot_dimension_numbers<[1], [1], [0], [0], [0, 0, 1, 0], [], []>} : vector<8x4xf32>, vector<512x4xf32>, vector<8x512xf32> -> vector<8x512xf32>
    %91 = arith.addf %84, %90 : vector<8x512xf32>
    %c0_104 = arith.constant 0 : index
    %c1_105 = arith.constant 1 : index
    %c1_106 = arith.constant 1 : index
    %c1_107 = arith.constant 1 : index
    %c0_108 = arith.constant 0 : index
    %92 = vector.load %arg1[%c0_104, %c1_105, %c1_106, %c1_107, %c0_108] : memref<1x10x10x10x4xf32, #tpu.memory_space<vmem>>, vector<1x8x8x8x4xf32>
    %93 = vector.shape_cast %92 : vector<1x8x8x8x4xf32> to vector<8x8x8x4xf32>
    %94 = vector.shape_cast %93 : vector<8x8x8x4xf32> to vector<512x4xf32>
    %c13 = arith.constant 13 : index
    %c0_109 = arith.constant 0 : index
    %c0_110 = arith.constant 0 : index
    %95 = vector.load %arg2[%c13, %c0_109, %c0_110] : memref<27x8x4xf32, #tpu.memory_space<vmem>>, vector<1x8x4xf32>
    %96 = vector.shape_cast %95 : vector<1x8x4xf32> to vector<8x4xf32>
    %cst_111 = arith.constant dense<0.000000e+00> : vector<8x512xf32>
    %97 = tpu.matmul %96, %94, %cst_111 {dimension_numbers = #tpu.dot_dimension_numbers<[1], [1], [0], [0], [0, 0, 1, 0], [], []>} : vector<8x4xf32>, vector<512x4xf32>, vector<8x512xf32> -> vector<8x512xf32>
    %98 = arith.addf %91, %97 : vector<8x512xf32>
    %c0_112 = arith.constant 0 : index
    %c1_113 = arith.constant 1 : index
    %c1_114 = arith.constant 1 : index
    %c2_115 = arith.constant 2 : index
    %c0_116 = arith.constant 0 : index
    %99 = vector.load %arg1[%c0_112, %c1_113, %c1_114, %c2_115, %c0_116] : memref<1x10x10x10x4xf32, #tpu.memory_space<vmem>>, vector<1x8x8x8x4xf32>
    %100 = vector.shape_cast %99 : vector<1x8x8x8x4xf32> to vector<8x8x8x4xf32>
    %101 = vector.shape_cast %100 : vector<8x8x8x4xf32> to vector<512x4xf32>
    %c14 = arith.constant 14 : index
    %c0_117 = arith.constant 0 : index
    %c0_118 = arith.constant 0 : index
    %102 = vector.load %arg2[%c14, %c0_117, %c0_118] : memref<27x8x4xf32, #tpu.memory_space<vmem>>, vector<1x8x4xf32>
    %103 = vector.shape_cast %102 : vector<1x8x4xf32> to vector<8x4xf32>
    %cst_119 = arith.constant dense<0.000000e+00> : vector<8x512xf32>
    %104 = tpu.matmul %103, %101, %cst_119 {dimension_numbers = #tpu.dot_dimension_numbers<[1], [1], [0], [0], [0, 0, 1, 0], [], []>} : vector<8x4xf32>, vector<512x4xf32>, vector<8x512xf32> -> vector<8x512xf32>
    %105 = arith.addf %98, %104 : vector<8x512xf32>
    %c0_120 = arith.constant 0 : index
    %c1_121 = arith.constant 1 : index
    %c2_122 = arith.constant 2 : index
    %c0_123 = arith.constant 0 : index
    %c0_124 = arith.constant 0 : index
    %106 = vector.load %arg1[%c0_120, %c1_121, %c2_122, %c0_123, %c0_124] : memref<1x10x10x10x4xf32, #tpu.memory_space<vmem>>, vector<1x8x8x8x4xf32>
    %107 = vector.shape_cast %106 : vector<1x8x8x8x4xf32> to vector<8x8x8x4xf32>
    %108 = vector.shape_cast %107 : vector<8x8x8x4xf32> to vector<512x4xf32>
    %c15 = arith.constant 15 : index
    %c0_125 = arith.constant 0 : index
    %c0_126 = arith.constant 0 : index
    %109 = vector.load %arg2[%c15, %c0_125, %c0_126] : memref<27x8x4xf32, #tpu.memory_space<vmem>>, vector<1x8x4xf32>
    %110 = vector.shape_cast %109 : vector<1x8x4xf32> to vector<8x4xf32>
    %cst_127 = arith.constant dense<0.000000e+00> : vector<8x512xf32>
    %111 = tpu.matmul %110, %108, %cst_127 {dimension_numbers = #tpu.dot_dimension_numbers<[1], [1], [0], [0], [0, 0, 1, 0], [], []>} : vector<8x4xf32>, vector<512x4xf32>, vector<8x512xf32> -> vector<8x512xf32>
    %112 = arith.addf %105, %111 : vector<8x512xf32>
    %c0_128 = arith.constant 0 : index
    %c1_129 = arith.constant 1 : index
    %c2_130 = arith.constant 2 : index
    %c1_131 = arith.constant 1 : index
    %c0_132 = arith.constant 0 : index
    %113 = vector.load %arg1[%c0_128, %c1_129, %c2_130, %c1_131, %c0_132] : memref<1x10x10x10x4xf32, #tpu.memory_space<vmem>>, vector<1x8x8x8x4xf32>
    %114 = vector.shape_cast %113 : vector<1x8x8x8x4xf32> to vector<8x8x8x4xf32>
    %115 = vector.shape_cast %114 : vector<8x8x8x4xf32> to vector<512x4xf32>
    %c16 = arith.constant 16 : index
    %c0_133 = arith.constant 0 : index
    %c0_134 = arith.constant 0 : index
    %116 = vector.load %arg2[%c16, %c0_133, %c0_134] : memref<27x8x4xf32, #tpu.memory_space<vmem>>, vector<1x8x4xf32>
    %117 = vector.shape_cast %116 : vector<1x8x4xf32> to vector<8x4xf32>
    %cst_135 = arith.constant dense<0.000000e+00> : vector<8x512xf32>
    %118 = tpu.matmul %117, %115, %cst_135 {dimension_numbers = #tpu.dot_dimension_numbers<[1], [1], [0], [0], [0, 0, 1, 0], [], []>} : vector<8x4xf32>, vector<512x4xf32>, vector<8x512xf32> -> vector<8x512xf32>
    %119 = arith.addf %112, %118 : vector<8x512xf32>
    %c0_136 = arith.constant 0 : index
    %c1_137 = arith.constant 1 : index
    %c2_138 = arith.constant 2 : index
    %c2_139 = arith.constant 2 : index
    %c0_140 = arith.constant 0 : index
    %120 = vector.load %arg1[%c0_136, %c1_137, %c2_138, %c2_139, %c0_140] : memref<1x10x10x10x4xf32, #tpu.memory_space<vmem>>, vector<1x8x8x8x4xf32>
    %121 = vector.shape_cast %120 : vector<1x8x8x8x4xf32> to vector<8x8x8x4xf32>
    %122 = vector.shape_cast %121 : vector<8x8x8x4xf32> to vector<512x4xf32>
    %c17 = arith.constant 17 : index
    %c0_141 = arith.constant 0 : index
    %c0_142 = arith.constant 0 : index
    %123 = vector.load %arg2[%c17, %c0_141, %c0_142] : memref<27x8x4xf32, #tpu.memory_space<vmem>>, vector<1x8x4xf32>
    %124 = vector.shape_cast %123 : vector<1x8x4xf32> to vector<8x4xf32>
    %cst_143 = arith.constant dense<0.000000e+00> : vector<8x512xf32>
    %125 = tpu.matmul %124, %122, %cst_143 {dimension_numbers = #tpu.dot_dimension_numbers<[1], [1], [0], [0], [0, 0, 1, 0], [], []>} : vector<8x4xf32>, vector<512x4xf32>, vector<8x512xf32> -> vector<8x512xf32>
    %126 = arith.addf %119, %125 : vector<8x512xf32>
    %c0_144 = arith.constant 0 : index
    %c2_145 = arith.constant 2 : index
    %c0_146 = arith.constant 0 : index
    %c0_147 = arith.constant 0 : index
    %c0_148 = arith.constant 0 : index
    %127 = vector.load %arg1[%c0_144, %c2_145, %c0_146, %c0_147, %c0_148] : memref<1x10x10x10x4xf32, #tpu.memory_space<vmem>>, vector<1x8x8x8x4xf32>
    %128 = vector.shape_cast %127 : vector<1x8x8x8x4xf32> to vector<8x8x8x4xf32>
    %129 = vector.shape_cast %128 : vector<8x8x8x4xf32> to vector<512x4xf32>
    %c18 = arith.constant 18 : index
    %c0_149 = arith.constant 0 : index
    %c0_150 = arith.constant 0 : index
    %130 = vector.load %arg2[%c18, %c0_149, %c0_150] : memref<27x8x4xf32, #tpu.memory_space<vmem>>, vector<1x8x4xf32>
    %131 = vector.shape_cast %130 : vector<1x8x4xf32> to vector<8x4xf32>
    %cst_151 = arith.constant dense<0.000000e+00> : vector<8x512xf32>
    %132 = tpu.matmul %131, %129, %cst_151 {dimension_numbers = #tpu.dot_dimension_numbers<[1], [1], [0], [0], [0, 0, 1, 0], [], []>} : vector<8x4xf32>, vector<512x4xf32>, vector<8x512xf32> -> vector<8x512xf32>
    %133 = arith.addf %126, %132 : vector<8x512xf32>
    %c0_152 = arith.constant 0 : index
    %c2_153 = arith.constant 2 : index
    %c0_154 = arith.constant 0 : index
    %c1_155 = arith.constant 1 : index
    %c0_156 = arith.constant 0 : index
    %134 = vector.load %arg1[%c0_152, %c2_153, %c0_154, %c1_155, %c0_156] : memref<1x10x10x10x4xf32, #tpu.memory_space<vmem>>, vector<1x8x8x8x4xf32>
    %135 = vector.shape_cast %134 : vector<1x8x8x8x4xf32> to vector<8x8x8x4xf32>
    %136 = vector.shape_cast %135 : vector<8x8x8x4xf32> to vector<512x4xf32>
    %c19 = arith.constant 19 : index
    %c0_157 = arith.constant 0 : index
    %c0_158 = arith.constant 0 : index
    %137 = vector.load %arg2[%c19, %c0_157, %c0_158] : memref<27x8x4xf32, #tpu.memory_space<vmem>>, vector<1x8x4xf32>
    %138 = vector.shape_cast %137 : vector<1x8x4xf32> to vector<8x4xf32>
    %cst_159 = arith.constant dense<0.000000e+00> : vector<8x512xf32>
    %139 = tpu.matmul %138, %136, %cst_159 {dimension_numbers = #tpu.dot_dimension_numbers<[1], [1], [0], [0], [0, 0, 1, 0], [], []>} : vector<8x4xf32>, vector<512x4xf32>, vector<8x512xf32> -> vector<8x512xf32>
    %140 = arith.addf %133, %139 : vector<8x512xf32>
    %c0_160 = arith.constant 0 : index
    %c2_161 = arith.constant 2 : index
    %c0_162 = arith.constant 0 : index
    %c2_163 = arith.constant 2 : index
    %c0_164 = arith.constant 0 : index
    %141 = vector.load %arg1[%c0_160, %c2_161, %c0_162, %c2_163, %c0_164] : memref<1x10x10x10x4xf32, #tpu.memory_space<vmem>>, vector<1x8x8x8x4xf32>
    %142 = vector.shape_cast %141 : vector<1x8x8x8x4xf32> to vector<8x8x8x4xf32>
    %143 = vector.shape_cast %142 : vector<8x8x8x4xf32> to vector<512x4xf32>
    %c20 = arith.constant 20 : index
    %c0_165 = arith.constant 0 : index
    %c0_166 = arith.constant 0 : index
    %144 = vector.load %arg2[%c20, %c0_165, %c0_166] : memref<27x8x4xf32, #tpu.memory_space<vmem>>, vector<1x8x4xf32>
    %145 = vector.shape_cast %144 : vector<1x8x4xf32> to vector<8x4xf32>
    %cst_167 = arith.constant dense<0.000000e+00> : vector<8x512xf32>
    %146 = tpu.matmul %145, %143, %cst_167 {dimension_numbers = #tpu.dot_dimension_numbers<[1], [1], [0], [0], [0, 0, 1, 0], [], []>} : vector<8x4xf32>, vector<512x4xf32>, vector<8x512xf32> -> vector<8x512xf32>
    %147 = arith.addf %140, %146 : vector<8x512xf32>
    %c0_168 = arith.constant 0 : index
    %c2_169 = arith.constant 2 : index
    %c1_170 = arith.constant 1 : index
    %c0_171 = arith.constant 0 : index
    %c0_172 = arith.constant 0 : index
    %148 = vector.load %arg1[%c0_168, %c2_169, %c1_170, %c0_171, %c0_172] : memref<1x10x10x10x4xf32, #tpu.memory_space<vmem>>, vector<1x8x8x8x4xf32>
    %149 = vector.shape_cast %148 : vector<1x8x8x8x4xf32> to vector<8x8x8x4xf32>
    %150 = vector.shape_cast %149 : vector<8x8x8x4xf32> to vector<512x4xf32>
    %c21 = arith.constant 21 : index
    %c0_173 = arith.constant 0 : index
    %c0_174 = arith.constant 0 : index
    %151 = vector.load %arg2[%c21, %c0_173, %c0_174] : memref<27x8x4xf32, #tpu.memory_space<vmem>>, vector<1x8x4xf32>
    %152 = vector.shape_cast %151 : vector<1x8x4xf32> to vector<8x4xf32>
    %cst_175 = arith.constant dense<0.000000e+00> : vector<8x512xf32>
    %153 = tpu.matmul %152, %150, %cst_175 {dimension_numbers = #tpu.dot_dimension_numbers<[1], [1], [0], [0], [0, 0, 1, 0], [], []>} : vector<8x4xf32>, vector<512x4xf32>, vector<8x512xf32> -> vector<8x512xf32>
    %154 = arith.addf %147, %153 : vector<8x512xf32>
    %c0_176 = arith.constant 0 : index
    %c2_177 = arith.constant 2 : index
    %c1_178 = arith.constant 1 : index
    %c1_179 = arith.constant 1 : index
    %c0_180 = arith.constant 0 : index
    %155 = vector.load %arg1[%c0_176, %c2_177, %c1_178, %c1_179, %c0_180] : memref<1x10x10x10x4xf32, #tpu.memory_space<vmem>>, vector<1x8x8x8x4xf32>
    %156 = vector.shape_cast %155 : vector<1x8x8x8x4xf32> to vector<8x8x8x4xf32>
    %157 = vector.shape_cast %156 : vector<8x8x8x4xf32> to vector<512x4xf32>
    %c22 = arith.constant 22 : index
    %c0_181 = arith.constant 0 : index
    %c0_182 = arith.constant 0 : index
    %158 = vector.load %arg2[%c22, %c0_181, %c0_182] : memref<27x8x4xf32, #tpu.memory_space<vmem>>, vector<1x8x4xf32>
    %159 = vector.shape_cast %158 : vector<1x8x4xf32> to vector<8x4xf32>
    %cst_183 = arith.constant dense<0.000000e+00> : vector<8x512xf32>
    %160 = tpu.matmul %159, %157, %cst_183 {dimension_numbers = #tpu.dot_dimension_numbers<[1], [1], [0], [0], [0, 0, 1, 0], [], []>} : vector<8x4xf32>, vector<512x4xf32>, vector<8x512xf32> -> vector<8x512xf32>
    %161 = arith.addf %154, %160 : vector<8x512xf32>
    %c0_184 = arith.constant 0 : index
    %c2_185 = arith.constant 2 : index
    %c1_186 = arith.constant 1 : index
    %c2_187 = arith.constant 2 : index
    %c0_188 = arith.constant 0 : index
    %162 = vector.load %arg1[%c0_184, %c2_185, %c1_186, %c2_187, %c0_188] : memref<1x10x10x10x4xf32, #tpu.memory_space<vmem>>, vector<1x8x8x8x4xf32>
    %163 = vector.shape_cast %162 : vector<1x8x8x8x4xf32> to vector<8x8x8x4xf32>
    %164 = vector.shape_cast %163 : vector<8x8x8x4xf32> to vector<512x4xf32>
    %c23 = arith.constant 23 : index
    %c0_189 = arith.constant 0 : index
    %c0_190 = arith.constant 0 : index
    %165 = vector.load %arg2[%c23, %c0_189, %c0_190] : memref<27x8x4xf32, #tpu.memory_space<vmem>>, vector<1x8x4xf32>
    %166 = vector.shape_cast %165 : vector<1x8x4xf32> to vector<8x4xf32>
    %cst_191 = arith.constant dense<0.000000e+00> : vector<8x512xf32>
    %167 = tpu.matmul %166, %164, %cst_191 {dimension_numbers = #tpu.dot_dimension_numbers<[1], [1], [0], [0], [0, 0, 1, 0], [], []>} : vector<8x4xf32>, vector<512x4xf32>, vector<8x512xf32> -> vector<8x512xf32>
    %168 = arith.addf %161, %167 : vector<8x512xf32>
    %c0_192 = arith.constant 0 : index
    %c2_193 = arith.constant 2 : index
    %c2_194 = arith.constant 2 : index
    %c0_195 = arith.constant 0 : index
    %c0_196 = arith.constant 0 : index
    %169 = vector.load %arg1[%c0_192, %c2_193, %c2_194, %c0_195, %c0_196] : memref<1x10x10x10x4xf32, #tpu.memory_space<vmem>>, vector<1x8x8x8x4xf32>
    %170 = vector.shape_cast %169 : vector<1x8x8x8x4xf32> to vector<8x8x8x4xf32>
    %171 = vector.shape_cast %170 : vector<8x8x8x4xf32> to vector<512x4xf32>
    %c24 = arith.constant 24 : index
    %c0_197 = arith.constant 0 : index
    %c0_198 = arith.constant 0 : index
    %172 = vector.load %arg2[%c24, %c0_197, %c0_198] : memref<27x8x4xf32, #tpu.memory_space<vmem>>, vector<1x8x4xf32>
    %173 = vector.shape_cast %172 : vector<1x8x4xf32> to vector<8x4xf32>
    %cst_199 = arith.constant dense<0.000000e+00> : vector<8x512xf32>
    %174 = tpu.matmul %173, %171, %cst_199 {dimension_numbers = #tpu.dot_dimension_numbers<[1], [1], [0], [0], [0, 0, 1, 0], [], []>} : vector<8x4xf32>, vector<512x4xf32>, vector<8x512xf32> -> vector<8x512xf32>
    %175 = arith.addf %168, %174 : vector<8x512xf32>
    %c0_200 = arith.constant 0 : index
    %c2_201 = arith.constant 2 : index
    %c2_202 = arith.constant 2 : index
    %c1_203 = arith.constant 1 : index
    %c0_204 = arith.constant 0 : index
    %176 = vector.load %arg1[%c0_200, %c2_201, %c2_202, %c1_203, %c0_204] : memref<1x10x10x10x4xf32, #tpu.memory_space<vmem>>, vector<1x8x8x8x4xf32>
    %177 = vector.shape_cast %176 : vector<1x8x8x8x4xf32> to vector<8x8x8x4xf32>
    %178 = vector.shape_cast %177 : vector<8x8x8x4xf32> to vector<512x4xf32>
    %c25 = arith.constant 25 : index
    %c0_205 = arith.constant 0 : index
    %c0_206 = arith.constant 0 : index
    %179 = vector.load %arg2[%c25, %c0_205, %c0_206] : memref<27x8x4xf32, #tpu.memory_space<vmem>>, vector<1x8x4xf32>
    %180 = vector.shape_cast %179 : vector<1x8x4xf32> to vector<8x4xf32>
    %cst_207 = arith.constant dense<0.000000e+00> : vector<8x512xf32>
    %181 = tpu.matmul %180, %178, %cst_207 {dimension_numbers = #tpu.dot_dimension_numbers<[1], [1], [0], [0], [0, 0, 1, 0], [], []>} : vector<8x4xf32>, vector<512x4xf32>, vector<8x512xf32> -> vector<8x512xf32>
    %182 = arith.addf %175, %181 : vector<8x512xf32>
    %c0_208 = arith.constant 0 : index
    %c2_209 = arith.constant 2 : index
    %c2_210 = arith.constant 2 : index
    %c2_211 = arith.constant 2 : index
    %c0_212 = arith.constant 0 : index
    %183 = vector.load %arg1[%c0_208, %c2_209, %c2_210, %c2_211, %c0_212] : memref<1x10x10x10x4xf32, #tpu.memory_space<vmem>>, vector<1x8x8x8x4xf32>
    %184 = vector.shape_cast %183 : vector<1x8x8x8x4xf32> to vector<8x8x8x4xf32>
    %185 = vector.shape_cast %184 : vector<8x8x8x4xf32> to vector<512x4xf32>
    %c26 = arith.constant 26 : index
    %c0_213 = arith.constant 0 : index
    %c0_214 = arith.constant 0 : index
    %186 = vector.load %arg2[%c26, %c0_213, %c0_214] : memref<27x8x4xf32, #tpu.memory_space<vmem>>, vector<1x8x4xf32>
    %187 = vector.shape_cast %186 : vector<1x8x4xf32> to vector<8x4xf32>
    %cst_215 = arith.constant dense<0.000000e+00> : vector<8x512xf32>
    %188 = tpu.matmul %187, %185, %cst_215 {dimension_numbers = #tpu.dot_dimension_numbers<[1], [1], [0], [0], [0, 0, 1, 0], [], []>} : vector<8x4xf32>, vector<512x4xf32>, vector<8x512xf32> -> vector<8x512xf32>
    %189 = arith.addf %182, %188 : vector<8x512xf32>
    %c0_216 = arith.constant 0 : index
    %c0_217 = arith.constant 0 : index
    %190 = vector.load %arg3[%c0_216, %c0_217] : memref<8x1xf32, #tpu.memory_space<vmem>>, vector<8x1xf32>
    %191 = vector.broadcast %190 : vector<8x1xf32> to vector<8x512xf32>
    %192 = arith.addf %189, %191 : vector<8x512xf32>
    %cst_218 = arith.constant 0.000000e+00 : f32
    %193 = vector.broadcast %cst_218 : f32 to vector<8x512xf32>
    %194 = arith.maximumf %192, %193 : vector<8x512xf32>
    %195 = vector.shape_cast %194 : vector<8x512xf32> to vector<1x8x512xf32>
    %c0_219 = arith.constant 0 : index
    %c0_220 = arith.constant 0 : index
    %c0_221 = arith.constant 0 : index
    %196 = vector.load %arg4[%c0_219, %c0_220, %c0_221] : memref<1x8x512xf32, #tpu.memory_space<vmem>>, vector<1x8x512xf32>
    tpu.vector_store %arg4[%c0_219, %c0_220, %c0_221], %195 {strides = array<i32>} : memref<1x8x512xf32, #tpu.memory_space<vmem>>, vector<1x8x512xf32>,
    return
  }
  func.func @transform_0(%arg0: i32) -> (i32, i32, i32, i32, i32) {
    %c0_i32 = arith.constant 0 : i32
    %c0_i32_0 = arith.constant 0 : i32
    %c0_i32_1 = arith.constant 0 : i32
    %c0_i32_2 = arith.constant 0 : i32
    %c0_i32_3 = arith.constant 0 : i32
    return %arg0, %c0_i32, %c0_i32_0, %c0_i32_1, %c0_i32_2 : i32, i32, i32, i32, i32
  }
  func.func @transform_1(%arg0: i32) -> (i32, i32, i32) {
    %c0_i32 = arith.constant 0 : i32
    %c0_i32_0 = arith.constant 0 : i32
    %c0_i32_1 = arith.constant 0 : i32
    %c0_i32_2 = arith.constant 0 : i32
    return %c0_i32, %c0_i32_0, %c0_i32_1 : i32, i32, i32
  }
  func.func @transform_2(%arg0: i32) -> (i32, i32) {
    %c0_i32 = arith.constant 0 : i32
    %c0_i32_0 = arith.constant 0 : i32
    %c0_i32_1 = arith.constant 0 : i32
    return %c0_i32, %c0_i32_0 : i32, i32
  }
  func.func @transform_3(%arg0: i32) -> (i32, i32, i32) {
    %c0_i32 = arith.constant 0 : i32
    %c0_i32_0 = arith.constant 0 : i32
    %c0_i32_1 = arith.constant 0 : i32
    return %arg0, %c0_i32, %c0_i32_0 : i32, i32, i32
  }
}

</mosaic_0001>

<bundles_post_ra>
// kernel: tpu_custom_call.1
= control target key start
LH: loop header
LB: loop body
LE: loop exit
PB: predicated region body
PF: predicated region fallthrough
CT: control target
= control target key end

     0   :  { %8 = vsyncpa [#allocation3], 0  ;;  %s22841_s0 = inlined_call_operand.vmem [shape: f32[2,10,10,10,4], index: 0, kind: input, shape index: {}]   ;;  %s22842_s1 = inlined_call_operand.vmem [shape: f32[27,8,4], index: 1, kind: input, shape index: {}]   ;;  %s22843_s2 = inlined_call_operand.vmem [shape: f32[8,1], index: 2, kind: input, shape index: {}]   ;;  %s22844_s3 = inlined_call_operand.hbm [shape: f32[2,8,512], index: 3, kind: output, shape index: {}]  }
   0x1   :  { %10 = vsyncpa [#allocation3 + $0x1], 0  ;;  %s16568_s12 = smov 0   ;;  %s16570_s13 = smov 0  }
   0x2   :  { %s16572_s14 = smov 0   ;;  %s16574_s15 = smov 0  }
   0x3 LB: > { %s16589_s16 = sadd.s32 4294967295, %s16544_s15   ;;  %s11250_s17 = sadd.s32 4294967294, %s16544_s15   ;;  %s16544_s15 = sphi %s16574_s15, %s23822_s15   ;;  %s16540_s14 = sphi %s16572_s14, %s23821_s14   ;;  %s16536_s13 = sphi %s16570_s13, %s23820_s13   ;;  %s16532_s12 = sphi %s16568_s12, %s23819_s12  }
   0x4   : > { %s16593_s18 = sadd.s32 1, %s16544_s15   ;;  %s91_s19 = sadd.s32 1, %s16540_s14 }
   0x5   : > { %s88_s20 = ssub.s32 %s16544_s15, %s16593_s18  ;;  %p101_p0 = scmp.ne.s32.totalorder %s16540_s14, %s16536_s13 }
   0x6   : > { %p89_p1 = scmp.eq.s32.totalorder %s88_s20, 0  ;;  %p102_p2 = scmp.eq.s32.totalorder %s16589_s16, 1 }
   0x7   : > { %p107_p3 = scmp.ne.s32.totalorder %s16536_s13, %s16532_s12  ;;  %p108_p4 = scmp.eq.s32.totalorder %s11250_s17, 1 }
   0x8   : > { %s16604_s21 = scalar_select %p89_p1, %s16540_s14, %s91_s19  }
   0x9   : > { %p16606_p5 = por %p102_p2, %p101_p0  ;;  %p16610_p6 = por %p108_p4, %p107_p3 }
   0xa   : > { %p11253_p7 = scmp.ge.s32.totalorder %s16544_s15, 1  ;;  %p140_p8 = scmp.lt.s32.totalorder %s16544_s15, 3 }
   0xc   : > { %p141_p9 = pnand %p11253_p7, %p140_p8 }
   0xe   : > { %144 = sbr.rel (%p141_p9) target bundleno = 1971 (0x7b3), region = 32 }
  0x13   : > { %p164_p10 = scmp.lt.s32.totalorder %s16589_s16, 1  ;;  %vm300_vm0 = vcmask 31744   ;;  %v16620_v0 = vld [vmem:[%s22842_s1 + $0x8] sm:$0xff]  ;;  %s14605_s8 = sshll.u32 %s16589_s16, 9 }
  0x14   : > { %14638 = vmatprep.mubr.msk.f32.mxu0 %vm300_vm0, %v16620_v0  ;;  %14672 = vmatprep.mubr.msk.f32.mxu1 %vm300_vm0, %v16620_v0  ;;  %s22804_s19 = scalar_lea.hbm %s22844_s3, %s14605_s8  ;;  %s16547_s24 = smov [#allocation2]  }
  0x15   : > { %s165_s26 = scalar_select %p164_p10, %s16589_s16, 1 }
  0x16   : > { %s16488_s25 = sshll.u32 %s16547_s24, 4  ;;  %s16489_s25 = int_to_ptr.vmem [resolvable:$false] %s16488_s25 }
  0x17   : > { %s16442_s27 = smul.u32 1600, %s165_s26  ;;  %s16490_s26 = scalar_lea.vmem %s16489_s25, 1024 }
  0x19   : > { %s16630_s30 = scalar_lea.vmem %s22841_s0, %s16442_s27 }
  0x1a   : > { %v265_v1 = vld [vmem:[%s16630_s30 + $0x251] sm:$0xff]  ;;  %v264_v5 = vld [vmem:[%s16630_s30 + $0x241] sm:$0xff] }
  0x1b   : > { %v297_v2 = vld [vmem:[%s16630_s30 + $0x4d1] sm:$0xff]  ;;  %14606 = vmatprep.subr.msk.mxu0 %vm300_vm0, %v265_v1  ;;  %v296_v6 = vld [vmem:[%s16630_s30 + $0x4c1] sm:$0xff] }
  0x1c   : > { %v249_v3 = vld [vmem:[%s16630_s30 + $0x111] sm:$0xff]  ;;  %14640 = vmatprep.subr.msk.mxu1 %vm300_vm0, %v297_v2  ;;  %v248_v7 = vld [vmem:[%s16630_s30 + $0x101] sm:$0xff] }
  0x1d   : > { %v281_v4 = vld [vmem:[%s16630_s30 + $0x391] sm:$0xff]  ;;  %14607 = vmatpush3.xpose.msk.msra.mxu0 %vm300_vm0, %v249_v3  ;;  %v280_v8 = vld [vmem:[%s16630_s30 + $0x381] sm:$0xff] }
  0x1e   : > { %14641 = vmatpush3.xpose.msk.msra.mxu1 %vm300_vm0, %v281_v4  ;;  %14608 = vmatprep.subr.msk.mxu0 %vm300_vm0, %v264_v5  ;;  %v263_v9 = vld [vmem:[%s16630_s30 + $0x231] sm:$0xff]  ;;  %v262_v13 = vld [vmem:[%s16630_s30 + $0x221] sm:$0xff] }
  0x1f   : > { %14642 = vmatprep.subr.msk.mxu1 %vm300_vm0, %v296_v6  ;;  %v295_v10 = vld [vmem:[%s16630_s30 + $0x4b1] sm:$0xff]  ;;  %v294_v14 = vld [vmem:[%s16630_s30 + $0x4a1] sm:$0xff] }
  0x20   : > { %v247_v11 = vld [vmem:[%s16630_s30 + $0xf1] sm:$0xff]  ;;  %v246_v15 = vld [vmem:[%s16630_s30 + $0xe1] sm:$0xff] }
  0x21   : > { %14609 = vmatpush3.xpose.msk.msra.mxu0 %vm300_vm0, %v248_v7  ;;  %v279_v12 = vld [vmem:[%s16630_s30 + $0x371] sm:$0xff]  ;;  %v278_v16 = vld [vmem:[%s16630_s30 + $0x361] sm:$0xff] }
  0x22   : > { %14643 = vmatpush3.xpose.msk.msra.mxu1 %vm300_vm0, %v280_v8  ;;  %14610 = vmatprep.subr.msk.mxu0 %vm300_vm0, %v263_v9  ;;  %v261_v17 = vld [vmem:[%s16630_s30 + $0x211] sm:$0xff]  ;;  %v260_v21 = vld [vmem:[%s16630_s30 + $0x201] sm:$0xff] }
  0x23   : > { %14644 = vmatprep.subr.msk.mxu1 %vm300_vm0, %v295_v10  ;;  %v293_v18 = vld [vmem:[%s16630_s30 + $0x491] sm:$0xff]  ;;  %v292_v22 = vld [vmem:[%s16630_s30 + $0x481] sm:$0xff] }
  0x24   : > { %v245_v19 = vld [vmem:[%s16630_s30 + $0xd1] sm:$0xff]  ;;  %v244_v23 = vld [vmem:[%s16630_s30 + $0xc1] sm:$0xff] }
  0x25   : > { %14611 = vmatpush3.xpose.msk.msra.mxu0 %vm300_vm0, %v247_v11  ;;  %v277_v20 = vld [vmem:[%s16630_s30 + $0x351] sm:$0xff]  ;;  %v276_v24 = vld [vmem:[%s16630_s30 + $0x341] sm:$0xff] }
  0x26   : > { %14645 = vmatpush3.xpose.msk.msra.mxu1 %vm300_vm0, %v279_v12  ;;  %14612 = vmatprep.subr.msk.mxu0 %vm300_vm0, %v262_v13  ;;  %v259_v25 = vld [vmem:[%s16630_s30 + $0x1f1] sm:$0xff]  ;;  %v258_v29 = vld [vmem:[%s16630_s30 + $0x1e1] sm:$0xff] }
  0x27   : > { %14646 = vmatprep.subr.msk.mxu1 %vm300_vm0, %v294_v14  ;;  %v291_v26 = vld [vmem:[%s16630_s30 + $0x471] sm:$0xff]  ;;  %v290_v30 = vld [vmem:[%s16630_s30 + $0x461] sm:$0xff] }
  0x28   : > { %v243_v27 = vld [vmem:[%s16630_s30 + $0xb1] sm:$0xff]  ;;  %v242_v31 = vld [vmem:[%s16630_s30 + $0xa1] sm:$0xff] }
  0x29   : > { %14613 = vmatpush3.xpose.msk.msra.mxu0 %vm300_vm0, %v246_v15  ;;  %v275_v28 = vld [vmem:[%s16630_s30 + $0x331] sm:$0xff]  ;;  %v274_v32 = vld [vmem:[%s16630_s30 + $0x321] sm:$0xff] }
  0x2a   : > { %14647 = vmatpush3.xpose.msk.msra.mxu1 %vm300_vm0, %v278_v16  ;;  %14614 = vmatprep.subr.msk.mxu0 %vm300_vm0, %v261_v17  ;;  %v257_v33 = vld [vmem:[%s16630_s30 + $0x1b1] sm:$0xff]  ;;  %v256_v37 = vld [vmem:[%s16630_s30 + $0x1a1] sm:$0xff] }
  0x2b   : > { %14648 = vmatprep.subr.msk.mxu1 %vm300_vm0, %v293_v18  ;;  %v289_v34 = vld [vmem:[%s16630_s30 + $0x431] sm:$0xff]  ;;  %v288_v38 = vld [vmem:[%s16630_s30 + $0x421] sm:$0xff] }
  0x2c   : > { %v241_v35 = vld [vmem:[%s16630_s30 + $0x71] sm:$0xff]  ;;  %v240_v39 = vld [vmem:[%s16630_s30 + $0x61] sm:$0xff] }
  0x2d   : > { %14615 = vmatpush3.xpose.msk.msra.mxu0 %vm300_vm0, %v245_v19  ;;  %v273_v36 = vld [vmem:[%s16630_s30 + $0x2f1] sm:$0xff]  ;;  %v272_v40 = vld [vmem:[%s16630_s30 + $0x2e1] sm:$0xff] }
  0x2e   : > { %14649 = vmatpush3.xpose.msk.msra.mxu1 %vm300_vm0, %v277_v20  ;;  %14616 = vmatprep.subr.msk.mxu0 %vm300_vm0, %v260_v21  ;;  %v255_v41 = vld [vmem:[%s16630_s30 + $0x191] sm:$0xff]  ;;  %v254_v45 = vld [vmem:[%s16630_s30 + $0x181] sm:$0xff] }
  0x2f   : > { %14650 = vmatprep.subr.msk.mxu1 %vm300_vm0, %v292_v22  ;;  %v287_v42 = vld [vmem:[%s16630_s30 + $0x411] sm:$0xff]  ;;  %v286_v46 = vld [vmem:[%s16630_s30 + $0x401] sm:$0xff] }
  0x30   : > { %v239_v43 = vld [vmem:[%s16630_s30 + $0x51] sm:$0xff]  ;;  %v238_v47 = vld [vmem:[%s16630_s30 + $0x41] sm:$0xff] }
  0x31   : > { %14617 = vmatpush3.xpose.msk.msra.mxu0 %vm300_vm0, %v244_v23  ;;  %v271_v44 = vld [vmem:[%s16630_s30 + $0x2d1] sm:$0xff]  ;;  %v270_v48 = vld [vmem:[%s16630_s30 + $0x2c1] sm:$0xff] }
  0x32   : > { %14651 = vmatpush3.xpose.msk.msra.mxu1 %vm300_vm0, %v276_v24  ;;  %14618 = vmatprep.subr.msk.mxu0 %vm300_vm0, %v259_v25  ;;  %v253_v49 = vld [vmem:[%s16630_s30 + $0x171] sm:$0xff]  ;;  %v252_v53 = vld [vmem:[%s16630_s30 + $0x161] sm:$0xff] }
  0x33   : > { %14652 = vmatprep.subr.msk.mxu1 %vm300_vm0, %v291_v26  ;;  %v285_v50 = vld [vmem:[%s16630_s30 + $0x3f1] sm:$0xff]  ;;  %v284_v54 = vld [vmem:[%s16630_s30 + $0x3e1] sm:$0xff] }
  0x34   : > { %v237_v51 = vld [vmem:[%s16630_s30 + $0x31] sm:$0xff]  ;;  %v236_v55 = vld [vmem:[%s16630_s30 + $0x21] sm:$0xff] }
  0x35   : > { %14619 = vmatpush3.xpose.msk.msra.mxu0 %vm300_vm0, %v243_v27  ;;  %v269_v52 = vld [vmem:[%s16630_s30 + $0x2b1] sm:$0xff]  ;;  %v268_v56 = vld [vmem:[%s16630_s30 + $0x2a1] sm:$0xff] }
  0x36   : > { %14653 = vmatpush3.xpose.msk.msra.mxu1 %vm300_vm0, %v275_v28  ;;  %14620 = vmatprep.subr.msk.mxu0 %vm300_vm0, %v258_v29  ;;  %v251_v57 = vld [vmem:[%s16630_s30 + $0x151] sm:$0xff]  ;;  %v250_v61 = vld [vmem:[%s16630_s30 + $0x141] sm:$0xff] }
  0x37   : > { %14654 = vmatprep.subr.msk.mxu1 %vm300_vm0, %v290_v30  ;;  %v283_v58 = vld [vmem:[%s16630_s30 + $0x3d1] sm:$0xff]  ;;  %v282_v62 = vld [vmem:[%s16630_s30 + $0x3c1] sm:$0xff] }
  0x38   : > { %v235_v59 = vld [vmem:[%s16630_s30 + $0x11] sm:$0xff]  ;;  %v234_v63 = vld [vmem:[%s16630_s30 + $0x1] sm:$0xff] }
  0x39   : > { %14621 = vmatpush3.xpose.msk.msra.mxu0 %vm300_vm0, %v242_v31  ;;  %v267_v60 = vld [vmem:[%s16630_s30 + $0x291] sm:$0xff]  ;;  %v266_v1 = vld [vmem:[%s16630_s30 + $0x281] sm:$0xff] }
  0x3a   : > { %14655 = vmatpush3.xpose.msk.msra.mxu1 %vm300_vm0, %v274_v32  ;;  %14622 = vmatprep.subr.msk.mxu0 %vm300_vm0, %v257_v33  ;;  %v16759_v2 = vld [vmem:[%s16630_s30 + $0x250] sm:$0xff]  ;;  %v16777_v6 = vld [vmem:[%s16630_s30 + $0x240] sm:$0xff] }
  0x3b   : > { %14656 = vmatprep.subr.msk.mxu1 %vm300_vm0, %v289_v34  ;;  %v16762_v3 = vld [vmem:[%s16630_s30 + $0x4d0] sm:$0xff]  ;;  %v16780_v7 = vld [vmem:[%s16630_s30 + $0x4c0] sm:$0xff] }
  0x3c   : > { %v16771_v4 = vld [vmem:[%s16630_s30 + $0x110] sm:$0xff]  ;;  %v16789_v8 = vld [vmem:[%s22842_s1] sm:$0xff] }
  0x3d   : > { %14623 = vmatpush3.xpose.msk.msra.mxu0 %vm300_vm0, %v241_v35  ;;  %v16774_v5 = vld [vmem:[%s16630_s30 + $0x390] sm:$0xff]  ;;  %v16803_v9 = vld [vmem:[%s16630_s30 + $0x380] sm:$0xff] }
  0x3e   : > { %14657 = vmatpush3.xpose.msk.msra.mxu1 %vm300_vm0, %v273_v36  ;;  %14624 = vmatprep.subr.msk.mxu0 %vm300_vm0, %v256_v37  ;;  %v16806_v10 = vld [vmem:[%s16630_s30 + $0x230] sm:$0xff]  ;;  %v16830_v14 = vld [vmem:[%s16630_s30 + $0x220] sm:$0xff] }
  0x3f   : > { %14658 = vmatprep.subr.msk.mxu1 %vm300_vm0, %v288_v38  ;;  %v16809_v11 = vld [vmem:[%s16630_s30 + $0x4b0] sm:$0xff]  ;;  %v16833_v15 = vld [vmem:[%s16630_s30 + $0x4a0] sm:$0xff] }
  0x40   : > { %v16824_v12 = vld [vmem:[%s16630_s30 + $0xf0] sm:$0xff]  ;;  %v16844_v16 = vld [vmem:[%s16630_s30 + $0xe0] sm:$0xff] }
  0x41   : > { %14625 = vmatpush3.xpose.msk.msra.mxu0 %vm300_vm0, %v240_v39  ;;  %v16827_v13 = vld [vmem:[%s16630_s30 + $0x370] sm:$0xff]  ;;  %v16847_v17 = vld [vmem:[%s16630_s30 + $0x360] sm:$0xff] }
  0x42   : > { %14659 = vmatpush3.xpose.msk.msra.mxu1 %vm300_vm0, %v272_v40  ;;  %14626 = vmatprep.subr.msk.mxu0 %vm300_vm0, %v255_v41  ;;  %v16850_v18 = vld [vmem:[%s16630_s30 + $0x210] sm:$0xff]  ;;  %v16870_v22 = vld [vmem:[%s16630_s30 + $0x200] sm:$0xff] }
  0x43   : > { %14660 = vmatprep.subr.msk.mxu1 %vm300_vm0, %v287_v42  ;;  %v16853_v19 = vld [vmem:[%s16630_s30 + $0x490] sm:$0xff]  ;;  %v16873_v23 = vld [vmem:[%s16630_s30 + $0x480] sm:$0xff] }
  0x44   : > { %v16864_v20 = vld [vmem:[%s16630_s30 + $0xd0] sm:$0xff]  ;;  %v16884_v24 = vld [vmem:[%s16630_s30 + $0xc0] sm:$0xff] }
  0x45   : > { %14627 = vmatpush3.xpose.msk.msra.mxu0 %vm300_vm0, %v239_v43  ;;  %v16867_v21 = vld [vmem:[%s16630_s30 + $0x350] sm:$0xff]  ;;  %v16887_v25 = vld [vmem:[%s16630_s30 + $0x340] sm:$0xff] }
  0x46   : > { %14661 = vmatpush3.xpose.msk.msra.mxu1 %vm300_vm0, %v271_v44  ;;  %14628 = vmatprep.subr.msk.mxu0 %vm300_vm0, %v254_v45  ;;  %v16890_v26 = vld [vmem:[%s16630_s30 + $0x1f0] sm:$0xff]  ;;  %v193_v30 = vld [vmem:[%s16630_s30 + $0x1e0] sm:$0xff] }
  0x47   : > { %14662 = vmatprep.subr.msk.mxu1 %vm300_vm0, %v286_v46  ;;  %v16893_v27 = vld [vmem:[%s16630_s30 + $0x470] sm:$0xff]  ;;  %v225_v31 = vld [vmem:[%s16630_s30 + $0x460] sm:$0xff] }
  0x48   : > { %v16904_v28 = vld [vmem:[%s16630_s30 + $0xb0] sm:$0xff]  ;;  %v177_v32 = vld [vmem:[%s16630_s30 + $0xa0] sm:$0xff] }
  0x49   : > { %14629 = vmatpush3.xpose.msk.msra.mxu0 %vm300_vm0, %v238_v47  ;;  %v16907_v29 = vld [vmem:[%s16630_s30 + $0x330] sm:$0xff]  ;;  %v209_v33 = vld [vmem:[%s16630_s30 + $0x320] sm:$0xff] }
  0x4a   : > { %14663 = vmatpush3.xpose.msk.msra.mxu1 %vm300_vm0, %v270_v48  ;;  %14630 = vmatprep.subr.msk.mxu0 %vm300_vm0, %v253_v49  ;;  %v16920_v34 = vld [vmem:[%s16630_s30 + $0x1b0] sm:$0xff]  ;;  %v16938_v38 = vld [vmem:[%s16630_s30 + $0x1a0] sm:$0xff] }
  0x4b   : > { %14664 = vmatprep.subr.msk.mxu1 %vm300_vm0, %v285_v50  ;;  %v16923_v35 = vld [vmem:[%s16630_s30 + $0x430] sm:$0xff]  ;;  %v16941_v39 = vld [vmem:[%s16630_s30 + $0x420] sm:$0xff] }
  0x4c   : > { %v16932_v36 = vld [vmem:[%s16630_s30 + $0x70] sm:$0xff]  ;;  %v16952_v40 = vld [vmem:[%s16630_s30 + $0x60] sm:$0xff] }
  0x4d   : > { %14631 = vmatpush3.xpose.msk.msra.mxu0 %vm300_vm0, %v237_v51  ;;  %v16935_v37 = vld [vmem:[%s16630_s30 + $0x2f0] sm:$0xff]  ;;  %v16955_v41 = vld [vmem:[%s16630_s30 + $0x2e0] sm:$0xff] }
  0x4e   : > { %14665 = vmatpush3.xpose.msk.msra.mxu1 %vm300_vm0, %v269_v52  ;;  %14632 = vmatprep.subr.msk.mxu0 %vm300_vm0, %v252_v53  ;;  %v16958_v42 = vld [vmem:[%s16630_s30 + $0x190] sm:$0xff]  ;;  %v16978_v46 = vld [vmem:[%s16630_s30 + $0x180] sm:$0xff] }
  0x4f   : > { %14666 = vmatprep.subr.msk.mxu1 %vm300_vm0, %v284_v54  ;;  %v16961_v43 = vld [vmem:[%s16630_s30 + $0x410] sm:$0xff]  ;;  %v16981_v47 = vld [vmem:[%s16630_s30 + $0x400] sm:$0xff] }
  0x50   : > { %v16972_v44 = vld [vmem:[%s16630_s30 + $0x50] sm:$0xff]  ;;  %v16992_v48 = vld [vmem:[%s16630_s30 + $0x40] sm:$0xff] }
  0x51   : > { %14633 = vmatpush3.xpose.msk.msra.mxu0 %vm300_vm0, %v236_v55  ;;  %v16975_v45 = vld [vmem:[%s16630_s30 + $0x2d0] sm:$0xff]  ;;  %v16995_v49 = vld [vmem:[%s16630_s30 + $0x2c0] sm:$0xff] }
  0x52   : > { %14667 = vmatpush3.xpose.msk.msra.mxu1 %vm300_vm0, %v268_v56  ;;  %14634 = vmatprep.subr.msk.mxu0 %vm300_vm0, %v251_v57  ;;  %v16998_v50 = vld [vmem:[%s16630_s30 + $0x170] sm:$0xff]  ;;  %v17018_v54 = vld [vmem:[%s16630_s30 + $0x160] sm:$0xff] }
  0x53   : > { %14668 = vmatprep.subr.msk.mxu1 %vm300_vm0, %v283_v58  ;;  %v17001_v51 = vld [vmem:[%s16630_s30 + $0x3f0] sm:$0xff]  ;;  %v17021_v55 = vld [vmem:[%s16630_s30 + $0x3e0] sm:$0xff] }
  0x54   : > { %v17012_v52 = vld [vmem:[%s16630_s30 + $0x30] sm:$0xff]  ;;  %v17032_v56 = vld [vmem:[%s16630_s30 + $0x20] sm:$0xff] }
  0x55   : > { %14635 = vmatpush3.xpose.msk.msra.mxu0 %vm300_vm0, %v235_v59  ;;  %v17015_v53 = vld [vmem:[%s16630_s30 + $0x2b0] sm:$0xff]  ;;  %v17035_v57 = vld [vmem:[%s16630_s30 + $0x2a0] sm:$0xff] }
  0x56   : > { %14669 = vmatpush3.xpose.msk.msra.mxu1 %vm300_vm0, %v267_v60  ;;  %14636 = vmatprep.subr.msk.mxu0 %vm300_vm0, %v250_v61  ;;  %v17038_v58 = vld [vmem:[%s16630_s30 + $0x150] sm:$0xff] }
  0x57   : > { %14670 = vmatprep.subr.msk.mxu1 %vm300_vm0, %v282_v62  ;;  %v17041_v59 = vld [vmem:[%s16630_s30 + $0x3d0] sm:$0xff]  ;;  %v185_v62 = vld [vmem:[%s16630_s30 + $0x140] sm:$0xff] }
  0x58   : > { %v17052_v60 = vld [vmem:[%s16630_s30 + $0x10] sm:$0xff] }
  0x59   : > { %14637 = vmatpush3.xpose.msk.msra.mxu0 %vm300_vm0, %v234_v63  ;;  %v17055_v61 = vld [vmem:[%s16630_s30 + $0x290] sm:$0xff]  ;;  %v217_v63 = vld [vmem:[%s16630_s30 + $0x3c0] sm:$0xff] }
  0x5a   : > { %14671 = vmatpush3.xpose.msk.msra.mxu1 %vm300_vm0, %v266_v1  ;;  %14674 = vmatprep.subr.msk.mxu0 %vm300_vm0, %v16759_v2  ;;  %23159 = vst [vmem:[#allocation5_spill] sm:$0xff] %v17055_v61  ;;  %v169_v1 = vld [vmem:[%s16630_s30] sm:$0xff] }
  0x5b   : > { %14708 = vmatprep.subr.msk.mxu1 %vm300_vm0, %v16762_v3 }
  0x5c   : > { %14639 = vmatmul.mubr.msk.f32.vlgmr.msra.gmra.mxu0 %vm300_vm0, %v16620_v0 }
  0x5d   : > { %14673 = vmatmul.mubr.msk.f32.vlgmr.msra.gmra.mxu1 %vm300_vm0, %v16620_v0  ;;  %14675 = vmatpush3.xpose.msk.msra.mxu0 %vm300_vm0, %v16771_v4  ;;  %v16800_v0 = vld [vmem:[%s16630_s30 + $0x100] sm:$0xff] }
  0x5e   : > { %14709 = vmatpush3.xpose.msk.msra.mxu1 %vm300_vm0, %v16774_v5  ;;  %14676 = vmatprep.subr.msk.mxu0 %vm300_vm0, %v16777_v6 }
  0x5f   : > { %14710 = vmatprep.subr.msk.mxu1 %vm300_vm0, %v16780_v7  ;;  %14706 = vmatprep.mubr.msk.f32.mxu0 %vm300_vm0, %v16789_v8 }
  0x60   : > { %14740 = vmatprep.mubr.msk.f32.mxu1 %vm300_vm0, %v16789_v8 }
  0x61   : > { %14677 = vmatpush3.xpose.msk.msra.mxu0 %vm300_vm0, %v16800_v0 }
  0x62   : > { %14711 = vmatpush3.xpose.msk.msra.mxu1 %vm300_vm0, %v16803_v9  ;;  %14678 = vmatprep.subr.msk.mxu0 %vm300_vm0, %v16806_v10 }
  0x63   : > { %14712 = vmatprep.subr.msk.mxu1 %vm300_vm0, %v16809_v11 }
  0x65   : > { %14679 = vmatpush3.xpose.msk.msra.mxu0 %vm300_vm0, %v16824_v12 }
  0x66   : > { %14713 = vmatpush3.xpose.msk.msra.mxu1 %vm300_vm0, %v16827_v13  ;;  %14680 = vmatprep.subr.msk.mxu0 %vm300_vm0, %v16830_v14 }
  0x67   : > { %14714 = vmatprep.subr.msk.mxu1 %vm300_vm0, %v16833_v15 }
  0x69   : > { %14681 = vmatpush3.xpose.msk.msra.mxu0 %vm300_vm0, %v16844_v16 }
  0x6a   : > { %14715 = vmatpush3.xpose.msk.msra.mxu1 %vm300_vm0, %v16847_v17  ;;  %14682 = vmatprep.subr.msk.mxu0 %vm300_vm0, %v16850_v18 }
  0x6b   : > { %14716 = vmatprep.subr.msk.mxu1 %vm300_vm0, %v16853_v19 }
  0x6d   : > { %14683 = vmatpush3.xpose.msk.msra.mxu0 %vm300_vm0, %v16864_v20 }
  0x6e   : > { %14717 = vmatpush3.xpose.msk.msra.mxu1 %vm300_vm0, %v16867_v21  ;;  %14684 = vmatprep.subr.msk.mxu0 %vm300_vm0, %v16870_v22 }
  0x6f   : > { %14718 = vmatprep.subr.msk.mxu1 %vm300_vm0, %v16873_v23 }
  0x71   : > { %14685 = vmatpush3.xpose.msk.msra.mxu0 %vm300_vm0, %v16884_v24 }
  0x72   : > { %14719 = vmatpush3.xpose.msk.msra.mxu1 %vm300_vm0, %v16887_v25  ;;  %14686 = vmatprep.subr.msk.mxu0 %vm300_vm0, %v16890_v26 }
  0x73   : > { %14720 = vmatprep.subr.msk.mxu1 %vm300_vm0, %v16893_v27 }
  0x75   : > { %14687 = vmatpush3.xpose.msk.msra.mxu0 %vm300_vm0, %v16904_v28 }
  0x76   : > { %14721 = vmatpush3.xpose.msk.msra.mxu1 %vm300_vm0, %v16907_v29  ;;  %14688 = vmatprep.subr.msk.mxu0 %vm300_vm0, %v193_v30  ;;  %v201_v30 = vld [vmem:[%s16630_s30 + $0x280] sm:$0xff] }
  0x77   : > { %14722 = vmatprep.subr.msk.mxu1 %vm300_vm0, %v225_v31  ;;  %v17068_v31 = vld [vmem:[%s16630_s30 + $0x252] sm:$0xff] }
  0x78   : > { %23160 = vst [vmem:[#allocation6_spill] sm:$0xff] %v17068_v31 }
  0x79   : > { %14689 = vmatpush3.xpose.msk.msra.mxu0 %vm300_vm0, %v177_v32  ;;  %v17071_v32 = vld [vmem:[%s16630_s30 + $0x4d2] sm:$0xff] }
  0x7a   : > { %14723 = vmatpush3.xpose.msk.msra.mxu1 %vm300_vm0, %v209_v33  ;;  %14690 = vmatprep.subr.msk.mxu0 %vm300_vm0, %v16920_v34  ;;  %23161 = vst [vmem:[#allocation7_spill] sm:$0xff] %v17071_v32  ;;  %v17080_v33 = vld [vmem:[%s16630_s30 + $0x112] sm:$0xff] }
  0x7b   : > { %14724 = vmatprep.subr.msk.mxu1 %vm300_vm0, %v16923_v35  ;;  %23162 = vst [vmem:[#allocation8_spill] sm:$0xff] %v17080_v33 }
  0x7d   : > { %14691 = vmatpush3.xpose.msk.msra.mxu0 %vm300_vm0, %v16932_v36 }
  0x7e   : > { %14725 = vmatpush3.xpose.msk.msra.mxu1 %vm300_vm0, %v16935_v37  ;;  %14692 = vmatprep.subr.msk.mxu0 %vm300_vm0, %v16938_v38 }
  0x7f   : > { %14726 = vmatprep.subr.msk.mxu1 %vm300_vm0, %v16941_v39 }
  0x81   : > { %14693 = vmatpush3.xpose.msk.msra.mxu0 %vm300_vm0, %v16952_v40 }
  0x82   : > { %14727 = vmatpush3.xpose.msk.msra.mxu1 %vm300_vm0, %v16955_v41  ;;  %14694 = vmatprep.subr.msk.mxu0 %vm300_vm0, %v16958_v42 }
  0x83   : > { %14728 = vmatprep.subr.msk.mxu1 %vm300_vm0, %v16961_v43 }
  0x85   : > { %14695 = vmatpush3.xpose.msk.msra.mxu0 %vm300_vm0, %v16972_v44 }
  0x86   : > { %14729 = vmatpush3.xpose.msk.msra.mxu1 %vm300_vm0, %v16975_v45  ;;  %14696 = vmatprep.subr.msk.mxu0 %vm300_vm0, %v16978_v46 }
  0x87   : > { %14730 = vmatprep.subr.msk.mxu1 %vm300_vm0, %v16981_v47 }
  0x89   : > { %14697 = vmatpush3.xpose.msk.msra.mxu0 %vm300_vm0, %v16992_v48 }
  0x8a   : > { %14731 = vmatpush3.xpose.msk.msra.mxu1 %vm300_vm0, %v16995_v49  ;;  %14698 = vmatprep.subr.msk.mxu0 %vm300_vm0, %v16998_v50 }
  0x8b   : > { %14732 = vmatprep.subr.msk.mxu1 %vm300_vm0, %v17001_v51 }
  0x8d   : > { %14699 = vmatpush3.xpose.msk.msra.mxu0 %vm300_vm0, %v17012_v52 }
  0x8e   : > { %14733 = vmatpush3.xpose.msk.msra.mxu1 %vm300_vm0, %v17015_v53  ;;  %14700 = vmatprep.subr.msk.mxu0 %vm300_vm0, %v17018_v54 }
  0x8f   : > { %14734 = vmatprep.subr.msk.mxu1 %vm300_vm0, %v17021_v55 }
  0x91   : > { %14701 = vmatpush3.xpose.msk.msra.mxu0 %vm300_vm0, %v17032_v56 }
  0x92   : > { %14735 = vmatpush3.xpose.msk.msra.mxu1 %vm300_vm0, %v17035_v57  ;;  %14702 = vmatprep.subr.msk.mxu0 %vm300_vm0, %v17038_v58 }
  0x93   : > { %14736 = vmatprep.subr.msk.mxu1 %vm300_vm0, %v17041_v59 }
  0x95   : > { %14703 = vmatpush3.xpose.msk.msra.mxu0 %vm300_vm0, %v17052_v60 }
  0x96   : > { %14737 = vmatpush3.xpose.msk.msra.mxu1 %vm300_vm0, %v17055_v61  ;;  %14704 = vmatprep.subr.msk.mxu0 %vm300_vm0, %v185_v62  ;;  %v17083_v62 = vld [vmem:[%s16630_s30 + $0x392] sm:$0xff]  ;;  %v17089_v61 = vld [vmem:[%s16630_s30 + $0x4c2] sm:$0xff] }
  0x97   : > { %14738 = vmatprep.subr.msk.mxu1 %vm300_vm0, %v217_v63  ;;  %23163 = vst [vmem:[#allocation9_spill] sm:$0xff] %v17083_v62  ;;  %v17086_v63 = vld [vmem:[%s16630_s30 + $0x242] sm:$0xff]  ;;  %23165 = vst [vmem:[#allocation11_spill] sm:$0xff] %v17089_v61 }
  0x98   : > { %23164 = vst [vmem:[#allocation10_spill] sm:$0xff] %v17086_v63 }
  0x99   : > { %14705 = vmatpush3.xpose.msk.msra.mxu0 %vm300_vm0, %v169_v1  ;;  %v17098_v1 = vld [vmem:[%s22842_s1 + $0x10] sm:$0xff] }
  0x9a   : > { %14739 = vmatpush3.xpose.msk.msra.mxu1 %vm300_vm0, %v201_v30  ;;  %14742 = vmatprep.subr.msk.mxu0 %vm300_vm0, %v17068_v31  ;;  %v17112_v30 = vld [vmem:[%s16630_s30 + $0x382] sm:$0xff]  ;;  %v17118_v31 = vld [vmem:[%s16630_s30 + $0x4b2] sm:$0xff] }
  0x9b   : > { %14776 = vmatprep.subr.msk.mxu1 %vm300_vm0, %v17071_v32  ;;  %23167 = vst [vmem:[#allocation13_spill] sm:$0xff] %v17112_v30  ;;  %v17115_v32 = vld [vmem:[%s16630_s30 + $0x232] sm:$0xff]  ;;  %23169 = vst [vmem:[#allocation15_spill] sm:$0xff] %v17118_v31 }
  0x9c   : > { %14707 = vmatmul.mubr.msk.f32.vlgmr.msra.gmra.mxu0 %vm300_vm0, %v16789_v8  ;;  %23168 = vst [vmem:[#allocation14_spill] sm:$0xff] %v17115_v32 }
  0x9d   : > { %14741 = vmatmul.mubr.msk.f32.vlgmr.msra.gmra.mxu1 %vm300_vm0, %v16789_v8  ;;  %14743 = vmatpush3.xpose.msk.msra.mxu0 %vm300_vm0, %v17080_v33  ;;  %v17109_v8 = vld [vmem:[%s16630_s30 + $0x102] sm:$0xff] }
  0x9e   : > { %14777 = vmatpush3.xpose.msk.msra.mxu1 %vm300_vm0, %v17083_v62  ;;  %14744 = vmatprep.subr.msk.mxu0 %vm300_vm0, %v17086_v63  ;;  %23166 = vst [vmem:[#allocation12_spill] sm:$0xff] %v17109_v8  ;;  %v17136_v63 = vld [vmem:[%s16630_s30 + $0x372] sm:$0xff]  ;;  %v17139_v62 = vld [vmem:[%s16630_s30 + $0x222] sm:$0xff] }
  0x9f   : > { %14778 = vmatprep.subr.msk.mxu1 %vm300_vm0, %v17089_v61  ;;  %14774 = vmatprep.mubr.msk.f32.mxu0 %vm300_vm0, %v17098_v1  ;;  %v17133_v61 = vld [vmem:[%s16630_s30 + $0xf2] sm:$0xff]  ;;  %23171 = vst [vmem:[#allocation17_spill] sm:$0xff] %v17136_v63  ;;  %23172 = vst [vmem:[#allocation18_spill] sm:$0xff] %v17139_v62  ;;  %v17142_v33 = vld [vmem:[%s16630_s30 + $0x4a2] sm:$0xff] }
  0xa0   : > { %14808 = vmatprep.mubr.msk.f32.mxu1 %vm300_vm0, %v17098_v1  ;;  %23170 = vst [vmem:[#allocation16_spill] sm:$0xff] %v17133_v61  ;;  %23173 = vst [vmem:[#allocation19_spill] sm:$0xff] %v17142_v33 }
  0xa1   : > { %14745 = vmatpush3.xpose.msk.msra.mxu0 %vm300_vm0, %v17109_v8  ;;  %v17162_v8 = vld [vmem:[%s16630_s30 + $0x492] sm:$0xff] }
  0xa2   : > { %14779 = vmatpush3.xpose.msk.msra.mxu1 %vm300_vm0, %v17112_v30  ;;  %14746 = vmatprep.subr.msk.mxu0 %vm300_vm0, %v17115_v32  ;;  %v17156_v32 = vld [vmem:[%s16630_s30 + $0x362] sm:$0xff]  ;;  %v17159_v30 = vld [vmem:[%s16630_s30 + $0x212] sm:$0xff]  ;;  %23177 = vst [vmem:[#allocation23_spill] sm:$0xff] %v17162_v8 }
  0xa3   : > { %14780 = vmatprep.subr.msk.mxu1 %vm300_vm0, %v17118_v31  ;;  %v17153_v31 = vld [vmem:[%s16630_s30 + $0xe2] sm:$0xff]  ;;  %23175 = vst [vmem:[#allocation21_spill] sm:$0xff] %v17156_v32  ;;  %23176 = vst [vmem:[#allocation22_spill] sm:$0xff] %v17159_v30 }
  0xa4   : > { %23174 = vst [vmem:[#allocation20_spill] sm:$0xff] %v17153_v31 }
  0xa5   : > { %14747 = vmatpush3.xpose.msk.msra.mxu0 %vm300_vm0, %v17133_v61  ;;  %v17182_v61 = vld [vmem:[%s16630_s30 + $0x482] sm:$0xff] }
  0xa6   : > { %14781 = vmatpush3.xpose.msk.msra.mxu1 %vm300_vm0, %v17136_v63  ;;  %14748 = vmatprep.subr.msk.mxu0 %vm300_vm0, %v17139_v62  ;;  %v17176_v62 = vld [vmem:[%s16630_s30 + $0x352] sm:$0xff]  ;;  %v17179_v63 = vld [vmem:[%s16630_s30 + $0x202] sm:$0xff]  ;;  %23181 = vst [vmem:[#allocation27_spill] sm:$0xff] %v17182_v61 }
  0xa7   : > { %14782 = vmatprep.subr.msk.mxu1 %vm300_vm0, %v17142_v33  ;;  %v17173_v33 = vld [vmem:[%s16630_s30 + $0xd2] sm:$0xff]  ;;  %23179 = vst [vmem:[#allocation25_spill] sm:$0xff] %v17176_v62  ;;  %23180 = vst [vmem:[#allocation26_spill] sm:$0xff] %v17179_v63 }
  0xa8   : > { %23178 = vst [vmem:[#allocation24_spill] sm:$0xff] %v17173_v33 }
  0xa9   : > { %14749 = vmatpush3.xpose.msk.msra.mxu0 %vm300_vm0, %v17153_v31  ;;  %v17202_v31 = vld [vmem:[%s16630_s30 + $0x472] sm:$0xff] }
  0xaa   : > { %14783 = vmatpush3.xpose.msk.msra.mxu1 %vm300_vm0, %v17156_v32  ;;  %14750 = vmatprep.subr.msk.mxu0 %vm300_vm0, %v17159_v30  ;;  %v17196_v30 = vld [vmem:[%s16630_s30 + $0x342] sm:$0xff]  ;;  %v17199_v32 = vld [vmem:[%s16630_s30 + $0x1f2] sm:$0xff]  ;;  %23185 = vst [vmem:[#allocation31_spill] sm:$0xff] %v17202_v31 }
  0xab   : > { %14784 = vmatprep.subr.msk.mxu1 %vm300_vm0, %v17162_v8  ;;  %v17193_v8 = vld [vmem:[%s16630_s30 + $0xc2] sm:$0xff]  ;;  %23183 = vst [vmem:[#allocation29_spill] sm:$0xff] %v17196_v30  ;;  %23184 = vst [vmem:[#allocation30_spill] sm:$0xff] %v17199_v32 }
  0xac   : > { %23182 = vst [vmem:[#allocation28_spill] sm:$0xff] %v17193_v8 }
  0xad   : > { %14751 = vmatpush3.xpose.msk.msra.mxu0 %vm300_vm0, %v17173_v33  ;;  %v1031_v33 = vld [vmem:[%s16630_s30 + $0x462] sm:$0xff] }
  0xae   : > { %14785 = vmatpush3.xpose.msk.msra.mxu1 %vm300_vm0, %v17176_v62  ;;  %14752 = vmatprep.subr.msk.mxu0 %vm300_vm0, %v17179_v63  ;;  %v17216_v63 = vld [vmem:[%s16630_s30 + $0x332] sm:$0xff]  ;;  %v999_v62 = vld [vmem:[%s16630_s30 + $0x1e2] sm:$0xff] }
  0xaf   : > { %14786 = vmatprep.subr.msk.mxu1 %vm300_vm0, %v17182_v61  ;;  %v17213_v61 = vld [vmem:[%s16630_s30 + $0xb2] sm:$0xff]  ;;  %23187 = vst [vmem:[#allocation33_spill] sm:$0xff] %v17216_v63 }
  0xb0   : > { %23186 = vst [vmem:[#allocation32_spill] sm:$0xff] %v17213_v61 }
  0xb1   : > { %14753 = vmatpush3.xpose.msk.msra.mxu0 %vm300_vm0, %v17193_v8  ;;  %v17232_v8 = vld [vmem:[%s16630_s30 + $0x432] sm:$0xff] }
  0xb2   : > { %14787 = vmatpush3.xpose.msk.msra.mxu1 %vm300_vm0, %v17196_v30  ;;  %14754 = vmatprep.subr.msk.mxu0 %vm300_vm0, %v17199_v32  ;;  %v1015_v32 = vld [vmem:[%s16630_s30 + $0x322] sm:$0xff]  ;;  %v17229_v30 = vld [vmem:[%s16630_s30 + $0x1b2] sm:$0xff]  ;;  %23189 = vst [vmem:[#allocation35_spill] sm:$0xff] %v17232_v8 }
  0xb3   : > { %14788 = vmatprep.subr.msk.mxu1 %vm300_vm0, %v17202_v31  ;;  %v983_v31 = vld [vmem:[%s16630_s30 + $0xa2] sm:$0xff]  ;;  %23188 = vst [vmem:[#allocation34_spill] sm:$0xff] %v17229_v30 }
  0xb5   : > { %14755 = vmatpush3.xpose.msk.msra.mxu0 %vm300_vm0, %v17213_v61  ;;  %v17250_v61 = vld [vmem:[%s16630_s30 + $0x422] sm:$0xff] }
  0xb6   : > { %14789 = vmatpush3.xpose.msk.msra.mxu1 %vm300_vm0, %v17216_v63  ;;  %14756 = vmatprep.subr.msk.mxu0 %vm300_vm0, %v999_v62  ;;  %v17244_v62 = vld [vmem:[%s16630_s30 + $0x2f2] sm:$0xff]  ;;  %v17247_v63 = vld [vmem:[%s16630_s30 + $0x1a2] sm:$0xff]  ;;  %23193 = vst [vmem:[#allocation39_spill] sm:$0xff] %v17250_v61 }
  0xb7   : > { %14790 = vmatprep.subr.msk.mxu1 %vm300_vm0, %v1031_v33  ;;  %v17241_v33 = vld [vmem:[%s16630_s30 + $0x72] sm:$0xff]  ;;  %23191 = vst [vmem:[#allocation37_spill] sm:$0xff] %v17244_v62  ;;  %23192 = vst [vmem:[#allocation38_spill] sm:$0xff] %v17247_v63 }
  0xb8   : > { %23190 = vst [vmem:[#allocation36_spill] sm:$0xff] %v17241_v33 }
  0xb9   : > { %14757 = vmatpush3.xpose.msk.msra.mxu0 %vm300_vm0, %v983_v31  ;;  %v17261_v31 = vld [vmem:[%s16630_s30 + $0x62] sm:$0xff] }
  0xba   : > { %14791 = vmatpush3.xpose.msk.msra.mxu1 %vm300_vm0, %v1015_v32  ;;  %14758 = vmatprep.subr.msk.mxu0 %vm300_vm0, %v17229_v30  ;;  %23194 = vst [vmem:[#allocation40_spill] sm:$0xff] %v17261_v31  ;;  %v17264_v32 = vld [vmem:[%s16630_s30 + $0x2e2] sm:$0xff]  ;;  %v17270_v30 = vld [vmem:[%s16630_s30 + $0x412] sm:$0xff] }
  0xbb   : > { %14792 = vmatprep.subr.msk.mxu1 %vm300_vm0, %v17232_v8  ;;  %23195 = vst [vmem:[#allocation41_spill] sm:$0xff] %v17264_v32  ;;  %v17267_v8 = vld [vmem:[%s16630_s30 + $0x192] sm:$0xff]  ;;  %23197 = vst [vmem:[#allocation43_spill] sm:$0xff] %v17270_v30 }
  0xbc   : > { %23196 = vst [vmem:[#allocation42_spill] sm:$0xff] %v17267_v8 }
  0xbd   : > { %14759 = vmatpush3.xpose.msk.msra.mxu0 %vm300_vm0, %v17241_v33  ;;  %v17290_v33 = vld [vmem:[%s16630_s30 + $0x402] sm:$0xff] }
  0xbe   : > { %14793 = vmatpush3.xpose.msk.msra.mxu1 %vm300_vm0, %v17244_v62  ;;  %14760 = vmatprep.subr.msk.mxu0 %vm300_vm0, %v17247_v63  ;;  %v17284_v63 = vld [vmem:[%s16630_s30 + $0x2d2] sm:$0xff]  ;;  %v17287_v62 = vld [vmem:[%s16630_s30 + $0x182] sm:$0xff]  ;;  %23201 = vst [vmem:[#allocation47_spill] sm:$0xff] %v17290_v33 }
  0xbf   : > { %14794 = vmatprep.subr.msk.mxu1 %vm300_vm0, %v17250_v61  ;;  %v17281_v61 = vld [vmem:[%s16630_s30 + $0x52] sm:$0xff]  ;;  %23199 = vst [vmem:[#allocation45_spill] sm:$0xff] %v17284_v63  ;;  %23200 = vst [vmem:[#allocation46_spill] sm:$0xff] %v17287_v62 }
  0xc0   : > { %23198 = vst [vmem:[#allocation44_spill] sm:$0xff] %v17281_v61 }
  0xc1   : > { %14761 = vmatpush3.xpose.msk.msra.mxu0 %vm300_vm0, %v17261_v31  ;;  %v17310_v31 = vld [vmem:[%s16630_s30 + $0x3f2] sm:$0xff] }
  0xc2   : > { %14795 = vmatpush3.xpose.msk.msra.mxu1 %vm300_vm0, %v17264_v32  ;;  %14762 = vmatprep.subr.msk.mxu0 %vm300_vm0, %v17267_v8  ;;  %v17304_v8 = vld [vmem:[%s16630_s30 + $0x2c2] sm:$0xff]  ;;  %v17307_v32 = vld [vmem:[%s16630_s30 + $0x172] sm:$0xff]  ;;  %23205 = vst [vmem:[#allocation51_spill] sm:$0xff] %v17310_v31 }
  0xc3   : > { %14796 = vmatprep.subr.msk.mxu1 %vm300_vm0, %v17270_v30  ;;  %v17301_v30 = vld [vmem:[%s16630_s30 + $0x42] sm:$0xff]  ;;  %23203 = vst [vmem:[#allocation49_spill] sm:$0xff] %v17304_v8  ;;  %23204 = vst [vmem:[#allocation50_spill] sm:$0xff] %v17307_v32 }
  0xc4   : > { %23202 = vst [vmem:[#allocation48_spill] sm:$0xff] %v17301_v30 }
  0xc5   : > { %14763 = vmatpush3.xpose.msk.msra.mxu0 %vm300_vm0, %v17281_v61  ;;  %v17330_v61 = vld [vmem:[%s16630_s30 + $0x3e2] sm:$0xff] }
  0xc6   : > { %14797 = vmatpush3.xpose.msk.msra.mxu1 %vm300_vm0, %v17284_v63  ;;  %14764 = vmatprep.subr.msk.mxu0 %vm300_vm0, %v17287_v62  ;;  %v17324_v62 = vld [vmem:[%s16630_s30 + $0x2b2] sm:$0xff]  ;;  %v17327_v63 = vld [vmem:[%s16630_s30 + $0x162] sm:$0xff]  ;;  %23209 = vst [vmem:[#allocation55_spill] sm:$0xff] %v17330_v61 }
  0xc7   : > { %14798 = vmatprep.subr.msk.mxu1 %vm300_vm0, %v17290_v33  ;;  %v17321_v33 = vld [vmem:[%s16630_s30 + $0x32] sm:$0xff]  ;;  %23207 = vst [vmem:[#allocation53_spill] sm:$0xff] %v17324_v62  ;;  %23208 = vst [vmem:[#allocation54_spill] sm:$0xff] %v17327_v63 }
  0xc8   : > { %23206 = vst [vmem:[#allocation52_spill] sm:$0xff] %v17321_v33 }
  0xc9   : > { %14765 = vmatpush3.xpose.msk.msra.mxu0 %vm300_vm0, %v17301_v30  ;;  %v17350_v30 = vld [vmem:[%s16630_s30 + $0x3d2] sm:$0xff] }
  0xca   : > { %14799 = vmatpush3.xpose.msk.msra.mxu1 %vm300_vm0, %v17304_v8  ;;  %14766 = vmatprep.subr.msk.mxu0 %vm300_vm0, %v17307_v32  ;;  %v17344_v32 = vld [vmem:[%s16630_s30 + $0x2a2] sm:$0xff]  ;;  %v17347_v8 = vld [vmem:[%s16630_s30 + $0x152] sm:$0xff]  ;;  %23213 = vst [vmem:[#allocation59_spill] sm:$0xff] %v17350_v30 }
  0xcb   : > { %14800 = vmatprep.subr.msk.mxu1 %vm300_vm0, %v17310_v31  ;;  %v17341_v31 = vld [vmem:[%s16630_s30 + $0x22] sm:$0xff]  ;;  %23211 = vst [vmem:[#allocation57_spill] sm:$0xff] %v17344_v32  ;;  %23212 = vst [vmem:[#allocation58_spill] sm:$0xff] %v17347_v8 }
  0xcc   : > { %23210 = vst [vmem:[#allocation56_spill] sm:$0xff] %v17341_v31 }
  0xcd   : > { %14767 = vmatpush3.xpose.msk.msra.mxu0 %vm300_vm0, %v17321_v33  ;;  %v1023_v33 = vld [vmem:[%s16630_s30 + $0x3c2] sm:$0xff] }
  0xce   : > { %14801 = vmatpush3.xpose.msk.msra.mxu1 %vm300_vm0, %v17324_v62  ;;  %14768 = vmatprep.subr.msk.mxu0 %vm300_vm0, %v17327_v63  ;;  %v17364_v63 = vld [vmem:[%s16630_s30 + $0x292] sm:$0xff]  ;;  %v991_v62 = vld [vmem:[%s16630_s30 + $0x142] sm:$0xff] }
  0xcf   : > { %14802 = vmatprep.subr.msk.mxu1 %vm300_vm0, %v17330_v61  ;;  %v17361_v61 = vld [vmem:[%s16630_s30 + $0x12] sm:$0xff]  ;;  %23214 = vst [vmem:[#allocation60_spill] sm:$0xff] %v17364_v63 }
  0xd1   : > { %14769 = vmatpush3.xpose.msk.msra.mxu0 %vm300_vm0, %v17341_v31  ;;  %v17380_v31 = vld [vmem:[%s16630_s30 + $0x4e0] sm:$0xff] }
  0xd2   : > { %14803 = vmatpush3.xpose.msk.msra.mxu1 %vm300_vm0, %v17344_v32  ;;  %14770 = vmatprep.subr.msk.mxu0 %vm300_vm0, %v17347_v8  ;;  %v975_v8 = vld [vmem:[%s16630_s30 + $0x2] sm:$0xff] }
  0xd3   : > { %14804 = vmatprep.subr.msk.mxu1 %vm300_vm0, %v17350_v30  ;;  %v1007_v30 = vld [vmem:[%s16630_s30 + $0x282] sm:$0xff] }
  0xd4   : > { %v17377_v32 = vld [vmem:[%s16630_s30 + $0x260] sm:$0xff] }
  0xd5   : > { %14771 = vmatpush3.xpose.msk.msra.mxu0 %vm300_vm0, %v17361_v61 }
  0xd6   : > { %14805 = vmatpush3.xpose.msk.msra.mxu1 %vm300_vm0, %v17364_v63  ;;  %14772 = vmatprep.subr.msk.mxu0 %vm300_vm0, %v991_v62  ;;  %v17389_v63 = vld [vmem:[%s16630_s30 + $0x120] sm:$0xff] }
  0xd7   : > { %14806 = vmatprep.subr.msk.mxu1 %vm300_vm0, %v1023_v33  ;;  %v17392_v62 = vld [vmem:[%s16630_s30 + $0x3a0] sm:$0xff] }
  0xd8   : > { %v17798_v33 = vld [vmem:[%s16630_s30 + $0x2c1] sm:$0xff] }
  0xd9   : > { %14773 = vmatpush3.xpose.msk.msra.mxu0 %vm300_vm0, %v975_v8  ;;  %v17401_v8 = vld [vmem:[%s22842_s1 + $0x18] sm:$0xff]  ;;  %23217 = vst [vmem:[#allocation61_spill] sm:$0xff] %v17798_v33 }
  0xda   : > { %14807 = vmatpush3.xpose.msk.msra.mxu1 %vm300_vm0, %v1007_v30  ;;  %14810 = vmatprep.subr.msk.mxu0 %vm300_vm0, %v17377_v32  ;;  %v17795_v30 = vld [vmem:[%s16630_s30 + $0x41] sm:$0xff] }
  0xdb   : > { %14844 = vmatprep.subr.msk.mxu1 %vm300_vm0, %v17380_v31 }
  0xdc   : > { %14775 = vmatmul.mubr.msk.f32.vlgmr.msra.gmra.mxu0 %vm300_vm0, %v17098_v1 }
  0xdd   : > { %14809 = vmatmul.mubr.msk.f32.vlgmr.msra.gmra.mxu1 %vm300_vm0, %v17098_v1  ;;  %14811 = vmatpush3.xpose.msk.msra.mxu0 %vm300_vm0, %v17389_v63  ;;  %v17784_v1 = vld [vmem:[%s16630_s30 + $0x401] sm:$0xff] }
  0xde   : > { %14845 = vmatpush3.xpose.msk.msra.mxu1 %vm300_vm0, %v17392_v62  ;;  %14812 = vmatprep.subr.msk.mxu0 %vm300_vm0, %v16759_v2  ;;  %v17464_v2 = vld [vmem:[%s16630_s30 + $0x1c0] sm:$0xff] }
  0xdf   : > { %14846 = vmatprep.subr.msk.mxu1 %vm300_vm0, %v16762_v3  ;;  %14842 = vmatprep.mubr.msk.f32.mxu0 %vm300_vm0, %v17401_v8  ;;  %v17467_v3 = vld [vmem:[%s16630_s30 + $0x440] sm:$0xff] }
  0xe0   : > { %14876 = vmatprep.mubr.msk.f32.mxu1 %vm300_vm0, %v17401_v8 }
  0xe1   : > { %14813 = vmatpush3.xpose.msk.msra.mxu0 %vm300_vm0, %v16771_v4  ;;  %v17478_v4 = vld [vmem:[%s16630_s30 + $0x80] sm:$0xff] }
  0xe2   : > { %14847 = vmatpush3.xpose.msk.msra.mxu1 %vm300_vm0, %v16774_v5  ;;  %14814 = vmatprep.subr.msk.mxu0 %vm300_vm0, %v16777_v6  ;;  %v17481_v5 = vld [vmem:[%s16630_s30 + $0x300] sm:$0xff] }
  0xe3   : > { %14848 = vmatprep.subr.msk.mxu1 %vm300_vm0, %v16780_v7  ;;  %v17540_v6 = vld [vmem:[%s16630_s30 + $0x261] sm:$0xff] }
  0xe4   : > { %v17543_v7 = vld [vmem:[%s16630_s30 + $0x4e1] sm:$0xff] }
  0xe5   : > { %14815 = vmatpush3.xpose.msk.msra.mxu0 %vm300_vm0, %v16800_v0  ;;  %v23215_v0 = vld [vmem:[#allocation5_spill] sm:$0xff] }
  0xe6   : > { %14849 = vmatpush3.xpose.msk.msra.mxu1 %vm300_vm0, %v16803_v9  ;;  %14816 = vmatprep.subr.msk.mxu0 %vm300_vm0, %v16806_v10  ;;  %v17554_v9 = vld [vmem:[%s16630_s30 + $0x121] sm:$0xff]  ;;  %23216 = vst [vmem:[#allocation5_spill] sm:$0xff] %v17795_v30 }
  0xe7   : > { %14850 = vmatprep.subr.msk.mxu1 %vm300_vm0, %v16809_v11  ;;  %v17557_v10 = vld [vmem:[%s16630_s30 + $0x3a1] sm:$0xff]  ;;  %v17560_v11 = vld [vmem:[%s16630_s30 + $0x251] sm:$0xff] }
  0xe9   : > { %14817 = vmatpush3.xpose.msk.msra.mxu0 %vm300_vm0, %v16824_v12  ;;  %v17563_v12 = vld [vmem:[%s16630_s30 + $0x4d1] sm:$0xff] }
  0xea   : > { %14851 = vmatpush3.xpose.msk.msra.mxu1 %vm300_vm0, %v16827_v13  ;;  %14818 = vmatprep.subr.msk.mxu0 %vm300_vm0, %v16830_v14  ;;  %v17572_v13 = vld [vmem:[%s22842_s1 + $0x20] sm:$0xff]  ;;  %v17583_v14 = vld [vmem:[%s16630_s30 + $0x111] sm:$0xff] }
  0xeb   : > { %14852 = vmatprep.subr.msk.mxu1 %vm300_vm0, %v16833_v15  ;;  %v17586_v15 = vld [vmem:[%s16630_s30 + $0x391] sm:$0xff] }
  0xed   : > { %14819 = vmatpush3.xpose.msk.msra.mxu0 %vm300_vm0, %v16844_v16  ;;  %v17589_v16 = vld [vmem:[%s16630_s30 + $0x241] sm:$0xff] }
  0xee   : > { %14853 = vmatpush3.xpose.msk.msra.mxu1 %vm300_vm0, %v16847_v17  ;;  %14820 = vmatprep.subr.msk.mxu0 %vm300_vm0, %v16850_v18  ;;  %v17592_v17 = vld [vmem:[%s16630_s30 + $0x4c1] sm:$0xff] }
  0xef   : > { %14854 = vmatprep.subr.msk.mxu1 %vm300_vm0, %v16853_v19  ;;  %v17607_v18 = vld [vmem:[%s16630_s30 + $0x101] sm:$0xff] }
  0xf0   : > { %v17610_v19 = vld [vmem:[%s16630_s30 + $0x381] sm:$0xff] }
  0xf1   : > { %14821 = vmatpush3.xpose.msk.msra.mxu0 %vm300_vm0, %v16864_v20  ;;  %v17613_v20 = vld [vmem:[%s16630_s30 + $0x231] sm:$0xff] }
  0xf2   : > { %14855 = vmatpush3.xpose.msk.msra.mxu1 %vm300_vm0, %v16867_v21  ;;  %14822 = vmatprep.subr.msk.mxu0 %vm300_vm0, %v16870_v22  ;;  %v17616_v21 = vld [vmem:[%s16630_s30 + $0x4b1] sm:$0xff] }
  0xf3   : > { %14856 = vmatprep.subr.msk.mxu1 %vm300_vm0, %v16873_v23  ;;  %v17627_v22 = vld [vmem:[%s16630_s30 + $0xf1] sm:$0xff] }
  0xf4   : > { %v17630_v23 = vld [vmem:[%s16630_s30 + $0x371] sm:$0xff] }
  0xf5   : > { %14823 = vmatpush3.xpose.msk.msra.mxu0 %vm300_vm0, %v16884_v24  ;;  %v17633_v24 = vld [vmem:[%s16630_s30 + $0x221] sm:$0xff] }
  0xf6   : > { %14857 = vmatpush3.xpose.msk.msra.mxu1 %vm300_vm0, %v16887_v25  ;;  %14824 = vmatprep.subr.msk.mxu0 %vm300_vm0, %v16890_v26  ;;  %v17636_v25 = vld [vmem:[%s16630_s30 + $0x4a1] sm:$0xff] }
  0xf7   : > { %14858 = vmatprep.subr.msk.mxu1 %vm300_vm0, %v16893_v27  ;;  %v17647_v26 = vld [vmem:[%s16630_s30 + $0xe1] sm:$0xff] }
  0xf8   : > { %v17650_v27 = vld [vmem:[%s16630_s30 + $0x361] sm:$0xff] }
  0xf9   : > { %14825 = vmatpush3.xpose.msk.msra.mxu0 %vm300_vm0, %v16904_v28  ;;  %v17653_v28 = vld [vmem:[%s16630_s30 + $0x211] sm:$0xff] }
  0xfa   : > { %14859 = vmatpush3.xpose.msk.msra.mxu1 %vm300_vm0, %v16907_v29  ;;  %14826 = vmatprep.subr.msk.mxu0 %vm300_vm0, %v17464_v2  ;;  %v17656_v29 = vld [vmem:[%s16630_s30 + $0x491] sm:$0xff] }
  0xfb   : > { %14860 = vmatprep.subr.msk.mxu1 %vm300_vm0, %v17467_v3 }
  0xfd   : > { %14827 = vmatpush3.xpose.msk.msra.mxu0 %vm300_vm0, %v17478_v4 }
  0xfe   : > { %14861 = vmatpush3.xpose.msk.msra.mxu1 %vm300_vm0, %v17481_v5  ;;  %14828 = vmatprep.subr.msk.mxu0 %vm300_vm0, %v16920_v34  ;;  %v17667_v34 = vld [vmem:[%s16630_s30 + $0xd1] sm:$0xff] }
  0xff   : > { %14862 = vmatprep.subr.msk.mxu1 %vm300_vm0, %v16923_v35  ;;  %v17670_v35 = vld [vmem:[%s16630_s30 + $0x351] sm:$0xff] }
 0x101   : > { %14829 = vmatpush3.xpose.msk.msra.mxu0 %vm300_vm0, %v16932_v36  ;;  %v17673_v36 = vld [vmem:[%s16630_s30 + $0x201] sm:$0xff] }
 0x102   : > { %14863 = vmatpush3.xpose.msk.msra.mxu1 %vm300_vm0, %v16935_v37  ;;  %14830 = vmatprep.subr.msk.mxu0 %vm300_vm0, %v16938_v38  ;;  %v17676_v37 = vld [vmem:[%s16630_s30 + $0x481] sm:$0xff] }
 0x103   : > { %14864 = vmatprep.subr.msk.mxu1 %vm300_vm0, %v16941_v39  ;;  %v17687_v38 = vld [vmem:[%s16630_s30 + $0xc1] sm:$0xff] }
 0x104   : > { %v17690_v39 = vld [vmem:[%s16630_s30 + $0x341] sm:$0xff] }
 0x105   : > { %14831 = vmatpush3.xpose.msk.msra.mxu0 %vm300_vm0, %v16952_v40  ;;  %v11611_v40 = vld [vmem:[%s16630_s30 + $0x1f1] sm:$0xff] }
 0x106   : > { %14865 = vmatpush3.xpose.msk.msra.mxu1 %vm300_vm0, %v16955_v41  ;;  %14832 = vmatprep.subr.msk.mxu0 %vm300_vm0, %v16958_v42  ;;  %v11643_v41 = vld [vmem:[%s16630_s30 + $0x471] sm:$0xff] }
 0x107   : > { %14866 = vmatprep.subr.msk.mxu1 %vm300_vm0, %v16961_v43  ;;  %v11595_v42 = vld [vmem:[%s16630_s30 + $0xb1] sm:$0xff] }
 0x108   : > { %v11627_v43 = vld [vmem:[%s16630_s30 + $0x331] sm:$0xff] }
 0x109   : > { %14833 = vmatpush3.xpose.msk.msra.mxu0 %vm300_vm0, %v16972_v44  ;;  %v17703_v44 = vld [vmem:[%s16630_s30 + $0x1c1] sm:$0xff] }
 0x10a   : > { %14867 = vmatpush3.xpose.msk.msra.mxu1 %vm300_vm0, %v16975_v45  ;;  %14834 = vmatprep.subr.msk.mxu0 %vm300_vm0, %v16978_v46  ;;  %v17706_v45 = vld [vmem:[%s16630_s30 + $0x441] sm:$0xff] }
 0x10b   : > { %14868 = vmatprep.subr.msk.mxu1 %vm300_vm0, %v16981_v47  ;;  %v17715_v46 = vld [vmem:[%s16630_s30 + $0x81] sm:$0xff] }
 0x10c   : > { %v17718_v47 = vld [vmem:[%s16630_s30 + $0x301] sm:$0xff] }
 0x10d   : > { %14835 = vmatpush3.xpose.msk.msra.mxu0 %vm300_vm0, %v16992_v48  ;;  %v17721_v48 = vld [vmem:[%s16630_s30 + $0x1b1] sm:$0xff] }
 0x10e   : > { %14869 = vmatpush3.xpose.msk.msra.mxu1 %vm300_vm0, %v16995_v49  ;;  %14836 = vmatprep.subr.msk.mxu0 %vm300_vm0, %v16998_v50  ;;  %v17724_v49 = vld [vmem:[%s16630_s30 + $0x431] sm:$0xff] }
 0x10f   : > { %14870 = vmatprep.subr.msk.mxu1 %vm300_vm0, %v17001_v51  ;;  %v17735_v50 = vld [vmem:[%s16630_s30 + $0x71] sm:$0xff] }
 0x110   : > { %v17738_v51 = vld [vmem:[%s16630_s30 + $0x2f1] sm:$0xff] }
 0x111   : > { %14837 = vmatpush3.xpose.msk.msra.mxu0 %vm300_vm0, %v17012_v52  ;;  %v17741_v52 = vld [vmem:[%s16630_s30 + $0x1a1] sm:$0xff] }
 0x112   : > { %14871 = vmatpush3.xpose.msk.msra.mxu1 %vm300_vm0, %v17015_v53  ;;  %14838 = vmatprep.subr.msk.mxu0 %vm300_vm0, %v17018_v54  ;;  %v17744_v53 = vld [vmem:[%s16630_s30 + $0x421] sm:$0xff] }
 0x113   : > { %14872 = vmatprep.subr.msk.mxu1 %vm300_vm0, %v17021_v55  ;;  %v17755_v54 = vld [vmem:[%s16630_s30 + $0x61] sm:$0xff] }
 0x114   : > { %v17758_v55 = vld [vmem:[%s16630_s30 + $0x2e1] sm:$0xff] }
 0x115   : > { %14839 = vmatpush3.xpose.msk.msra.mxu0 %vm300_vm0, %v17032_v56  ;;  %v17761_v56 = vld [vmem:[%s16630_s30 + $0x191] sm:$0xff] }
 0x116   : > { %14873 = vmatpush3.xpose.msk.msra.mxu1 %vm300_vm0, %v17035_v57  ;;  %14840 = vmatprep.subr.msk.mxu0 %vm300_vm0, %v17038_v58  ;;  %v17764_v57 = vld [vmem:[%s16630_s30 + $0x411] sm:$0xff] }
 0x117   : > { %14874 = vmatprep.subr.msk.mxu1 %vm300_vm0, %v17041_v59  ;;  %v17775_v58 = vld [vmem:[%s16630_s30 + $0x51] sm:$0xff] }
 0x118   : > { %v17778_v59 = vld [vmem:[%s16630_s30 + $0x2d1] sm:$0xff] }
 0x119   : > { %14841 = vmatpush3.xpose.msk.msra.mxu0 %vm300_vm0, %v17052_v60  ;;  %v17781_v60 = vld [vmem:[%s16630_s30 + $0x181] sm:$0xff] }
 0x11a   : > { %14875 = vmatpush3.xpose.msk.msra.mxu1 %vm300_vm0, %v23215_v0  ;;  %14878 = vmatprep.subr.msk.mxu0 %vm300_vm0, %v17540_v6  ;;  %v17804_v0 = vld [vmem:[%s16630_s30 + $0x3f1] sm:$0xff] }
 0x11b   : > { %14912 = vmatprep.subr.msk.mxu1 %vm300_vm0, %v17543_v7  ;;  %23219 = vst [vmem:[#allocation63_spill] sm:$0xff] %v17804_v0 }
 0x11c   : > { %14843 = vmatmul.mubr.msk.f32.vlgmr.msra.gmra.mxu0 %vm300_vm0, %v17401_v8 }
 0x11d   : > { %14877 = vmatmul.mubr.msk.f32.vlgmr.msra.gmra.mxu1 %vm300_vm0, %v17401_v8  ;;  %14879 = vmatpush3.xpose.msk.msra.mxu0 %vm300_vm0, %v17554_v9  ;;  %v17801_v8 = vld [vmem:[%s16630_s30 + $0x171] sm:$0xff] }
 0x11e   : > { %14913 = vmatpush3.xpose.msk.msra.mxu1 %vm300_vm0, %v17557_v10  ;;  %14880 = vmatprep.subr.msk.mxu0 %vm300_vm0, %v17560_v11  ;;  %23218 = vst [vmem:[#allocation62_spill] sm:$0xff] %v17801_v8 }
 0x11f   : > { %14914 = vmatprep.subr.msk.mxu1 %vm300_vm0, %v17563_v12  ;;  %14910 = vmatprep.mubr.msk.f32.mxu0 %vm300_vm0, %v17572_v13 }
 0x120   : > { %14944 = vmatprep.mubr.msk.f32.mxu1 %vm300_vm0, %v17572_v13 }
 0x121   : > { %14881 = vmatpush3.xpose.msk.msra.mxu0 %vm300_vm0, %v17583_v14 }
 0x122   : > { %14915 = vmatpush3.xpose.msk.msra.mxu1 %vm300_vm0, %v17586_v15  ;;  %14882 = vmatprep.subr.msk.mxu0 %vm300_vm0, %v17589_v16 }
 0x123   : > { %14916 = vmatprep.subr.msk.mxu1 %vm300_vm0, %v17592_v17 }
 0x125   : > { %14883 = vmatpush3.xpose.msk.msra.mxu0 %vm300_vm0, %v17607_v18 }
 0x126   : > { %14917 = vmatpush3.xpose.msk.msra.mxu1 %vm300_vm0, %v17610_v19  ;;  %14884 = vmatprep.subr.msk.mxu0 %vm300_vm0, %v17613_v20 }
 0x127   : > { %14918 = vmatprep.subr.msk.mxu1 %vm300_vm0, %v17616_v21 }
 0x129   : > { %14885 = vmatpush3.xpose.msk.msra.mxu0 %vm300_vm0, %v17627_v22 }
 0x12a   : > { %14919 = vmatpush3.xpose.msk.msra.mxu1 %vm300_vm0, %v17630_v23  ;;  %14886 = vmatprep.subr.msk.mxu0 %vm300_vm0, %v17633_v24 }
 0x12b   : > { %14920 = vmatprep.subr.msk.mxu1 %vm300_vm0, %v17636_v25 }
 0x12d   : > { %14887 = vmatpush3.xpose.msk.msra.mxu0 %vm300_vm0, %v17647_v26 }
 0x12e   : > { %14921 = vmatpush3.xpose.msk.msra.mxu1 %vm300_vm0, %v17650_v27  ;;  %14888 = vmatprep.subr.msk.mxu0 %vm300_vm0, %v17653_v28 }
 0x12f   : > { %14922 = vmatprep.subr.msk.mxu1 %vm300_vm0, %v17656_v29 }
 0x131   : > { %14889 = vmatpush3.xpose.msk.msra.mxu0 %vm300_vm0, %v17667_v34 }
 0x132   : > { %14923 = vmatpush3.xpose.msk.msra.mxu1 %vm300_vm0, %v17670_v35  ;;  %14890 = vmatprep.subr.msk.mxu0 %vm300_vm0, %v17673_v36 }
 0x133   : > { %14924 = vmatprep.subr.msk.mxu1 %vm300_vm0, %v17676_v37 }
 0x135   : > { %14891 = vmatpush3.xpose.msk.msra.mxu0 %vm300_vm0, %v17687_v38 }
 0x136   : > { %14925 = vmatpush3.xpose.msk.msra.mxu1 %vm300_vm0, %v17690_v39  ;;  %14892 = vmatprep.subr.msk.mxu0 %vm300_vm0, %v11611_v40  ;;  %v17815_v40 = vld [vmem:[%s16630_s30 + $0x31] sm:$0xff] }
 0x137   : > { %14926 = vmatprep.subr.msk.mxu1 %vm300_vm0, %v11643_v41  ;;  %23220 = vst [vmem:[#allocation64_spill] sm:$0xff] %v17815_v40  ;;  %v17818_v41 = vld [vmem:[%s16630_s30 + $0x2b1] sm:$0xff] }
 0x138   : > { %23221 = vst [vmem:[#allocation65_spill] sm:$0xff] %v17818_v41 }
 0x139   : > { %14893 = vmatpush3.xpose.msk.msra.mxu0 %vm300_vm0, %v11595_v42  ;;  %v17821_v42 = vld [vmem:[%s16630_s30 + $0x161] sm:$0xff] }
 0x13a   : > { %14927 = vmatpush3.xpose.msk.msra.mxu1 %vm300_vm0, %v11627_v43  ;;  %14894 = vmatprep.subr.msk.mxu0 %vm300_vm0, %v17703_v44  ;;  %23222 = vst [vmem:[#allocation66_spill] sm:$0xff] %v17821_v42  ;;  %v17824_v43 = vld [vmem:[%s16630_s30 + $0x3e1] sm:$0xff] }
 0x13b   : > { %14928 = vmatprep.subr.msk.mxu1 %vm300_vm0, %v17706_v45  ;;  %23223 = vst [vmem:[#allocation67_spill] sm:$0xff] %v17824_v43 }
 0x13d   : > { %14895 = vmatpush3.xpose.msk.msra.mxu0 %vm300_vm0, %v17715_v46 }
 0x13e   : > { %14929 = vmatpush3.xpose.msk.msra.mxu1 %vm300_vm0, %v17718_v47  ;;  %14896 = vmatprep.subr.msk.mxu0 %vm300_vm0, %v17721_v48 }
 0x13f   : > { %14930 = vmatprep.subr.msk.mxu1 %vm300_vm0, %v17724_v49 }
 0x141   : > { %14897 = vmatpush3.xpose.msk.msra.mxu0 %vm300_vm0, %v17735_v50 }
 0x142   : > { %14931 = vmatpush3.xpose.msk.msra.mxu1 %vm300_vm0, %v17738_v51  ;;  %14898 = vmatprep.subr.msk.mxu0 %vm300_vm0, %v17741_v52 }
 0x143   : > { %14932 = vmatprep.subr.msk.mxu1 %vm300_vm0, %v17744_v53 }
 0x145   : > { %14899 = vmatpush3.xpose.msk.msra.mxu0 %vm300_vm0, %v17755_v54 }
 0x146   : > { %14933 = vmatpush3.xpose.msk.msra.mxu1 %vm300_vm0, %v17758_v55  ;;  %14900 = vmatprep.subr.msk.mxu0 %vm300_vm0, %v17761_v56 }
 0x147   : > { %14934 = vmatprep.subr.msk.mxu1 %vm300_vm0, %v17764_v57 }
 0x149   : > { %14901 = vmatpush3.xpose.msk.msra.mxu0 %vm300_vm0, %v17775_v58 }
 0x14a   : > { %14935 = vmatpush3.xpose.msk.msra.mxu1 %vm300_vm0, %v17778_v59  ;;  %14902 = vmatprep.subr.msk.mxu0 %vm300_vm0, %v17781_v60 }
 0x14b   : > { %14936 = vmatprep.subr.msk.mxu1 %vm300_vm0, %v17784_v1 }
 0x14d   : > { %14903 = vmatpush3.xpose.msk.msra.mxu0 %vm300_vm0, %v17795_v30  ;;  %v11635_v30 = vld [vmem:[%s16630_s30 + $0x3d1] sm:$0xff] }
 0x14e   : > { %14937 = vmatpush3.xpose.msk.msra.mxu1 %vm300_vm0, %v17798_v33  ;;  %14904 = vmatprep.subr.msk.mxu0 %vm300_vm0, %v17801_v8  ;;  %v17838_v8 = vld [vmem:[%s16630_s30 + $0x2a1] sm:$0xff]  ;;  %v11603_v33 = vld [vmem:[%s16630_s30 + $0x151] sm:$0xff] }
 0x14f   : > { %14938 = vmatprep.subr.msk.mxu1 %vm300_vm0, %v17804_v0  ;;  %v17835_v0 = vld [vmem:[%s16630_s30 + $0x21] sm:$0xff]  ;;  %23225 = vst [vmem:[#allocation69_spill] sm:$0xff] %v17838_v8 }
 0x150   : > { %23224 = vst [vmem:[#allocation68_spill] sm:$0xff] %v17835_v0 }
 0x151   : > { %14905 = vmatpush3.xpose.msk.msra.mxu0 %vm300_vm0, %v17815_v40  ;;  %v17854_v40 = vld [vmem:[%s16630_s30 + $0x4e2] sm:$0xff] }
 0x152   : > { %14939 = vmatpush3.xpose.msk.msra.mxu1 %vm300_vm0, %v17818_v41  ;;  %14906 = vmatprep.subr.msk.mxu0 %vm300_vm0, %v17821_v42  ;;  %v11587_v42 = vld [vmem:[%s16630_s30 + $0x11] sm:$0xff]  ;;  %v17851_v41 = vld [vmem:[%s16630_s30 + $0x262] sm:$0xff]  ;;  %23227 = vst [vmem:[#allocation71_spill] sm:$0xff] %v17854_v40 }
 0x153   : > { %14940 = vmatprep.subr.msk.mxu1 %vm300_vm0, %v17824_v43  ;;  %v11619_v43 = vld [vmem:[%s16630_s30 + $0x291] sm:$0xff]  ;;  %23226 = vst [vmem:[#allocation70_spill] sm:$0xff] %v17851_v41 }
 0x155   : > { %14907 = vmatpush3.xpose.msk.msra.mxu0 %vm300_vm0, %v17835_v0  ;;  %v23239_v0 = vld [vmem:[#allocation15_spill] sm:$0xff] }
 0x156   : > { %14941 = vmatpush3.xpose.msk.msra.mxu1 %vm300_vm0, %v17838_v8  ;;  %14908 = vmatprep.subr.msk.mxu0 %vm300_vm0, %v11603_v33  ;;  %v17863_v8 = vld [vmem:[%s16630_s30 + $0x122] sm:$0xff] }
 0x157   : > { %14942 = vmatprep.subr.msk.mxu1 %vm300_vm0, %v11635_v30  ;;  %23228 = vst [vmem:[#allocation72_spill] sm:$0xff] %v17863_v8  ;;  %v17866_v33 = vld [vmem:[%s16630_s30 + $0x3a2] sm:$0xff] }
 0x158   : > { %23229 = vst [vmem:[#allocation73_spill] sm:$0xff] %v17866_v33  ;;  %v17875_v30 = vld [vmem:[%s22842_s1 + $0x28] sm:$0xff] }
 0x159   : > { %14909 = vmatpush3.xpose.msk.msra.mxu0 %vm300_vm0, %v11587_v42  ;;  %v23230_v42 = vld [vmem:[#allocation6_spill] sm:$0xff] }
 0x15a   : > { %14943 = vmatpush3.xpose.msk.msra.mxu1 %vm300_vm0, %v11619_v43  ;;  %14946 = vmatprep.subr.msk.mxu0 %vm300_vm0, %v17851_v41  ;;  %v23231_v43 = vld [vmem:[#allocation7_spill] sm:$0xff]  ;;  %v23238_v41 = vld [vmem:[#allocation14_spill] sm:$0xff] }
 0x15b   : > { %14980 = vmatprep.subr.msk.mxu1 %vm300_vm0, %v17854_v40  ;;  %v23233_v40 = vld [vmem:[#allocation9_spill] sm:$0xff] }
 0x15c   : > { %14911 = vmatmul.mubr.msk.f32.vlgmr.msra.gmra.mxu0 %vm300_vm0, %v17572_v13 }
 0x15d   : > { %14945 = vmatmul.mubr.msk.f32.vlgmr.msra.gmra.mxu1 %vm300_vm0, %v17572_v13  ;;  %14947 = vmatpush3.xpose.msk.msra.mxu0 %vm300_vm0, %v17863_v8  ;;  %v23232_v13 = vld [vmem:[#allocation8_spill] sm:$0xff]  ;;  %v23234_v8 = vld [vmem:[#allocation10_spill] sm:$0xff] }
 0x15e   : > { %14981 = vmatpush3.xpose.msk.msra.mxu1 %vm300_vm0, %v17866_v33  ;;  %14948 = vmatprep.subr.msk.mxu0 %vm300_vm0, %v23230_v42  ;;  %v23235_v33 = vld [vmem:[#allocation11_spill] sm:$0xff]  ;;  %v23236_v42 = vld [vmem:[#allocation12_spill] sm:$0xff] }
 0x15f   : > { %14982 = vmatprep.subr.msk.mxu1 %vm300_vm0, %v23231_v43  ;;  %14978 = vmatprep.mubr.msk.f32.mxu0 %vm300_vm0, %v17875_v30  ;;  %v23237_v43 = vld [vmem:[#allocation13_spill] sm:$0xff] }
 0x160   : > { %15012 = vmatprep.mubr.msk.f32.mxu1 %vm300_vm0, %v17875_v30 }
 0x161   : > { %14949 = vmatpush3.xpose.msk.msra.mxu0 %vm300_vm0, %v23232_v13  ;;  %v23240_v13 = vld [vmem:[#allocation16_spill] sm:$0xff] }
 0x162   : > { %14983 = vmatpush3.xpose.msk.msra.mxu1 %vm300_vm0, %v23233_v40  ;;  %14950 = vmatprep.subr.msk.mxu0 %vm300_vm0, %v23234_v8  ;;  %v23241_v40 = vld [vmem:[#allocation17_spill] sm:$0xff]  ;;  %v23242_v8 = vld [vmem:[#allocation18_spill] sm:$0xff] }
 0x163   : > { %14984 = vmatprep.subr.msk.mxu1 %vm300_vm0, %v23235_v33  ;;  %v23243_v33 = vld [vmem:[#allocation19_spill] sm:$0xff] }
 0x165   : > { %14951 = vmatpush3.xpose.msk.msra.mxu0 %vm300_vm0, %v23236_v42  ;;  %v23244_v42 = vld [vmem:[#allocation20_spill] sm:$0xff] }
 0x166   : > { %14985 = vmatpush3.xpose.msk.msra.mxu1 %vm300_vm0, %v23237_v43  ;;  %14952 = vmatprep.subr.msk.mxu0 %vm300_vm0, %v23238_v41  ;;  %v23245_v41 = vld [vmem:[#allocation21_spill] sm:$0xff]  ;;  %v23247_v43 = vld [vmem:[#allocation23_spill] sm:$0xff] }
 0x167   : > { %14986 = vmatprep.subr.msk.mxu1 %vm300_vm0, %v23239_v0  ;;  %v23246_v0 = vld [vmem:[#allocation22_spill] sm:$0xff] }
 0x169   : > { %14953 = vmatpush3.xpose.msk.msra.mxu0 %vm300_vm0, %v23240_v13  ;;  %v23248_v13 = vld [vmem:[#allocation24_spill] sm:$0xff] }
 0x16a   : > { %14987 = vmatpush3.xpose.msk.msra.mxu1 %vm300_vm0, %v23241_v40  ;;  %14954 = vmatprep.subr.msk.mxu0 %vm300_vm0, %v23242_v8  ;;  %v23249_v40 = vld [vmem:[#allocation25_spill] sm:$0xff]  ;;  %v23250_v8 = vld [vmem:[#allocation26_spill] sm:$0xff] }
 0x16b   : > { %14988 = vmatprep.subr.msk.mxu1 %vm300_vm0, %v23243_v33  ;;  %v23251_v33 = vld [vmem:[#allocation27_spill] sm:$0xff] }
 0x16d   : > { %14955 = vmatpush3.xpose.msk.msra.mxu0 %vm300_vm0, %v23244_v42  ;;  %v23252_v42 = vld [vmem:[#allocation28_spill] sm:$0xff] }
 0x16e   : > { %14989 = vmatpush3.xpose.msk.msra.mxu1 %vm300_vm0, %v23245_v41  ;;  %14956 = vmatprep.subr.msk.mxu0 %vm300_vm0, %v23246_v0  ;;  %v23253_v41 = vld [vmem:[#allocation29_spill] sm:$0xff]  ;;  %v23254_v0 = vld [vmem:[#allocation30_spill] sm:$0xff] }
 0x16f   : > { %14990 = vmatprep.subr.msk.mxu1 %vm300_vm0, %v23247_v43  ;;  %v23255_v43 = vld [vmem:[#allocation31_spill] sm:$0xff] }
 0x171   : > { %14957 = vmatpush3.xpose.msk.msra.mxu0 %vm300_vm0, %v23248_v13  ;;  %v17938_v13 = vld [vmem:[%s16630_s30 + $0x1c2] sm:$0xff] }
 0x172   : > { %14991 = vmatpush3.xpose.msk.msra.mxu1 %vm300_vm0, %v23249_v40  ;;  %14958 = vmatprep.subr.msk.mxu0 %vm300_vm0, %v23250_v8  ;;  %23256 = vst [vmem:[#allocation6_spill] sm:$0xff] %v17938_v13  ;;  %v17941_v40 = vld [vmem:[%s16630_s30 + $0x442] sm:$0xff]  ;;  %v23258_v8 = vld [vmem:[#allocation32_spill] sm:$0xff] }
 0x173   : > { %14992 = vmatprep.subr.msk.mxu1 %vm300_vm0, %v23251_v33  ;;  %23257 = vst [vmem:[#allocation7_spill] sm:$0xff] %v17941_v40  ;;  %v23259_v33 = vld [vmem:[#allocation33_spill] sm:$0xff] }
 0x175   : > { %14959 = vmatpush3.xpose.msk.msra.mxu0 %vm300_vm0, %v23252_v42  ;;  %v17952_v42 = vld [vmem:[%s16630_s30 + $0x82] sm:$0xff] }
 0x176   : > { %14993 = vmatpush3.xpose.msk.msra.mxu1 %vm300_vm0, %v23253_v41  ;;  %14960 = vmatprep.subr.msk.mxu0 %vm300_vm0, %v23254_v0  ;;  %23260 = vst [vmem:[#allocation8_spill] sm:$0xff] %v17952_v42  ;;  %v17955_v41 = vld [vmem:[%s16630_s30 + $0x302] sm:$0xff] }
 0x177   : > { %14994 = vmatprep.subr.msk.mxu1 %vm300_vm0, %v23255_v43  ;;  %23261 = vst [vmem:[#allocation9_spill] sm:$0xff] %v17955_v41  ;;  %v23262_v0 = vld [vmem:[#allocation34_spill] sm:$0xff]  ;;  %v23263_v43 = vld [vmem:[#allocation35_spill] sm:$0xff] }
 0x179   : > { %14961 = vmatpush3.xpose.msk.msra.mxu0 %vm300_vm0, %v23258_v8  ;;  %v23264_v8 = vld [vmem:[#allocation36_spill] sm:$0xff] }
 0x17a   : > { %14995 = vmatpush3.xpose.msk.msra.mxu1 %vm300_vm0, %v23259_v33  ;;  %14962 = vmatprep.subr.msk.mxu0 %vm300_vm0, %v17938_v13  ;;  %v23265_v33 = vld [vmem:[#allocation37_spill] sm:$0xff]  ;;  %v23267_v13 = vld [vmem:[#allocation39_spill] sm:$0xff] }
 0x17b   : > { %14996 = vmatprep.subr.msk.mxu1 %vm300_vm0, %v17941_v40  ;;  %v23266_v40 = vld [vmem:[#allocation38_spill] sm:$0xff] }
 0x17d   : > { %14963 = vmatpush3.xpose.msk.msra.mxu0 %vm300_vm0, %v17952_v42  ;;  %v23268_v42 = vld [vmem:[#allocation40_spill] sm:$0xff] }
 0x17e   : > { %14997 = vmatpush3.xpose.msk.msra.mxu1 %vm300_vm0, %v17955_v41  ;;  %14964 = vmatprep.subr.msk.mxu0 %vm300_vm0, %v23262_v0  ;;  %v23269_v41 = vld [vmem:[#allocation41_spill] sm:$0xff]  ;;  %v23270_v0 = vld [vmem:[#allocation42_spill] sm:$0xff] }
 0x17f   : > { %14998 = vmatprep.subr.msk.mxu1 %vm300_vm0, %v23263_v43  ;;  %v23271_v43 = vld [vmem:[#allocation43_spill] sm:$0xff] }
 0x181   : > { %14965 = vmatpush3.xpose.msk.msra.mxu0 %vm300_vm0, %v23264_v8  ;;  %v23272_v8 = vld [vmem:[#allocation44_spill] sm:$0xff] }
 0x182   : > { %14999 = vmatpush3.xpose.msk.msra.mxu1 %vm300_vm0, %v23265_v33  ;;  %14966 = vmatprep.subr.msk.mxu0 %vm300_vm0, %v23266_v40  ;;  %v23273_v33 = vld [vmem:[#allocation45_spill] sm:$0xff]  ;;  %v23275_v40 = vld [vmem:[#allocation47_spill] sm:$0xff] }
 0x183   : > { %15000 = vmatprep.subr.msk.mxu1 %vm300_vm0, %v23267_v13  ;;  %v23274_v13 = vld [vmem:[#allocation46_spill] sm:$0xff] }
 0x185   : > { %14967 = vmatpush3.xpose.msk.msra.mxu0 %vm300_vm0, %v23268_v42  ;;  %v23276_v42 = vld [vmem:[#allocation48_spill] sm:$0xff] }
 0x186   : > { %15001 = vmatpush3.xpose.msk.msra.mxu1 %vm300_vm0, %v23269_v41  ;;  %14968 = vmatprep.subr.msk.mxu0 %vm300_vm0, %v23270_v0  ;;  %v23277_v41 = vld [vmem:[#allocation49_spill] sm:$0xff]  ;;  %v23278_v0 = vld [vmem:[#allocation50_spill] sm:$0xff] }
 0x187   : > { %15002 = vmatprep.subr.msk.mxu1 %vm300_vm0, %v23271_v43  ;;  %v23279_v43 = vld [vmem:[#allocation51_spill] sm:$0xff] }
 0x189   : > { %14969 = vmatpush3.xpose.msk.msra.mxu0 %vm300_vm0, %v23272_v8  ;;  %v23280_v8 = vld [vmem:[#allocation52_spill] sm:$0xff] }
 0x18a   : > { %15003 = vmatpush3.xpose.msk.msra.mxu1 %vm300_vm0, %v23273_v33  ;;  %14970 = vmatprep.subr.msk.mxu0 %vm300_vm0, %v23274_v13  ;;  %v23281_v33 = vld [vmem:[#allocation53_spill] sm:$0xff]  ;;  %v23282_v13 = vld [vmem:[#allocation54_spill] sm:$0xff] }
 0x18b   : > { %15004 = vmatprep.subr.msk.mxu1 %vm300_vm0, %v23275_v40  ;;  %v23283_v40 = vld [vmem:[#allocation55_spill] sm:$0xff] }
 0x18d   : > { %14971 = vmatpush3.xpose.msk.msra.mxu0 %vm300_vm0, %v23276_v42  ;;  %v23284_v42 = vld [vmem:[#allocation56_spill] sm:$0xff] }
 0x18e   : > { %15005 = vmatpush3.xpose.msk.msra.mxu1 %vm300_vm0, %v23277_v41  ;;  %14972 = vmatprep.subr.msk.mxu0 %vm300_vm0, %v23278_v0  ;;  %v23285_v41 = vld [vmem:[#allocation57_spill] sm:$0xff]  ;;  %v23286_v0 = vld [vmem:[#allocation58_spill] sm:$0xff] }
 0x18f   : > { %15006 = vmatprep.subr.msk.mxu1 %vm300_vm0, %v23279_v43  ;;  %v23287_v43 = vld [vmem:[#allocation59_spill] sm:$0xff] }
 0x191   : > { %14973 = vmatpush3.xpose.msk.msra.mxu0 %vm300_vm0, %v23280_v8  ;;  %v11880_v8 = vld [vmem:[%s16630_s30 + $0x270] sm:$0xff] }
 0x192   : > { %15007 = vmatpush3.xpose.msk.msra.mxu1 %vm300_vm0, %v23281_v33  ;;  %14974 = vmatprep.subr.msk.mxu0 %vm300_vm0, %v23282_v13  ;;  %v11912_v33 = vld [vmem:[%s16630_s30 + $0x4f0] sm:$0xff]  ;;  %v23288_v13 = vld [vmem:[#allocation60_spill] sm:$0xff] }
 0x193   : > { %15008 = vmatprep.subr.msk.mxu1 %vm300_vm0, %v23283_v40  ;;  %v11864_v40 = vld [vmem:[%s16630_s30 + $0x130] sm:$0xff] }
 0x195   : > { %14975 = vmatpush3.xpose.msk.msra.mxu0 %vm300_vm0, %v23284_v42  ;;  %v11896_v42 = vld [vmem:[%s16630_s30 + $0x3b0] sm:$0xff] }
 0x196   : > { %15009 = vmatpush3.xpose.msk.msra.mxu1 %vm300_vm0, %v23285_v41  ;;  %14976 = vmatprep.subr.msk.mxu0 %vm300_vm0, %v23286_v0  ;;  %v18039_v41 = vld [vmem:[%s16630_s30 + $0x250] sm:$0xff]  ;;  %v18063_v0 = vld [vmem:[%s16630_s30 + $0x240] sm:$0xff] }
 0x197   : > { %15010 = vmatprep.subr.msk.mxu1 %vm300_vm0, %v23287_v43  ;;  %23289 = vst [vmem:[#allocation10_spill] sm:$0xff] %v18039_v41  ;;  %23293 = vst [vmem:[#allocation14_spill] sm:$0xff] %v18063_v0  ;;  %v18066_v43 = vld [vmem:[%s16630_s30 + $0x4c0] sm:$0xff] }
 0x198   : > { %23294 = vst [vmem:[#allocation15_spill] sm:$0xff] %v18066_v43 }
 0x199   : > { %14977 = vmatpush3.xpose.msk.msra.mxu0 %vm300_vm0, %v17361_v61  ;;  %v18030_v61 = vld [vmem:[%s22842_s1 + $0x30] sm:$0xff] }
 0x19a   : > { %15011 = vmatpush3.xpose.msk.msra.mxu1 %vm300_vm0, %v23288_v13  ;;  %15014 = vmatprep.subr.msk.mxu0 %vm300_vm0, %v11880_v8  ;;  %v18083_v8 = vld [vmem:[%s16630_s30 + $0x230] sm:$0xff] }
 0x19b   : > { %15048 = vmatprep.subr.msk.mxu1 %vm300_vm0, %v11912_v33  ;;  %23297 = vst [vmem:[#allocation18_spill] sm:$0xff] %v18083_v8  ;;  %v18086_v33 = vld [vmem:[%s16630_s30 + $0x4b0] sm:$0xff] }
 0x19c   : > { %14979 = vmatmul.mubr.msk.f32.vlgmr.msra.gmra.mxu0 %vm300_vm0, %v17875_v30  ;;  %23298 = vst [vmem:[#allocation19_spill] sm:$0xff] %v18086_v33  ;;  %v18097_v13 = vld [vmem:[%s16630_s30 + $0xf0] sm:$0xff] }
 0x19d   : > { %15013 = vmatmul.mubr.msk.f32.vlgmr.msra.gmra.mxu1 %vm300_vm0, %v17875_v30  ;;  %15015 = vmatpush3.xpose.msk.msra.mxu0 %vm300_vm0, %v11864_v40  ;;  %v18042_v30 = vld [vmem:[%s16630_s30 + $0x4d0] sm:$0xff]  ;;  %23299 = vst [vmem:[#allocation20_spill] sm:$0xff] %v18097_v13 }
 0x19e   : > { %15049 = vmatpush3.xpose.msk.msra.mxu1 %vm300_vm0, %v11896_v42  ;;  %15016 = vmatprep.subr.msk.mxu0 %vm300_vm0, %v17377_v32  ;;  %23290 = vst [vmem:[#allocation11_spill] sm:$0xff] %v18042_v30  ;;  %v18060_v32 = vld [vmem:[%s16630_s30 + $0x390] sm:$0xff]  ;;  %v18103_v42 = vld [vmem:[%s16630_s30 + $0x220] sm:$0xff] }
 0x19f   : > { %15050 = vmatprep.subr.msk.mxu1 %vm300_vm0, %v17380_v31  ;;  %15046 = vmatprep.mubr.msk.f32.mxu0 %vm300_vm0, %v18030_v61  ;;  %v18057_v31 = vld [vmem:[%s16630_s30 + $0x110] sm:$0xff]  ;;  %23292 = vst [vmem:[#allocation13_spill] sm:$0xff] %v18060_v32  ;;  %23301 = vst [vmem:[#allocation22_spill] sm:$0xff] %v18103_v42 }
 0x1a0   : > { %15080 = vmatprep.mubr.msk.f32.mxu1 %vm300_vm0, %v18030_v61  ;;  %23291 = vst [vmem:[#allocation12_spill] sm:$0xff] %v18057_v31  ;;  %v18100_v40 = vld [vmem:[%s16630_s30 + $0x370] sm:$0xff] }
 0x1a1   : > { %15017 = vmatpush3.xpose.msk.msra.mxu0 %vm300_vm0, %v17389_v63  ;;  %v18077_v63 = vld [vmem:[%s16630_s30 + $0x100] sm:$0xff]  ;;  %23300 = vst [vmem:[#allocation21_spill] sm:$0xff] %v18100_v40 }
 0x1a2   : > { %15051 = vmatpush3.xpose.msk.msra.mxu1 %vm300_vm0, %v17392_v62  ;;  %15018 = vmatprep.subr.msk.mxu0 %vm300_vm0, %v18039_v41  ;;  %23295 = vst [vmem:[#allocation16_spill] sm:$0xff] %v18077_v63  ;;  %v18080_v62 = vld [vmem:[%s16630_s30 + $0x380] sm:$0xff]  ;;  %v18262_v41 = vld [vmem:[%s16630_s30 + $0x2b0] sm:$0xff] }
 0x1a3   : > { %15052 = vmatprep.subr.msk.mxu1 %vm300_vm0, %v18042_v30  ;;  %23296 = vst [vmem:[#allocation17_spill] sm:$0xff] %v18080_v62  ;;  %v18251_v30 = vld [vmem:[%s16630_s30 + $0x3f0] sm:$0xff]  ;;  %23318 = vst [vmem:[#allocation39_spill] sm:$0xff] %v18262_v41 }
 0x1a4   : > { %23317 = vst [vmem:[#allocation38_spill] sm:$0xff] %v18251_v30 }
 0x1a5   : > { %15019 = vmatpush3.xpose.msk.msra.mxu0 %vm300_vm0, %v18057_v31  ;;  %v18248_v31 = vld [vmem:[%s16630_s30 + $0x170] sm:$0xff] }
 0x1a6   : > { %15053 = vmatpush3.xpose.msk.msra.mxu1 %vm300_vm0, %v18060_v32  ;;  %15020 = vmatprep.subr.msk.mxu0 %vm300_vm0, %v18063_v0  ;;  %v18234_v0 = vld [vmem:[%s16630_s30 + $0x400] sm:$0xff]  ;;  %23316 = vst [vmem:[#allocation37_spill] sm:$0xff] %v18248_v31 }
 0x1a7   : > { %15054 = vmatprep.subr.msk.mxu1 %vm300_vm0, %v18066_v43  ;;  %v18106_v43 = vld [vmem:[%s16630_s30 + $0x4a0] sm:$0xff]  ;;  %23314 = vst [vmem:[#allocation35_spill] sm:$0xff] %v18234_v0 }
 0x1a8   : > { %23302 = vst [vmem:[#allocation23_spill] sm:$0xff] %v18106_v43  ;;  %v18245_v32 = vld [vmem:[%s16630_s30 + $0x2c0] sm:$0xff] }
 0x1a9   : > { %15021 = vmatpush3.xpose.msk.msra.mxu0 %vm300_vm0, %v18077_v63  ;;  %v18126_v63 = vld [vmem:[%s16630_s30 + $0x490] sm:$0xff]  ;;  %23315 = vst [vmem:[#allocation36_spill] sm:$0xff] %v18245_v32 }
 0x1aa   : > { %15055 = vmatpush3.xpose.msk.msra.mxu1 %vm300_vm0, %v18080_v62  ;;  %15022 = vmatprep.subr.msk.mxu0 %vm300_vm0, %v18083_v8  ;;  %v18120_v8 = vld [vmem:[%s16630_s30 + $0x360] sm:$0xff]  ;;  %v18123_v62 = vld [vmem:[%s16630_s30 + $0x210] sm:$0xff]  ;;  %23306 = vst [vmem:[#allocation27_spill] sm:$0xff] %v18126_v63 }
 0x1ab   : > { %15056 = vmatprep.subr.msk.mxu1 %vm300_vm0, %v18086_v33  ;;  %v18117_v33 = vld [vmem:[%s16630_s30 + $0xe0] sm:$0xff]  ;;  %23304 = vst [vmem:[#allocation25_spill] sm:$0xff] %v18120_v8  ;;  %23305 = vst [vmem:[#allocation26_spill] sm:$0xff] %v18123_v62 }
 0x1ac   : > { %23303 = vst [vmem:[#allocation24_spill] sm:$0xff] %v18117_v33 }
 0x1ad   : > { %15023 = vmatpush3.xpose.msk.msra.mxu0 %vm300_vm0, %v18097_v13  ;;  %v18146_v13 = vld [vmem:[%s16630_s30 + $0x480] sm:$0xff] }
 0x1ae   : > { %15057 = vmatpush3.xpose.msk.msra.mxu1 %vm300_vm0, %v18100_v40  ;;  %15024 = vmatprep.subr.msk.mxu0 %vm300_vm0, %v18103_v42  ;;  %v18140_v42 = vld [vmem:[%s16630_s30 + $0x350] sm:$0xff]  ;;  %v18143_v40 = vld [vmem:[%s16630_s30 + $0x200] sm:$0xff]  ;;  %23310 = vst [vmem:[#allocation31_spill] sm:$0xff] %v18146_v13 }
 0x1af   : > { %15058 = vmatprep.subr.msk.mxu1 %vm300_vm0, %v18106_v43  ;;  %v18137_v43 = vld [vmem:[%s16630_s30 + $0xd0] sm:$0xff]  ;;  %23308 = vst [vmem:[#allocation29_spill] sm:$0xff] %v18140_v42  ;;  %23309 = vst [vmem:[#allocation30_spill] sm:$0xff] %v18143_v40 }
 0x1b0   : > { %23307 = vst [vmem:[#allocation28_spill] sm:$0xff] %v18137_v43 }
 0x1b1   : > { %15025 = vmatpush3.xpose.msk.msra.mxu0 %vm300_vm0, %v18117_v33  ;;  %v11904_v33 = vld [vmem:[%s16630_s30 + $0x450] sm:$0xff] }
 0x1b2   : > { %15059 = vmatpush3.xpose.msk.msra.mxu1 %vm300_vm0, %v18120_v8  ;;  %15026 = vmatprep.subr.msk.mxu0 %vm300_vm0, %v18123_v62  ;;  %v18160_v62 = vld [vmem:[%s16630_s30 + $0x340] sm:$0xff]  ;;  %v11872_v8 = vld [vmem:[%s16630_s30 + $0x1d0] sm:$0xff] }
 0x1b3   : > { %15060 = vmatprep.subr.msk.mxu1 %vm300_vm0, %v18126_v63  ;;  %v18157_v63 = vld [vmem:[%s16630_s30 + $0xc0] sm:$0xff]  ;;  %23312 = vst [vmem:[#allocation33_spill] sm:$0xff] %v18160_v62 }
 0x1b4   : > { %23311 = vst [vmem:[#allocation32_spill] sm:$0xff] %v18157_v63 }
 0x1b5   : > { %15027 = vmatpush3.xpose.msk.msra.mxu0 %vm300_vm0, %v18137_v43  ;;  %v18231_v43 = vld [vmem:[%s16630_s30 + $0x180] sm:$0xff] }
 0x1b6   : > { %15061 = vmatpush3.xpose.msk.msra.mxu1 %vm300_vm0, %v18140_v42  ;;  %15028 = vmatprep.subr.msk.mxu0 %vm300_vm0, %v18143_v40  ;;  %v11888_v40 = vld [vmem:[%s16630_s30 + $0x310] sm:$0xff]  ;;  %23313 = vst [vmem:[#allocation34_spill] sm:$0xff] %v18231_v43 }
 0x1b7   : > { %15062 = vmatprep.subr.msk.mxu1 %vm300_vm0, %v18146_v13  ;;  %v11856_v13 = vld [vmem:[%s16630_s30 + $0x90] sm:$0xff] }
 0x1b8   : > { %v18228_v42 = vld [vmem:[%s16630_s30 + $0x2d0] sm:$0xff] }
 0x1b9   : > { %15029 = vmatpush3.xpose.msk.msra.mxu0 %vm300_vm0, %v18157_v63  ;;  %v18217_v63 = vld [vmem:[%s16630_s30 + $0x410] sm:$0xff] }
 0x1ba   : > { %15063 = vmatpush3.xpose.msk.msra.mxu1 %vm300_vm0, %v18160_v62  ;;  %15030 = vmatprep.subr.msk.mxu0 %vm300_vm0, %v11872_v8  ;;  %v18179_v62 = vld [vmem:[%s16630_s30 + $0x1b0] sm:$0xff] }
 0x1bb   : > { %15064 = vmatprep.subr.msk.mxu1 %vm300_vm0, %v11904_v33  ;;  %v18182_v8 = vld [vmem:[%s16630_s30 + $0x430] sm:$0xff]  ;;  %v18197_v33 = vld [vmem:[%s16630_s30 + $0x1a0] sm:$0xff] }
 0x1bd   : > { %15031 = vmatpush3.xpose.msk.msra.mxu0 %vm300_vm0, %v11856_v13  ;;  %v18200_v13 = vld [vmem:[%s16630_s30 + $0x420] sm:$0xff] }
 0x1be   : > { %15065 = vmatpush3.xpose.msk.msra.mxu1 %vm300_vm0, %v11888_v40  ;;  %15032 = vmatprep.subr.msk.mxu0 %vm300_vm0, %v17464_v2  ;;  %v11854_v2 = vld [vmem:[%s16630_s30 + $0x70] sm:$0xff] }
 0x1bf   : > { %15066 = vmatprep.subr.msk.mxu1 %vm300_vm0, %v17467_v3  ;;  %v18194_v3 = vld [vmem:[%s16630_s30 + $0x2f0] sm:$0xff] }
 0x1c0   : > { %v18214_v40 = vld [vmem:[%s16630_s30 + $0x190] sm:$0xff] }
 0x1c1   : > { %15033 = vmatpush3.xpose.msk.msra.mxu0 %vm300_vm0, %v17478_v4  ;;  %v11853_v4 = vld [vmem:[%s16630_s30 + $0x60] sm:$0xff] }
 0x1c2   : > { %15067 = vmatpush3.xpose.msk.msra.mxu1 %vm300_vm0, %v17481_v5  ;;  %15034 = vmatprep.subr.msk.mxu0 %vm300_vm0, %v18179_v62  ;;  %v18211_v5 = vld [vmem:[%s16630_s30 + $0x2e0] sm:$0xff] }
 0x1c3   : > { %15068 = vmatprep.subr.msk.mxu1 %vm300_vm0, %v18182_v8 }
 0x1c5   : > { %15035 = vmatpush3.xpose.msk.msra.mxu0 %vm300_vm0, %v11854_v2  ;;  %v11852_v2 = vld [vmem:[%s16630_s30 + $0x50] sm:$0xff] }
 0x1c6   : > { %15069 = vmatpush3.xpose.msk.msra.mxu1 %vm300_vm0, %v18194_v3  ;;  %15036 = vmatprep.subr.msk.mxu0 %vm300_vm0, %v18197_v33 }
 0x1c7   : > { %15070 = vmatprep.subr.msk.mxu1 %vm300_vm0, %v18200_v13 }
 0x1c9   : > { %15037 = vmatpush3.xpose.msk.msra.mxu0 %vm300_vm0, %v11853_v4  ;;  %v11851_v4 = vld [vmem:[%s16630_s30 + $0x40] sm:$0xff] }
 0x1ca   : > { %15071 = vmatpush3.xpose.msk.msra.mxu1 %vm300_vm0, %v18211_v5  ;;  %15038 = vmatprep.subr.msk.mxu0 %vm300_vm0, %v18214_v40 }
 0x1cb   : > { %15072 = vmatprep.subr.msk.mxu1 %vm300_vm0, %v18217_v63 }
 0x1cd   : > { %15039 = vmatpush3.xpose.msk.msra.mxu0 %vm300_vm0, %v11852_v2  ;;  %v11850_v2 = vld [vmem:[%s16630_s30 + $0x30] sm:$0xff] }
 0x1ce   : > { %15073 = vmatpush3.xpose.msk.msra.mxu1 %vm300_vm0, %v18228_v42  ;;  %15040 = vmatprep.subr.msk.mxu0 %vm300_vm0, %v18231_v43  ;;  %v18268_v43 = vld [vmem:[%s16630_s30 + $0x3e0] sm:$0xff] }
 0x1cf   : > { %15074 = vmatprep.subr.msk.mxu1 %vm300_vm0, %v18234_v0  ;;  %v18265_v0 = vld [vmem:[%s16630_s30 + $0x160] sm:$0xff]  ;;  %23319 = vst [vmem:[#allocation40_spill] sm:$0xff] %v18268_v43 }
 0x1d1   : > { %15041 = vmatpush3.xpose.msk.msra.mxu0 %vm300_vm0, %v11851_v4  ;;  %v11849_v4 = vld [vmem:[%s16630_s30 + $0x20] sm:$0xff] }
 0x1d2   : > { %15075 = vmatpush3.xpose.msk.msra.mxu1 %vm300_vm0, %v18245_v32  ;;  %15042 = vmatprep.subr.msk.mxu0 %vm300_vm0, %v18248_v31  ;;  %v12011_v31 = vld [vmem:[%s16630_s30 + $0x271] sm:$0xff] }
 0x1d3   : > { %15076 = vmatprep.subr.msk.mxu1 %vm300_vm0, %v18251_v30  ;;  %v18279_v30 = vld [vmem:[%s16630_s30 + $0x2a0] sm:$0xff]  ;;  %v12043_v32 = vld [vmem:[%s16630_s30 + $0x4f1] sm:$0xff] }
 0x1d5   : > { %15043 = vmatpush3.xpose.msk.msra.mxu0 %vm300_vm0, %v11850_v2  ;;  %v11995_v2 = vld [vmem:[%s16630_s30 + $0x131] sm:$0xff] }
 0x1d6   : > { %15077 = vmatpush3.xpose.msk.msra.mxu1 %vm300_vm0, %v18262_v41  ;;  %15044 = vmatprep.subr.msk.mxu0 %vm300_vm0, %v18265_v0  ;;  %v12027_v41 = vld [vmem:[%s16630_s30 + $0x3b1] sm:$0xff] }
 0x1d7   : > { %15078 = vmatprep.subr.msk.mxu1 %vm300_vm0, %v18268_v43  ;;  %v18297_v43 = vld [vmem:[%s22842_s1 + $0x38] sm:$0xff] }
 0x1d9   : > { %15045 = vmatpush3.xpose.msk.msra.mxu0 %vm300_vm0, %v11849_v4  ;;  %v23334_v4 = vld [vmem:[#allocation6_spill] sm:$0xff] }
 0x1da   : > { %15079 = vmatpush3.xpose.msk.msra.mxu1 %vm300_vm0, %v18279_v30  ;;  %15082 = vmatprep.subr.msk.mxu0 %vm300_vm0, %v12011_v31  ;;  %v12166_v31 = vld [vmem:[%s16630_s30 + $0x452] sm:$0xff] }
 0x1db   : > { %15116 = vmatprep.subr.msk.mxu1 %vm300_vm0, %v12043_v32  ;;  %v12118_v32 = vld [vmem:[%s16630_s30 + $0x92] sm:$0xff] }
 0x1dc   : > { %15047 = vmatmul.mubr.msk.f32.vlgmr.msra.gmra.mxu0 %vm300_vm0, %v18030_v61 }
 0x1dd   : > { %15081 = vmatmul.mubr.msk.f32.vlgmr.msra.gmra.mxu1 %vm300_vm0, %v18030_v61  ;;  %15083 = vmatpush3.xpose.msk.msra.mxu0 %vm300_vm0, %v11995_v2  ;;  %v18568_v61 = vld [vmem:[%s16630_s30 + $0x342] sm:$0xff]  ;;  %v23335_v2 = vld [vmem:[#allocation7_spill] sm:$0xff] }
 0x1de   : > { %15117 = vmatpush3.xpose.msk.msra.mxu1 %vm300_vm0, %v12027_v41  ;;  %15084 = vmatprep.subr.msk.mxu0 %vm300_vm0, %v17540_v6  ;;  %v12003_v6 = vld [vmem:[%s16630_s30 + $0x1d1] sm:$0xff] }
 0x1df   : > { %15118 = vmatprep.subr.msk.mxu1 %vm300_vm0, %v17543_v7  ;;  %15114 = vmatprep.mubr.msk.f32.mxu0 %vm300_vm0, %v18297_v43  ;;  %v12035_v7 = vld [vmem:[%s16630_s30 + $0x451] sm:$0xff] }
 0x1e0   : > { %15148 = vmatprep.mubr.msk.f32.mxu1 %vm300_vm0, %v18297_v43  ;;  %v12134_v41 = vld [vmem:[%s16630_s30 + $0x1d2] sm:$0xff] }
 0x1e1   : > { %15085 = vmatpush3.xpose.msk.msra.mxu0 %vm300_vm0, %v17554_v9  ;;  %v11987_v9 = vld [vmem:[%s16630_s30 + $0x91] sm:$0xff] }
 0x1e2   : > { %15119 = vmatpush3.xpose.msk.msra.mxu1 %vm300_vm0, %v17557_v10  ;;  %15086 = vmatprep.subr.msk.mxu0 %vm300_vm0, %v17560_v11  ;;  %v12019_v10 = vld [vmem:[%s16630_s30 + $0x311] sm:$0xff]  ;;  %v23320_v11 = vld [vmem:[#allocation5_spill] sm:$0xff] }
 0x1e3   : > { %15120 = vmatprep.subr.msk.mxu1 %vm300_vm0, %v17563_v12  ;;  %v23321_v12 = vld [vmem:[#allocation61_spill] sm:$0xff] }
 0x1e5   : > { %15087 = vmatpush3.xpose.msk.msra.mxu0 %vm300_vm0, %v17583_v14  ;;  %v23322_v14 = vld [vmem:[#allocation62_spill] sm:$0xff] }
 0x1e6   : > { %15121 = vmatpush3.xpose.msk.msra.mxu1 %vm300_vm0, %v17586_v15  ;;  %15088 = vmatprep.subr.msk.mxu0 %vm300_vm0, %v17589_v16  ;;  %v23323_v15 = vld [vmem:[#allocation63_spill] sm:$0xff]  ;;  %v23324_v16 = vld [vmem:[#allocation64_spill] sm:$0xff] }
 0x1e7   : > { %15122 = vmatprep.subr.msk.mxu1 %vm300_vm0, %v17592_v17  ;;  %v23325_v17 = vld [vmem:[#allocation65_spill] sm:$0xff] }
 0x1e9   : > { %15089 = vmatpush3.xpose.msk.msra.mxu0 %vm300_vm0, %v17607_v18  ;;  %v23326_v18 = vld [vmem:[#allocation66_spill] sm:$0xff] }
 0x1ea   : > { %15123 = vmatpush3.xpose.msk.msra.mxu1 %vm300_vm0, %v17610_v19  ;;  %15090 = vmatprep.subr.msk.mxu0 %vm300_vm0, %v17613_v20  ;;  %v23327_v19 = vld [vmem:[#allocation67_spill] sm:$0xff] }
 0x1eb   : > { %15124 = vmatprep.subr.msk.mxu1 %vm300_vm0, %v17616_v21  ;;  %v12142_v20 = vld [vmem:[%s16630_s30 + $0x272] sm:$0xff] }
 0x1ec   : > { %v12174_v21 = vld [vmem:[%s16630_s30 + $0x4f2] sm:$0xff] }
 0x1ed   : > { %15091 = vmatpush3.xpose.msk.msra.mxu0 %vm300_vm0, %v17627_v22  ;;  %v23328_v22 = vld [vmem:[#allocation68_spill] sm:$0xff] }
 0x1ee   : > { %15125 = vmatpush3.xpose.msk.msra.mxu1 %vm300_vm0, %v17630_v23  ;;  %15092 = vmatprep.subr.msk.mxu0 %vm300_vm0, %v17633_v24  ;;  %v23329_v23 = vld [vmem:[#allocation69_spill] sm:$0xff]  ;;  %v12126_v24 = vld [vmem:[%s16630_s30 + $0x132] sm:$0xff] }
 0x1ef   : > { %15126 = vmatprep.subr.msk.mxu1 %vm300_vm0, %v17636_v25  ;;  %v12158_v25 = vld [vmem:[%s16630_s30 + $0x3b2] sm:$0xff] }
 0x1f1   : > { %15093 = vmatpush3.xpose.msk.msra.mxu0 %vm300_vm0, %v17647_v26  ;;  %v18438_v26 = vld [vmem:[%s22842_s1 + $0x40] sm:$0xff] }
 0x1f2   : > { %15127 = vmatpush3.xpose.msk.msra.mxu1 %vm300_vm0, %v17650_v27  ;;  %15094 = vmatprep.subr.msk.mxu0 %vm300_vm0, %v17653_v28  ;;  %v23330_v27 = vld [vmem:[#allocation70_spill] sm:$0xff]  ;;  %v23331_v28 = vld [vmem:[#allocation71_spill] sm:$0xff] }
 0x1f3   : > { %15128 = vmatprep.subr.msk.mxu1 %vm300_vm0, %v17656_v29  ;;  %v18447_v29 = vld [vmem:[%s16630_s30 + $0x252] sm:$0xff] }
 0x1f5   : > { %15095 = vmatpush3.xpose.msk.msra.mxu0 %vm300_vm0, %v17667_v34  ;;  %v18450_v34 = vld [vmem:[%s16630_s30 + $0x4d2] sm:$0xff] }
 0x1f6   : > { %15129 = vmatpush3.xpose.msk.msra.mxu1 %vm300_vm0, %v17670_v35  ;;  %15096 = vmatprep.subr.msk.mxu0 %vm300_vm0, %v17673_v36  ;;  %v23332_v35 = vld [vmem:[#allocation72_spill] sm:$0xff]  ;;  %v23333_v36 = vld [vmem:[#allocation73_spill] sm:$0xff] }
 0x1f7   : > { %15130 = vmatprep.subr.msk.mxu1 %vm300_vm0, %v17676_v37  ;;  %v18465_v37 = vld [vmem:[%s16630_s30 + $0x112] sm:$0xff] }
 0x1f9   : > { %15097 = vmatpush3.xpose.msk.msra.mxu0 %vm300_vm0, %v17687_v38  ;;  %v18468_v38 = vld [vmem:[%s16630_s30 + $0x392] sm:$0xff] }
 0x1fa   : > { %15131 = vmatpush3.xpose.msk.msra.mxu1 %vm300_vm0, %v17690_v39  ;;  %15098 = vmatprep.subr.msk.mxu0 %vm300_vm0, %v12003_v6  ;;  %v18471_v39 = vld [vmem:[%s16630_s30 + $0x242] sm:$0xff]  ;;  %v18587_v6 = vld [vmem:[%s16630_s30 + $0x1b2] sm:$0xff] }
 0x1fb   : > { %15132 = vmatprep.subr.msk.mxu1 %vm300_vm0, %v12035_v7  ;;  %v18590_v7 = vld [vmem:[%s16630_s30 + $0x432] sm:$0xff] }
 0x1fd   : > { %15099 = vmatpush3.xpose.msk.msra.mxu0 %vm300_vm0, %v11987_v9  ;;  %v23336_v9 = vld [vmem:[#allocation8_spill] sm:$0xff] }
 0x1fe   : > { %15133 = vmatpush3.xpose.msk.msra.mxu1 %vm300_vm0, %v12019_v10  ;;  %15100 = vmatprep.subr.msk.mxu0 %vm300_vm0, %v17703_v44  ;;  %v18474_v44 = vld [vmem:[%s16630_s30 + $0x4c2] sm:$0xff] }
 0x1ff   : > { %15134 = vmatprep.subr.msk.mxu1 %vm300_vm0, %v17706_v45  ;;  %v18485_v45 = vld [vmem:[%s16630_s30 + $0x102] sm:$0xff] }
 0x200   : > { %v23337_v10 = vld [vmem:[#allocation9_spill] sm:$0xff] }
 0x201   : > { %15101 = vmatpush3.xpose.msk.msra.mxu0 %vm300_vm0, %v17715_v46  ;;  %v18488_v46 = vld [vmem:[%s16630_s30 + $0x382] sm:$0xff] }
 0x202   : > { %15135 = vmatpush3.xpose.msk.msra.mxu1 %vm300_vm0, %v17718_v47  ;;  %15102 = vmatprep.subr.msk.mxu0 %vm300_vm0, %v17721_v48  ;;  %v18491_v47 = vld [vmem:[%s16630_s30 + $0x232] sm:$0xff] }
 0x203   : > { %15136 = vmatprep.subr.msk.mxu1 %vm300_vm0, %v17724_v49  ;;  %v18494_v48 = vld [vmem:[%s16630_s30 + $0x4b2] sm:$0xff] }
 0x204   : > { %v18505_v49 = vld [vmem:[%s16630_s30 + $0xf2] sm:$0xff] }
 0x205   : > { %15103 = vmatpush3.xpose.msk.msra.mxu0 %vm300_vm0, %v17735_v50  ;;  %v18508_v50 = vld [vmem:[%s16630_s30 + $0x372] sm:$0xff] }
 0x206   : > { %15137 = vmatpush3.xpose.msk.msra.mxu1 %vm300_vm0, %v17738_v51  ;;  %15104 = vmatprep.subr.msk.mxu0 %vm300_vm0, %v17741_v52  ;;  %v18511_v51 = vld [vmem:[%s16630_s30 + $0x222] sm:$0xff] }
 0x207   : > { %15138 = vmatprep.subr.msk.mxu1 %vm300_vm0, %v17744_v53  ;;  %v18514_v52 = vld [vmem:[%s16630_s30 + $0x4a2] sm:$0xff] }
 0x208   : > { %v18525_v53 = vld [vmem:[%s16630_s30 + $0xe2] sm:$0xff] }
 0x209   : > { %15105 = vmatpush3.xpose.msk.msra.mxu0 %vm300_vm0, %v17755_v54  ;;  %v18528_v54 = vld [vmem:[%s16630_s30 + $0x362] sm:$0xff] }
 0x20a   : > { %15139 = vmatpush3.xpose.msk.msra.mxu1 %vm300_vm0, %v17758_v55  ;;  %15106 = vmatprep.subr.msk.mxu0 %vm300_vm0, %v17761_v56  ;;  %v18531_v55 = vld [vmem:[%s16630_s30 + $0x212] sm:$0xff] }
 0x20b   : > { %15140 = vmatprep.subr.msk.mxu1 %vm300_vm0, %v17764_v57  ;;  %v18534_v56 = vld [vmem:[%s16630_s30 + $0x492] sm:$0xff] }
 0x20c   : > { %v18545_v57 = vld [vmem:[%s16630_s30 + $0xd2] sm:$0xff] }
 0x20d   : > { %15107 = vmatpush3.xpose.msk.msra.mxu0 %vm300_vm0, %v17775_v58  ;;  %v18548_v58 = vld [vmem:[%s16630_s30 + $0x352] sm:$0xff] }
 0x20e   : > { %15141 = vmatpush3.xpose.msk.msra.mxu1 %vm300_vm0, %v17778_v59  ;;  %15108 = vmatprep.subr.msk.mxu0 %vm300_vm0, %v17781_v60  ;;  %v18551_v59 = vld [vmem:[%s16630_s30 + $0x202] sm:$0xff] }
 0x20f   : > { %15142 = vmatprep.subr.msk.mxu1 %vm300_vm0, %v17784_v1  ;;  %v18554_v60 = vld [vmem:[%s16630_s30 + $0x482] sm:$0xff] }
 0x210   : > { %v18565_v1 = vld [vmem:[%s16630_s30 + $0xc2] sm:$0xff] }
 0x211   : > { %15109 = vmatpush3.xpose.msk.msra.mxu0 %vm300_vm0, %v23320_v11  ;;  %v12116_v11 = vld [vmem:[%s16630_s30 + $0x72] sm:$0xff] }
 0x212   : > { %15143 = vmatpush3.xpose.msk.msra.mxu1 %vm300_vm0, %v23321_v12  ;;  %15110 = vmatprep.subr.msk.mxu0 %vm300_vm0, %v23322_v14  ;;  %v18602_v12 = vld [vmem:[%s16630_s30 + $0x2f2] sm:$0xff]  ;;  %v18605_v14 = vld [vmem:[%s16630_s30 + $0x1a2] sm:$0xff] }
 0x213   : > { %15144 = vmatprep.subr.msk.mxu1 %vm300_vm0, %v23323_v15  ;;  %v18608_v15 = vld [vmem:[%s16630_s30 + $0x422] sm:$0xff] }
 0x215   : > { %15111 = vmatpush3.xpose.msk.msra.mxu0 %vm300_vm0, %v23324_v16  ;;  %v12115_v16 = vld [vmem:[%s16630_s30 + $0x62] sm:$0xff] }
 0x216   : > { %15145 = vmatpush3.xpose.msk.msra.mxu1 %vm300_vm0, %v23325_v17  ;;  %15112 = vmatprep.subr.msk.mxu0 %vm300_vm0, %v23326_v18  ;;  %v18619_v17 = vld [vmem:[%s16630_s30 + $0x2e2] sm:$0xff]  ;;  %v18622_v18 = vld [vmem:[%s16630_s30 + $0x192] sm:$0xff] }
 0x217   : > { %15146 = vmatprep.subr.msk.mxu1 %vm300_vm0, %v23327_v19  ;;  %v18625_v19 = vld [vmem:[%s16630_s30 + $0x412] sm:$0xff] }
 0x219   : > { %15113 = vmatpush3.xpose.msk.msra.mxu0 %vm300_vm0, %v23328_v22  ;;  %v18639_v22 = vld [vmem:[%s16630_s30 + $0x182] sm:$0xff] }
 0x21a   : > { %15147 = vmatpush3.xpose.msk.msra.mxu1 %vm300_vm0, %v23329_v23  ;;  %15150 = vmatprep.subr.msk.mxu0 %vm300_vm0, %v12142_v20  ;;  %v12114_v20 = vld [vmem:[%s16630_s30 + $0x52] sm:$0xff]  ;;  %v18642_v23 = vld [vmem:[%s16630_s30 + $0x402] sm:$0xff] }
 0x21b   : > { %15184 = vmatprep.subr.msk.mxu1 %vm300_vm0, %v12174_v21  ;;  %v18636_v21 = vld [vmem:[%s16630_s30 + $0x2d2] sm:$0xff] }
 0x21c   : > { %15115 = vmatmul.mubr.msk.f32.vlgmr.msra.gmra.mxu0 %vm300_vm0, %v18297_v43 }
 0x21d   : > { %15149 = vmatmul.mubr.msk.f32.vlgmr.msra.gmra.mxu1 %vm300_vm0, %v18297_v43  ;;  %15151 = vmatpush3.xpose.msk.msra.mxu0 %vm300_vm0, %v12126_v24  ;;  %v12150_v43 = vld [vmem:[%s16630_s30 + $0x312] sm:$0xff]  ;;  %v12113_v24 = vld [vmem:[%s16630_s30 + $0x42] sm:$0xff] }
 0x21e   : > { %15185 = vmatpush3.xpose.msk.msra.mxu1 %vm300_vm0, %v12158_v25  ;;  %15152 = vmatprep.subr.msk.mxu0 %vm300_vm0, %v23330_v27  ;;  %v18653_v25 = vld [vmem:[%s16630_s30 + $0x2c2] sm:$0xff]  ;;  %v18656_v27 = vld [vmem:[%s16630_s30 + $0x172] sm:$0xff] }
 0x21f   : > { %15186 = vmatprep.subr.msk.mxu1 %vm300_vm0, %v23331_v28  ;;  %15182 = vmatprep.mubr.msk.f32.mxu0 %vm300_vm0, %v18438_v26  ;;  %v18659_v28 = vld [vmem:[%s16630_s30 + $0x3f2] sm:$0xff] }
 0x220   : > { %15216 = vmatprep.mubr.msk.f32.mxu1 %vm300_vm0, %v18438_v26 }
 0x221   : > { %15153 = vmatpush3.xpose.msk.msra.mxu0 %vm300_vm0, %v23332_v35  ;;  %v12112_v35 = vld [vmem:[%s16630_s30 + $0x32] sm:$0xff] }
 0x222   : > { %15187 = vmatpush3.xpose.msk.msra.mxu1 %vm300_vm0, %v23333_v36  ;;  %15154 = vmatprep.subr.msk.mxu0 %vm300_vm0, %v18447_v29  ;;  %v18670_v36 = vld [vmem:[%s16630_s30 + $0x2b2] sm:$0xff] }
 0x223   : > { %15188 = vmatprep.subr.msk.mxu1 %vm300_vm0, %v18450_v34 }
 0x225   : > { %15155 = vmatpush3.xpose.msk.msra.mxu0 %vm300_vm0, %v18465_v37 }
 0x226   : > { %15189 = vmatpush3.xpose.msk.msra.mxu1 %vm300_vm0, %v18468_v38  ;;  %15156 = vmatprep.subr.msk.mxu0 %vm300_vm0, %v18471_v39 }
 0x227   : > { %15190 = vmatprep.subr.msk.mxu1 %vm300_vm0, %v18474_v44 }
 0x229   : > { %15157 = vmatpush3.xpose.msk.msra.mxu0 %vm300_vm0, %v18485_v45 }
 0x22a   : > { %15191 = vmatpush3.xpose.msk.msra.mxu1 %vm300_vm0, %v18488_v46  ;;  %15158 = vmatprep.subr.msk.mxu0 %vm300_vm0, %v18491_v47 }
 0x22b   : > { %15192 = vmatprep.subr.msk.mxu1 %vm300_vm0, %v18494_v48 }
 0x22d   : > { %15159 = vmatpush3.xpose.msk.msra.mxu0 %vm300_vm0, %v18505_v49 }
 0x22e   : > { %15193 = vmatpush3.xpose.msk.msra.mxu1 %vm300_vm0, %v18508_v50  ;;  %15160 = vmatprep.subr.msk.mxu0 %vm300_vm0, %v18511_v51 }
 0x22f   : > { %15194 = vmatprep.subr.msk.mxu1 %vm300_vm0, %v18514_v52 }
 0x231   : > { %15161 = vmatpush3.xpose.msk.msra.mxu0 %vm300_vm0, %v18525_v53 }
 0x232   : > { %15195 = vmatpush3.xpose.msk.msra.mxu1 %vm300_vm0, %v18528_v54  ;;  %15162 = vmatprep.subr.msk.mxu0 %vm300_vm0, %v18531_v55 }
 0x233   : > { %15196 = vmatprep.subr.msk.mxu1 %vm300_vm0, %v18534_v56 }
 0x235   : > { %15163 = vmatpush3.xpose.msk.msra.mxu0 %vm300_vm0, %v18545_v57 }
 0x236   : > { %15197 = vmatpush3.xpose.msk.msra.mxu1 %vm300_vm0, %v18548_v58  ;;  %15164 = vmatprep.subr.msk.mxu0 %vm300_vm0, %v18551_v59 }
 0x237   : > { %15198 = vmatprep.subr.msk.mxu1 %vm300_vm0, %v18554_v60 }
 0x239   : > { %15165 = vmatpush3.xpose.msk.msra.mxu0 %vm300_vm0, %v18565_v1 }
 0x23a   : > { %15199 = vmatpush3.xpose.msk.msra.mxu1 %vm300_vm0, %v18568_v61  ;;  %15166 = vmatprep.subr.msk.mxu0 %vm300_vm0, %v12134_v41  ;;  %v18673_v41 = vld [vmem:[%s16630_s30 + $0x162] sm:$0xff] }
 0x23b   : > { %15200 = vmatprep.subr.msk.mxu1 %vm300_vm0, %v12166_v31  ;;  %v18676_v31 = vld [vmem:[%s16630_s30 + $0x3e2] sm:$0xff] }
 0x23d   : > { %15167 = vmatpush3.xpose.msk.msra.mxu0 %vm300_vm0, %v12118_v32  ;;  %v12111_v32 = vld [vmem:[%s16630_s30 + $0x22] sm:$0xff] }
 0x23e   : > { %15201 = vmatpush3.xpose.msk.msra.mxu1 %vm300_vm0, %v12150_v43  ;;  %15168 = vmatprep.subr.msk.mxu0 %vm300_vm0, %v23334_v4  ;;  %v18687_v43 = vld [vmem:[%s16630_s30 + $0x2a2] sm:$0xff]  ;;  %v18690_v4 = vld [vmem:[%s16630_s30 + $0x570] sm:$0xff] }
 0x23f   : > { %15202 = vmatprep.subr.msk.mxu1 %vm300_vm0, %v23335_v2  ;;  %v18700_v2 = vld [vmem:[%s16630_s30 + $0x560] sm:$0xff] }
 0x241   : > { %15169 = vmatpush3.xpose.msk.msra.mxu0 %vm300_vm0, %v23336_v9  ;;  %v18709_v9 = vld [vmem:[%s22842_s1 + $0x48] sm:$0xff] }
 0x242   : > { %15203 = vmatpush3.xpose.msk.msra.mxu1 %vm300_vm0, %v23337_v10  ;;  %15170 = vmatprep.subr.msk.mxu0 %vm300_vm0, %v18587_v6  ;;  %v18768_v10 = vld [vmem:[%s16630_s30 + $0x290] sm:$0xff] }
 0x243   : > { %15204 = vmatprep.subr.msk.mxu1 %vm300_vm0, %v18590_v7 }
 0x245   : > { %15171 = vmatpush3.xpose.msk.msra.mxu0 %vm300_vm0, %v12116_v11  ;;  %v18771_v11 = vld [vmem:[%s16630_s30 + $0x510] sm:$0xff] }
 0x246   : > { %15205 = vmatpush3.xpose.msk.msra.mxu1 %vm300_vm0, %v18602_v12  ;;  %15172 = vmatprep.subr.msk.mxu0 %vm300_vm0, %v18605_v14 }
 0x247   : > { %15206 = vmatprep.subr.msk.mxu1 %vm300_vm0, %v18608_v15 }
 0x249   : > { %15173 = vmatpush3.xpose.msk.msra.mxu0 %vm300_vm0, %v12115_v16  ;;  %v23344_v16 = vld [vmem:[#allocation40_spill] sm:$0xff] }
 0x24a   : > { %15207 = vmatpush3.xpose.msk.msra.mxu1 %vm300_vm0, %v18619_v17  ;;  %15174 = vmatprep.subr.msk.mxu0 %vm300_vm0, %v18622_v18 }
 0x24b   : > { %15208 = vmatprep.subr.msk.mxu1 %vm300_vm0, %v18625_v19 }
 0x24d   : > { %15175 = vmatpush3.xpose.msk.msra.mxu0 %vm300_vm0, %v12114_v20  ;;  %v18785_v20 = vld [vmem:[%s16630_s30 + $0x3d0] sm:$0xff] }
 0x24e   : > { %15209 = vmatpush3.xpose.msk.msra.mxu1 %vm300_vm0, %v18636_v21  ;;  %15176 = vmatprep.subr.msk.mxu0 %vm300_vm0, %v18639_v22 }
 0x24f   : > { %15210 = vmatprep.subr.msk.mxu1 %vm300_vm0, %v18642_v23 }
 0x251   : > { %15177 = vmatpush3.xpose.msk.msra.mxu0 %vm300_vm0, %v12113_v24  ;;  %v12266_v24 = vld [vmem:[%s16630_s30 + $0x280] sm:$0xff] }
 0x252   : > { %15211 = vmatpush3.xpose.msk.msra.mxu1 %vm300_vm0, %v18653_v25  ;;  %15178 = vmatprep.subr.msk.mxu0 %vm300_vm0, %v18656_v27 }
 0x253   : > { %15212 = vmatprep.subr.msk.mxu1 %vm300_vm0, %v18659_v28 }
 0x255   : > { %15179 = vmatpush3.xpose.msk.msra.mxu0 %vm300_vm0, %v12112_v35  ;;  %v12298_v35 = vld [vmem:[%s16630_s30 + $0x500] sm:$0xff] }
 0x256   : > { %15213 = vmatpush3.xpose.msk.msra.mxu1 %vm300_vm0, %v18670_v36  ;;  %15180 = vmatprep.subr.msk.mxu0 %vm300_vm0, %v18673_v41 }
 0x257   : > { %15214 = vmatprep.subr.msk.mxu1 %vm300_vm0, %v18676_v31 }
 0x259   : > { %15181 = vmatpush3.xpose.msk.msra.mxu0 %vm300_vm0, %v12111_v32  ;;  %v12282_v32 = vld [vmem:[%s16630_s30 + $0x3c0] sm:$0xff] }
 0x25a   : > { %15215 = vmatpush3.xpose.msk.msra.mxu1 %vm300_vm0, %v18687_v43  ;;  %15218 = vmatprep.subr.msk.mxu0 %vm300_vm0, %v18194_v3  ;;  %v18720_v3 = vld [vmem:[%s16630_s30 + $0x550] sm:$0xff] }
 0x25b   : > { %15252 = vmatprep.subr.msk.mxu1 %vm300_vm0, %v18690_v4 }
 0x25c   : > { %15183 = vmatmul.mubr.msk.f32.vlgmr.msra.gmra.mxu0 %vm300_vm0, %v18438_v26 }
 0x25d   : > { %15217 = vmatmul.mubr.msk.f32.vlgmr.msra.gmra.mxu1 %vm300_vm0, %v18438_v26  ;;  %15219 = vmatpush3.xpose.msk.msra.mxu0 %vm300_vm0, %v18179_v62  ;;  %v18735_v62 = vld [vmem:[%s16630_s30 + $0x540] sm:$0xff]  ;;  %v23343_v26 = vld [vmem:[#allocation38_spill] sm:$0xff] }
 0x25e   : > { %15253 = vmatpush3.xpose.msk.msra.mxu1 %vm300_vm0, %v18182_v8  ;;  %15220 = vmatprep.subr.msk.mxu0 %vm300_vm0, %v18211_v5  ;;  %v23338_v8 = vld [vmem:[#allocation36_spill] sm:$0xff]  ;;  %v23341_v5 = vld [vmem:[#allocation39_spill] sm:$0xff] }
 0x25f   : > { %15254 = vmatprep.subr.msk.mxu1 %vm300_vm0, %v18700_v2  ;;  %15250 = vmatprep.mubr.msk.f32.mxu0 %vm300_vm0, %v18709_v9 }
 0x260   : > { %15284 = vmatprep.mubr.msk.f32.mxu1 %vm300_vm0, %v18709_v9 }
 0x261   : > { %15221 = vmatpush3.xpose.msk.msra.mxu0 %vm300_vm0, %v18197_v33  ;;  %v23339_v33 = vld [vmem:[#allocation34_spill] sm:$0xff] }
 0x262   : > { %15255 = vmatpush3.xpose.msk.msra.mxu1 %vm300_vm0, %v18200_v13  ;;  %15222 = vmatprep.subr.msk.mxu0 %vm300_vm0, %v18228_v42  ;;  %v18746_v42 = vld [vmem:[%s16630_s30 + $0x530] sm:$0xff] }
 0x263   : > { %15256 = vmatprep.subr.msk.mxu1 %vm300_vm0, %v18720_v3  ;;  %v23340_v13 = vld [vmem:[#allocation35_spill] sm:$0xff] }
 0x265   : > { %15223 = vmatpush3.xpose.msk.msra.mxu0 %vm300_vm0, %v18214_v40  ;;  %v23342_v40 = vld [vmem:[#allocation37_spill] sm:$0xff] }
 0x266   : > { %15257 = vmatpush3.xpose.msk.msra.mxu1 %vm300_vm0, %v18217_v63  ;;  %15224 = vmatprep.subr.msk.mxu0 %vm300_vm0, %v23338_v8  ;;  %v18757_v63 = vld [vmem:[%s16630_s30 + $0x520] sm:$0xff]  ;;  %v23345_v8 = vld [vmem:[#allocation10_spill] sm:$0xff] }
 0x267   : > { %15258 = vmatprep.subr.msk.mxu1 %vm300_vm0, %v18735_v62 }
 0x269   : > { %15225 = vmatpush3.xpose.msk.msra.mxu0 %vm300_vm0, %v23339_v33  ;;  %v23346_v33 = vld [vmem:[#allocation11_spill] sm:$0xff] }
 0x26a   : > { %15259 = vmatpush3.xpose.msk.msra.mxu1 %vm300_vm0, %v23340_v13  ;;  %15226 = vmatprep.subr.msk.mxu0 %vm300_vm0, %v23341_v5  ;;  %v23347_v13 = vld [vmem:[#allocation12_spill] sm:$0xff]  ;;  %v23348_v5 = vld [vmem:[#allocation13_spill] sm:$0xff] }
 0x26b   : > { %15260 = vmatprep.subr.msk.mxu1 %vm300_vm0, %v18746_v42 }
 0x26d   : > { %15227 = vmatpush3.xpose.msk.msra.mxu0 %vm300_vm0, %v23342_v40  ;;  %v23349_v40 = vld [vmem:[#allocation14_spill] sm:$0xff] }
 0x26e   : > { %15261 = vmatpush3.xpose.msk.msra.mxu1 %vm300_vm0, %v23343_v26  ;;  %15228 = vmatprep.subr.msk.mxu0 %vm300_vm0, %v18279_v30  ;;  %v18782_v30 = vld [vmem:[%s16630_s30 + $0x150] sm:$0xff] }
 0x26f   : > { %15262 = vmatprep.subr.msk.mxu1 %vm300_vm0, %v18757_v63  ;;  %v23350_v26 = vld [vmem:[#allocation15_spill] sm:$0xff] }
 0x271   : > { %15229 = vmatpush3.xpose.msk.msra.mxu0 %vm300_vm0, %v18265_v0  ;;  %v12250_v0 = vld [vmem:[%s16630_s30 + $0x140] sm:$0xff] }
 0x272   : > { %15263 = vmatpush3.xpose.msk.msra.mxu1 %vm300_vm0, %v23344_v16  ;;  %15230 = vmatprep.subr.msk.mxu0 %vm300_vm0, %v18768_v10  ;;  %v23351_v16 = vld [vmem:[#allocation16_spill] sm:$0xff] }
 0x273   : > { %15264 = vmatprep.subr.msk.mxu1 %vm300_vm0, %v18771_v11 }
 0x275   : > { %15231 = vmatpush3.xpose.msk.msra.mxu0 %vm300_vm0, %v18782_v30 }
 0x276   : > { %15265 = vmatpush3.xpose.msk.msra.mxu1 %vm300_vm0, %v18785_v20  ;;  %15232 = vmatprep.subr.msk.mxu0 %vm300_vm0, %v12266_v24  ;;  %v23352_v24 = vld [vmem:[#allocation17_spill] sm:$0xff] }
 0x277   : > { %15266 = vmatprep.subr.msk.mxu1 %vm300_vm0, %v12298_v35  ;;  %v23353_v35 = vld [vmem:[#allocation18_spill] sm:$0xff] }
 0x279   : > { %15233 = vmatpush3.xpose.msk.msra.mxu0 %vm300_vm0, %v12250_v0  ;;  %v23354_v0 = vld [vmem:[#allocation19_spill] sm:$0xff] }
 0x27a   : > { %15267 = vmatpush3.xpose.msk.msra.mxu1 %vm300_vm0, %v12282_v32  ;;  %15234 = vmatprep.subr.msk.mxu0 %vm300_vm0, %v23345_v8  ;;  %v23355_v32 = vld [vmem:[#allocation20_spill] sm:$0xff]  ;;  %v23356_v8 = vld [vmem:[#allocation21_spill] sm:$0xff] }
 0x27b   : > { %15268 = vmatprep.subr.msk.mxu1 %vm300_vm0, %v23346_v33  ;;  %v23357_v33 = vld [vmem:[#allocation22_spill] sm:$0xff] }
 0x27d   : > { %15235 = vmatpush3.xpose.msk.msra.mxu0 %vm300_vm0, %v23347_v13  ;;  %v23358_v13 = vld [vmem:[#allocation23_spill] sm:$0xff] }
 0x27e   : > { %15269 = vmatpush3.xpose.msk.msra.mxu1 %vm300_vm0, %v23348_v5  ;;  %15236 = vmatprep.subr.msk.mxu0 %vm300_vm0, %v23349_v40  ;;  %v23359_v5 = vld [vmem:[#allocation24_spill] sm:$0xff]  ;;  %v23360_v40 = vld [vmem:[#allocation25_spill] sm:$0xff] }
 0x27f   : > { %15270 = vmatprep.subr.msk.mxu1 %vm300_vm0, %v23350_v26  ;;  %v23361_v26 = vld [vmem:[#allocation26_spill] sm:$0xff] }
 0x281   : > { %15237 = vmatpush3.xpose.msk.msra.mxu0 %vm300_vm0, %v23351_v16  ;;  %v23362_v16 = vld [vmem:[#allocation27_spill] sm:$0xff] }
 0x282   : > { %15271 = vmatpush3.xpose.msk.msra.mxu1 %vm300_vm0, %v23352_v24  ;;  %15238 = vmatprep.subr.msk.mxu0 %vm300_vm0, %v23353_v35  ;;  %v23363_v24 = vld [vmem:[#allocation28_spill] sm:$0xff]  ;;  %v23364_v35 = vld [vmem:[#allocation29_spill] sm:$0xff] }
 0x283   : > { %15272 = vmatprep.subr.msk.mxu1 %vm300_vm0, %v23354_v0  ;;  %v23365_v0 = vld [vmem:[#allocation30_spill] sm:$0xff] }
 0x285   : > { %15239 = vmatpush3.xpose.msk.msra.mxu0 %vm300_vm0, %v23355_v32  ;;  %v23366_v32 = vld [vmem:[#allocation31_spill] sm:$0xff] }
 0x286   : > { %15273 = vmatpush3.xpose.msk.msra.mxu1 %vm300_vm0, %v23356_v8  ;;  %15240 = vmatprep.subr.msk.mxu0 %vm300_vm0, %v23357_v33  ;;  %v18844_v8 = vld [vmem:[%s16630_s30 + $0x1f0] sm:$0xff] }
 0x287   : > { %15274 = vmatprep.subr.msk.mxu1 %vm300_vm0, %v23358_v13  ;;  %v18847_v33 = vld [vmem:[%s16630_s30 + $0x470] sm:$0xff]  ;;  %v23367_v13 = vld [vmem:[#allocation32_spill] sm:$0xff] }
 0x289   : > { %15241 = vmatpush3.xpose.msk.msra.mxu0 %vm300_vm0, %v23359_v5  ;;  %v23368_v5 = vld [vmem:[#allocation33_spill] sm:$0xff] }
 0x28a   : > { %15275 = vmatpush3.xpose.msk.msra.mxu1 %vm300_vm0, %v23360_v40  ;;  %15242 = vmatprep.subr.msk.mxu0 %vm300_vm0, %v23361_v26  ;;  %v18858_v40 = vld [vmem:[%s16630_s30 + $0xb0] sm:$0xff] }
 0x28b   : > { %15276 = vmatprep.subr.msk.mxu1 %vm300_vm0, %v23362_v16  ;;  %v18861_v26 = vld [vmem:[%s16630_s30 + $0x330] sm:$0xff]  ;;  %v12258_v16 = vld [vmem:[%s16630_s30 + $0x1e0] sm:$0xff] }
 0x28c   : > { %23369 = vst [vmem:[#allocation41_spill] sm:$0xff] %v18861_v26 }
 0x28d   : > { %15243 = vmatpush3.xpose.msk.msra.mxu0 %vm300_vm0, %v23363_v24  ;;  %v12290_v24 = vld [vmem:[%s16630_s30 + $0x460] sm:$0xff] }
 0x28e   : > { %15277 = vmatpush3.xpose.msk.msra.mxu1 %vm300_vm0, %v23364_v35  ;;  %15244 = vmatprep.subr.msk.mxu0 %vm300_vm0, %v23365_v0  ;;  %v12242_v35 = vld [vmem:[%s16630_s30 + $0xa0] sm:$0xff] }
 0x28f   : > { %15278 = vmatprep.subr.msk.mxu1 %vm300_vm0, %v23366_v32  ;;  %v12274_v0 = vld [vmem:[%s16630_s30 + $0x320] sm:$0xff]  ;;  %v18874_v32 = vld [vmem:[%s16630_s30 + $0x2f1] sm:$0xff] }
 0x290   : > { %23370 = vst [vmem:[#allocation42_spill] sm:$0xff] %v18874_v32 }
 0x291   : > { %15245 = vmatpush3.xpose.msk.msra.mxu0 %vm300_vm0, %v23367_v13  ;;  %v18877_v13 = vld [vmem:[%s16630_s30 + $0x571] sm:$0xff] }
 0x292   : > { %15279 = vmatpush3.xpose.msk.msra.mxu1 %vm300_vm0, %v23368_v5  ;;  %15246 = vmatprep.subr.msk.mxu0 %vm300_vm0, %v18844_v8  ;;  %23371 = vst [vmem:[#allocation43_spill] sm:$0xff] %v18877_v13  ;;  %v18886_v5 = vld [vmem:[%s16630_s30 + $0x1b1] sm:$0xff] }
 0x293   : > { %15280 = vmatprep.subr.msk.mxu1 %vm300_vm0, %v18847_v33  ;;  %23372 = vst [vmem:[#allocation44_spill] sm:$0xff] %v18886_v5 }
 0x295   : > { %15247 = vmatpush3.xpose.msk.msra.mxu0 %vm300_vm0, %v18858_v40 }
 0x296   : > { %15281 = vmatpush3.xpose.msk.msra.mxu1 %vm300_vm0, %v18861_v26  ;;  %15248 = vmatprep.subr.msk.mxu0 %vm300_vm0, %v12258_v16  ;;  %v18889_v16 = vld [vmem:[%s16630_s30 + $0x431] sm:$0xff]  ;;  %v18895_v26 = vld [vmem:[%s16630_s30 + $0x561] sm:$0xff] }
 0x297   : > { %15282 = vmatprep.subr.msk.mxu1 %vm300_vm0, %v12290_v24  ;;  %23373 = vst [vmem:[#allocation45_spill] sm:$0xff] %v18889_v16  ;;  %v18892_v24 = vld [vmem:[%s16630_s30 + $0x2e1] sm:$0xff]  ;;  %23375 = vst [vmem:[#allocation47_spill] sm:$0xff] %v18895_v26 }
 0x298   : > { %23374 = vst [vmem:[#allocation46_spill] sm:$0xff] %v18892_v24 }
 0x299   : > { %15249 = vmatpush3.xpose.msk.msra.mxu0 %vm300_vm0, %v12242_v35  ;;  %v18904_v35 = vld [vmem:[%s22842_s1 + $0x50] sm:$0xff] }
 0x29a   : > { %15283 = vmatpush3.xpose.msk.msra.mxu1 %vm300_vm0, %v12274_v0  ;;  %15286 = vmatprep.subr.msk.mxu0 %vm300_vm0, %v18874_v32  ;;  %v18918_v0 = vld [vmem:[%s16630_s30 + $0x421] sm:$0xff]  ;;  %v18924_v32 = vld [vmem:[%s16630_s30 + $0x551] sm:$0xff] }
 0x29b   : > { %15320 = vmatprep.subr.msk.mxu1 %vm300_vm0, %v18877_v13  ;;  %23377 = vst [vmem:[#allocation49_spill] sm:$0xff] %v18918_v0  ;;  %v18921_v13 = vld [vmem:[%s16630_s30 + $0x2d1] sm:$0xff]  ;;  %23379 = vst [vmem:[#allocation51_spill] sm:$0xff] %v18924_v32 }
 0x29c   : > { %15251 = vmatmul.mubr.msk.f32.vlgmr.msra.gmra.mxu0 %vm300_vm0, %v18709_v9  ;;  %23378 = vst [vmem:[#allocation50_spill] sm:$0xff] %v18921_v13 }
 0x29d   : > { %15285 = vmatmul.mubr.msk.f32.vlgmr.msra.gmra.mxu1 %vm300_vm0, %v18709_v9  ;;  %15287 = vmatpush3.xpose.msk.msra.mxu0 %vm300_vm0, %v18886_v5  ;;  %v18915_v9 = vld [vmem:[%s16630_s30 + $0x1a1] sm:$0xff] }
 0x29e   : > { %15321 = vmatpush3.xpose.msk.msra.mxu1 %vm300_vm0, %v18889_v16  ;;  %15288 = vmatprep.subr.msk.mxu0 %vm300_vm0, %v18892_v24  ;;  %23376 = vst [vmem:[#allocation48_spill] sm:$0xff] %v18915_v9  ;;  %v18942_v24 = vld [vmem:[%s16630_s30 + $0x411] sm:$0xff]  ;;  %v18945_v16 = vld [vmem:[%s16630_s30 + $0x2c1] sm:$0xff] }
 0x29f   : > { %15322 = vmatprep.subr.msk.mxu1 %vm300_vm0, %v18895_v26  ;;  %15318 = vmatprep.mubr.msk.f32.mxu0 %vm300_vm0, %v18904_v35  ;;  %v18939_v26 = vld [vmem:[%s16630_s30 + $0x191] sm:$0xff]  ;;  %23381 = vst [vmem:[#allocation53_spill] sm:$0xff] %v18942_v24  ;;  %23382 = vst [vmem:[#allocation54_spill] sm:$0xff] %v18945_v16  ;;  %v18948_v5 = vld [vmem:[%s16630_s30 + $0x541] sm:$0xff] }
 0x2a0   : > { %15352 = vmatprep.mubr.msk.f32.mxu1 %vm300_vm0, %v18904_v35  ;;  %23380 = vst [vmem:[#allocation52_spill] sm:$0xff] %v18939_v26  ;;  %23383 = vst [vmem:[#allocation55_spill] sm:$0xff] %v18948_v5 }
 0x2a1   : > { %15289 = vmatpush3.xpose.msk.msra.mxu0 %vm300_vm0, %v18915_v9  ;;  %v18968_v9 = vld [vmem:[%s16630_s30 + $0x531] sm:$0xff] }
 0x2a2   : > { %15323 = vmatpush3.xpose.msk.msra.mxu1 %vm300_vm0, %v18918_v0  ;;  %15290 = vmatprep.subr.msk.mxu0 %vm300_vm0, %v18921_v13  ;;  %v18962_v13 = vld [vmem:[%s16630_s30 + $0x401] sm:$0xff]  ;;  %v18965_v0 = vld [vmem:[%s16630_s30 + $0x2b1] sm:$0xff]  ;;  %23387 = vst [vmem:[#allocation59_spill] sm:$0xff] %v18968_v9 }
 0x2a3   : > { %15324 = vmatprep.subr.msk.mxu1 %vm300_vm0, %v18924_v32  ;;  %v18959_v32 = vld [vmem:[%s16630_s30 + $0x181] sm:$0xff]  ;;  %23385 = vst [vmem:[#allocation57_spill] sm:$0xff] %v18962_v13  ;;  %23386 = vst [vmem:[#allocation58_spill] sm:$0xff] %v18965_v0 }
 0x2a4   : > { %23384 = vst [vmem:[#allocation56_spill] sm:$0xff] %v18959_v32 }
 0x2a5   : > { %15291 = vmatpush3.xpose.msk.msra.mxu0 %vm300_vm0, %v18939_v26  ;;  %v18988_v26 = vld [vmem:[%s16630_s30 + $0x521] sm:$0xff] }
 0x2a6   : > { %15325 = vmatpush3.xpose.msk.msra.mxu1 %vm300_vm0, %v18942_v24  ;;  %15292 = vmatprep.subr.msk.mxu0 %vm300_vm0, %v18945_v16  ;;  %v18982_v16 = vld [vmem:[%s16630_s30 + $0x3f1] sm:$0xff]  ;;  %v18985_v24 = vld [vmem:[%s16630_s30 + $0x2a1] sm:$0xff]  ;;  %23391 = vst [vmem:[#allocation62_spill] sm:$0xff] %v18988_v26 }
 0x2a7   : > { %15326 = vmatprep.subr.msk.mxu1 %vm300_vm0, %v18948_v5  ;;  %v18979_v5 = vld [vmem:[%s16630_s30 + $0x171] sm:$0xff]  ;;  %23389 = vst [vmem:[#allocation5_spill] sm:$0xff] %v18982_v16  ;;  %23390 = vst [vmem:[#allocation61_spill] sm:$0xff] %v18985_v24 }
 0x2a8   : > { %23388 = vst [vmem:[#allocation60_spill] sm:$0xff] %v18979_v5 }
 0x2a9   : > { %15293 = vmatpush3.xpose.msk.msra.mxu0 %vm300_vm0, %v18959_v32  ;;  %v19008_v32 = vld [vmem:[%s16630_s30 + $0x511] sm:$0xff] }
 0x2aa   : > { %15327 = vmatpush3.xpose.msk.msra.mxu1 %vm300_vm0, %v18962_v13  ;;  %15294 = vmatprep.subr.msk.mxu0 %vm300_vm0, %v18965_v0  ;;  %v19002_v0 = vld [vmem:[%s16630_s30 + $0x3e1] sm:$0xff]  ;;  %v19005_v13 = vld [vmem:[%s16630_s30 + $0x291] sm:$0xff]  ;;  %23395 = vst [vmem:[#allocation66_spill] sm:$0xff] %v19008_v32 }
 0x2ab   : > { %15328 = vmatprep.subr.msk.mxu1 %vm300_vm0, %v18968_v9  ;;  %v18999_v9 = vld [vmem:[%s16630_s30 + $0x161] sm:$0xff]  ;;  %23393 = vst [vmem:[#allocation64_spill] sm:$0xff] %v19002_v0  ;;  %23394 = vst [vmem:[#allocation65_spill] sm:$0xff] %v19005_v13 }
 0x2ac   : > { %23392 = vst [vmem:[#allocation63_spill] sm:$0xff] %v18999_v9 }
 0x2ad   : > { %15295 = vmatpush3.xpose.msk.msra.mxu0 %vm300_vm0, %v18979_v5  ;;  %v12429_v5 = vld [vmem:[%s16630_s30 + $0x501] sm:$0xff] }
 0x2ae   : > { %15329 = vmatpush3.xpose.msk.msra.mxu1 %vm300_vm0, %v18982_v16  ;;  %15296 = vmatprep.subr.msk.mxu0 %vm300_vm0, %v18985_v24  ;;  %v19022_v24 = vld [vmem:[%s16630_s30 + $0x3d1] sm:$0xff]  ;;  %v12397_v16 = vld [vmem:[%s16630_s30 + $0x281] sm:$0xff] }
 0x2af   : > { %15330 = vmatprep.subr.msk.mxu1 %vm300_vm0, %v18988_v26  ;;  %v19019_v26 = vld [vmem:[%s16630_s30 + $0x151] sm:$0xff]  ;;  %23397 = vst [vmem:[#allocation68_spill] sm:$0xff] %v19022_v24 }
 0x2b0   : > { %23396 = vst [vmem:[#allocation67_spill] sm:$0xff] %v19019_v26 }
 0x2b1   : > { %15297 = vmatpush3.xpose.msk.msra.mxu0 %vm300_vm0, %v18999_v9  ;;  %v19038_v9 = vld [vmem:[%s16630_s30 + $0x4d1] sm:$0xff] }
 0x2b2   : > { %15331 = vmatpush3.xpose.msk.msra.mxu1 %vm300_vm0, %v19002_v0  ;;  %15298 = vmatprep.subr.msk.mxu0 %vm300_vm0, %v19005_v13  ;;  %v12413_v13 = vld [vmem:[%s16630_s30 + $0x3c1] sm:$0xff]  ;;  %v19035_v0 = vld [vmem:[%s16630_s30 + $0x251] sm:$0xff]  ;;  %23399 = vst [vmem:[#allocation70_spill] sm:$0xff] %v19038_v9 }
 0x2b3   : > { %15332 = vmatprep.subr.msk.mxu1 %vm300_vm0, %v19008_v32  ;;  %v12381_v32 = vld [vmem:[%s16630_s30 + $0x141] sm:$0xff]  ;;  %23398 = vst [vmem:[#allocation69_spill] sm:$0xff] %v19035_v0 }
 0x2b5   : > { %15299 = vmatpush3.xpose.msk.msra.mxu0 %vm300_vm0, %v19019_v26  ;;  %v19056_v26 = vld [vmem:[%s16630_s30 + $0x4c1] sm:$0xff] }
 0x2b6   : > { %15333 = vmatpush3.xpose.msk.msra.mxu1 %vm300_vm0, %v19022_v24  ;;  %15300 = vmatprep.subr.msk.mxu0 %vm300_vm0, %v12397_v16  ;;  %v19050_v16 = vld [vmem:[%s16630_s30 + $0x391] sm:$0xff]  ;;  %v19053_v24 = vld [vmem:[%s16630_s30 + $0x241] sm:$0xff]  ;;  %23403 = vst [vmem:[#allocation6_spill] sm:$0xff] %v19056_v26 }
 0x2b7   : > { %15334 = vmatprep.subr.msk.mxu1 %vm300_vm0, %v12429_v5  ;;  %v19047_v5 = vld [vmem:[%s16630_s30 + $0x111] sm:$0xff]  ;;  %23401 = vst [vmem:[#allocation72_spill] sm:$0xff] %v19050_v16  ;;  %23402 = vst [vmem:[#allocation73_spill] sm:$0xff] %v19053_v24 }
 0x2b8   : > { %23400 = vst [vmem:[#allocation71_spill] sm:$0xff] %v19047_v5 }
 0x2b9   : > { %15301 = vmatpush3.xpose.msk.msra.mxu0 %vm300_vm0, %v12381_v32  ;;  %v19067_v32 = vld [vmem:[%s16630_s30 + $0x101] sm:$0xff] }
 0x2ba   : > { %15335 = vmatpush3.xpose.msk.msra.mxu1 %vm300_vm0, %v12413_v13  ;;  %15302 = vmatprep.subr.msk.mxu0 %vm300_vm0, %v19035_v0  ;;  %23404 = vst [vmem:[#allocation7_spill] sm:$0xff] %v19067_v32  ;;  %v19070_v13 = vld [vmem:[%s16630_s30 + $0x381] sm:$0xff]  ;;  %v19076_v0 = vld [vmem:[%s16630_s30 + $0x4b1] sm:$0xff] }
 0x2bb   : > { %15336 = vmatprep.subr.msk.mxu1 %vm300_vm0, %v19038_v9  ;;  %23405 = vst [vmem:[#allocation8_spill] sm:$0xff] %v19070_v13  ;;  %v19073_v9 = vld [vmem:[%s16630_s30 + $0x231] sm:$0xff]  ;;  %23407 = vst [vmem:[#allocation36_spill] sm:$0xff] %v19076_v0 }
 0x2bc   : > { %23406 = vst [vmem:[#allocation9_spill] sm:$0xff] %v19073_v9 }
 0x2bd   : > { %15303 = vmatpush3.xpose.msk.msra.mxu0 %vm300_vm0, %v19047_v5  ;;  %v19096_v5 = vld [vmem:[%s16630_s30 + $0x4a1] sm:$0xff] }
 0x2be   : > { %15337 = vmatpush3.xpose.msk.msra.mxu1 %vm300_vm0, %v19050_v16  ;;  %15304 = vmatprep.subr.msk.mxu0 %vm300_vm0, %v19053_v24  ;;  %v19090_v24 = vld [vmem:[%s16630_s30 + $0x371] sm:$0xff]  ;;  %v19093_v16 = vld [vmem:[%s16630_s30 + $0x221] sm:$0xff]  ;;  %23411 = vst [vmem:[#allocation37_spill] sm:$0xff] %v19096_v5 }
 0x2bf   : > { %15338 = vmatprep.subr.msk.mxu1 %vm300_vm0, %v19056_v26  ;;  %v19087_v26 = vld [vmem:[%s16630_s30 + $0xf1] sm:$0xff]  ;;  %23409 = vst [vmem:[#allocation35_spill] sm:$0xff] %v19090_v24  ;;  %23410 = vst [vmem:[#allocation39_spill] sm:$0xff] %v19093_v16 }
 0x2c0   : > { %23408 = vst [vmem:[#allocation34_spill] sm:$0xff] %v19087_v26 }
 0x2c1   : > { %15305 = vmatpush3.xpose.msk.msra.mxu0 %vm300_vm0, %v19067_v32  ;;  %v19116_v32 = vld [vmem:[%s16630_s30 + $0x491] sm:$0xff] }
 0x2c2   : > { %15339 = vmatpush3.xpose.msk.msra.mxu1 %vm300_vm0, %v19070_v13  ;;  %15306 = vmatprep.subr.msk.mxu0 %vm300_vm0, %v19073_v9  ;;  %v19110_v9 = vld [vmem:[%s16630_s30 + $0x361] sm:$0xff]  ;;  %v19113_v13 = vld [vmem:[%s16630_s30 + $0x211] sm:$0xff]  ;;  %23415 = vst [vmem:[#allocation11_spill] sm:$0xff] %v19116_v32 }
 0x2c3   : > { %15340 = vmatprep.subr.msk.mxu1 %vm300_vm0, %v19076_v0  ;;  %v19107_v0 = vld [vmem:[%s16630_s30 + $0xe1] sm:$0xff]  ;;  %23413 = vst [vmem:[#allocation40_spill] sm:$0xff] %v19110_v9  ;;  %23414 = vst [vmem:[#allocation10_spill] sm:$0xff] %v19113_v13 }
 0x2c4   : > { %23412 = vst [vmem:[#allocation38_spill] sm:$0xff] %v19107_v0 }
 0x2c5   : > { %15307 = vmatpush3.xpose.msk.msra.mxu0 %vm300_vm0, %v19087_v26  ;;  %v19136_v26 = vld [vmem:[%s16630_s30 + $0x481] sm:$0xff] }
 0x2c6   : > { %15341 = vmatpush3.xpose.msk.msra.mxu1 %vm300_vm0, %v19090_v24  ;;  %15308 = vmatprep.subr.msk.mxu0 %vm300_vm0, %v19093_v16  ;;  %v19130_v16 = vld [vmem:[%s16630_s30 + $0x351] sm:$0xff]  ;;  %v19133_v24 = vld [vmem:[%s16630_s30 + $0x201] sm:$0xff]  ;;  %23419 = vst [vmem:[#allocation15_spill] sm:$0xff] %v19136_v26 }
 0x2c7   : > { %15342 = vmatprep.subr.msk.mxu1 %vm300_vm0, %v19096_v5  ;;  %v19127_v5 = vld [vmem:[%s16630_s30 + $0xd1] sm:$0xff]  ;;  %23417 = vst [vmem:[#allocation13_spill] sm:$0xff] %v19130_v16  ;;  %23418 = vst [vmem:[#allocation14_spill] sm:$0xff] %v19133_v24 }
 0x2c8   : > { %23416 = vst [vmem:[#allocation12_spill] sm:$0xff] %v19127_v5 }
 0x2c9   : > { %15309 = vmatpush3.xpose.msk.msra.mxu0 %vm300_vm0, %v19107_v0  ;;  %v19156_v0 = vld [vmem:[%s16630_s30 + $0x471] sm:$0xff] }
 0x2ca   : > { %15343 = vmatpush3.xpose.msk.msra.mxu1 %vm300_vm0, %v19110_v9  ;;  %15310 = vmatprep.subr.msk.mxu0 %vm300_vm0, %v19113_v13  ;;  %v19150_v13 = vld [vmem:[%s16630_s30 + $0x341] sm:$0xff]  ;;  %v19153_v9 = vld [vmem:[%s16630_s30 + $0x1f1] sm:$0xff]  ;;  %23422 = vst [vmem:[#allocation18_spill] sm:$0xff] %v19156_v0 }
 0x2cb   : > { %15344 = vmatprep.subr.msk.mxu1 %vm300_vm0, %v19116_v32  ;;  %v19147_v32 = vld [vmem:[%s16630_s30 + $0xc1] sm:$0xff]  ;;  %23420 = vst [vmem:[#allocation16_spill] sm:$0xff] %v19150_v13  ;;  %23421 = vst [vmem:[#allocation17_spill] sm:$0xff] %v19153_v9 }
 0x2cd   : > { %15311 = vmatpush3.xpose.msk.msra.mxu0 %vm300_vm0, %v19127_v5  ;;  %v12421_v5 = vld [vmem:[%s16630_s30 + $0x461] sm:$0xff] }
 0x2ce   : > { %15345 = vmatpush3.xpose.msk.msra.mxu1 %vm300_vm0, %v19130_v16  ;;  %15312 = vmatprep.subr.msk.mxu0 %vm300_vm0, %v19133_v24  ;;  %v19170_v24 = vld [vmem:[%s16630_s30 + $0x331] sm:$0xff]  ;;  %v12389_v16 = vld [vmem:[%s16630_s30 + $0x1e1] sm:$0xff] }
 0x2cf   : > { %15346 = vmatprep.subr.msk.mxu1 %vm300_vm0, %v19136_v26  ;;  %v19167_v26 = vld [vmem:[%s16630_s30 + $0xb1] sm:$0xff]  ;;  %23423 = vst [vmem:[#allocation19_spill] sm:$0xff] %v19170_v24 }
 0x2d1   : > { %15313 = vmatpush3.xpose.msk.msra.mxu0 %vm300_vm0, %v19147_v32 }
 0x2d2   : > { %15347 = vmatpush3.xpose.msk.msra.mxu1 %vm300_vm0, %v19150_v13  ;;  %15314 = vmatprep.subr.msk.mxu0 %vm300_vm0, %v19153_v9  ;;  %v12373_v9 = vld [vmem:[%s16630_s30 + $0xa1] sm:$0xff]  ;;  %v19183_v13 = vld [vmem:[%s16630_s30 + $0x572] sm:$0xff] }
 0x2d3   : > { %15348 = vmatprep.subr.msk.mxu1 %vm300_vm0, %v19156_v0  ;;  %v12405_v0 = vld [vmem:[%s16630_s30 + $0x321] sm:$0xff] }
 0x2d5   : > { %15315 = vmatpush3.xpose.msk.msra.mxu0 %vm300_vm0, %v19167_v26 }
 0x2d6   : > { %15349 = vmatpush3.xpose.msk.msra.mxu1 %vm300_vm0, %v19170_v24  ;;  %15316 = vmatprep.subr.msk.mxu0 %vm300_vm0, %v12389_v16  ;;  %v19192_v24 = vld [vmem:[%s16630_s30 + $0x562] sm:$0xff]  ;;  %v19567_v16 = vld [vmem:[%s16630_s30 + $0x230] sm:$0xff] }
 0x2d7   : > { %15350 = vmatprep.subr.msk.mxu1 %vm300_vm0, %v12421_v5  ;;  %v19564_v5 = vld [vmem:[%s16630_s30 + $0x380] sm:$0xff] }
 0x2d9   : > { %15317 = vmatpush3.xpose.msk.msra.mxu0 %vm300_vm0, %v12373_v9  ;;  %v19201_v9 = vld [vmem:[%s22842_s1 + $0x58] sm:$0xff] }
 0x2da   : > { %15351 = vmatpush3.xpose.msk.msra.mxu1 %vm300_vm0, %v12405_v0  ;;  %15354 = vmatprep.subr.msk.mxu0 %vm300_vm0, %v18602_v12  ;;  %v19212_v12 = vld [vmem:[%s16630_s30 + $0x552] sm:$0xff]  ;;  %v19561_v0 = vld [vmem:[%s16630_s30 + $0x100] sm:$0xff] }
 0x2db   : > { %15388 = vmatprep.subr.msk.mxu1 %vm300_vm0, %v19183_v13 }
 0x2dc   : > { %15319 = vmatmul.mubr.msk.f32.vlgmr.msra.gmra.mxu0 %vm300_vm0, %v18904_v35 }
 0x2dd   : > { %15353 = vmatmul.mubr.msk.f32.vlgmr.msra.gmra.mxu1 %vm300_vm0, %v18904_v35  ;;  %15355 = vmatpush3.xpose.msk.msra.mxu0 %vm300_vm0, %v18587_v6  ;;  %v19227_v6 = vld [vmem:[%s16630_s30 + $0x542] sm:$0xff] }
 0x2de   : > { %15389 = vmatpush3.xpose.msk.msra.mxu1 %vm300_vm0, %v18590_v7  ;;  %15356 = vmatprep.subr.msk.mxu0 %vm300_vm0, %v18619_v17  ;;  %v19238_v7 = vld [vmem:[%s16630_s30 + $0x532] sm:$0xff]  ;;  %v19550_v35 = vld [vmem:[%s16630_s30 + $0x4c0] sm:$0xff] }
 0x2df   : > { %15390 = vmatprep.subr.msk.mxu1 %vm300_vm0, %v19192_v24  ;;  %15386 = vmatprep.mubr.msk.f32.mxu0 %vm300_vm0, %v19201_v9  ;;  %v19263_v17 = vld [vmem:[%s16630_s30 + $0x512] sm:$0xff] }
 0x2e0   : > { %15420 = vmatprep.mubr.msk.f32.mxu1 %vm300_vm0, %v19201_v9 }
 0x2e1   : > { %15357 = vmatpush3.xpose.msk.msra.mxu0 %vm300_vm0, %v18605_v14  ;;  %v19249_v14 = vld [vmem:[%s16630_s30 + $0x522] sm:$0xff] }
 0x2e2   : > { %15391 = vmatpush3.xpose.msk.msra.mxu1 %vm300_vm0, %v18608_v15  ;;  %15358 = vmatprep.subr.msk.mxu0 %vm300_vm0, %v18636_v21  ;;  %v19260_v15 = vld [vmem:[%s16630_s30 + $0x292] sm:$0xff]  ;;  %v12528_v21 = vld [vmem:[%s16630_s30 + $0x282] sm:$0xff] }
 0x2e3   : > { %15392 = vmatprep.subr.msk.mxu1 %vm300_vm0, %v19212_v12 }
 0x2e5   : > { %15359 = vmatpush3.xpose.msk.msra.mxu0 %vm300_vm0, %v18622_v18  ;;  %v19274_v18 = vld [vmem:[%s16630_s30 + $0x152] sm:$0xff] }
 0x2e6   : > { %15393 = vmatpush3.xpose.msk.msra.mxu1 %vm300_vm0, %v18625_v19  ;;  %15360 = vmatprep.subr.msk.mxu0 %vm300_vm0, %v18653_v25  ;;  %v19277_v19 = vld [vmem:[%s16630_s30 + $0x3d2] sm:$0xff]  ;;  %v12544_v25 = vld [vmem:[%s16630_s30 + $0x3c2] sm:$0xff] }
 0x2e7   : > { %15394 = vmatprep.subr.msk.mxu1 %vm300_vm0, %v19227_v6 }
 0x2e9   : > { %15361 = vmatpush3.xpose.msk.msra.mxu0 %vm300_vm0, %v18639_v22  ;;  %v12560_v22 = vld [vmem:[%s16630_s30 + $0x502] sm:$0xff] }
 0x2ea   : > { %15395 = vmatpush3.xpose.msk.msra.mxu1 %vm300_vm0, %v18642_v23  ;;  %15362 = vmatprep.subr.msk.mxu0 %vm300_vm0, %v18670_v36  ;;  %v12512_v23 = vld [vmem:[%s16630_s30 + $0x142] sm:$0xff]  ;;  %v19476_v36 = vld [vmem:[%s16630_s30 + $0x170] sm:$0xff] }
 0x2eb   : > { %15396 = vmatprep.subr.msk.mxu1 %vm300_vm0, %v19238_v7 }
 0x2ed   : > { %15363 = vmatpush3.xpose.msk.msra.mxu0 %vm300_vm0, %v18656_v27  ;;  %v19462_v27 = vld [vmem:[%s16630_s30 + $0x400] sm:$0xff] }
 0x2ee   : > { %15397 = vmatpush3.xpose.msk.msra.mxu1 %vm300_vm0, %v18659_v28  ;;  %15364 = vmatprep.subr.msk.mxu0 %vm300_vm0, %v18687_v43  ;;  %v19465_v28 = vld [vmem:[%s16630_s30 + $0x2b0] sm:$0xff]  ;;  %v19493_v43 = vld [vmem:[%s16630_s30 + $0x160] sm:$0xff] }
 0x2ef   : > { %15398 = vmatprep.subr.msk.mxu1 %vm300_vm0, %v19249_v14 }
 0x2f1   : > { %15365 = vmatpush3.xpose.msk.msra.mxu0 %vm300_vm0, %v18673_v41  ;;  %v19479_v41 = vld [vmem:[%s16630_s30 + $0x3f0] sm:$0xff] }
 0x2f2   : > { %15399 = vmatpush3.xpose.msk.msra.mxu1 %vm300_vm0, %v18676_v31  ;;  %15366 = vmatprep.subr.msk.mxu0 %vm300_vm0, %v19260_v15  ;;  %v19482_v31 = vld [vmem:[%s16630_s30 + $0x2a0] sm:$0xff] }
 0x2f3   : > { %15400 = vmatprep.subr.msk.mxu1 %vm300_vm0, %v19263_v17 }
 0x2f5   : > { %15367 = vmatpush3.xpose.msk.msra.mxu0 %vm300_vm0, %v19274_v18 }
 0x2f6   : > { %15401 = vmatpush3.xpose.msk.msra.mxu1 %vm300_vm0, %v19277_v19  ;;  %15368 = vmatprep.subr.msk.mxu0 %vm300_vm0, %v12528_v21  ;;  %v19581_v21 = vld [vmem:[%s16630_s30 + $0xf0] sm:$0xff] }
 0x2f7   : > { %15402 = vmatprep.subr.msk.mxu1 %vm300_vm0, %v12560_v22  ;;  %23424 = vst [vmem:[#allocation20_spill] sm:$0xff] %v19581_v21  ;;  %v19584_v22 = vld [vmem:[%s16630_s30 + $0x370] sm:$0xff] }
 0x2f8   : > { %23425 = vst [vmem:[#allocation21_spill] sm:$0xff] %v19584_v22 }
 0x2f9   : > { %15369 = vmatpush3.xpose.msk.msra.mxu0 %vm300_vm0, %v12512_v23  ;;  %v19587_v23 = vld [vmem:[%s16630_s30 + $0x220] sm:$0xff] }
 0x2fa   : > { %15403 = vmatpush3.xpose.msk.msra.mxu1 %vm300_vm0, %v12544_v25  ;;  %15370 = vmatprep.subr.msk.mxu0 %vm300_vm0, %v18447_v29  ;;  %v19336_v29 = vld [vmem:[%s16630_s30 + $0x1f2] sm:$0xff]  ;;  %23426 = vst [vmem:[#allocation22_spill] sm:$0xff] %v19587_v23  ;;  %v19590_v25 = vld [vmem:[%s16630_s30 + $0x4a0] sm:$0xff] }
 0x2fb   : > { %15404 = vmatprep.subr.msk.mxu1 %vm300_vm0, %v18450_v34  ;;  %v19339_v34 = vld [vmem:[%s16630_s30 + $0x472] sm:$0xff]  ;;  %23427 = vst [vmem:[#allocation23_spill] sm:$0xff] %v19590_v25 }
 0x2fd   : > { %15371 = vmatpush3.xpose.msk.msra.mxu0 %vm300_vm0, %v18465_v37  ;;  %v19350_v37 = vld [vmem:[%s16630_s30 + $0xb2] sm:$0xff] }
 0x2fe   : > { %15405 = vmatpush3.xpose.msk.msra.mxu1 %vm300_vm0, %v18468_v38  ;;  %15372 = vmatprep.subr.msk.mxu0 %vm300_vm0, %v18471_v39  ;;  %v19353_v38 = vld [vmem:[%s16630_s30 + $0x332] sm:$0xff]  ;;  %v12520_v39 = vld [vmem:[%s16630_s30 + $0x1e2] sm:$0xff] }
 0x2ff   : > { %15406 = vmatprep.subr.msk.mxu1 %vm300_vm0, %v18474_v44  ;;  %v12552_v44 = vld [vmem:[%s16630_s30 + $0x462] sm:$0xff] }
 0x301   : > { %15373 = vmatpush3.xpose.msk.msra.mxu0 %vm300_vm0, %v18485_v45  ;;  %v12504_v45 = vld [vmem:[%s16630_s30 + $0xa2] sm:$0xff] }
 0x302   : > { %15407 = vmatpush3.xpose.msk.msra.mxu1 %vm300_vm0, %v18488_v46  ;;  %15374 = vmatprep.subr.msk.mxu0 %vm300_vm0, %v18491_v47  ;;  %v12536_v46 = vld [vmem:[%s16630_s30 + $0x322] sm:$0xff] }
 0x303   : > { %15408 = vmatprep.subr.msk.mxu1 %vm300_vm0, %v18494_v48  ;;  %v19366_v47 = vld [vmem:[%s16630_s30 + $0x300] sm:$0xff] }
 0x304   : > { %v19369_v48 = vld [vmem:[%s16630_s30 + $0x580] sm:$0xff] }
 0x305   : > { %15375 = vmatpush3.xpose.msk.msra.mxu0 %vm300_vm0, %v18505_v49  ;;  %v19378_v49 = vld [vmem:[%s16630_s30 + $0x1c0] sm:$0xff] }
 0x306   : > { %15409 = vmatpush3.xpose.msk.msra.mxu1 %vm300_vm0, %v18508_v50  ;;  %15376 = vmatprep.subr.msk.mxu0 %vm300_vm0, %v18511_v51  ;;  %v19381_v50 = vld [vmem:[%s16630_s30 + $0x440] sm:$0xff]  ;;  %v19384_v51 = vld [vmem:[%s16630_s30 + $0x2f0] sm:$0xff] }
 0x307   : > { %15410 = vmatprep.subr.msk.mxu1 %vm300_vm0, %v18514_v52  ;;  %v19393_v52 = vld [vmem:[%s22842_s1 + $0x60] sm:$0xff] }
 0x309   : > { %15377 = vmatpush3.xpose.msk.msra.mxu0 %vm300_vm0, %v18525_v53  ;;  %v19404_v53 = vld [vmem:[%s16630_s30 + $0x1b0] sm:$0xff] }
 0x30a   : > { %15411 = vmatpush3.xpose.msk.msra.mxu1 %vm300_vm0, %v18528_v54  ;;  %15378 = vmatprep.subr.msk.mxu0 %vm300_vm0, %v18531_v55  ;;  %v19407_v54 = vld [vmem:[%s16630_s30 + $0x430] sm:$0xff]  ;;  %v19410_v55 = vld [vmem:[%s16630_s30 + $0x2e0] sm:$0xff] }
 0x30b   : > { %15412 = vmatprep.subr.msk.mxu1 %vm300_vm0, %v18534_v56  ;;  %v19425_v56 = vld [vmem:[%s16630_s30 + $0x1a0] sm:$0xff] }
 0x30d   : > { %15379 = vmatpush3.xpose.msk.msra.mxu0 %vm300_vm0, %v18545_v57  ;;  %v19428_v57 = vld [vmem:[%s16630_s30 + $0x420] sm:$0xff] }
 0x30e   : > { %15413 = vmatpush3.xpose.msk.msra.mxu1 %vm300_vm0, %v18548_v58  ;;  %15380 = vmatprep.subr.msk.mxu0 %vm300_vm0, %v18551_v59  ;;  %v19431_v58 = vld [vmem:[%s16630_s30 + $0x2d0] sm:$0xff] }
 0x30f   : > { %15414 = vmatprep.subr.msk.mxu1 %vm300_vm0, %v18554_v60  ;;  %v19442_v59 = vld [vmem:[%s16630_s30 + $0x190] sm:$0xff] }
 0x310   : > { %v19445_v60 = vld [vmem:[%s16630_s30 + $0x410] sm:$0xff] }
 0x311   : > { %15381 = vmatpush3.xpose.msk.msra.mxu0 %vm300_vm0, %v18565_v1  ;;  %v19448_v1 = vld [vmem:[%s16630_s30 + $0x2c0] sm:$0xff] }
 0x312   : > { %15415 = vmatpush3.xpose.msk.msra.mxu1 %vm300_vm0, %v18568_v61  ;;  %15382 = vmatprep.subr.msk.mxu0 %vm300_vm0, %v19336_v29  ;;  %v19459_v61 = vld [vmem:[%s16630_s30 + $0x180] sm:$0xff] }
 0x313   : > { %15416 = vmatprep.subr.msk.mxu1 %vm300_vm0, %v19339_v34 }
 0x315   : > { %15383 = vmatpush3.xpose.msk.msra.mxu0 %vm300_vm0, %v19350_v37 }
 0x316   : > { %15417 = vmatpush3.xpose.msk.msra.mxu1 %vm300_vm0, %v19353_v38  ;;  %15384 = vmatprep.subr.msk.mxu0 %vm300_vm0, %v12520_v39  ;;  %v19601_v39 = vld [vmem:[%s16630_s30 + $0xe0] sm:$0xff] }
 0x317   : > { %15418 = vmatprep.subr.msk.mxu1 %vm300_vm0, %v12552_v44  ;;  %v19604_v44 = vld [vmem:[%s16630_s30 + $0x360] sm:$0xff] }
 0x319   : > { %15385 = vmatpush3.xpose.msk.msra.mxu0 %vm300_vm0, %v12504_v45  ;;  %v19607_v45 = vld [vmem:[%s16630_s30 + $0x210] sm:$0xff] }
 0x31a   : > { %15419 = vmatpush3.xpose.msk.msra.mxu1 %vm300_vm0, %v12536_v46  ;;  %15422 = vmatprep.subr.msk.mxu0 %vm300_vm0, %v19366_v47  ;;  %23428 = vst [vmem:[#allocation24_spill] sm:$0xff] %v19607_v45  ;;  %v19610_v46 = vld [vmem:[%s16630_s30 + $0x490] sm:$0xff] }
 0x31b   : > { %15456 = vmatprep.subr.msk.mxu1 %vm300_vm0, %v19369_v48  ;;  %23429 = vst [vmem:[#allocation25_spill] sm:$0xff] %v19610_v46 }
 0x31c   : > { %15387 = vmatmul.mubr.msk.f32.vlgmr.msra.gmra.mxu0 %vm300_vm0, %v19201_v9 }
 0x31d   : > { %15421 = vmatmul.mubr.msk.f32.vlgmr.msra.gmra.mxu1 %vm300_vm0, %v19201_v9  ;;  %15423 = vmatpush3.xpose.msk.msra.mxu0 %vm300_vm0, %v19378_v49  ;;  %v19570_v9 = vld [vmem:[%s16630_s30 + $0x4b0] sm:$0xff] }
 0x31e   : > { %15457 = vmatpush3.xpose.msk.msra.mxu1 %vm300_vm0, %v19381_v50  ;;  %15424 = vmatprep.subr.msk.mxu0 %vm300_vm0, %v19384_v51 }
 0x31f   : > { %15458 = vmatprep.subr.msk.mxu1 %vm300_vm0, %v18690_v4  ;;  %15454 = vmatprep.mubr.msk.f32.mxu0 %vm300_vm0, %v19393_v52  ;;  %v19496_v4 = vld [vmem:[%s16630_s30 + $0x3e0] sm:$0xff] }
 0x320   : > { %15488 = vmatprep.mubr.msk.f32.mxu1 %vm300_vm0, %v19393_v52 }
 0x321   : > { %15425 = vmatpush3.xpose.msk.msra.mxu0 %vm300_vm0, %v19404_v53 }
 0x322   : > { %15459 = vmatpush3.xpose.msk.msra.mxu1 %vm300_vm0, %v19407_v54  ;;  %15426 = vmatprep.subr.msk.mxu0 %vm300_vm0, %v19410_v55 }
 0x323   : > { %15460 = vmatprep.subr.msk.mxu1 %vm300_vm0, %v18700_v2  ;;  %v19507_v2 = vld [vmem:[%s16630_s30 + $0x260] sm:$0xff] }
 0x325   : > { %15427 = vmatpush3.xpose.msk.msra.mxu0 %vm300_vm0, %v19425_v56 }
 0x326   : > { %15461 = vmatpush3.xpose.msk.msra.mxu1 %vm300_vm0, %v19428_v57  ;;  %15428 = vmatprep.subr.msk.mxu0 %vm300_vm0, %v19431_v58 }
 0x327   : > { %15462 = vmatprep.subr.msk.mxu1 %vm300_vm0, %v18720_v3  ;;  %v19510_v3 = vld [vmem:[%s16630_s30 + $0x4e0] sm:$0xff] }
 0x329   : > { %15429 = vmatpush3.xpose.msk.msra.mxu0 %vm300_vm0, %v19442_v59 }
 0x32a   : > { %15463 = vmatpush3.xpose.msk.msra.mxu1 %vm300_vm0, %v19445_v60  ;;  %15430 = vmatprep.subr.msk.mxu0 %vm300_vm0, %v19448_v1 }
 0x32b   : > { %15464 = vmatprep.subr.msk.mxu1 %vm300_vm0, %v18735_v62  ;;  %v19521_v62 = vld [vmem:[%s16630_s30 + $0x120] sm:$0xff] }
 0x32d   : > { %15431 = vmatpush3.xpose.msk.msra.mxu0 %vm300_vm0, %v19459_v61 }
 0x32e   : > { %15465 = vmatpush3.xpose.msk.msra.mxu1 %vm300_vm0, %v19462_v27  ;;  %15432 = vmatprep.subr.msk.mxu0 %vm300_vm0, %v19465_v28 }
 0x32f   : > { %15466 = vmatprep.subr.msk.mxu1 %vm300_vm0, %v18746_v42  ;;  %v19524_v42 = vld [vmem:[%s16630_s30 + $0x3a0] sm:$0xff] }
 0x331   : > { %15433 = vmatpush3.xpose.msk.msra.mxu0 %vm300_vm0, %v19476_v36 }
 0x332   : > { %15467 = vmatpush3.xpose.msk.msra.mxu1 %vm300_vm0, %v19479_v41  ;;  %15434 = vmatprep.subr.msk.mxu0 %vm300_vm0, %v19482_v31 }
 0x333   : > { %15468 = vmatprep.subr.msk.mxu1 %vm300_vm0, %v18757_v63  ;;  %v19527_v63 = vld [vmem:[%s16630_s30 + $0x250] sm:$0xff] }
 0x335   : > { %15435 = vmatpush3.xpose.msk.msra.mxu0 %vm300_vm0, %v19493_v43 }
 0x336   : > { %15469 = vmatpush3.xpose.msk.msra.mxu1 %vm300_vm0, %v19496_v4  ;;  %15436 = vmatprep.subr.msk.mxu0 %vm300_vm0, %v18768_v10  ;;  %v19530_v10 = vld [vmem:[%s16630_s30 + $0x4d0] sm:$0xff] }
 0x337   : > { %15470 = vmatprep.subr.msk.mxu1 %vm300_vm0, %v18771_v11  ;;  %v19541_v11 = vld [vmem:[%s16630_s30 + $0x110] sm:$0xff] }
 0x339   : > { %15437 = vmatpush3.xpose.msk.msra.mxu0 %vm300_vm0, %v18782_v30  ;;  %v19544_v30 = vld [vmem:[%s16630_s30 + $0x390] sm:$0xff] }
 0x33a   : > { %15471 = vmatpush3.xpose.msk.msra.mxu1 %vm300_vm0, %v18785_v20  ;;  %15438 = vmatprep.subr.msk.mxu0 %vm300_vm0, %v19507_v2  ;;  %v19547_v20 = vld [vmem:[%s16630_s30 + $0x240] sm:$0xff] }
 0x33b   : > { %15472 = vmatprep.subr.msk.mxu1 %vm300_vm0, %v19510_v3 }
 0x33d   : > { %15439 = vmatpush3.xpose.msk.msra.mxu0 %vm300_vm0, %v19521_v62 }
 0x33e   : > { %15473 = vmatpush3.xpose.msk.msra.mxu1 %vm300_vm0, %v19524_v42  ;;  %15440 = vmatprep.subr.msk.mxu0 %vm300_vm0, %v19527_v63 }
 0x33f   : > { %15474 = vmatprep.subr.msk.mxu1 %vm300_vm0, %v19530_v10 }
 0x341   : > { %15441 = vmatpush3.xpose.msk.msra.mxu0 %vm300_vm0, %v19541_v11 }
 0x342   : > { %15475 = vmatpush3.xpose.msk.msra.mxu1 %vm300_vm0, %v19544_v30  ;;  %15442 = vmatprep.subr.msk.mxu0 %vm300_vm0, %v19547_v20 }
 0x343   : > { %15476 = vmatprep.subr.msk.mxu1 %vm300_vm0, %v19550_v35 }
 0x345   : > { %15443 = vmatpush3.xpose.msk.msra.mxu0 %vm300_vm0, %v19561_v0 }
 0x346   : > { %15477 = vmatpush3.xpose.msk.msra.mxu1 %vm300_vm0, %v19564_v5  ;;  %15444 = vmatprep.subr.msk.mxu0 %vm300_vm0, %v19567_v16 }
 0x347   : > { %15478 = vmatprep.subr.msk.mxu1 %vm300_vm0, %v19570_v9 }
 0x349   : > { %15445 = vmatpush3.xpose.msk.msra.mxu0 %vm300_vm0, %v19581_v21  ;;  %v19630_v21 = vld [vmem:[%s16630_s30 + $0x480] sm:$0xff] }
 0x34a   : > { %15479 = vmatpush3.xpose.msk.msra.mxu1 %vm300_vm0, %v19584_v22  ;;  %15446 = vmatprep.subr.msk.mxu0 %vm300_vm0, %v19587_v23  ;;  %v19624_v23 = vld [vmem:[%s16630_s30 + $0x350] sm:$0xff]  ;;  %v19627_v22 = vld [vmem:[%s16630_s30 + $0x200] sm:$0xff]  ;;  %23432 = vst [vmem:[#allocation28_spill] sm:$0xff] %v19630_v21 }
 0x34b   : > { %15480 = vmatprep.subr.msk.mxu1 %vm300_vm0, %v19590_v25  ;;  %v19621_v25 = vld [vmem:[%s16630_s30 + $0xd0] sm:$0xff]  ;;  %23430 = vst [vmem:[#allocation26_spill] sm:$0xff] %v19624_v23  ;;  %23431 = vst [vmem:[#allocation27_spill] sm:$0xff] %v19627_v22 }
 0x34d   : > { %15447 = vmatpush3.xpose.msk.msra.mxu0 %vm300_vm0, %v19601_v39 }
 0x34e   : > { %15481 = vmatpush3.xpose.msk.msra.mxu1 %vm300_vm0, %v19604_v44  ;;  %15448 = vmatprep.subr.msk.mxu0 %vm300_vm0, %v19607_v45  ;;  %v19644_v45 = vld [vmem:[%s16630_s30 + $0x340] sm:$0xff] }
 0x34f   : > { %15482 = vmatprep.subr.msk.mxu1 %vm300_vm0, %v19610_v46  ;;  %v19641_v46 = vld [vmem:[%s16630_s30 + $0xc0] sm:$0xff]  ;;  %23434 = vst [vmem:[#allocation30_spill] sm:$0xff] %v19644_v45 }
 0x350   : > { %23433 = vst [vmem:[#allocation29_spill] sm:$0xff] %v19641_v46 }
 0x351   : > { %15449 = vmatpush3.xpose.msk.msra.mxu0 %vm300_vm0, %v19621_v25 }
 0x352   : > { %15483 = vmatpush3.xpose.msk.msra.mxu1 %vm300_vm0, %v19624_v23  ;;  %15450 = vmatprep.subr.msk.mxu0 %vm300_vm0, %v19627_v22  ;;  %v19655_v22 = vld [vmem:[%s16630_s30 + $0x301] sm:$0xff] }
 0x353   : > { %15484 = vmatprep.subr.msk.mxu1 %vm300_vm0, %v19630_v21  ;;  %23435 = vst [vmem:[#allocation31_spill] sm:$0xff] %v19655_v22  ;;  %v19658_v23 = vld [vmem:[%s16630_s30 + $0x581] sm:$0xff] }
 0x354   : > { %23436 = vst [vmem:[#allocation32_spill] sm:$0xff] %v19658_v23  ;;  %v23437_v21 = vld [vmem:[#allocation41_spill] sm:$0xff] }
 0x355   : > { %15451 = vmatpush3.xpose.msk.msra.mxu0 %vm300_vm0, %v19641_v46  ;;  %v23449_v46 = vld [vmem:[#allocation51_spill] sm:$0xff] }
 0x356   : > { %15485 = vmatpush3.xpose.msk.msra.mxu1 %vm300_vm0, %v19644_v45  ;;  %15452 = vmatprep.subr.msk.mxu0 %vm300_vm0, %v18844_v8  ;;  %v19669_v8 = vld [vmem:[%s16630_s30 + $0x1c1] sm:$0xff] }
 0x357   : > { %15486 = vmatprep.subr.msk.mxu1 %vm300_vm0, %v18847_v33  ;;  %23438 = vst [vmem:[#allocation33_spill] sm:$0xff] %v19669_v8  ;;  %v19672_v45 = vld [vmem:[%s16630_s30 + $0x441] sm:$0xff] }
 0x358   : > { %23439 = vst [vmem:[#allocation41_spill] sm:$0xff] %v19672_v45  ;;  %v19681_v33 = vld [vmem:[%s22842_s1 + $0x68] sm:$0xff] }
 0x359   : > { %15453 = vmatpush3.xpose.msk.msra.mxu0 %vm300_vm0, %v18858_v40  ;;  %v23440_v40 = vld [vmem:[#allocation42_spill] sm:$0xff] }
 0x35a   : > { %15487 = vmatpush3.xpose.msk.msra.mxu1 %vm300_vm0, %v23437_v21  ;;  %15490 = vmatprep.subr.msk.mxu0 %vm300_vm0, %v19655_v22  ;;  %v23441_v21 = vld [vmem:[#allocation43_spill] sm:$0xff]  ;;  %v23448_v22 = vld [vmem:[#allocation50_spill] sm:$0xff] }
 0x35b   : > { %15524 = vmatprep.subr.msk.mxu1 %vm300_vm0, %v19658_v23  ;;  %v23443_v23 = vld [vmem:[#allocation45_spill] sm:$0xff] }
 0x35c   : > { %15455 = vmatmul.mubr.msk.f32.vlgmr.msra.gmra.mxu0 %vm300_vm0, %v19393_v52 }
 0x35d   : > { %15489 = vmatmul.mubr.msk.f32.vlgmr.msra.gmra.mxu1 %vm300_vm0, %v19393_v52  ;;  %15491 = vmatpush3.xpose.msk.msra.mxu0 %vm300_vm0, %v19669_v8  ;;  %v23442_v52 = vld [vmem:[#allocation44_spill] sm:$0xff]  ;;  %v23444_v8 = vld [vmem:[#allocation46_spill] sm:$0xff] }
 0x35e   : > { %15525 = vmatpush3.xpose.msk.msra.mxu1 %vm300_vm0, %v19672_v45  ;;  %15492 = vmatprep.subr.msk.mxu0 %vm300_vm0, %v23440_v40  ;;  %v23445_v45 = vld [vmem:[#allocation47_spill] sm:$0xff]  ;;  %v23446_v40 = vld [vmem:[#allocation48_spill] sm:$0xff] }
 0x35f   : > { %15526 = vmatprep.subr.msk.mxu1 %vm300_vm0, %v23441_v21  ;;  %15522 = vmatprep.mubr.msk.f32.mxu0 %vm300_vm0, %v19681_v33  ;;  %v23447_v21 = vld [vmem:[#allocation49_spill] sm:$0xff] }
 0x360   : > { %15556 = vmatprep.mubr.msk.f32.mxu1 %vm300_vm0, %v19681_v33 }
 0x361   : > { %15493 = vmatpush3.xpose.msk.msra.mxu0 %vm300_vm0, %v23442_v52  ;;  %v23450_v52 = vld [vmem:[#allocation52_spill] sm:$0xff] }
 0x362   : > { %15527 = vmatpush3.xpose.msk.msra.mxu1 %vm300_vm0, %v23443_v23  ;;  %15494 = vmatprep.subr.msk.mxu0 %vm300_vm0, %v23444_v8  ;;  %v23451_v23 = vld [vmem:[#allocation53_spill] sm:$0xff]  ;;  %v23453_v8 = vld [vmem:[#allocation55_spill] sm:$0xff] }
 0x363   : > { %15528 = vmatprep.subr.msk.mxu1 %vm300_vm0, %v23445_v45  ;;  %v23452_v45 = vld [vmem:[#allocation54_spill] sm:$0xff] }
 0x365   : > { %15495 = vmatpush3.xpose.msk.msra.mxu0 %vm300_vm0, %v23446_v40  ;;  %v23454_v40 = vld [vmem:[#allocation56_spill] sm:$0xff] }
 0x366   : > { %15529 = vmatpush3.xpose.msk.msra.mxu1 %vm300_vm0, %v23447_v21  ;;  %15496 = vmatprep.subr.msk.mxu0 %vm300_vm0, %v23448_v22  ;;  %v23455_v22 = vld [vmem:[#allocation57_spill] sm:$0xff]  ;;  %v23457_v21 = vld [vmem:[#allocation59_spill] sm:$0xff] }
 0x367   : > { %15530 = vmatprep.subr.msk.mxu1 %vm300_vm0, %v23449_v46  ;;  %v23456_v46 = vld [vmem:[#allocation58_spill] sm:$0xff] }
 0x369   : > { %15497 = vmatpush3.xpose.msk.msra.mxu0 %vm300_vm0, %v23450_v52  ;;  %v23458_v52 = vld [vmem:[#allocation60_spill] sm:$0xff] }
 0x36a   : > { %15531 = vmatpush3.xpose.msk.msra.mxu1 %vm300_vm0, %v23451_v23  ;;  %15498 = vmatprep.subr.msk.mxu0 %vm300_vm0, %v23452_v45  ;;  %v23459_v23 = vld [vmem:[#allocation5_spill] sm:$0xff] }
 0x36b   : > { %15532 = vmatprep.subr.msk.mxu1 %vm300_vm0, %v23453_v8  ;;  %v23460_v45 = vld [vmem:[#allocation61_spill] sm:$0xff]  ;;  %v23461_v8 = vld [vmem:[#allocation62_spill] sm:$0xff] }
 0x36d   : > { %15499 = vmatpush3.xpose.msk.msra.mxu0 %vm300_vm0, %v23454_v40  ;;  %v23462_v40 = vld [vmem:[#allocation63_spill] sm:$0xff] }
 0x36e   : > { %15533 = vmatpush3.xpose.msk.msra.mxu1 %vm300_vm0, %v23455_v22  ;;  %15500 = vmatprep.subr.msk.mxu0 %vm300_vm0, %v23456_v46  ;;  %v23463_v22 = vld [vmem:[#allocation64_spill] sm:$0xff]  ;;  %v23464_v46 = vld [vmem:[#allocation65_spill] sm:$0xff] }
 0x36f   : > { %15534 = vmatprep.subr.msk.mxu1 %vm300_vm0, %v23457_v21  ;;  %v23465_v21 = vld [vmem:[#allocation66_spill] sm:$0xff] }
 0x371   : > { %15501 = vmatpush3.xpose.msk.msra.mxu0 %vm300_vm0, %v23458_v52  ;;  %v19744_v52 = vld [vmem:[%s16630_s30 + $0x261] sm:$0xff] }
 0x372   : > { %15535 = vmatpush3.xpose.msk.msra.mxu1 %vm300_vm0, %v23459_v23  ;;  %15502 = vmatprep.subr.msk.mxu0 %vm300_vm0, %v23460_v45  ;;  %23466 = vst [vmem:[#allocation42_spill] sm:$0xff] %v19744_v52  ;;  %v19747_v23 = vld [vmem:[%s16630_s30 + $0x4e1] sm:$0xff]  ;;  %v23468_v45 = vld [vmem:[#allocation67_spill] sm:$0xff] }
 0x373   : > { %15536 = vmatprep.subr.msk.mxu1 %vm300_vm0, %v23461_v8  ;;  %23467 = vst [vmem:[#allocation43_spill] sm:$0xff] %v19747_v23  ;;  %v23469_v8 = vld [vmem:[#allocation68_spill] sm:$0xff] }
 0x375   : > { %15503 = vmatpush3.xpose.msk.msra.mxu0 %vm300_vm0, %v23462_v40  ;;  %v19758_v40 = vld [vmem:[%s16630_s30 + $0x121] sm:$0xff] }
 0x376   : > { %15537 = vmatpush3.xpose.msk.msra.mxu1 %vm300_vm0, %v23463_v22  ;;  %15504 = vmatprep.subr.msk.mxu0 %vm300_vm0, %v23464_v46  ;;  %23470 = vst [vmem:[#allocation44_spill] sm:$0xff] %v19758_v40  ;;  %v19761_v22 = vld [vmem:[%s16630_s30 + $0x3a1] sm:$0xff] }
 0x377   : > { %15538 = vmatprep.subr.msk.mxu1 %vm300_vm0, %v23465_v21  ;;  %23471 = vst [vmem:[#allocation45_spill] sm:$0xff] %v19761_v22  ;;  %v23472_v46 = vld [vmem:[#allocation69_spill] sm:$0xff]  ;;  %v23473_v21 = vld [vmem:[#allocation70_spill] sm:$0xff] }
 0x379   : > { %15505 = vmatpush3.xpose.msk.msra.mxu0 %vm300_vm0, %v23468_v45  ;;  %v23474_v45 = vld [vmem:[#allocation71_spill] sm:$0xff] }
 0x37a   : > { %15539 = vmatpush3.xpose.msk.msra.mxu1 %vm300_vm0, %v23469_v8  ;;  %15506 = vmatprep.subr.msk.mxu0 %vm300_vm0, %v19744_v52  ;;  %v23475_v8 = vld [vmem:[#allocation72_spill] sm:$0xff]  ;;  %v23477_v52 = vld [vmem:[#allocation6_spill] sm:$0xff] }
 0x37b   : > { %15540 = vmatprep.subr.msk.mxu1 %vm300_vm0, %v19747_v23  ;;  %v23476_v23 = vld [vmem:[#allocation73_spill] sm:$0xff] }
 0x37d   : > { %15507 = vmatpush3.xpose.msk.msra.mxu0 %vm300_vm0, %v19758_v40  ;;  %v23478_v40 = vld [vmem:[#allocation7_spill] sm:$0xff] }
 0x37e   : > { %15541 = vmatpush3.xpose.msk.msra.mxu1 %vm300_vm0, %v19761_v22  ;;  %15508 = vmatprep.subr.msk.mxu0 %vm300_vm0, %v23472_v46  ;;  %v23479_v22 = vld [vmem:[#allocation8_spill] sm:$0xff]  ;;  %v23480_v46 = vld [vmem:[#allocation9_spill] sm:$0xff] }
 0x37f   : > { %15542 = vmatprep.subr.msk.mxu1 %vm300_vm0, %v23473_v21  ;;  %v23481_v21 = vld [vmem:[#allocation36_spill] sm:$0xff] }
 0x381   : > { %15509 = vmatpush3.xpose.msk.msra.mxu0 %vm300_vm0, %v23474_v45  ;;  %v23482_v45 = vld [vmem:[#allocation34_spill] sm:$0xff] }
 0x382   : > { %15543 = vmatpush3.xpose.msk.msra.mxu1 %vm300_vm0, %v23475_v8  ;;  %15510 = vmatprep.subr.msk.mxu0 %vm300_vm0, %v23476_v23  ;;  %v23483_v8 = vld [vmem:[#allocation35_spill] sm:$0xff]  ;;  %v23485_v23 = vld [vmem:[#allocation37_spill] sm:$0xff] }
 0x383   : > { %15544 = vmatprep.subr.msk.mxu1 %vm300_vm0, %v23477_v52  ;;  %v23484_v52 = vld [vmem:[#allocation39_spill] sm:$0xff] }
 0x385   : > { %15511 = vmatpush3.xpose.msk.msra.mxu0 %vm300_vm0, %v23478_v40  ;;  %v23486_v40 = vld [vmem:[#allocation38_spill] sm:$0xff] }
 0x386   : > { %15545 = vmatpush3.xpose.msk.msra.mxu1 %vm300_vm0, %v23479_v22  ;;  %15512 = vmatprep.subr.msk.mxu0 %vm300_vm0, %v23480_v46  ;;  %v23487_v22 = vld [vmem:[#allocation40_spill] sm:$0xff]  ;;  %v23488_v46 = vld [vmem:[#allocation10_spill] sm:$0xff] }
 0x387   : > { %15546 = vmatprep.subr.msk.mxu1 %vm300_vm0, %v23481_v21  ;;  %v23489_v21 = vld [vmem:[#allocation11_spill] sm:$0xff] }
 0x389   : > { %15513 = vmatpush3.xpose.msk.msra.mxu0 %vm300_vm0, %v23482_v45  ;;  %v23490_v45 = vld [vmem:[#allocation12_spill] sm:$0xff] }
 0x38a   : > { %15547 = vmatpush3.xpose.msk.msra.mxu1 %vm300_vm0, %v23483_v8  ;;  %15514 = vmatprep.subr.msk.mxu0 %vm300_vm0, %v23484_v52  ;;  %v23491_v8 = vld [vmem:[#allocation13_spill] sm:$0xff]  ;;  %v23492_v52 = vld [vmem:[#allocation14_spill] sm:$0xff] }
 0x38b   : > { %15548 = vmatprep.subr.msk.mxu1 %vm300_vm0, %v23485_v23  ;;  %v23493_v23 = vld [vmem:[#allocation15_spill] sm:$0xff] }
 0x38d   : > { %15515 = vmatpush3.xpose.msk.msra.mxu0 %vm300_vm0, %v23486_v40  ;;  %v23494_v40 = vld [vmem:[#allocation16_spill] sm:$0xff] }
 0x38e   : > { %15549 = vmatpush3.xpose.msk.msra.mxu1 %vm300_vm0, %v23487_v22  ;;  %15516 = vmatprep.subr.msk.mxu0 %vm300_vm0, %v23488_v46  ;;  %v23495_v22 = vld [vmem:[#allocation17_spill] sm:$0xff]  ;;  %v23496_v46 = vld [vmem:[#allocation18_spill] sm:$0xff] }
 0x38f   : > { %15550 = vmatprep.subr.msk.mxu1 %vm300_vm0, %v23489_v21  ;;  %v19820_v21 = vld [vmem:[%s16630_s30 + $0x302] sm:$0xff] }
 0x391   : > { %15517 = vmatpush3.xpose.msk.msra.mxu0 %vm300_vm0, %v23490_v45  ;;  %v19823_v45 = vld [vmem:[%s16630_s30 + $0x582] sm:$0xff] }
 0x392   : > { %15551 = vmatpush3.xpose.msk.msra.mxu1 %vm300_vm0, %v23491_v8  ;;  %15518 = vmatprep.subr.msk.mxu0 %vm300_vm0, %v23492_v52  ;;  %v23497_v8 = vld [vmem:[#allocation19_spill] sm:$0xff]  ;;  %v19837_v52 = vld [vmem:[%s16630_s30 + $0x442] sm:$0xff] }
 0x393   : > { %15552 = vmatprep.subr.msk.mxu1 %vm300_vm0, %v23493_v23  ;;  %v19840_v23 = vld [vmem:[%s16630_s30 + $0x2f2] sm:$0xff] }
 0x395   : > { %15519 = vmatpush3.xpose.msk.msra.mxu0 %vm300_vm0, %v19147_v32  ;;  %v19834_v32 = vld [vmem:[%s16630_s30 + $0x1c2] sm:$0xff] }
 0x396   : > { %15553 = vmatpush3.xpose.msk.msra.mxu1 %vm300_vm0, %v23494_v40  ;;  %15520 = vmatprep.subr.msk.mxu0 %vm300_vm0, %v23495_v22  ;;  %v19863_v40 = vld [vmem:[%s16630_s30 + $0x432] sm:$0xff]  ;;  %v19866_v22 = vld [vmem:[%s16630_s30 + $0x2e2] sm:$0xff] }
 0x397   : > { %15554 = vmatprep.subr.msk.mxu1 %vm300_vm0, %v23496_v46  ;;  %23498 = vst [vmem:[#allocation46_spill] sm:$0xff] %v19863_v40  ;;  %23499 = vst [vmem:[#allocation47_spill] sm:$0xff] %v19866_v22  ;;  %v19884_v46 = vld [vmem:[%s16630_s30 + $0x422] sm:$0xff] }
 0x398   : > { %23500 = vst [vmem:[#allocation48_spill] sm:$0xff] %v19884_v46 }
 0x399   : > { %15521 = vmatpush3.xpose.msk.msra.mxu0 %vm300_vm0, %v19167_v26  ;;  %v19849_v26 = vld [vmem:[%s22842_s1 + $0x70] sm:$0xff] }
 0x39a   : > { %15555 = vmatpush3.xpose.msk.msra.mxu1 %vm300_vm0, %v23497_v8  ;;  %15558 = vmatprep.subr.msk.mxu0 %vm300_vm0, %v19820_v21  ;;  %v19887_v8 = vld [vmem:[%s16630_s30 + $0x2d2] sm:$0xff] }
 0x39b   : > { %15592 = vmatprep.subr.msk.mxu1 %vm300_vm0, %v19823_v45  ;;  %23501 = vst [vmem:[#allocation49_spill] sm:$0xff] %v19887_v8 }
 0x39c   : > { %15523 = vmatmul.mubr.msk.f32.vlgmr.msra.gmra.mxu0 %vm300_vm0, %v19681_v33 }
 0x39d   : > { %15557 = vmatmul.mubr.msk.f32.vlgmr.msra.gmra.mxu1 %vm300_vm0, %v19681_v33  ;;  %15559 = vmatpush3.xpose.msk.msra.mxu0 %vm300_vm0, %v19834_v32  ;;  %v19860_v33 = vld [vmem:[%s16630_s30 + $0x1b2] sm:$0xff] }
 0x39e   : > { %15593 = vmatpush3.xpose.msk.msra.mxu1 %vm300_vm0, %v19837_v52  ;;  %15560 = vmatprep.subr.msk.mxu0 %vm300_vm0, %v19840_v23 }
 0x39f   : > { %15594 = vmatprep.subr.msk.mxu1 %vm300_vm0, %v19183_v13  ;;  %15590 = vmatprep.mubr.msk.f32.mxu0 %vm300_vm0, %v19849_v26  ;;  %v19881_v13 = vld [vmem:[%s16630_s30 + $0x1a2] sm:$0xff] }
 0x3a0   : > { %15624 = vmatprep.mubr.msk.f32.mxu1 %vm300_vm0, %v19849_v26 }
 0x3a1   : > { %15561 = vmatpush3.xpose.msk.msra.mxu0 %vm300_vm0, %v19860_v33 }
 0x3a2   : > { %15595 = vmatpush3.xpose.msk.msra.mxu1 %vm300_vm0, %v19863_v40  ;;  %15562 = vmatprep.subr.msk.mxu0 %vm300_vm0, %v19866_v22  ;;  %v19901_v22 = vld [vmem:[%s16630_s30 + $0x412] sm:$0xff]  ;;  %v19904_v40 = vld [vmem:[%s16630_s30 + $0x2c2] sm:$0xff] }
 0x3a3   : > { %15596 = vmatprep.subr.msk.mxu1 %vm300_vm0, %v19192_v24  ;;  %v19898_v24 = vld [vmem:[%s16630_s30 + $0x192] sm:$0xff]  ;;  %23502 = vst [vmem:[#allocation50_spill] sm:$0xff] %v19901_v22  ;;  %23503 = vst [vmem:[#allocation51_spill] sm:$0xff] %v19904_v40 }
 0x3a5   : > { %15563 = vmatpush3.xpose.msk.msra.mxu0 %vm300_vm0, %v19881_v13 }
 0x3a6   : > { %15597 = vmatpush3.xpose.msk.msra.mxu1 %vm300_vm0, %v19884_v46  ;;  %15564 = vmatprep.subr.msk.mxu0 %vm300_vm0, %v19887_v8  ;;  %v19918_v8 = vld [vmem:[%s16630_s30 + $0x402] sm:$0xff]  ;;  %v19921_v46 = vld [vmem:[%s16630_s30 + $0x2b2] sm:$0xff] }
 0x3a7   : > { %15598 = vmatprep.subr.msk.mxu1 %vm300_vm0, %v19212_v12  ;;  %v19915_v12 = vld [vmem:[%s16630_s30 + $0x182] sm:$0xff]  ;;  %23504 = vst [vmem:[#allocation52_spill] sm:$0xff] %v19921_v46 }
 0x3a9   : > { %15565 = vmatpush3.xpose.msk.msra.mxu0 %vm300_vm0, %v19898_v24 }
 0x3aa   : > { %15599 = vmatpush3.xpose.msk.msra.mxu1 %vm300_vm0, %v19901_v22  ;;  %15566 = vmatprep.subr.msk.mxu0 %vm300_vm0, %v19904_v40  ;;  %v19935_v40 = vld [vmem:[%s16630_s30 + $0x3f2] sm:$0xff]  ;;  %v19938_v22 = vld [vmem:[%s16630_s30 + $0x2a2] sm:$0xff] }
 0x3ab   : > { %15600 = vmatprep.subr.msk.mxu1 %vm300_vm0, %v19227_v6  ;;  %v19932_v6 = vld [vmem:[%s16630_s30 + $0x172] sm:$0xff]  ;;  %23505 = vst [vmem:[#allocation53_spill] sm:$0xff] %v19938_v22 }
 0x3ad   : > { %15567 = vmatpush3.xpose.msk.msra.mxu0 %vm300_vm0, %v19915_v12 }
 0x3ae   : > { %15601 = vmatpush3.xpose.msk.msra.mxu1 %vm300_vm0, %v19918_v8  ;;  %15568 = vmatprep.subr.msk.mxu0 %vm300_vm0, %v19921_v46  ;;  %v19952_v46 = vld [vmem:[%s16630_s30 + $0x3e2] sm:$0xff] }
 0x3af   : > { %15602 = vmatprep.subr.msk.mxu1 %vm300_vm0, %v19238_v7  ;;  %v19949_v7 = vld [vmem:[%s16630_s30 + $0x162] sm:$0xff]  ;;  %23507 = vst [vmem:[#allocation55_spill] sm:$0xff] %v19952_v46 }
 0x3b0   : > { %23506 = vst [vmem:[#allocation54_spill] sm:$0xff] %v19949_v7 }
 0x3b1   : > { %15569 = vmatpush3.xpose.msk.msra.mxu0 %vm300_vm0, %v19932_v6 }
 0x3b2   : > { %15603 = vmatpush3.xpose.msk.msra.mxu1 %vm300_vm0, %v19935_v40  ;;  %15570 = vmatprep.subr.msk.mxu0 %vm300_vm0, %v19938_v22  ;;  %v19966_v22 = vld [vmem:[%s16630_s30 + $0x4e2] sm:$0xff] }
 0x3b3   : > { %15604 = vmatprep.subr.msk.mxu1 %vm300_vm0, %v19249_v14  ;;  %v19963_v14 = vld [vmem:[%s16630_s30 + $0x262] sm:$0xff]  ;;  %23509 = vst [vmem:[#allocation57_spill] sm:$0xff] %v19966_v22 }
 0x3b4   : > { %23508 = vst [vmem:[#allocation56_spill] sm:$0xff] %v19963_v14 }
 0x3b5   : > { %15571 = vmatpush3.xpose.msk.msra.mxu0 %vm300_vm0, %v19949_v7  ;;  %v19986_v7 = vld [vmem:[%s16630_s30 + $0x4d2] sm:$0xff] }
 0x3b6   : > { %15605 = vmatpush3.xpose.msk.msra.mxu1 %vm300_vm0, %v19952_v46  ;;  %15572 = vmatprep.subr.msk.mxu0 %vm300_vm0, %v19260_v15  ;;  %v19977_v15 = vld [vmem:[%s16630_s30 + $0x122] sm:$0xff]  ;;  %v19983_v46 = vld [vmem:[%s16630_s30 + $0x252] sm:$0xff]  ;;  %23513 = vst [vmem:[#allocation5_spill] sm:$0xff] %v19986_v7 }
 0x3b7   : > { %15606 = vmatprep.subr.msk.mxu1 %vm300_vm0, %v19263_v17  ;;  %23510 = vst [vmem:[#allocation58_spill] sm:$0xff] %v19977_v15  ;;  %v19980_v17 = vld [vmem:[%s16630_s30 + $0x3a2] sm:$0xff]  ;;  %23512 = vst [vmem:[#allocation60_spill] sm:$0xff] %v19983_v46 }
 0x3b8   : > { %23511 = vst [vmem:[#allocation59_spill] sm:$0xff] %v19980_v17 }
 0x3b9   : > { %15573 = vmatpush3.xpose.msk.msra.mxu0 %vm300_vm0, %v19274_v18  ;;  %v19997_v18 = vld [vmem:[%s16630_s30 + $0x112] sm:$0xff] }
 0x3ba   : > { %15607 = vmatpush3.xpose.msk.msra.mxu1 %vm300_vm0, %v19277_v19  ;;  %15574 = vmatprep.subr.msk.mxu0 %vm300_vm0, %v19963_v14  ;;  %23514 = vst [vmem:[#allocation61_spill] sm:$0xff] %v19997_v18  ;;  %v20000_v19 = vld [vmem:[%s16630_s30 + $0x392] sm:$0xff]  ;;  %v20006_v14 = vld [vmem:[%s16630_s30 + $0x4c2] sm:$0xff] }
 0x3bb   : > { %15608 = vmatprep.subr.msk.mxu1 %vm300_vm0, %v19966_v22  ;;  %23515 = vst [vmem:[#allocation62_spill] sm:$0xff] %v20000_v19  ;;  %v20003_v22 = vld [vmem:[%s16630_s30 + $0x242] sm:$0xff]  ;;  %23517 = vst [vmem:[#allocation64_spill] sm:$0xff] %v20006_v14 }
 0x3bc   : > { %23516 = vst [vmem:[#allocation63_spill] sm:$0xff] %v20003_v22 }
 0x3bd   : > { %15575 = vmatpush3.xpose.msk.msra.mxu0 %vm300_vm0, %v19977_v15  ;;  %v20026_v15 = vld [vmem:[%s16630_s30 + $0x4b2] sm:$0xff] }
 0x3be   : > { %15609 = vmatpush3.xpose.msk.msra.mxu1 %vm300_vm0, %v19980_v17  ;;  %15576 = vmatprep.subr.msk.mxu0 %vm300_vm0, %v19983_v46  ;;  %v20020_v46 = vld [vmem:[%s16630_s30 + $0x382] sm:$0xff]  ;;  %v20023_v17 = vld [vmem:[%s16630_s30 + $0x232] sm:$0xff]  ;;  %23521 = vst [vmem:[#allocation68_spill] sm:$0xff] %v20026_v15 }
 0x3bf   : > { %15610 = vmatprep.subr.msk.mxu1 %vm300_vm0, %v19986_v7  ;;  %v20017_v7 = vld [vmem:[%s16630_s30 + $0x102] sm:$0xff]  ;;  %23519 = vst [vmem:[#allocation66_spill] sm:$0xff] %v20020_v46  ;;  %23520 = vst [vmem:[#allocation67_spill] sm:$0xff] %v20023_v17 }
 0x3c0   : > { %23518 = vst [vmem:[#allocation65_spill] sm:$0xff] %v20017_v7 }
 0x3c1   : > { %15577 = vmatpush3.xpose.msk.msra.mxu0 %vm300_vm0, %v19997_v18  ;;  %v20046_v18 = vld [vmem:[%s16630_s30 + $0x4a2] sm:$0xff] }
 0x3c2   : > { %15611 = vmatpush3.xpose.msk.msra.mxu1 %vm300_vm0, %v20000_v19  ;;  %15578 = vmatprep.subr.msk.mxu0 %vm300_vm0, %v20003_v22  ;;  %v20040_v22 = vld [vmem:[%s16630_s30 + $0x372] sm:$0xff]  ;;  %v20043_v19 = vld [vmem:[%s16630_s30 + $0x222] sm:$0xff]  ;;  %23525 = vst [vmem:[#allocation72_spill] sm:$0xff] %v20046_v18 }
 0x3c3   : > { %15612 = vmatprep.subr.msk.mxu1 %vm300_vm0, %v20006_v14  ;;  %v20037_v14 = vld [vmem:[%s16630_s30 + $0xf2] sm:$0xff]  ;;  %23523 = vst [vmem:[#allocation70_spill] sm:$0xff] %v20040_v22  ;;  %23524 = vst [vmem:[#allocation71_spill] sm:$0xff] %v20043_v19 }
 0x3c4   : > { %23522 = vst [vmem:[#allocation69_spill] sm:$0xff] %v20037_v14 }
 0x3c5   : > { %15579 = vmatpush3.xpose.msk.msra.mxu0 %vm300_vm0, %v20017_v7  ;;  %v20066_v7 = vld [vmem:[%s16630_s30 + $0x492] sm:$0xff] }
 0x3c6   : > { %15613 = vmatpush3.xpose.msk.msra.mxu1 %vm300_vm0, %v20020_v46  ;;  %15580 = vmatprep.subr.msk.mxu0 %vm300_vm0, %v20023_v17  ;;  %v20060_v17 = vld [vmem:[%s16630_s30 + $0x362] sm:$0xff]  ;;  %v20063_v46 = vld [vmem:[%s16630_s30 + $0x212] sm:$0xff]  ;;  %23527 = vst [vmem:[#allocation6_spill] sm:$0xff] %v20066_v7 }
 0x3c7   : > { %15614 = vmatprep.subr.msk.mxu1 %vm300_vm0, %v20026_v15  ;;  %v20057_v15 = vld [vmem:[%s16630_s30 + $0xe2] sm:$0xff]  ;;  %23526 = vst [vmem:[#allocation73_spill] sm:$0xff] %v20063_v46 }
 0x3c9   : > { %15581 = vmatpush3.xpose.msk.msra.mxu0 %vm300_vm0, %v20037_v14  ;;  %v20086_v14 = vld [vmem:[%s16630_s30 + $0x482] sm:$0xff] }
 0x3ca   : > { %15615 = vmatpush3.xpose.msk.msra.mxu1 %vm300_vm0, %v20040_v22  ;;  %15582 = vmatprep.subr.msk.mxu0 %vm300_vm0, %v20043_v19  ;;  %v20080_v19 = vld [vmem:[%s16630_s30 + $0x352] sm:$0xff]  ;;  %v20083_v22 = vld [vmem:[%s16630_s30 + $0x202] sm:$0xff] }
 0x3cb   : > { %15616 = vmatprep.subr.msk.mxu1 %vm300_vm0, %v20046_v18  ;;  %v20077_v18 = vld [vmem:[%s16630_s30 + $0xd2] sm:$0xff]  ;;  %23528 = vst [vmem:[#allocation7_spill] sm:$0xff] %v20080_v19  ;;  %23529 = vst [vmem:[#allocation8_spill] sm:$0xff] %v20083_v22 }
 0x3cd   : > { %15583 = vmatpush3.xpose.msk.msra.mxu0 %vm300_vm0, %v20057_v15 }
 0x3ce   : > { %15617 = vmatpush3.xpose.msk.msra.mxu1 %vm300_vm0, %v20060_v17  ;;  %15584 = vmatprep.subr.msk.mxu0 %vm300_vm0, %v20063_v46  ;;  %v20100_v46 = vld [vmem:[%s16630_s30 + $0x342] sm:$0xff] }
 0x3cf   : > { %15618 = vmatprep.subr.msk.mxu1 %vm300_vm0, %v20066_v7  ;;  %v20097_v7 = vld [vmem:[%s16630_s30 + $0xc2] sm:$0xff]  ;;  %23531 = vst [vmem:[#allocation36_spill] sm:$0xff] %v20100_v46 }
 0x3d0   : > { %23530 = vst [vmem:[#allocation9_spill] sm:$0xff] %v20097_v7 }
 0x3d1   : > { %15585 = vmatpush3.xpose.msk.msra.mxu0 %vm300_vm0, %v20077_v18 }
 0x3d2   : > { %15619 = vmatpush3.xpose.msk.msra.mxu1 %vm300_vm0, %v20080_v19  ;;  %15586 = vmatprep.subr.msk.mxu0 %vm300_vm0, %v20083_v22  ;;  %v13059_v22 = vld [vmem:[%s16630_s30 + $0x310] sm:$0xff] }
 0x3d3   : > { %15620 = vmatprep.subr.msk.mxu1 %vm300_vm0, %v20086_v14  ;;  %v13091_v19 = vld [vmem:[%s16630_s30 + $0x590] sm:$0xff] }
 0x3d5   : > { %15587 = vmatpush3.xpose.msk.msra.mxu0 %vm300_vm0, %v20097_v7  ;;  %v13075_v7 = vld [vmem:[%s16630_s30 + $0x450] sm:$0xff] }
 0x3d6   : > { %15621 = vmatpush3.xpose.msk.msra.mxu1 %vm300_vm0, %v20100_v46  ;;  %15588 = vmatprep.subr.msk.mxu0 %vm300_vm0, %v19336_v29  ;;  %v13043_v46 = vld [vmem:[%s16630_s30 + $0x1d0] sm:$0xff]  ;;  %v20127_v29 = vld [vmem:[%s22842_s1 + $0x78] sm:$0xff] }
 0x3d7   : > { %15622 = vmatprep.subr.msk.mxu1 %vm300_vm0, %v19339_v34  ;;  %v20136_v34 = vld [vmem:[%s16630_s30 + $0x570] sm:$0xff] }
 0x3d9   : > { %15589 = vmatpush3.xpose.msk.msra.mxu0 %vm300_vm0, %v19350_v37  ;;  %v20151_v37 = vld [vmem:[%s16630_s30 + $0x560] sm:$0xff] }
 0x3da   : > { %15623 = vmatpush3.xpose.msk.msra.mxu1 %vm300_vm0, %v19353_v38  ;;  %15626 = vmatprep.subr.msk.mxu0 %vm300_vm0, %v13059_v22  ;;  %v20162_v38 = vld [vmem:[%s16630_s30 + $0x550] sm:$0xff]  ;;  %v20362_v22 = vld [vmem:[%s16630_s30 + $0x541] sm:$0xff] }
 0x3db   : > { %15660 = vmatprep.subr.msk.mxu1 %vm300_vm0, %v13091_v19  ;;  %v20379_v19 = vld [vmem:[%s16630_s30 + $0x2b1] sm:$0xff] }
 0x3dc   : > { %15591 = vmatmul.mubr.msk.f32.vlgmr.msra.gmra.mxu0 %vm300_vm0, %v19849_v26 }
 0x3dd   : > { %15625 = vmatmul.mubr.msk.f32.vlgmr.msra.gmra.mxu1 %vm300_vm0, %v19849_v26  ;;  %15627 = vmatpush3.xpose.msk.msra.mxu0 %vm300_vm0, %v13043_v46  ;;  %v20359_v26 = vld [vmem:[%s16630_s30 + $0x2c1] sm:$0xff] }
 0x3de   : > { %15661 = vmatpush3.xpose.msk.msra.mxu1 %vm300_vm0, %v13075_v7  ;;  %15628 = vmatprep.subr.msk.mxu0 %vm300_vm0, %v19366_v47  ;;  %v20173_v47 = vld [vmem:[%s16630_s30 + $0x540] sm:$0xff] }
 0x3df   : > { %15662 = vmatprep.subr.msk.mxu1 %vm300_vm0, %v19369_v48  ;;  %15658 = vmatprep.mubr.msk.f32.mxu0 %vm300_vm0, %v20127_v29  ;;  %v20184_v48 = vld [vmem:[%s16630_s30 + $0x530] sm:$0xff]  ;;  %v20373_v46 = vld [vmem:[%s16630_s30 + $0x181] sm:$0xff] }
 0x3e0   : > { %15692 = vmatprep.mubr.msk.f32.mxu1 %vm300_vm0, %v20127_v29  ;;  %v20376_v7 = vld [vmem:[%s16630_s30 + $0x401] sm:$0xff] }
 0x3e1   : > { %15629 = vmatpush3.xpose.msk.msra.mxu0 %vm300_vm0, %v19378_v49  ;;  %v20195_v49 = vld [vmem:[%s16630_s30 + $0x520] sm:$0xff] }
 0x3e2   : > { %15663 = vmatpush3.xpose.msk.msra.mxu1 %vm300_vm0, %v19381_v50  ;;  %15630 = vmatprep.subr.msk.mxu0 %vm300_vm0, %v19384_v51  ;;  %v13051_v50 = vld [vmem:[%s16630_s30 + $0x270] sm:$0xff] }
 0x3e3   : > { %15664 = vmatprep.subr.msk.mxu1 %vm300_vm0, %v20136_v34  ;;  %v13083_v51 = vld [vmem:[%s16630_s30 + $0x4f0] sm:$0xff] }
 0x3e5   : > { %15631 = vmatpush3.xpose.msk.msra.mxu0 %vm300_vm0, %v19404_v53  ;;  %v13035_v53 = vld [vmem:[%s16630_s30 + $0x130] sm:$0xff] }
 0x3e6   : > { %15665 = vmatpush3.xpose.msk.msra.mxu1 %vm300_vm0, %v19407_v54  ;;  %15632 = vmatprep.subr.msk.mxu0 %vm300_vm0, %v19410_v55  ;;  %v13067_v54 = vld [vmem:[%s16630_s30 + $0x3b0] sm:$0xff]  ;;  %v23532_v55 = vld [vmem:[#allocation20_spill] sm:$0xff] }
 0x3e7   : > { %15666 = vmatprep.subr.msk.mxu1 %vm300_vm0, %v20151_v37 }
 0x3e9   : > { %15633 = vmatpush3.xpose.msk.msra.mxu0 %vm300_vm0, %v19425_v56  ;;  %v23533_v56 = vld [vmem:[#allocation21_spill] sm:$0xff] }
 0x3ea   : > { %15667 = vmatpush3.xpose.msk.msra.mxu1 %vm300_vm0, %v19428_v57  ;;  %15634 = vmatprep.subr.msk.mxu0 %vm300_vm0, %v19431_v58  ;;  %v23534_v57 = vld [vmem:[#allocation22_spill] sm:$0xff]  ;;  %v23535_v58 = vld [vmem:[#allocation23_spill] sm:$0xff] }
 0x3eb   : > { %15668 = vmatprep.subr.msk.mxu1 %vm300_vm0, %v20162_v38 }
 0x3ed   : > { %15635 = vmatpush3.xpose.msk.msra.mxu0 %vm300_vm0, %v19442_v59  ;;  %v23536_v59 = vld [vmem:[#allocation24_spill] sm:$0xff] }
 0x3ee   : > { %15669 = vmatpush3.xpose.msk.msra.mxu1 %vm300_vm0, %v19445_v60  ;;  %15636 = vmatprep.subr.msk.mxu0 %vm300_vm0, %v19448_v1  ;;  %v23537_v60 = vld [vmem:[#allocation25_spill] sm:$0xff]  ;;  %v23538_v1 = vld [vmem:[#allocation26_spill] sm:$0xff] }
 0x3ef   : > { %15670 = vmatprep.subr.msk.mxu1 %vm300_vm0, %v20173_v47 }
 0x3f1   : > { %15637 = vmatpush3.xpose.msk.msra.mxu0 %vm300_vm0, %v19459_v61  ;;  %v23539_v61 = vld [vmem:[#allocation27_spill] sm:$0xff] }
 0x3f2   : > { %15671 = vmatpush3.xpose.msk.msra.mxu1 %vm300_vm0, %v19462_v27  ;;  %15638 = vmatprep.subr.msk.mxu0 %vm300_vm0, %v19465_v28  ;;  %v23540_v27 = vld [vmem:[#allocation28_spill] sm:$0xff] }
 0x3f3   : > { %15672 = vmatprep.subr.msk.mxu1 %vm300_vm0, %v20184_v48  ;;  %v13190_v28 = vld [vmem:[%s16630_s30 + $0x311] sm:$0xff] }
 0x3f5   : > { %15639 = vmatpush3.xpose.msk.msra.mxu0 %vm300_vm0, %v19476_v36  ;;  %v13222_v36 = vld [vmem:[%s16630_s30 + $0x591] sm:$0xff] }
 0x3f6   : > { %15673 = vmatpush3.xpose.msk.msra.mxu1 %vm300_vm0, %v19479_v41  ;;  %15640 = vmatprep.subr.msk.mxu0 %vm300_vm0, %v19482_v31  ;;  %v23541_v41 = vld [vmem:[#allocation29_spill] sm:$0xff]  ;;  %v23542_v31 = vld [vmem:[#allocation30_spill] sm:$0xff] }
 0x3f7   : > { %15674 = vmatprep.subr.msk.mxu1 %vm300_vm0, %v20195_v49 }
 0x3f9   : > { %15641 = vmatpush3.xpose.msk.msra.mxu0 %vm300_vm0, %v19493_v43  ;;  %v13174_v43 = vld [vmem:[%s16630_s30 + $0x1d1] sm:$0xff] }
 0x3fa   : > { %15675 = vmatpush3.xpose.msk.msra.mxu1 %vm300_vm0, %v19496_v4  ;;  %15642 = vmatprep.subr.msk.mxu0 %vm300_vm0, %v13051_v50  ;;  %v13206_v4 = vld [vmem:[%s16630_s30 + $0x451] sm:$0xff] }
 0x3fb   : > { %15676 = vmatprep.subr.msk.mxu1 %vm300_vm0, %v13083_v51  ;;  %v20393_v50 = vld [vmem:[%s16630_s30 + $0x171] sm:$0xff] }
 0x3fc   : > { %23547 = vst [vmem:[#allocation34_spill] sm:$0xff] %v20393_v50  ;;  %v20396_v51 = vld [vmem:[%s16630_s30 + $0x3f1] sm:$0xff] }
 0x3fd   : > { %15643 = vmatpush3.xpose.msk.msra.mxu0 %vm300_vm0, %v13035_v53  ;;  %23548 = vst [vmem:[#allocation35_spill] sm:$0xff] %v20396_v51  ;;  %v20399_v53 = vld [vmem:[%s16630_s30 + $0x2a1] sm:$0xff] }
 0x3fe   : > { %15677 = vmatpush3.xpose.msk.msra.mxu1 %vm300_vm0, %v13067_v54  ;;  %15644 = vmatprep.subr.msk.mxu0 %vm300_vm0, %v19507_v2  ;;  %v20286_v2 = vld [vmem:[%s22842_s1 + $0x80] sm:$0xff]  ;;  %23549 = vst [vmem:[#allocation39_spill] sm:$0xff] %v20399_v53 }
 0x3ff   : > { %15678 = vmatprep.subr.msk.mxu1 %vm300_vm0, %v19510_v3  ;;  %v23543_v3 = vld [vmem:[#allocation31_spill] sm:$0xff]  ;;  %v20402_v54 = vld [vmem:[%s16630_s30 + $0x521] sm:$0xff] }
 0x400   : > { %23550 = vst [vmem:[#allocation37_spill] sm:$0xff] %v20402_v54 }
 0x401   : > { %15645 = vmatpush3.xpose.msk.msra.mxu0 %vm300_vm0, %v19521_v62  ;;  %v23544_v62 = vld [vmem:[#allocation32_spill] sm:$0xff] }
 0x402   : > { %15679 = vmatpush3.xpose.msk.msra.mxu1 %vm300_vm0, %v19524_v42  ;;  %15646 = vmatprep.subr.msk.mxu0 %vm300_vm0, %v19527_v63  ;;  %v20295_v42 = vld [vmem:[%s16630_s30 + $0x2f1] sm:$0xff] }
 0x403   : > { %15680 = vmatprep.subr.msk.mxu1 %vm300_vm0, %v19530_v10  ;;  %v20298_v63 = vld [vmem:[%s16630_s30 + $0x571] sm:$0xff]  ;;  %v23545_v10 = vld [vmem:[#allocation33_spill] sm:$0xff] }
 0x405   : > { %15647 = vmatpush3.xpose.msk.msra.mxu0 %vm300_vm0, %v19541_v11  ;;  %v23546_v11 = vld [vmem:[#allocation41_spill] sm:$0xff] }
 0x406   : > { %15681 = vmatpush3.xpose.msk.msra.mxu1 %vm300_vm0, %v19544_v30  ;;  %15648 = vmatprep.subr.msk.mxu0 %vm300_vm0, %v19547_v20  ;;  %v20313_v30 = vld [vmem:[%s16630_s30 + $0x1b1] sm:$0xff] }
 0x407   : > { %15682 = vmatprep.subr.msk.mxu1 %vm300_vm0, %v19550_v35  ;;  %v20316_v20 = vld [vmem:[%s16630_s30 + $0x431] sm:$0xff]  ;;  %v20319_v35 = vld [vmem:[%s16630_s30 + $0x2e1] sm:$0xff] }
 0x409   : > { %15649 = vmatpush3.xpose.msk.msra.mxu0 %vm300_vm0, %v19561_v0  ;;  %v20322_v0 = vld [vmem:[%s16630_s30 + $0x561] sm:$0xff] }
 0x40a   : > { %15683 = vmatpush3.xpose.msk.msra.mxu1 %vm300_vm0, %v19564_v5  ;;  %15650 = vmatprep.subr.msk.mxu0 %vm300_vm0, %v19567_v16  ;;  %v20333_v5 = vld [vmem:[%s16630_s30 + $0x1a1] sm:$0xff] }
 0x40b   : > { %15684 = vmatprep.subr.msk.mxu1 %vm300_vm0, %v19570_v9  ;;  %v20336_v16 = vld [vmem:[%s16630_s30 + $0x421] sm:$0xff]  ;;  %v20339_v9 = vld [vmem:[%s16630_s30 + $0x2d1] sm:$0xff] }
 0x40d   : > { %15651 = vmatpush3.xpose.msk.msra.mxu0 %vm300_vm0, %v23532_v55  ;;  %v20413_v55 = vld [vmem:[%s16630_s30 + $0x161] sm:$0xff] }
 0x40e   : > { %15685 = vmatpush3.xpose.msk.msra.mxu1 %vm300_vm0, %v23533_v56  ;;  %15652 = vmatprep.subr.msk.mxu0 %vm300_vm0, %v23534_v57  ;;  %23551 = vst [vmem:[#allocation38_spill] sm:$0xff] %v20413_v55  ;;  %v20416_v56 = vld [vmem:[%s16630_s30 + $0x3e1] sm:$0xff]  ;;  %v13182_v57 = vld [vmem:[%s16630_s30 + $0x271] sm:$0xff] }
 0x40f   : > { %15686 = vmatprep.subr.msk.mxu1 %vm300_vm0, %v23535_v58  ;;  %23552 = vst [vmem:[#allocation40_spill] sm:$0xff] %v20416_v56  ;;  %v13214_v58 = vld [vmem:[%s16630_s30 + $0x4f1] sm:$0xff] }
 0x411   : > { %15653 = vmatpush3.xpose.msk.msra.mxu0 %vm300_vm0, %v19601_v39  ;;  %v20353_v39 = vld [vmem:[%s16630_s30 + $0x191] sm:$0xff] }
 0x412   : > { %15687 = vmatpush3.xpose.msk.msra.mxu1 %vm300_vm0, %v19604_v44  ;;  %15654 = vmatprep.subr.msk.mxu0 %vm300_vm0, %v23536_v59  ;;  %v20356_v44 = vld [vmem:[%s16630_s30 + $0x411] sm:$0xff] }
 0x413   : > { %15688 = vmatprep.subr.msk.mxu1 %vm300_vm0, %v23537_v60  ;;  %v13166_v59 = vld [vmem:[%s16630_s30 + $0x131] sm:$0xff] }
 0x414   : > { %v13198_v60 = vld [vmem:[%s16630_s30 + $0x3b1] sm:$0xff] }
 0x415   : > { %15655 = vmatpush3.xpose.msk.msra.mxu0 %vm300_vm0, %v19621_v25  ;;  %v20342_v25 = vld [vmem:[%s16630_s30 + $0x551] sm:$0xff] }
 0x416   : > { %15689 = vmatpush3.xpose.msk.msra.mxu1 %vm300_vm0, %v23538_v1  ;;  %15656 = vmatprep.subr.msk.mxu0 %vm300_vm0, %v23539_v61  ;;  %v23553_v1 = vld [vmem:[#allocation42_spill] sm:$0xff]  ;;  %v23554_v61 = vld [vmem:[#allocation43_spill] sm:$0xff] }
 0x417   : > { %15690 = vmatprep.subr.msk.mxu1 %vm300_vm0, %v23540_v27  ;;  %v20435_v27 = vld [vmem:[%s16630_s30 + $0x251] sm:$0xff] }
 0x419   : > { %15657 = vmatpush3.xpose.msk.msra.mxu0 %vm300_vm0, %v23541_v41  ;;  %v23556_v41 = vld [vmem:[#allocation45_spill] sm:$0xff] }
 0x41a   : > { %15691 = vmatpush3.xpose.msk.msra.mxu1 %vm300_vm0, %v23542_v31  ;;  %15694 = vmatprep.subr.msk.mxu0 %vm300_vm0, %v13190_v28  ;;  %v20438_v28 = vld [vmem:[%s16630_s30 + $0x4d1] sm:$0xff] }
 0x41b   : > { %15728 = vmatprep.subr.msk.mxu1 %vm300_vm0, %v13222_v36  ;;  %v23555_v36 = vld [vmem:[#allocation44_spill] sm:$0xff] }
 0x41c   : > { %15659 = vmatmul.mubr.msk.f32.vlgmr.msra.gmra.mxu0 %vm300_vm0, %v20127_v29  ;;  %v13164_v31 = vld [vmem:[%s16630_s30 + $0x111] sm:$0xff] }
 0x41d   : > { %15693 = vmatmul.mubr.msk.f32.vlgmr.msra.gmra.mxu1 %vm300_vm0, %v20127_v29  ;;  %15695 = vmatpush3.xpose.msk.msra.mxu0 %vm300_vm0, %v13174_v43  ;;  %v20382_v29 = vld [vmem:[%s16630_s30 + $0x531] sm:$0xff] }
 0x41e   : > { %15729 = vmatpush3.xpose.msk.msra.mxu1 %vm300_vm0, %v13206_v4  ;;  %15696 = vmatprep.subr.msk.mxu0 %vm300_vm0, %v23543_v3  ;;  %v20450_v43 = vld [vmem:[%s16630_s30 + $0x391] sm:$0xff]  ;;  %v20453_v4 = vld [vmem:[%s16630_s30 + $0x241] sm:$0xff] }
 0x41f   : > { %15730 = vmatprep.subr.msk.mxu1 %vm300_vm0, %v23544_v62  ;;  %15726 = vmatprep.mubr.msk.f32.mxu0 %vm300_vm0, %v20286_v2  ;;  %v20456_v3 = vld [vmem:[%s16630_s30 + $0x4c1] sm:$0xff] }
 0x420   : > { %15760 = vmatprep.mubr.msk.f32.mxu1 %vm300_vm0, %v20286_v2  ;;  %v13163_v62 = vld [vmem:[%s16630_s30 + $0x101] sm:$0xff] }
 0x421   : > { %15697 = vmatpush3.xpose.msk.msra.mxu0 %vm300_vm0, %v23545_v10  ;;  %v20467_v10 = vld [vmem:[%s16630_s30 + $0x381] sm:$0xff] }
 0x422   : > { %15731 = vmatpush3.xpose.msk.msra.mxu1 %vm300_vm0, %v23546_v11  ;;  %15698 = vmatprep.subr.msk.mxu0 %vm300_vm0, %v20295_v42  ;;  %v20470_v11 = vld [vmem:[%s16630_s30 + $0x231] sm:$0xff] }
 0x423   : > { %15732 = vmatprep.subr.msk.mxu1 %vm300_vm0, %v20298_v63 }
 0x425   : > { %15699 = vmatpush3.xpose.msk.msra.mxu0 %vm300_vm0, %v20313_v30 }
 0x426   : > { %15733 = vmatpush3.xpose.msk.msra.mxu1 %vm300_vm0, %v20316_v20  ;;  %15700 = vmatprep.subr.msk.mxu0 %vm300_vm0, %v20319_v35 }
 0x427   : > { %15734 = vmatprep.subr.msk.mxu1 %vm300_vm0, %v20322_v0 }
 0x429   : > { %15701 = vmatpush3.xpose.msk.msra.mxu0 %vm300_vm0, %v20333_v5 }
 0x42a   : > { %15735 = vmatpush3.xpose.msk.msra.mxu1 %vm300_vm0, %v20336_v16  ;;  %15702 = vmatprep.subr.msk.mxu0 %vm300_vm0, %v20339_v9 }
 0x42b   : > { %15736 = vmatprep.subr.msk.mxu1 %vm300_vm0, %v20342_v25 }
 0x42d   : > { %15703 = vmatpush3.xpose.msk.msra.mxu0 %vm300_vm0, %v20353_v39 }
 0x42e   : > { %15737 = vmatpush3.xpose.msk.msra.mxu1 %vm300_vm0, %v20356_v44  ;;  %15704 = vmatprep.subr.msk.mxu0 %vm300_vm0, %v20359_v26 }
 0x42f   : > { %15738 = vmatprep.subr.msk.mxu1 %vm300_vm0, %v20362_v22 }
 0x431   : > { %15705 = vmatpush3.xpose.msk.msra.mxu0 %vm300_vm0, %v20373_v46 }
 0x432   : > { %15739 = vmatpush3.xpose.msk.msra.mxu1 %vm300_vm0, %v20376_v7  ;;  %15706 = vmatprep.subr.msk.mxu0 %vm300_vm0, %v20379_v19 }
 0x433   : > { %15740 = vmatprep.subr.msk.mxu1 %vm300_vm0, %v20382_v29 }
 0x435   : > { %15707 = vmatpush3.xpose.msk.msra.mxu0 %vm300_vm0, %v20393_v50  ;;  %v13337_v50 = vld [vmem:[%s16630_s30 + $0x452] sm:$0xff] }
 0x436   : > { %15741 = vmatpush3.xpose.msk.msra.mxu1 %vm300_vm0, %v20396_v51  ;;  %15708 = vmatprep.subr.msk.mxu0 %vm300_vm0, %v20399_v53  ;;  %v13321_v53 = vld [vmem:[%s16630_s30 + $0x312] sm:$0xff] }
 0x437   : > { %15742 = vmatprep.subr.msk.mxu1 %vm300_vm0, %v20402_v54  ;;  %v20535_v54 = vld [vmem:[%s16630_s30 + $0x341] sm:$0xff]  ;;  %v13353_v51 = vld [vmem:[%s16630_s30 + $0x592] sm:$0xff] }
 0x439   : > { %15709 = vmatpush3.xpose.msk.msra.mxu0 %vm300_vm0, %v20413_v55  ;;  %v20524_v55 = vld [vmem:[%s16630_s30 + $0x481] sm:$0xff] }
 0x43a   : > { %15743 = vmatpush3.xpose.msk.msra.mxu1 %vm300_vm0, %v20416_v56  ;;  %15710 = vmatprep.subr.msk.mxu0 %vm300_vm0, %v13182_v57  ;;  %v20473_v57 = vld [vmem:[%s16630_s30 + $0x4b1] sm:$0xff]  ;;  %v20521_v56 = vld [vmem:[%s16630_s30 + $0x201] sm:$0xff] }
 0x43b   : > { %15744 = vmatprep.subr.msk.mxu1 %vm300_vm0, %v13214_v58  ;;  %v13162_v58 = vld [vmem:[%s16630_s30 + $0xf1] sm:$0xff] }
 0x43d   : > { %15711 = vmatpush3.xpose.msk.msra.mxu0 %vm300_vm0, %v13166_v59  ;;  %v20484_v59 = vld [vmem:[%s16630_s30 + $0x371] sm:$0xff] }
 0x43e   : > { %15745 = vmatpush3.xpose.msk.msra.mxu1 %vm300_vm0, %v13198_v60  ;;  %15712 = vmatprep.subr.msk.mxu0 %vm300_vm0, %v23553_v1  ;;  %v20487_v60 = vld [vmem:[%s16630_s30 + $0x221] sm:$0xff] }
 0x43f   : > { %15746 = vmatprep.subr.msk.mxu1 %vm300_vm0, %v23554_v61  ;;  %v20490_v1 = vld [vmem:[%s16630_s30 + $0x4a1] sm:$0xff] }
 0x440   : > { %v13161_v61 = vld [vmem:[%s16630_s30 + $0xe1] sm:$0xff] }
 0x441   : > { %15713 = vmatpush3.xpose.msk.msra.mxu0 %vm300_vm0, %v23555_v36  ;;  %v20501_v36 = vld [vmem:[%s16630_s30 + $0x361] sm:$0xff] }
 0x442   : > { %15747 = vmatpush3.xpose.msk.msra.mxu1 %vm300_vm0, %v23556_v41  ;;  %15714 = vmatprep.subr.msk.mxu0 %vm300_vm0, %v20435_v27  ;;  %v20504_v41 = vld [vmem:[%s16630_s30 + $0x211] sm:$0xff] }
 0x443   : > { %15748 = vmatprep.subr.msk.mxu1 %vm300_vm0, %v20438_v28 }
 0x445   : > { %15715 = vmatpush3.xpose.msk.msra.mxu0 %vm300_vm0, %v13164_v31  ;;  %v20507_v31 = vld [vmem:[%s16630_s30 + $0x491] sm:$0xff] }
 0x446   : > { %15749 = vmatpush3.xpose.msk.msra.mxu1 %vm300_vm0, %v20450_v43  ;;  %15716 = vmatprep.subr.msk.mxu0 %vm300_vm0, %v20453_v4 }
 0x447   : > { %15750 = vmatprep.subr.msk.mxu1 %vm300_vm0, %v20456_v3 }
 0x449   : > { %15717 = vmatpush3.xpose.msk.msra.mxu0 %vm300_vm0, %v13163_v62  ;;  %v13160_v62 = vld [vmem:[%s16630_s30 + $0xd1] sm:$0xff] }
 0x44a   : > { %15751 = vmatpush3.xpose.msk.msra.mxu1 %vm300_vm0, %v20467_v10  ;;  %15718 = vmatprep.subr.msk.mxu0 %vm300_vm0, %v20470_v11 }
 0x44b   : > { %15752 = vmatprep.subr.msk.mxu1 %vm300_vm0, %v20473_v57 }
 0x44d   : > { %15719 = vmatpush3.xpose.msk.msra.mxu0 %vm300_vm0, %v13162_v58  ;;  %v20518_v58 = vld [vmem:[%s16630_s30 + $0x351] sm:$0xff] }
 0x44e   : > { %15753 = vmatpush3.xpose.msk.msra.mxu1 %vm300_vm0, %v20484_v59  ;;  %15720 = vmatprep.subr.msk.mxu0 %vm300_vm0, %v20487_v60 }
 0x44f   : > { %15754 = vmatprep.subr.msk.mxu1 %vm300_vm0, %v20490_v1 }
 0x451   : > { %15721 = vmatpush3.xpose.msk.msra.mxu0 %vm300_vm0, %v13161_v61  ;;  %v13159_v61 = vld [vmem:[%s16630_s30 + $0xc1] sm:$0xff] }
 0x452   : > { %15755 = vmatpush3.xpose.msk.msra.mxu1 %vm300_vm0, %v20501_v36  ;;  %15722 = vmatprep.subr.msk.mxu0 %vm300_vm0, %v20504_v41 }
 0x453   : > { %15756 = vmatprep.subr.msk.mxu1 %vm300_vm0, %v20507_v31 }
 0x455   : > { %15723 = vmatpush3.xpose.msk.msra.mxu0 %vm300_vm0, %v13160_v62  ;;  %v13305_v62 = vld [vmem:[%s16630_s30 + $0x1d2] sm:$0xff] }
 0x456   : > { %15757 = vmatpush3.xpose.msk.msra.mxu1 %vm300_vm0, %v20518_v58  ;;  %15724 = vmatprep.subr.msk.mxu0 %vm300_vm0, %v20521_v56 }
 0x457   : > { %15758 = vmatprep.subr.msk.mxu1 %vm300_vm0, %v20524_v55 }
 0x459   : > { %15725 = vmatpush3.xpose.msk.msra.mxu0 %vm300_vm0, %v13159_v61  ;;  %v20553_v61 = vld [vmem:[%s22842_s1 + $0x88] sm:$0xff] }
 0x45a   : > { %15759 = vmatpush3.xpose.msk.msra.mxu1 %vm300_vm0, %v20535_v54  ;;  %15762 = vmatprep.subr.msk.mxu0 %vm300_vm0, %v13321_v53  ;;  %v20610_v53 = vld [vmem:[%s16630_s30 + $0x532] sm:$0xff] }
 0x45b   : > { %15796 = vmatprep.subr.msk.mxu1 %vm300_vm0, %v13353_v51  ;;  %v20562_v51 = vld [vmem:[%s16630_s30 + $0x572] sm:$0xff] }
 0x45c   : > { %15727 = vmatmul.mubr.msk.f32.vlgmr.msra.gmra.mxu0 %vm300_vm0, %v20286_v2 }
 0x45d   : > { %15761 = vmatmul.mubr.msk.f32.vlgmr.msra.gmra.mxu1 %vm300_vm0, %v20286_v2  ;;  %15763 = vmatpush3.xpose.msk.msra.mxu0 %vm300_vm0, %v13305_v62  ;;  %v23558_v2 = vld [vmem:[#allocation47_spill] sm:$0xff]  ;;  %v20621_v62 = vld [vmem:[%s16630_s30 + $0x522] sm:$0xff] }
 0x45e   : > { %15797 = vmatpush3.xpose.msk.msra.mxu1 %vm300_vm0, %v13337_v50  ;;  %15764 = vmatprep.subr.msk.mxu0 %vm300_vm0, %v19820_v21  ;;  %v20577_v21 = vld [vmem:[%s16630_s30 + $0x562] sm:$0xff] }
 0x45f   : > { %15798 = vmatprep.subr.msk.mxu1 %vm300_vm0, %v19823_v45  ;;  %15794 = vmatprep.mubr.msk.f32.mxu0 %vm300_vm0, %v20553_v61  ;;  %v23557_v45 = vld [vmem:[#allocation46_spill] sm:$0xff] }
 0x460   : > { %15828 = vmatprep.mubr.msk.f32.mxu1 %vm300_vm0, %v20553_v61  ;;  %v23561_v50 = vld [vmem:[#allocation50_spill] sm:$0xff] }
 0x461   : > { %15765 = vmatpush3.xpose.msk.msra.mxu0 %vm300_vm0, %v19834_v32  ;;  %v20588_v32 = vld [vmem:[%s16630_s30 + $0x552] sm:$0xff] }
 0x462   : > { %15799 = vmatpush3.xpose.msk.msra.mxu1 %vm300_vm0, %v19837_v52  ;;  %15766 = vmatprep.subr.msk.mxu0 %vm300_vm0, %v19840_v23  ;;  %v23559_v52 = vld [vmem:[#allocation48_spill] sm:$0xff]  ;;  %v23560_v23 = vld [vmem:[#allocation49_spill] sm:$0xff] }
 0x463   : > { %15800 = vmatprep.subr.msk.mxu1 %vm300_vm0, %v20562_v51 }
 0x465   : > { %15767 = vmatpush3.xpose.msk.msra.mxu0 %vm300_vm0, %v19860_v33  ;;  %v20599_v33 = vld [vmem:[%s16630_s30 + $0x542] sm:$0xff] }
 0x466   : > { %15801 = vmatpush3.xpose.msk.msra.mxu1 %vm300_vm0, %v23557_v45  ;;  %15768 = vmatprep.subr.msk.mxu0 %vm300_vm0, %v23558_v2  ;;  %v23564_v45 = vld [vmem:[#allocation53_spill] sm:$0xff]  ;;  %v23565_v2 = vld [vmem:[#allocation54_spill] sm:$0xff] }
 0x467   : > { %15802 = vmatprep.subr.msk.mxu1 %vm300_vm0, %v20577_v21 }
 0x469   : > { %15769 = vmatpush3.xpose.msk.msra.mxu0 %vm300_vm0, %v19881_v13  ;;  %v23562_v13 = vld [vmem:[#allocation51_spill] sm:$0xff] }
 0x46a   : > { %15803 = vmatpush3.xpose.msk.msra.mxu1 %vm300_vm0, %v23559_v52  ;;  %15770 = vmatprep.subr.msk.mxu0 %vm300_vm0, %v23560_v23  ;;  %v23566_v52 = vld [vmem:[#allocation55_spill] sm:$0xff]  ;;  %v23567_v23 = vld [vmem:[#allocation56_spill] sm:$0xff] }
 0x46b   : > { %15804 = vmatprep.subr.msk.mxu1 %vm300_vm0, %v20588_v32 }
 0x46d   : > { %15771 = vmatpush3.xpose.msk.msra.mxu0 %vm300_vm0, %v19898_v24  ;;  %v23563_v24 = vld [vmem:[#allocation52_spill] sm:$0xff] }
 0x46e   : > { %15805 = vmatpush3.xpose.msk.msra.mxu1 %vm300_vm0, %v23561_v50  ;;  %15772 = vmatprep.subr.msk.mxu0 %vm300_vm0, %v23562_v13  ;;  %v23568_v50 = vld [vmem:[#allocation57_spill] sm:$0xff]  ;;  %v23569_v13 = vld [vmem:[#allocation58_spill] sm:$0xff] }
 0x46f   : > { %15806 = vmatprep.subr.msk.mxu1 %vm300_vm0, %v20599_v33 }
 0x471   : > { %15773 = vmatpush3.xpose.msk.msra.mxu0 %vm300_vm0, %v19915_v12  ;;  %v13345_v12 = vld [vmem:[%s16630_s30 + $0x4f2] sm:$0xff] }
 0x472   : > { %15807 = vmatpush3.xpose.msk.msra.mxu1 %vm300_vm0, %v19918_v8  ;;  %15774 = vmatprep.subr.msk.mxu0 %vm300_vm0, %v23563_v24  ;;  %v13313_v8 = vld [vmem:[%s16630_s30 + $0x272] sm:$0xff] }
 0x473   : > { %15808 = vmatprep.subr.msk.mxu1 %vm300_vm0, %v20610_v53  ;;  %v23570_v24 = vld [vmem:[#allocation59_spill] sm:$0xff] }
 0x475   : > { %15775 = vmatpush3.xpose.msk.msra.mxu0 %vm300_vm0, %v19932_v6  ;;  %v13297_v6 = vld [vmem:[%s16630_s30 + $0x132] sm:$0xff] }
 0x476   : > { %15809 = vmatpush3.xpose.msk.msra.mxu1 %vm300_vm0, %v19935_v40  ;;  %15776 = vmatprep.subr.msk.mxu0 %vm300_vm0, %v23564_v45  ;;  %v13329_v40 = vld [vmem:[%s16630_s30 + $0x3b2] sm:$0xff] }
 0x477   : > { %15810 = vmatprep.subr.msk.mxu1 %vm300_vm0, %v20621_v62  ;;  %v23571_v45 = vld [vmem:[#allocation60_spill] sm:$0xff] }
 0x479   : > { %15777 = vmatpush3.xpose.msk.msra.mxu0 %vm300_vm0, %v23565_v2  ;;  %v23574_v2 = vld [vmem:[#allocation62_spill] sm:$0xff] }
 0x47a   : > { %15811 = vmatpush3.xpose.msk.msra.mxu1 %vm300_vm0, %v23566_v52  ;;  %15778 = vmatprep.subr.msk.mxu0 %vm300_vm0, %v13313_v8  ;;  %v23572_v8 = vld [vmem:[#allocation5_spill] sm:$0xff]  ;;  %v23575_v52 = vld [vmem:[#allocation63_spill] sm:$0xff] }
 0x47b   : > { %15812 = vmatprep.subr.msk.mxu1 %vm300_vm0, %v13345_v12  ;;  %v23573_v12 = vld [vmem:[#allocation61_spill] sm:$0xff] }
 0x47d   : > { %15779 = vmatpush3.xpose.msk.msra.mxu0 %vm300_vm0, %v13297_v6  ;;  %v23576_v6 = vld [vmem:[#allocation64_spill] sm:$0xff] }
 0x47e   : > { %15813 = vmatpush3.xpose.msk.msra.mxu1 %vm300_vm0, %v13329_v40  ;;  %15780 = vmatprep.subr.msk.mxu0 %vm300_vm0, %v23567_v23  ;;  %v23577_v40 = vld [vmem:[#allocation65_spill] sm:$0xff]  ;;  %v23578_v23 = vld [vmem:[#allocation66_spill] sm:$0xff] }
 0x47f   : > { %15814 = vmatprep.subr.msk.mxu1 %vm300_vm0, %v23568_v50  ;;  %v23579_v50 = vld [vmem:[#allocation67_spill] sm:$0xff] }
 0x481   : > { %15781 = vmatpush3.xpose.msk.msra.mxu0 %vm300_vm0, %v23569_v13  ;;  %v23580_v13 = vld [vmem:[#allocation68_spill] sm:$0xff] }
 0x482   : > { %15815 = vmatpush3.xpose.msk.msra.mxu1 %vm300_vm0, %v23570_v24  ;;  %15782 = vmatprep.subr.msk.mxu0 %vm300_vm0, %v23571_v45  ;;  %v23581_v24 = vld [vmem:[#allocation69_spill] sm:$0xff]  ;;  %v23582_v45 = vld [vmem:[#allocation70_spill] sm:$0xff] }
 0x483   : > { %15816 = vmatprep.subr.msk.mxu1 %vm300_vm0, %v23572_v8  ;;  %v23583_v8 = vld [vmem:[#allocation71_spill] sm:$0xff] }
 0x485   : > { %15783 = vmatpush3.xpose.msk.msra.mxu0 %vm300_vm0, %v23573_v12  ;;  %v23584_v12 = vld [vmem:[#allocation72_spill] sm:$0xff] }
 0x486   : > { %15817 = vmatpush3.xpose.msk.msra.mxu1 %vm300_vm0, %v23574_v2  ;;  %15784 = vmatprep.subr.msk.mxu0 %vm300_vm0, %v23575_v52  ;;  %v23585_v2 = vld [vmem:[#allocation73_spill] sm:$0xff]  ;;  %v23586_v52 = vld [vmem:[#allocation6_spill] sm:$0xff] }
 0x487   : > { %15818 = vmatprep.subr.msk.mxu1 %vm300_vm0, %v23576_v6  ;;  %v23587_v6 = vld [vmem:[#allocation7_spill] sm:$0xff] }
 0x489   : > { %15785 = vmatpush3.xpose.msk.msra.mxu0 %vm300_vm0, %v23577_v40  ;;  %v23588_v40 = vld [vmem:[#allocation8_spill] sm:$0xff] }
 0x48a   : > { %15819 = vmatpush3.xpose.msk.msra.mxu1 %vm300_vm0, %v23578_v23  ;;  %15786 = vmatprep.subr.msk.mxu0 %vm300_vm0, %v23579_v50  ;;  %v23589_v23 = vld [vmem:[#allocation9_spill] sm:$0xff]  ;;  %v23590_v50 = vld [vmem:[#allocation36_spill] sm:$0xff] }
 0x48b   : > { %15820 = vmatprep.subr.msk.mxu1 %vm300_vm0, %v23580_v13  ;;  %v20716_v13 = vld [vmem:[%s16630_s30 + $0x380] sm:$0xff] }
 0x48d   : > { %15787 = vmatpush3.xpose.msk.msra.mxu0 %vm300_vm0, %v23581_v24  ;;  %v20719_v24 = vld [vmem:[%s16630_s30 + $0x600] sm:$0xff] }
 0x48e   : > { %15821 = vmatpush3.xpose.msk.msra.mxu1 %vm300_vm0, %v23582_v45  ;;  %15788 = vmatprep.subr.msk.mxu0 %vm300_vm0, %v23583_v8  ;;  %v20728_v45 = vld [vmem:[%s22842_s1 + $0x90] sm:$0xff]  ;;  %v20742_v8 = vld [vmem:[%s16630_s30 + $0x4c0] sm:$0xff] }
 0x48f   : > { %15822 = vmatprep.subr.msk.mxu1 %vm300_vm0, %v23584_v12  ;;  %23591 = vst [vmem:[#allocation10_spill] sm:$0xff] %v20742_v8  ;;  %v20745_v12 = vld [vmem:[%s16630_s30 + $0x370] sm:$0xff] }
 0x490   : > { %23592 = vst [vmem:[#allocation11_spill] sm:$0xff] %v20745_v12 }
 0x491   : > { %15789 = vmatpush3.xpose.msk.msra.mxu0 %vm300_vm0, %v20057_v15  ;;  %v20696_v15 = vld [vmem:[%s16630_s30 + $0x390] sm:$0xff] }
 0x492   : > { %15823 = vmatpush3.xpose.msk.msra.mxu1 %vm300_vm0, %v20060_v17  ;;  %15790 = vmatprep.subr.msk.mxu0 %vm300_vm0, %v23585_v2  ;;  %v20699_v17 = vld [vmem:[%s16630_s30 + $0x610] sm:$0xff] }
 0x493   : > { %15824 = vmatprep.subr.msk.mxu1 %vm300_vm0, %v23586_v52  ;;  %v20748_v2 = vld [vmem:[%s16630_s30 + $0x5f0] sm:$0xff] }
 0x494   : > { %23593 = vst [vmem:[#allocation12_spill] sm:$0xff] %v20748_v2  ;;  %v20763_v52 = vld [vmem:[%s16630_s30 + $0x230] sm:$0xff] }
 0x495   : > { %15791 = vmatpush3.xpose.msk.msra.mxu0 %vm300_vm0, %v20077_v18  ;;  %v20713_v18 = vld [vmem:[%s16630_s30 + $0x4d0] sm:$0xff]  ;;  %23594 = vst [vmem:[#allocation13_spill] sm:$0xff] %v20763_v52 }
 0x496   : > { %15825 = vmatpush3.xpose.msk.msra.mxu1 %vm300_vm0, %v23587_v6  ;;  %15792 = vmatprep.subr.msk.mxu0 %vm300_vm0, %v23588_v40  ;;  %v20766_v6 = vld [vmem:[%s16630_s30 + $0x4b0] sm:$0xff]  ;;  %v20769_v40 = vld [vmem:[%s16630_s30 + $0x360] sm:$0xff] }
 0x497   : > { %15826 = vmatprep.subr.msk.mxu1 %vm300_vm0, %v20086_v14  ;;  %v20710_v14 = vld [vmem:[%s16630_s30 + $0x250] sm:$0xff]  ;;  %23595 = vst [vmem:[#allocation14_spill] sm:$0xff] %v20766_v6  ;;  %23596 = vst [vmem:[#allocation15_spill] sm:$0xff] %v20769_v40 }
 0x499   : > { %15793 = vmatpush3.xpose.msk.msra.mxu0 %vm300_vm0, %v23589_v23  ;;  %v20772_v23 = vld [vmem:[%s16630_s30 + $0x5e0] sm:$0xff] }
 0x49a   : > { %15827 = vmatpush3.xpose.msk.msra.mxu1 %vm300_vm0, %v23590_v50  ;;  %15830 = vmatprep.subr.msk.mxu0 %vm300_vm0, %v20696_v15  ;;  %23597 = vst [vmem:[#allocation16_spill] sm:$0xff] %v20772_v23  ;;  %v20783_v50 = vld [vmem:[%s16630_s30 + $0x220] sm:$0xff] }
 0x49b   : > { %15864 = vmatprep.subr.msk.mxu1 %vm300_vm0, %v20699_v17  ;;  %23598 = vst [vmem:[#allocation17_spill] sm:$0xff] %v20783_v50 }
 0x49c   : > { %15795 = vmatmul.mubr.msk.f32.vlgmr.msra.gmra.mxu0 %vm300_vm0, %v20553_v61 }
 0x49d   : > { %15829 = vmatmul.mubr.msk.f32.vlgmr.msra.gmra.mxu1 %vm300_vm0, %v20553_v61  ;;  %15831 = vmatpush3.xpose.msk.msra.mxu0 %vm300_vm0, %v20710_v14  ;;  %v20739_v61 = vld [vmem:[%s16630_s30 + $0x240] sm:$0xff] }
 0x49e   : > { %15865 = vmatpush3.xpose.msk.msra.mxu1 %vm300_vm0, %v20713_v18  ;;  %15832 = vmatprep.subr.msk.mxu0 %vm300_vm0, %v20716_v13 }
 0x49f   : > { %15866 = vmatprep.subr.msk.mxu1 %vm300_vm0, %v20719_v24  ;;  %15862 = vmatprep.mubr.msk.f32.mxu0 %vm300_vm0, %v20728_v45 }
 0x4a0   : > { %15896 = vmatprep.mubr.msk.f32.mxu1 %vm300_vm0, %v20728_v45 }
 0x4a1   : > { %15833 = vmatpush3.xpose.msk.msra.mxu0 %vm300_vm0, %v20739_v61 }
 0x4a2   : > { %15867 = vmatpush3.xpose.msk.msra.mxu1 %vm300_vm0, %v20742_v8  ;;  %15834 = vmatprep.subr.msk.mxu0 %vm300_vm0, %v20745_v12  ;;  %v20789_v12 = vld [vmem:[%s16630_s30 + $0x350] sm:$0xff] }
 0x4a3   : > { %15868 = vmatprep.subr.msk.mxu1 %vm300_vm0, %v20748_v2  ;;  %v20786_v2 = vld [vmem:[%s16630_s30 + $0x4a0] sm:$0xff]  ;;  %23600 = vst [vmem:[#allocation19_spill] sm:$0xff] %v20789_v12  ;;  %v20792_v8 = vld [vmem:[%s16630_s30 + $0x5d0] sm:$0xff] }
 0x4a4   : > { %23599 = vst [vmem:[#allocation18_spill] sm:$0xff] %v20786_v2  ;;  %23601 = vst [vmem:[#allocation20_spill] sm:$0xff] %v20792_v8 }
 0x4a5   : > { %15835 = vmatpush3.xpose.msk.msra.mxu0 %vm300_vm0, %v20763_v52  ;;  %v20812_v52 = vld [vmem:[%s16630_s30 + $0x5c0] sm:$0xff] }
 0x4a6   : > { %15869 = vmatpush3.xpose.msk.msra.mxu1 %vm300_vm0, %v20766_v6  ;;  %15836 = vmatprep.subr.msk.mxu0 %vm300_vm0, %v20769_v40  ;;  %v20806_v40 = vld [vmem:[%s16630_s30 + $0x490] sm:$0xff]  ;;  %v20809_v6 = vld [vmem:[%s16630_s30 + $0x340] sm:$0xff]  ;;  %23605 = vst [vmem:[#allocation24_spill] sm:$0xff] %v20812_v52 }
 0x4a7   : > { %15870 = vmatprep.subr.msk.mxu1 %vm300_vm0, %v20772_v23  ;;  %v20803_v23 = vld [vmem:[%s16630_s30 + $0x210] sm:$0xff]  ;;  %23603 = vst [vmem:[#allocation22_spill] sm:$0xff] %v20806_v40  ;;  %23604 = vst [vmem:[#allocation23_spill] sm:$0xff] %v20809_v6 }
 0x4a8   : > { %23602 = vst [vmem:[#allocation21_spill] sm:$0xff] %v20803_v23 }
 0x4a9   : > { %15837 = vmatpush3.xpose.msk.msra.mxu0 %vm300_vm0, %v20783_v50  ;;  %v20832_v50 = vld [vmem:[%s16630_s30 + $0x5b0] sm:$0xff] }
 0x4aa   : > { %15871 = vmatpush3.xpose.msk.msra.mxu1 %vm300_vm0, %v20786_v2  ;;  %15838 = vmatprep.subr.msk.mxu0 %vm300_vm0, %v20789_v12  ;;  %v20826_v12 = vld [vmem:[%s16630_s30 + $0x480] sm:$0xff]  ;;  %v20829_v2 = vld [vmem:[%s16630_s30 + $0x330] sm:$0xff]  ;;  %23608 = vst [vmem:[#allocation27_spill] sm:$0xff] %v20832_v50 }
 0x4ab   : > { %15872 = vmatprep.subr.msk.mxu1 %vm300_vm0, %v20792_v8  ;;  %v20823_v8 = vld [vmem:[%s16630_s30 + $0x200] sm:$0xff]  ;;  %23606 = vst [vmem:[#allocation25_spill] sm:$0xff] %v20826_v12  ;;  %23607 = vst [vmem:[#allocation26_spill] sm:$0xff] %v20829_v2 }
 0x4ad   : > { %15839 = vmatpush3.xpose.msk.msra.mxu0 %vm300_vm0, %v20803_v23  ;;  %v13477_v23 = vld [vmem:[%s16630_s30 + $0x5a0] sm:$0xff] }
 0x4ae   : > { %15873 = vmatpush3.xpose.msk.msra.mxu1 %vm300_vm0, %v20806_v40  ;;  %15840 = vmatprep.subr.msk.mxu0 %vm300_vm0, %v20809_v6  ;;  %v20846_v6 = vld [vmem:[%s16630_s30 + $0x470] sm:$0xff]  ;;  %v13445_v40 = vld [vmem:[%s16630_s30 + $0x320] sm:$0xff] }
 0x4af   : > { %15874 = vmatprep.subr.msk.mxu1 %vm300_vm0, %v20812_v52  ;;  %v20843_v52 = vld [vmem:[%s16630_s30 + $0x1f0] sm:$0xff]  ;;  %23609 = vst [vmem:[#allocation28_spill] sm:$0xff] %v20846_v6 }
 0x4b1   : > { %15841 = vmatpush3.xpose.msk.msra.mxu0 %vm300_vm0, %v20823_v8 }
 0x4b2   : > { %15875 = vmatpush3.xpose.msk.msra.mxu1 %vm300_vm0, %v20826_v12  ;;  %15842 = vmatprep.subr.msk.mxu0 %vm300_vm0, %v20829_v2  ;;  %v13461_v2 = vld [vmem:[%s16630_s30 + $0x460] sm:$0xff]  ;;  %v20859_v12 = vld [vmem:[%s16630_s30 + $0x2f0] sm:$0xff] }
 0x4b3   : > { %15876 = vmatprep.subr.msk.mxu1 %vm300_vm0, %v20832_v50  ;;  %v13429_v50 = vld [vmem:[%s16630_s30 + $0x1e0] sm:$0xff] }
 0x4b5   : > { %15843 = vmatpush3.xpose.msk.msra.mxu0 %vm300_vm0, %v20843_v52 }
 0x4b6   : > { %15877 = vmatpush3.xpose.msk.msra.mxu1 %vm300_vm0, %v20846_v6  ;;  %15844 = vmatprep.subr.msk.mxu0 %vm300_vm0, %v13445_v40  ;;  %v20868_v40 = vld [vmem:[%s16630_s30 + $0x1b0] sm:$0xff]  ;;  %v20874_v6 = vld [vmem:[%s16630_s30 + $0x2e0] sm:$0xff] }
 0x4b7   : > { %15878 = vmatprep.subr.msk.mxu1 %vm300_vm0, %v13477_v23  ;;  %v20871_v23 = vld [vmem:[%s16630_s30 + $0x430] sm:$0xff]  ;;  %23611 = vst [vmem:[#allocation30_spill] sm:$0xff] %v20874_v6 }
 0x4b8   : > { %23610 = vst [vmem:[#allocation29_spill] sm:$0xff] %v20871_v23 }
 0x4b9   : > { %15845 = vmatpush3.xpose.msk.msra.mxu0 %vm300_vm0, %v13429_v50  ;;  %v20891_v50 = vld [vmem:[%s16630_s30 + $0x2d0] sm:$0xff] }
 0x4ba   : > { %15879 = vmatpush3.xpose.msk.msra.mxu1 %vm300_vm0, %v13461_v2  ;;  %15846 = vmatprep.subr.msk.mxu0 %vm300_vm0, %v20859_v12  ;;  %v20888_v2 = vld [vmem:[%s16630_s30 + $0x420] sm:$0xff]  ;;  %23613 = vst [vmem:[#allocation32_spill] sm:$0xff] %v20891_v50 }
 0x4bb   : > { %15880 = vmatprep.subr.msk.mxu1 %vm300_vm0, %v20136_v34  ;;  %v20885_v34 = vld [vmem:[%s16630_s30 + $0x1a0] sm:$0xff]  ;;  %23612 = vst [vmem:[#allocation31_spill] sm:$0xff] %v20888_v2 }
 0x4bd   : > { %15847 = vmatpush3.xpose.msk.msra.mxu0 %vm300_vm0, %v20868_v40 }
 0x4be   : > { %15881 = vmatpush3.xpose.msk.msra.mxu1 %vm300_vm0, %v20871_v23  ;;  %15848 = vmatprep.subr.msk.mxu0 %vm300_vm0, %v20874_v6  ;;  %v20905_v6 = vld [vmem:[%s16630_s30 + $0x410] sm:$0xff]  ;;  %v20908_v23 = vld [vmem:[%s16630_s30 + $0x2c0] sm:$0xff] }
 0x4bf   : > { %15882 = vmatprep.subr.msk.mxu1 %vm300_vm0, %v20151_v37  ;;  %v20902_v37 = vld [vmem:[%s16630_s30 + $0x190] sm:$0xff]  ;;  %23614 = vst [vmem:[#allocation33_spill] sm:$0xff] %v20905_v6  ;;  %23615 = vst [vmem:[#allocation41_spill] sm:$0xff] %v20908_v23 }
 0x4c1   : > { %15849 = vmatpush3.xpose.msk.msra.mxu0 %vm300_vm0, %v20885_v34 }
 0x4c2   : > { %15883 = vmatpush3.xpose.msk.msra.mxu1 %vm300_vm0, %v20888_v2  ;;  %15850 = vmatprep.subr.msk.mxu0 %vm300_vm0, %v20891_v50  ;;  %v20922_v50 = vld [vmem:[%s16630_s30 + $0x400] sm:$0xff]  ;;  %v20925_v2 = vld [vmem:[%s16630_s30 + $0x2b0] sm:$0xff] }
 0x4c3   : > { %15884 = vmatprep.subr.msk.mxu1 %vm300_vm0, %v20162_v38  ;;  %v20919_v38 = vld [vmem:[%s16630_s30 + $0x180] sm:$0xff]  ;;  %23617 = vst [vmem:[#allocation43_spill] sm:$0xff] %v20922_v50  ;;  %23618 = vst [vmem:[#allocation44_spill] sm:$0xff] %v20925_v2 }
 0x4c4   : > { %23616 = vst [vmem:[#allocation42_spill] sm:$0xff] %v20919_v38 }
 0x4c5   : > { %15851 = vmatpush3.xpose.msk.msra.mxu0 %vm300_vm0, %v20902_v37 }
 0x4c6   : > { %15885 = vmatpush3.xpose.msk.msra.mxu1 %vm300_vm0, %v20905_v6  ;;  %15852 = vmatprep.subr.msk.mxu0 %vm300_vm0, %v20908_v23  ;;  %v20939_v23 = vld [vmem:[%s16630_s30 + $0x3f0] sm:$0xff]  ;;  %v20942_v6 = vld [vmem:[%s16630_s30 + $0x2a0] sm:$0xff] }
 0x4c7   : > { %15886 = vmatprep.subr.msk.mxu1 %vm300_vm0, %v20173_v47  ;;  %v20936_v47 = vld [vmem:[%s16630_s30 + $0x170] sm:$0xff]  ;;  %23620 = vst [vmem:[#allocation46_spill] sm:$0xff] %v20939_v23  ;;  %23621 = vst [vmem:[#allocation47_spill] sm:$0xff] %v20942_v6 }
 0x4c8   : > { %23619 = vst [vmem:[#allocation45_spill] sm:$0xff] %v20936_v47 }
 0x4c9   : > { %15853 = vmatpush3.xpose.msk.msra.mxu0 %vm300_vm0, %v20919_v38  ;;  %v20962_v38 = vld [vmem:[%s16630_s30 + $0x510] sm:$0xff] }
 0x4ca   : > { %15887 = vmatpush3.xpose.msk.msra.mxu1 %vm300_vm0, %v20922_v50  ;;  %15854 = vmatprep.subr.msk.mxu0 %vm300_vm0, %v20925_v2  ;;  %v20956_v2 = vld [vmem:[%s16630_s30 + $0x3e0] sm:$0xff]  ;;  %v20959_v50 = vld [vmem:[%s16630_s30 + $0x290] sm:$0xff]  ;;  %23624 = vst [vmem:[#allocation50_spill] sm:$0xff] %v20962_v38 }
 0x4cb   : > { %15888 = vmatprep.subr.msk.mxu1 %vm300_vm0, %v20184_v48  ;;  %v20953_v48 = vld [vmem:[%s16630_s30 + $0x160] sm:$0xff]  ;;  %23622 = vst [vmem:[#allocation48_spill] sm:$0xff] %v20956_v2  ;;  %23623 = vst [vmem:[#allocation49_spill] sm:$0xff] %v20959_v50 }
 0x4cd   : > { %15855 = vmatpush3.xpose.msk.msra.mxu0 %vm300_vm0, %v20936_v47  ;;  %v13469_v47 = vld [vmem:[%s16630_s30 + $0x500] sm:$0xff] }
 0x4ce   : > { %15889 = vmatpush3.xpose.msk.msra.mxu1 %vm300_vm0, %v20939_v23  ;;  %15856 = vmatprep.subr.msk.mxu0 %vm300_vm0, %v20942_v6  ;;  %v20976_v6 = vld [vmem:[%s16630_s30 + $0x3d0] sm:$0xff]  ;;  %v13437_v23 = vld [vmem:[%s16630_s30 + $0x280] sm:$0xff] }
 0x4cf   : > { %15890 = vmatprep.subr.msk.mxu1 %vm300_vm0, %v20195_v49  ;;  %v20973_v49 = vld [vmem:[%s16630_s30 + $0x150] sm:$0xff]  ;;  %23625 = vst [vmem:[#allocation51_spill] sm:$0xff] %v20976_v6 }
 0x4d1   : > { %15857 = vmatpush3.xpose.msk.msra.mxu0 %vm300_vm0, %v20953_v48 }
 0x4d2   : > { %15891 = vmatpush3.xpose.msk.msra.mxu1 %vm300_vm0, %v20956_v2  ;;  %15858 = vmatprep.subr.msk.mxu0 %vm300_vm0, %v20959_v50  ;;  %v13421_v50 = vld [vmem:[%s16630_s30 + $0x140] sm:$0xff]  ;;  %v20989_v2 = vld [vmem:[%s16630_s30 + $0x611] sm:$0xff] }
 0x4d3   : > { %15892 = vmatprep.subr.msk.mxu1 %vm300_vm0, %v20962_v38  ;;  %v13453_v38 = vld [vmem:[%s16630_s30 + $0x3c0] sm:$0xff] }
 0x4d5   : > { %15859 = vmatpush3.xpose.msk.msra.mxu0 %vm300_vm0, %v20973_v49 }
 0x4d6   : > { %15893 = vmatpush3.xpose.msk.msra.mxu1 %vm300_vm0, %v20976_v6  ;;  %15860 = vmatprep.subr.msk.mxu0 %vm300_vm0, %v13437_v23  ;;  %v20998_v6 = vld [vmem:[%s16630_s30 + $0x601] sm:$0xff]  ;;  %v21007_v23 = vld [vmem:[%s22842_s1 + $0x98] sm:$0xff] }
 0x4d7   : > { %15894 = vmatprep.subr.msk.mxu1 %vm300_vm0, %v13469_v47  ;;  %v21243_v47 = vld [vmem:[%s16630_s30 + $0x362] sm:$0xff] }
 0x4d9   : > { %15861 = vmatpush3.xpose.msk.msra.mxu0 %vm300_vm0, %v13421_v50  ;;  %v21237_v50 = vld [vmem:[%s16630_s30 + $0x232] sm:$0xff] }
 0x4da   : > { %15895 = vmatpush3.xpose.msk.msra.mxu1 %vm300_vm0, %v13453_v38  ;;  %15898 = vmatprep.subr.msk.mxu0 %vm300_vm0, %v20450_v43  ;;  %v21018_v43 = vld [vmem:[%s16630_s30 + $0x5f1] sm:$0xff] }
 0x4db   : > { %15932 = vmatprep.subr.msk.mxu1 %vm300_vm0, %v20989_v2  ;;  %v21240_v38 = vld [vmem:[%s16630_s30 + $0x4b2] sm:$0xff] }
 0x4dc   : > { %15863 = vmatmul.mubr.msk.f32.vlgmr.msra.gmra.mxu0 %vm300_vm0, %v20728_v45 }
 0x4dd   : > { %15897 = vmatmul.mubr.msk.f32.vlgmr.msra.gmra.mxu1 %vm300_vm0, %v20728_v45  ;;  %15899 = vmatpush3.xpose.msk.msra.mxu0 %vm300_vm0, %v20435_v27  ;;  %v21033_v27 = vld [vmem:[%s16630_s30 + $0x5e1] sm:$0xff]  ;;  %v21222_v45 = vld [vmem:[%s16630_s30 + $0x5f2] sm:$0xff] }
 0x4de   : > { %15933 = vmatpush3.xpose.msk.msra.mxu1 %vm300_vm0, %v20438_v28  ;;  %15900 = vmatprep.subr.msk.mxu0 %vm300_vm0, %v20467_v10  ;;  %v21044_v28 = vld [vmem:[%s16630_s30 + $0x5d1] sm:$0xff] }
 0x4df   : > { %15934 = vmatprep.subr.msk.mxu1 %vm300_vm0, %v20998_v6  ;;  %15930 = vmatprep.mubr.msk.f32.mxu0 %vm300_vm0, %v21007_v23  ;;  %v21069_v10 = vld [vmem:[%s16630_s30 + $0x5b1] sm:$0xff] }
 0x4e0   : > { %15964 = vmatprep.mubr.msk.f32.mxu1 %vm300_vm0, %v21007_v23 }
 0x4e1   : > { %15901 = vmatpush3.xpose.msk.msra.mxu0 %vm300_vm0, %v20453_v4  ;;  %v21055_v4 = vld [vmem:[%s16630_s30 + $0x5c1] sm:$0xff] }
 0x4e2   : > { %15935 = vmatpush3.xpose.msk.msra.mxu1 %vm300_vm0, %v20456_v3  ;;  %15902 = vmatprep.subr.msk.mxu0 %vm300_vm0, %v20484_v59  ;;  %v21066_v3 = vld [vmem:[%s16630_s30 + $0x331] sm:$0xff]  ;;  %v13608_v59 = vld [vmem:[%s16630_s30 + $0x5a1] sm:$0xff] }
 0x4e3   : > { %15936 = vmatprep.subr.msk.mxu1 %vm300_vm0, %v21018_v43 }
 0x4e5   : > { %15903 = vmatpush3.xpose.msk.msra.mxu0 %vm300_vm0, %v20470_v11  ;;  %v21083_v11 = vld [vmem:[%s16630_s30 + $0x471] sm:$0xff] }
 0x4e6   : > { %15937 = vmatpush3.xpose.msk.msra.mxu1 %vm300_vm0, %v20473_v57  ;;  %15904 = vmatprep.subr.msk.mxu0 %vm300_vm0, %v20501_v36  ;;  %v13576_v57 = vld [vmem:[%s16630_s30 + $0x321] sm:$0xff] }
 0x4e7   : > { %15938 = vmatprep.subr.msk.mxu1 %vm300_vm0, %v21033_v27  ;;  %v21202_v36 = vld [vmem:[%s22842_s1 + $0xa0] sm:$0xff] }
 0x4e9   : > { %15905 = vmatpush3.xpose.msk.msra.mxu0 %vm300_vm0, %v20487_v60  ;;  %v21190_v60 = vld [vmem:[%s16630_s30 + $0x382] sm:$0xff] }
 0x4ea   : > { %15939 = vmatpush3.xpose.msk.msra.mxu1 %vm300_vm0, %v20490_v1  ;;  %15906 = vmatprep.subr.msk.mxu0 %vm300_vm0, %v20518_v58  ;;  %v21193_v1 = vld [vmem:[%s16630_s30 + $0x602] sm:$0xff]  ;;  %v21219_v58 = vld [vmem:[%s16630_s30 + $0x372] sm:$0xff] }
 0x4eb   : > { %15940 = vmatprep.subr.msk.mxu1 %vm300_vm0, %v21044_v28 }
 0x4ed   : > { %15907 = vmatpush3.xpose.msk.msra.mxu0 %vm300_vm0, %v20504_v41  ;;  %v21213_v41 = vld [vmem:[%s16630_s30 + $0x242] sm:$0xff] }
 0x4ee   : > { %15941 = vmatpush3.xpose.msk.msra.mxu1 %vm300_vm0, %v20507_v31  ;;  %15908 = vmatprep.subr.msk.mxu0 %vm300_vm0, %v20535_v54  ;;  %v21080_v54 = vld [vmem:[%s16630_s30 + $0x1f1] sm:$0xff]  ;;  %v21216_v31 = vld [vmem:[%s16630_s30 + $0x4c2] sm:$0xff] }
 0x4ef   : > { %15942 = vmatprep.subr.msk.mxu1 %vm300_vm0, %v21055_v4 }
 0x4f1   : > { %15909 = vmatpush3.xpose.msk.msra.mxu0 %vm300_vm0, %v20521_v56  ;;  %v13592_v56 = vld [vmem:[%s16630_s30 + $0x461] sm:$0xff] }
 0x4f2   : > { %15943 = vmatpush3.xpose.msk.msra.mxu1 %vm300_vm0, %v20524_v55  ;;  %15910 = vmatprep.subr.msk.mxu0 %vm300_vm0, %v21066_v3  ;;  %v13560_v55 = vld [vmem:[%s16630_s30 + $0x1e1] sm:$0xff] }
 0x4f3   : > { %15944 = vmatprep.subr.msk.mxu1 %vm300_vm0, %v21069_v10 }
 0x4f5   : > { %15911 = vmatpush3.xpose.msk.msra.mxu0 %vm300_vm0, %v21080_v54 }
 0x4f6   : > { %15945 = vmatpush3.xpose.msk.msra.mxu1 %vm300_vm0, %v21083_v11  ;;  %15912 = vmatprep.subr.msk.mxu0 %vm300_vm0, %v13576_v57  ;;  %v21257_v57 = vld [vmem:[%s16630_s30 + $0x222] sm:$0xff] }
 0x4f7   : > { %15946 = vmatprep.subr.msk.mxu1 %vm300_vm0, %v13608_v59  ;;  %v21260_v59 = vld [vmem:[%s16630_s30 + $0x4a2] sm:$0xff] }
 0x4f9   : > { %15913 = vmatpush3.xpose.msk.msra.mxu0 %vm300_vm0, %v13560_v55  ;;  %v21263_v55 = vld [vmem:[%s16630_s30 + $0x352] sm:$0xff] }
 0x4fa   : > { %15947 = vmatpush3.xpose.msk.msra.mxu1 %vm300_vm0, %v13592_v56  ;;  %15914 = vmatprep.subr.msk.mxu0 %vm300_vm0, %v20295_v42  ;;  %v23626_v42 = vld [vmem:[#allocation34_spill] sm:$0xff]  ;;  %v21266_v56 = vld [vmem:[%s16630_s30 + $0x5d2] sm:$0xff] }
 0x4fb   : > { %15948 = vmatprep.subr.msk.mxu1 %vm300_vm0, %v20298_v63  ;;  %v23627_v63 = vld [vmem:[#allocation35_spill] sm:$0xff] }
 0x4fd   : > { %15915 = vmatpush3.xpose.msk.msra.mxu0 %vm300_vm0, %v20313_v30  ;;  %v23628_v30 = vld [vmem:[#allocation39_spill] sm:$0xff] }
 0x4fe   : > { %15949 = vmatpush3.xpose.msk.msra.mxu1 %vm300_vm0, %v20316_v20  ;;  %15916 = vmatprep.subr.msk.mxu0 %vm300_vm0, %v20319_v35  ;;  %v23629_v20 = vld [vmem:[#allocation37_spill] sm:$0xff]  ;;  %v21142_v35 = vld [vmem:[%s16630_s30 + $0x291] sm:$0xff] }
 0x4ff   : > { %15950 = vmatprep.subr.msk.mxu1 %vm300_vm0, %v20322_v0  ;;  %v21145_v0 = vld [vmem:[%s16630_s30 + $0x511] sm:$0xff] }
 0x501   : > { %15917 = vmatpush3.xpose.msk.msra.mxu0 %vm300_vm0, %v20333_v5  ;;  %v23630_v5 = vld [vmem:[#allocation38_spill] sm:$0xff] }
 0x502   : > { %15951 = vmatpush3.xpose.msk.msra.mxu1 %vm300_vm0, %v20336_v16  ;;  %15918 = vmatprep.subr.msk.mxu0 %vm300_vm0, %v20339_v9  ;;  %v23631_v16 = vld [vmem:[#allocation40_spill] sm:$0xff] }
 0x503   : > { %15952 = vmatprep.subr.msk.mxu1 %vm300_vm0, %v20342_v25  ;;  %v21156_v9 = vld [vmem:[%s16630_s30 + $0x151] sm:$0xff] }
 0x504   : > { %v21159_v25 = vld [vmem:[%s16630_s30 + $0x3d1] sm:$0xff] }
 0x505   : > { %15919 = vmatpush3.xpose.msk.msra.mxu0 %vm300_vm0, %v20353_v39  ;;  %v13568_v39 = vld [vmem:[%s16630_s30 + $0x281] sm:$0xff] }
 0x506   : > { %15953 = vmatpush3.xpose.msk.msra.mxu1 %vm300_vm0, %v20356_v44  ;;  %15920 = vmatprep.subr.msk.mxu0 %vm300_vm0, %v20359_v26  ;;  %v13600_v44 = vld [vmem:[%s16630_s30 + $0x501] sm:$0xff] }
 0x507   : > { %15954 = vmatprep.subr.msk.mxu1 %vm300_vm0, %v20362_v22  ;;  %v13552_v26 = vld [vmem:[%s16630_s30 + $0x141] sm:$0xff] }
 0x508   : > { %v13584_v22 = vld [vmem:[%s16630_s30 + $0x3c1] sm:$0xff] }
 0x509   : > { %15921 = vmatpush3.xpose.msk.msra.mxu0 %vm300_vm0, %v20373_v46  ;;  %v21172_v46 = vld [vmem:[%s16630_s30 + $0x392] sm:$0xff] }
 0x50a   : > { %15955 = vmatpush3.xpose.msk.msra.mxu1 %vm300_vm0, %v20376_v7  ;;  %15922 = vmatprep.subr.msk.mxu0 %vm300_vm0, %v20379_v19  ;;  %v21175_v7 = vld [vmem:[%s16630_s30 + $0x612] sm:$0xff] }
 0x50b   : > { %15956 = vmatprep.subr.msk.mxu1 %vm300_vm0, %v20382_v29  ;;  %v21184_v19 = vld [vmem:[%s16630_s30 + $0x252] sm:$0xff] }
 0x50c   : > { %v21187_v29 = vld [vmem:[%s16630_s30 + $0x4d2] sm:$0xff] }
 0x50d   : > { %15923 = vmatpush3.xpose.msk.msra.mxu0 %vm300_vm0, %v23626_v42  ;;  %v21277_v42 = vld [vmem:[%s16630_s30 + $0x212] sm:$0xff] }
 0x50e   : > { %15957 = vmatpush3.xpose.msk.msra.mxu1 %vm300_vm0, %v23627_v63  ;;  %15924 = vmatprep.subr.msk.mxu0 %vm300_vm0, %v23628_v30  ;;  %v21280_v63 = vld [vmem:[%s16630_s30 + $0x492] sm:$0xff]  ;;  %v21283_v30 = vld [vmem:[%s16630_s30 + $0x342] sm:$0xff] }
 0x50f   : > { %15958 = vmatprep.subr.msk.mxu1 %vm300_vm0, %v23629_v20  ;;  %23632 = vst [vmem:[#allocation52_spill] sm:$0xff] %v21283_v30  ;;  %v21286_v20 = vld [vmem:[%s16630_s30 + $0x5c2] sm:$0xff] }
 0x510   : > { %23633 = vst [vmem:[#allocation53_spill] sm:$0xff] %v21286_v20 }
 0x511   : > { %15925 = vmatpush3.xpose.msk.msra.mxu0 %vm300_vm0, %v23630_v5  ;;  %v21297_v5 = vld [vmem:[%s16630_s30 + $0x202] sm:$0xff] }
 0x512   : > { %15959 = vmatpush3.xpose.msk.msra.mxu1 %vm300_vm0, %v23631_v16  ;;  %15926 = vmatprep.subr.msk.mxu0 %vm300_vm0, %v21142_v35  ;;  %v21300_v16 = vld [vmem:[%s16630_s30 + $0x482] sm:$0xff] }
 0x513   : > { %15960 = vmatprep.subr.msk.mxu1 %vm300_vm0, %v21145_v0  ;;  %23634 = vst [vmem:[#allocation54_spill] sm:$0xff] %v21300_v16 }
 0x515   : > { %15927 = vmatpush3.xpose.msk.msra.mxu0 %vm300_vm0, %v21156_v9 }
 0x516   : > { %15961 = vmatpush3.xpose.msk.msra.mxu1 %vm300_vm0, %v21159_v25  ;;  %15928 = vmatprep.subr.msk.mxu0 %vm300_vm0, %v13568_v39  ;;  %v21303_v39 = vld [vmem:[%s16630_s30 + $0x332] sm:$0xff] }
 0x517   : > { %15962 = vmatprep.subr.msk.mxu1 %vm300_vm0, %v13600_v44  ;;  %23635 = vst [vmem:[#allocation55_spill] sm:$0xff] %v21303_v39  ;;  %v21306_v44 = vld [vmem:[%s16630_s30 + $0x5b2] sm:$0xff] }
 0x518   : > { %23636 = vst [vmem:[#allocation56_spill] sm:$0xff] %v21306_v44 }
 0x519   : > { %15929 = vmatpush3.xpose.msk.msra.mxu0 %vm300_vm0, %v13552_v26  ;;  %v21317_v26 = vld [vmem:[%s16630_s30 + $0x1f2] sm:$0xff] }
 0x51a   : > { %15963 = vmatpush3.xpose.msk.msra.mxu1 %vm300_vm0, %v13584_v22  ;;  %15966 = vmatprep.subr.msk.mxu0 %vm300_vm0, %v21172_v46  ;;  %v21320_v22 = vld [vmem:[%s16630_s30 + $0x472] sm:$0xff] }
 0x51b   : > { %16000 = vmatprep.subr.msk.mxu1 %vm300_vm0, %v21175_v7  ;;  %23637 = vst [vmem:[#allocation57_spill] sm:$0xff] %v21320_v22 }
 0x51c   : > { %15931 = vmatmul.mubr.msk.f32.vlgmr.msra.gmra.mxu0 %vm300_vm0, %v21007_v23 }
 0x51d   : > { %15965 = vmatmul.mubr.msk.f32.vlgmr.msra.gmra.mxu1 %vm300_vm0, %v21007_v23  ;;  %15967 = vmatpush3.xpose.msk.msra.mxu0 %vm300_vm0, %v21184_v19  ;;  %v21246_v23 = vld [vmem:[%s16630_s30 + $0x5e2] sm:$0xff] }
 0x51e   : > { %16001 = vmatpush3.xpose.msk.msra.mxu1 %vm300_vm0, %v21187_v29  ;;  %15968 = vmatprep.subr.msk.mxu0 %vm300_vm0, %v21190_v60 }
 0x51f   : > { %16002 = vmatprep.subr.msk.mxu1 %vm300_vm0, %v21193_v1  ;;  %15998 = vmatprep.mubr.msk.f32.mxu0 %vm300_vm0, %v21202_v36 }
 0x520   : > { %16032 = vmatprep.mubr.msk.f32.mxu1 %vm300_vm0, %v21202_v36 }
 0x521   : > { %15969 = vmatpush3.xpose.msk.msra.mxu0 %vm300_vm0, %v21213_v41 }
 0x522   : > { %16003 = vmatpush3.xpose.msk.msra.mxu1 %vm300_vm0, %v21216_v31  ;;  %15970 = vmatprep.subr.msk.mxu0 %vm300_vm0, %v21219_v58 }
 0x523   : > { %16004 = vmatprep.subr.msk.mxu1 %vm300_vm0, %v21222_v45 }
 0x525   : > { %15971 = vmatpush3.xpose.msk.msra.mxu0 %vm300_vm0, %v21237_v50 }
 0x526   : > { %16005 = vmatpush3.xpose.msk.msra.mxu1 %vm300_vm0, %v21240_v38  ;;  %15972 = vmatprep.subr.msk.mxu0 %vm300_vm0, %v21243_v47 }
 0x527   : > { %16006 = vmatprep.subr.msk.mxu1 %vm300_vm0, %v21246_v23 }
 0x529   : > { %15973 = vmatpush3.xpose.msk.msra.mxu0 %vm300_vm0, %v21257_v57 }
 0x52a   : > { %16007 = vmatpush3.xpose.msk.msra.mxu1 %vm300_vm0, %v21260_v59  ;;  %15974 = vmatprep.subr.msk.mxu0 %vm300_vm0, %v21263_v55 }
 0x52b   : > { %16008 = vmatprep.subr.msk.mxu1 %vm300_vm0, %v21266_v56 }
 0x52d   : > { %15975 = vmatpush3.xpose.msk.msra.mxu0 %vm300_vm0, %v21277_v42 }
 0x52e   : > { %16009 = vmatpush3.xpose.msk.msra.mxu1 %vm300_vm0, %v21280_v63  ;;  %15976 = vmatprep.subr.msk.mxu0 %vm300_vm0, %v21283_v30  ;;  %v13739_v30 = vld [vmem:[%s16630_s30 + $0x5a2] sm:$0xff] }
 0x52f   : > { %16010 = vmatprep.subr.msk.mxu1 %vm300_vm0, %v21286_v20  ;;  %v13707_v20 = vld [vmem:[%s16630_s30 + $0x322] sm:$0xff] }
 0x531   : > { %15977 = vmatpush3.xpose.msk.msra.mxu0 %vm300_vm0, %v21297_v5 }
 0x532   : > { %16011 = vmatpush3.xpose.msk.msra.mxu1 %vm300_vm0, %v21300_v16  ;;  %15978 = vmatprep.subr.msk.mxu0 %vm300_vm0, %v21303_v39  ;;  %v13723_v39 = vld [vmem:[%s16630_s30 + $0x462] sm:$0xff]  ;;  %v21333_v16 = vld [vmem:[%s16630_s30 + $0x2f2] sm:$0xff] }
 0x533   : > { %16012 = vmatprep.subr.msk.mxu1 %vm300_vm0, %v21306_v44  ;;  %v13691_v44 = vld [vmem:[%s16630_s30 + $0x1e2] sm:$0xff] }
 0x535   : > { %15979 = vmatpush3.xpose.msk.msra.mxu0 %vm300_vm0, %v21317_v26 }
 0x536   : > { %16013 = vmatpush3.xpose.msk.msra.mxu1 %vm300_vm0, %v21320_v22  ;;  %15980 = vmatprep.subr.msk.mxu0 %vm300_vm0, %v13707_v20  ;;  %v21342_v20 = vld [vmem:[%s16630_s30 + $0x1b2] sm:$0xff]  ;;  %v21348_v22 = vld [vmem:[%s16630_s30 + $0x2e2] sm:$0xff] }
 0x537   : > { %16014 = vmatprep.subr.msk.mxu1 %vm300_vm0, %v13739_v30  ;;  %v21345_v30 = vld [vmem:[%s16630_s30 + $0x432] sm:$0xff]  ;;  %23639 = vst [vmem:[#allocation59_spill] sm:$0xff] %v21348_v22 }
 0x538   : > { %23638 = vst [vmem:[#allocation58_spill] sm:$0xff] %v21345_v30 }
 0x539   : > { %15981 = vmatpush3.xpose.msk.msra.mxu0 %vm300_vm0, %v13691_v44  ;;  %v21365_v44 = vld [vmem:[%s16630_s30 + $0x2d2] sm:$0xff] }
 0x53a   : > { %16015 = vmatpush3.xpose.msk.msra.mxu1 %vm300_vm0, %v13723_v39  ;;  %15982 = vmatprep.subr.msk.mxu0 %vm300_vm0, %v21333_v16  ;;  %v21362_v39 = vld [vmem:[%s16630_s30 + $0x422] sm:$0xff]  ;;  %23641 = vst [vmem:[#allocation5_spill] sm:$0xff] %v21365_v44 }
 0x53b   : > { %16016 = vmatprep.subr.msk.mxu1 %vm300_vm0, %v20562_v51  ;;  %v21359_v51 = vld [vmem:[%s16630_s30 + $0x1a2] sm:$0xff]  ;;  %23640 = vst [vmem:[#allocation60_spill] sm:$0xff] %v21362_v39 }
 0x53d   : > { %15983 = vmatpush3.xpose.msk.msra.mxu0 %vm300_vm0, %v21342_v20 }
 0x53e   : > { %16017 = vmatpush3.xpose.msk.msra.mxu1 %vm300_vm0, %v21345_v30  ;;  %15984 = vmatprep.subr.msk.mxu0 %vm300_vm0, %v21348_v22  ;;  %v21379_v22 = vld [vmem:[%s16630_s30 + $0x412] sm:$0xff]  ;;  %v21382_v30 = vld [vmem:[%s16630_s30 + $0x2c2] sm:$0xff] }
 0x53f   : > { %16018 = vmatprep.subr.msk.mxu1 %vm300_vm0, %v20577_v21  ;;  %v21376_v21 = vld [vmem:[%s16630_s30 + $0x192] sm:$0xff]  ;;  %23642 = vst [vmem:[#allocation61_spill] sm:$0xff] %v21379_v22  ;;  %23643 = vst [vmem:[#allocation62_spill] sm:$0xff] %v21382_v30 }
 0x541   : > { %15985 = vmatpush3.xpose.msk.msra.mxu0 %vm300_vm0, %v21359_v51 }
 0x542   : > { %16019 = vmatpush3.xpose.msk.msra.mxu1 %vm300_vm0, %v21362_v39  ;;  %15986 = vmatprep.subr.msk.mxu0 %vm300_vm0, %v21365_v44  ;;  %v21396_v44 = vld [vmem:[%s16630_s30 + $0x402] sm:$0xff]  ;;  %v21399_v39 = vld [vmem:[%s16630_s30 + $0x2b2] sm:$0xff] }
 0x543   : > { %16020 = vmatprep.subr.msk.mxu1 %vm300_vm0, %v20588_v32  ;;  %v21393_v32 = vld [vmem:[%s16630_s30 + $0x182] sm:$0xff]  ;;  %23645 = vst [vmem:[#allocation64_spill] sm:$0xff] %v21396_v44  ;;  %23646 = vst [vmem:[#allocation65_spill] sm:$0xff] %v21399_v39 }
 0x544   : > { %23644 = vst [vmem:[#allocation63_spill] sm:$0xff] %v21393_v32 }
 0x545   : > { %15987 = vmatpush3.xpose.msk.msra.mxu0 %vm300_vm0, %v21376_v21 }
 0x546   : > { %16021 = vmatpush3.xpose.msk.msra.mxu1 %vm300_vm0, %v21379_v22  ;;  %15988 = vmatprep.subr.msk.mxu0 %vm300_vm0, %v21382_v30  ;;  %v21413_v30 = vld [vmem:[%s16630_s30 + $0x3f2] sm:$0xff]  ;;  %v21416_v22 = vld [vmem:[%s16630_s30 + $0x2a2] sm:$0xff] }
 0x547   : > { %16022 = vmatprep.subr.msk.mxu1 %vm300_vm0, %v20599_v33  ;;  %v21410_v33 = vld [vmem:[%s16630_s30 + $0x172] sm:$0xff]  ;;  %23648 = vst [vmem:[#allocation67_spill] sm:$0xff] %v21413_v30  ;;  %23649 = vst [vmem:[#allocation68_spill] sm:$0xff] %v21416_v22 }
 0x548   : > { %23647 = vst [vmem:[#allocation66_spill] sm:$0xff] %v21410_v33 }
 0x549   : > { %15989 = vmatpush3.xpose.msk.msra.mxu0 %vm300_vm0, %v21393_v32  ;;  %v21436_v32 = vld [vmem:[%s16630_s30 + $0x512] sm:$0xff] }
 0x54a   : > { %16023 = vmatpush3.xpose.msk.msra.mxu1 %vm300_vm0, %v21396_v44  ;;  %15990 = vmatprep.subr.msk.mxu0 %vm300_vm0, %v21399_v39  ;;  %v21430_v39 = vld [vmem:[%s16630_s30 + $0x3e2] sm:$0xff]  ;;  %v21433_v44 = vld [vmem:[%s16630_s30 + $0x292] sm:$0xff]  ;;  %23653 = vst [vmem:[#allocation72_spill] sm:$0xff] %v21436_v32 }
 0x54b   : > { %16024 = vmatprep.subr.msk.mxu1 %vm300_vm0, %v20610_v53  ;;  %v21427_v53 = vld [vmem:[%s16630_s30 + $0x162] sm:$0xff]  ;;  %23651 = vst [vmem:[#allocation70_spill] sm:$0xff] %v21430_v39  ;;  %23652 = vst [vmem:[#allocation71_spill] sm:$0xff] %v21433_v44 }
 0x54c   : > { %23650 = vst [vmem:[#allocation69_spill] sm:$0xff] %v21427_v53 }
 0x54d   : > { %15991 = vmatpush3.xpose.msk.msra.mxu0 %vm300_vm0, %v21410_v33  ;;  %v13731_v33 = vld [vmem:[%s16630_s30 + $0x502] sm:$0xff] }
 0x54e   : > { %16025 = vmatpush3.xpose.msk.msra.mxu1 %vm300_vm0, %v21413_v30  ;;  %15992 = vmatprep.subr.msk.mxu0 %vm300_vm0, %v21416_v22  ;;  %v21450_v22 = vld [vmem:[%s16630_s30 + $0x3d2] sm:$0xff]  ;;  %v13699_v30 = vld [vmem:[%s16630_s30 + $0x282] sm:$0xff] }
 0x54f   : > { %16026 = vmatprep.subr.msk.mxu1 %vm300_vm0, %v20621_v62  ;;  %v21447_v62 = vld [vmem:[%s16630_s30 + $0x152] sm:$0xff]  ;;  %23654 = vst [vmem:[#allocation73_spill] sm:$0xff] %v21450_v22 }
 0x551   : > { %15993 = vmatpush3.xpose.msk.msra.mxu0 %vm300_vm0, %v21427_v53  ;;  %v21466_v53 = vld [vmem:[%s16630_s30 + $0x620] sm:$0xff] }
 0x552   : > { %16027 = vmatpush3.xpose.msk.msra.mxu1 %vm300_vm0, %v21430_v39  ;;  %15994 = vmatprep.subr.msk.mxu0 %vm300_vm0, %v21433_v44  ;;  %v13683_v44 = vld [vmem:[%s16630_s30 + $0x142] sm:$0xff] }
 0x553   : > { %16028 = vmatprep.subr.msk.mxu1 %vm300_vm0, %v21436_v32  ;;  %v13715_v32 = vld [vmem:[%s16630_s30 + $0x3c2] sm:$0xff] }
 0x554   : > { %v21463_v39 = vld [vmem:[%s16630_s30 + $0x3a0] sm:$0xff] }
 0x555   : > { %15995 = vmatpush3.xpose.msk.msra.mxu0 %vm300_vm0, %v21447_v62 }
 0x556   : > { %16029 = vmatpush3.xpose.msk.msra.mxu1 %vm300_vm0, %v21450_v22  ;;  %15996 = vmatprep.subr.msk.mxu0 %vm300_vm0, %v13699_v30  ;;  %v21475_v22 = vld [vmem:[%s16630_s30 + $0x260] sm:$0xff] }
 0x557   : > { %16030 = vmatprep.subr.msk.mxu1 %vm300_vm0, %v13731_v33  ;;  %v21478_v30 = vld [vmem:[%s16630_s30 + $0x4e0] sm:$0xff]  ;;  %v23664_v33 = vld [vmem:[#allocation19_spill] sm:$0xff] }
 0x559   : > { %15997 = vmatpush3.xpose.msk.msra.mxu0 %vm300_vm0, %v13683_v44  ;;  %v21487_v44 = vld [vmem:[%s22842_s1 + $0xa8] sm:$0xff] }
 0x55a   : > { %16031 = vmatpush3.xpose.msk.msra.mxu1 %vm300_vm0, %v13715_v32  ;;  %16034 = vmatprep.subr.msk.mxu0 %vm300_vm0, %v21463_v39  ;;  %v23663_v32 = vld [vmem:[#allocation18_spill] sm:$0xff] }
 0x55b   : > { %16068 = vmatprep.subr.msk.mxu1 %vm300_vm0, %v21466_v53 }
 0x55c   : > { %15999 = vmatmul.mubr.msk.f32.vlgmr.msra.gmra.mxu0 %vm300_vm0, %v21202_v36 }
 0x55d   : > { %16033 = vmatmul.mubr.msk.f32.vlgmr.msra.gmra.mxu1 %vm300_vm0, %v21202_v36  ;;  %16035 = vmatpush3.xpose.msk.msra.mxu0 %vm300_vm0, %v21475_v22  ;;  %v23657_v36 = vld [vmem:[#allocation12_spill] sm:$0xff] }
 0x55e   : > { %16069 = vmatpush3.xpose.msk.msra.mxu1 %vm300_vm0, %v21478_v30  ;;  %16036 = vmatprep.subr.msk.mxu0 %vm300_vm0, %v20696_v15  ;;  %v23655_v15 = vld [vmem:[#allocation10_spill] sm:$0xff] }
 0x55f   : > { %16070 = vmatprep.subr.msk.mxu1 %vm300_vm0, %v20699_v17  ;;  %16066 = vmatprep.mubr.msk.f32.mxu0 %vm300_vm0, %v21487_v44  ;;  %v23656_v17 = vld [vmem:[#allocation11_spill] sm:$0xff] }
 0x560   : > { %16100 = vmatprep.mubr.msk.f32.mxu1 %vm300_vm0, %v21487_v44 }
 0x561   : > { %16037 = vmatpush3.xpose.msk.msra.mxu0 %vm300_vm0, %v20710_v14  ;;  %v23658_v14 = vld [vmem:[#allocation13_spill] sm:$0xff] }
 0x562   : > { %16071 = vmatpush3.xpose.msk.msra.mxu1 %vm300_vm0, %v20713_v18  ;;  %16038 = vmatprep.subr.msk.mxu0 %vm300_vm0, %v20716_v13  ;;  %v23659_v18 = vld [vmem:[#allocation14_spill] sm:$0xff]  ;;  %v23660_v13 = vld [vmem:[#allocation15_spill] sm:$0xff] }
 0x563   : > { %16072 = vmatprep.subr.msk.mxu1 %vm300_vm0, %v20719_v24  ;;  %v23661_v24 = vld [vmem:[#allocation16_spill] sm:$0xff] }
 0x565   : > { %16039 = vmatpush3.xpose.msk.msra.mxu0 %vm300_vm0, %v20739_v61  ;;  %v23662_v61 = vld [vmem:[#allocation17_spill] sm:$0xff] }
 0x566   : > { %16073 = vmatpush3.xpose.msk.msra.mxu1 %vm300_vm0, %v23655_v15  ;;  %16040 = vmatprep.subr.msk.mxu0 %vm300_vm0, %v23656_v17  ;;  %v23665_v15 = vld [vmem:[#allocation20_spill] sm:$0xff]  ;;  %v23666_v17 = vld [vmem:[#allocation21_spill] sm:$0xff] }
 0x567   : > { %16074 = vmatprep.subr.msk.mxu1 %vm300_vm0, %v23657_v36  ;;  %v23667_v36 = vld [vmem:[#allocation22_spill] sm:$0xff] }
 0x569   : > { %16041 = vmatpush3.xpose.msk.msra.mxu0 %vm300_vm0, %v23658_v14  ;;  %v23668_v14 = vld [vmem:[#allocation23_spill] sm:$0xff] }
 0x56a   : > { %16075 = vmatpush3.xpose.msk.msra.mxu1 %vm300_vm0, %v23659_v18  ;;  %16042 = vmatprep.subr.msk.mxu0 %vm300_vm0, %v23660_v13  ;;  %v23669_v18 = vld [vmem:[#allocation24_spill] sm:$0xff]  ;;  %v23670_v13 = vld [vmem:[#allocation25_spill] sm:$0xff] }
 0x56b   : > { %16076 = vmatprep.subr.msk.mxu1 %vm300_vm0, %v23661_v24  ;;  %v23671_v24 = vld [vmem:[#allocation26_spill] sm:$0xff] }
 0x56d   : > { %16043 = vmatpush3.xpose.msk.msra.mxu0 %vm300_vm0, %v23662_v61  ;;  %v23672_v61 = vld [vmem:[#allocation27_spill] sm:$0xff] }
 0x56e   : > { %16077 = vmatpush3.xpose.msk.msra.mxu1 %vm300_vm0, %v23663_v32  ;;  %16044 = vmatprep.subr.msk.mxu0 %vm300_vm0, %v23664_v33  ;;  %v21550_v32 = vld [vmem:[%s16630_s30 + $0x300] sm:$0xff] }
 0x56f   : > { %16078 = vmatprep.subr.msk.mxu1 %vm300_vm0, %v23665_v15  ;;  %v21553_v33 = vld [vmem:[%s16630_s30 + $0x580] sm:$0xff]  ;;  %v23673_v15 = vld [vmem:[#allocation28_spill] sm:$0xff] }
 0x571   : > { %16045 = vmatpush3.xpose.msk.msra.mxu0 %vm300_vm0, %v23666_v17  ;;  %v21567_v17 = vld [vmem:[%s16630_s30 + $0x440] sm:$0xff] }
 0x572   : > { %16079 = vmatpush3.xpose.msk.msra.mxu1 %vm300_vm0, %v23667_v36  ;;  %16046 = vmatprep.subr.msk.mxu0 %vm300_vm0, %v23668_v14  ;;  %v21570_v36 = vld [vmem:[%s16630_s30 + $0x570] sm:$0xff]  ;;  %v23674_v14 = vld [vmem:[#allocation29_spill] sm:$0xff] }
 0x573   : > { %16080 = vmatprep.subr.msk.mxu1 %vm300_vm0, %v23669_v18  ;;  %v23675_v18 = vld [vmem:[#allocation30_spill] sm:$0xff] }
 0x575   : > { %16047 = vmatpush3.xpose.msk.msra.mxu0 %vm300_vm0, %v20823_v8  ;;  %v21564_v8 = vld [vmem:[%s16630_s30 + $0x1c0] sm:$0xff] }
 0x576   : > { %16081 = vmatpush3.xpose.msk.msra.mxu1 %vm300_vm0, %v23670_v13  ;;  %16048 = vmatprep.subr.msk.mxu0 %vm300_vm0, %v23671_v24  ;;  %v23676_v13 = vld [vmem:[#allocation31_spill] sm:$0xff]  ;;  %v23677_v24 = vld [vmem:[#allocation32_spill] sm:$0xff] }
 0x577   : > { %16082 = vmatprep.subr.msk.mxu1 %vm300_vm0, %v23672_v61  ;;  %v23678_v61 = vld [vmem:[#allocation33_spill] sm:$0xff] }
 0x579   : > { %16049 = vmatpush3.xpose.msk.msra.mxu0 %vm300_vm0, %v20843_v52  ;;  %v21581_v52 = vld [vmem:[%s16630_s30 + $0x560] sm:$0xff] }
 0x57a   : > { %16083 = vmatpush3.xpose.msk.msra.mxu1 %vm300_vm0, %v23673_v15  ;;  %16050 = vmatprep.subr.msk.mxu0 %vm300_vm0, %v21550_v32  ;;  %v23679_v15 = vld [vmem:[#allocation41_spill] sm:$0xff] }
 0x57b   : > { %16084 = vmatprep.subr.msk.mxu1 %vm300_vm0, %v21553_v33 }
 0x57d   : > { %16051 = vmatpush3.xpose.msk.msra.mxu0 %vm300_vm0, %v21564_v8 }
 0x57e   : > { %16085 = vmatpush3.xpose.msk.msra.mxu1 %vm300_vm0, %v21567_v17  ;;  %16052 = vmatprep.subr.msk.mxu0 %vm300_vm0, %v20859_v12  ;;  %v21592_v12 = vld [vmem:[%s16630_s30 + $0x550] sm:$0xff] }
 0x57f   : > { %16086 = vmatprep.subr.msk.mxu1 %vm300_vm0, %v21570_v36 }
 0x581   : > { %16053 = vmatpush3.xpose.msk.msra.mxu0 %vm300_vm0, %v20868_v40  ;;  %v21603_v40 = vld [vmem:[%s16630_s30 + $0x540] sm:$0xff] }
 0x582   : > { %16087 = vmatpush3.xpose.msk.msra.mxu1 %vm300_vm0, %v23674_v14  ;;  %16054 = vmatprep.subr.msk.mxu0 %vm300_vm0, %v23675_v18  ;;  %v23680_v14 = vld [vmem:[#allocation42_spill] sm:$0xff]  ;;  %v23681_v18 = vld [vmem:[#allocation43_spill] sm:$0xff] }
 0x583   : > { %16088 = vmatprep.subr.msk.mxu1 %vm300_vm0, %v21581_v52 }
 0x585   : > { %16055 = vmatpush3.xpose.msk.msra.mxu0 %vm300_vm0, %v20885_v34  ;;  %v21614_v34 = vld [vmem:[%s16630_s30 + $0x530] sm:$0xff] }
 0x586   : > { %16089 = vmatpush3.xpose.msk.msra.mxu1 %vm300_vm0, %v23676_v13  ;;  %16056 = vmatprep.subr.msk.mxu0 %vm300_vm0, %v23677_v24  ;;  %v21625_v13 = vld [vmem:[%s16630_s30 + $0x520] sm:$0xff] }
 0x587   : > { %16090 = vmatprep.subr.msk.mxu1 %vm300_vm0, %v21592_v12  ;;  %v23683_v24 = vld [vmem:[#allocation45_spill] sm:$0xff] }
 0x589   : > { %16057 = vmatpush3.xpose.msk.msra.mxu0 %vm300_vm0, %v20902_v37  ;;  %v23682_v37 = vld [vmem:[#allocation44_spill] sm:$0xff] }
 0x58a   : > { %16091 = vmatpush3.xpose.msk.msra.mxu1 %vm300_vm0, %v23678_v61  ;;  %16058 = vmatprep.subr.msk.mxu0 %vm300_vm0, %v23679_v15  ;;  %v23684_v61 = vld [vmem:[#allocation46_spill] sm:$0xff]  ;;  %v23685_v15 = vld [vmem:[#allocation47_spill] sm:$0xff] }
 0x58b   : > { %16092 = vmatprep.subr.msk.mxu1 %vm300_vm0, %v21603_v40 }
 0x58d   : > { %16059 = vmatpush3.xpose.msk.msra.mxu0 %vm300_vm0, %v23680_v14  ;;  %v23686_v14 = vld [vmem:[#allocation48_spill] sm:$0xff] }
 0x58e   : > { %16093 = vmatpush3.xpose.msk.msra.mxu1 %vm300_vm0, %v23681_v18  ;;  %16060 = vmatprep.subr.msk.mxu0 %vm300_vm0, %v23682_v37  ;;  %v23687_v18 = vld [vmem:[#allocation49_spill] sm:$0xff]  ;;  %v23688_v37 = vld [vmem:[#allocation50_spill] sm:$0xff] }
 0x58f   : > { %16094 = vmatprep.subr.msk.mxu1 %vm300_vm0, %v21614_v34 }
 0x591   : > { %16061 = vmatpush3.xpose.msk.msra.mxu0 %vm300_vm0, %v23683_v24  ;;  %v21644_v24 = vld [vmem:[%s16630_s30 + $0x3a1] sm:$0xff] }
 0x592   : > { %16095 = vmatpush3.xpose.msk.msra.mxu1 %vm300_vm0, %v23684_v61  ;;  %16062 = vmatprep.subr.msk.mxu0 %vm300_vm0, %v23685_v15  ;;  %v21647_v61 = vld [vmem:[%s16630_s30 + $0x621] sm:$0xff]  ;;  %v23689_v15 = vld [vmem:[#allocation51_spill] sm:$0xff] }
 0x593   : > { %16096 = vmatprep.subr.msk.mxu1 %vm300_vm0, %v21625_v13 }
 0x595   : > { %16063 = vmatpush3.xpose.msk.msra.mxu0 %vm300_vm0, %v20953_v48  ;;  %v21658_v48 = vld [vmem:[%s16630_s30 + $0x261] sm:$0xff] }
 0x596   : > { %16097 = vmatpush3.xpose.msk.msra.mxu1 %vm300_vm0, %v23686_v14  ;;  %16064 = vmatprep.subr.msk.mxu0 %vm300_vm0, %v23687_v18  ;;  %v21661_v14 = vld [vmem:[%s16630_s30 + $0x4e1] sm:$0xff]  ;;  %v21664_v18 = vld [vmem:[%s16630_s30 + $0x391] sm:$0xff] }
 0x597   : > { %16098 = vmatprep.subr.msk.mxu1 %vm300_vm0, %v23688_v37  ;;  %23690 = vst [vmem:[#allocation6_spill] sm:$0xff] %v21661_v14  ;;  %23691 = vst [vmem:[#allocation7_spill] sm:$0xff] %v21664_v18  ;;  %v21687_v37 = vld [vmem:[%s16630_s30 + $0x4d1] sm:$0xff] }
 0x598   : > { %23692 = vst [vmem:[#allocation8_spill] sm:$0xff] %v21687_v37 }
 0x599   : > { %16065 = vmatpush3.xpose.msk.msra.mxu0 %vm300_vm0, %v20973_v49  ;;  %v21673_v49 = vld [vmem:[%s22842_s1 + $0xb0] sm:$0xff] }
 0x59a   : > { %16099 = vmatpush3.xpose.msk.msra.mxu1 %vm300_vm0, %v23689_v15  ;;  %16102 = vmatprep.subr.msk.mxu0 %vm300_vm0, %v21644_v24  ;;  %v21690_v15 = vld [vmem:[%s16630_s30 + $0x381] sm:$0xff] }
 0x59b   : > { %16136 = vmatprep.subr.msk.mxu1 %vm300_vm0, %v21647_v61  ;;  %23693 = vst [vmem:[#allocation9_spill] sm:$0xff] %v21690_v15 }
 0x59c   : > { %16067 = vmatmul.mubr.msk.f32.vlgmr.msra.gmra.mxu0 %vm300_vm0, %v21487_v44 }
 0x59d   : > { %16101 = vmatmul.mubr.msk.f32.vlgmr.msra.gmra.mxu1 %vm300_vm0, %v21487_v44  ;;  %16103 = vmatpush3.xpose.msk.msra.mxu0 %vm300_vm0, %v21658_v48  ;;  %v21684_v44 = vld [vmem:[%s16630_s30 + $0x251] sm:$0xff] }
 0x59e   : > { %16137 = vmatpush3.xpose.msk.msra.mxu1 %vm300_vm0, %v21661_v14  ;;  %16104 = vmatprep.subr.msk.mxu0 %vm300_vm0, %v21664_v18  ;;  %v21708_v18 = vld [vmem:[%s16630_s30 + $0x4c1] sm:$0xff]  ;;  %v21711_v14 = vld [vmem:[%s16630_s30 + $0x371] sm:$0xff] }
 0x59f   : > { %16138 = vmatprep.subr.msk.mxu1 %vm300_vm0, %v20989_v2  ;;  %16134 = vmatprep.mubr.msk.f32.mxu0 %vm300_vm0, %v21673_v49  ;;  %v21705_v2 = vld [vmem:[%s16630_s30 + $0x241] sm:$0xff]  ;;  %23694 = vst [vmem:[#allocation36_spill] sm:$0xff] %v21708_v18  ;;  %23695 = vst [vmem:[#allocation34_spill] sm:$0xff] %v21711_v14 }
 0x5a0   : > { %16168 = vmatprep.mubr.msk.f32.mxu1 %vm300_vm0, %v21673_v49 }
 0x5a1   : > { %16105 = vmatpush3.xpose.msk.msra.mxu0 %vm300_vm0, %v21684_v44 }
 0x5a2   : > { %16139 = vmatpush3.xpose.msk.msra.mxu1 %vm300_vm0, %v21687_v37  ;;  %16106 = vmatprep.subr.msk.mxu0 %vm300_vm0, %v21690_v15  ;;  %v21725_v15 = vld [vmem:[%s16630_s30 + $0x4b1] sm:$0xff]  ;;  %v21728_v37 = vld [vmem:[%s16630_s30 + $0x361] sm:$0xff] }
 0x5a3   : > { %16140 = vmatprep.subr.msk.mxu1 %vm300_vm0, %v20998_v6  ;;  %v21722_v6 = vld [vmem:[%s16630_s30 + $0x231] sm:$0xff]  ;;  %23696 = vst [vmem:[#allocation35_spill] sm:$0xff] %v21725_v15  ;;  %23697 = vst [vmem:[#allocation39_spill] sm:$0xff] %v21728_v37 }
 0x5a5   : > { %16107 = vmatpush3.xpose.msk.msra.mxu0 %vm300_vm0, %v21705_v2 }
 0x5a6   : > { %16141 = vmatpush3.xpose.msk.msra.mxu1 %vm300_vm0, %v21708_v18  ;;  %16108 = vmatprep.subr.msk.mxu0 %vm300_vm0, %v21711_v14  ;;  %v21742_v14 = vld [vmem:[%s16630_s30 + $0x4a1] sm:$0xff]  ;;  %v21745_v18 = vld [vmem:[%s16630_s30 + $0x351] sm:$0xff] }
 0x5a7   : > { %16142 = vmatprep.subr.msk.mxu1 %vm300_vm0, %v21018_v43  ;;  %v21739_v43 = vld [vmem:[%s16630_s30 + $0x221] sm:$0xff]  ;;  %23698 = vst [vmem:[#allocation37_spill] sm:$0xff] %v21745_v18 }
 0x5a9   : > { %16109 = vmatpush3.xpose.msk.msra.mxu0 %vm300_vm0, %v21722_v6 }
 0x5aa   : > { %16143 = vmatpush3.xpose.msk.msra.mxu1 %vm300_vm0, %v21725_v15  ;;  %16110 = vmatprep.subr.msk.mxu0 %vm300_vm0, %v21728_v37  ;;  %v21759_v37 = vld [vmem:[%s16630_s30 + $0x491] sm:$0xff]  ;;  %v21762_v15 = vld [vmem:[%s16630_s30 + $0x341] sm:$0xff] }
 0x5ab   : > { %16144 = vmatprep.subr.msk.mxu1 %vm300_vm0, %v21033_v27  ;;  %v21756_v27 = vld [vmem:[%s16630_s30 + $0x211] sm:$0xff]  ;;  %23699 = vst [vmem:[#allocation38_spill] sm:$0xff] %v21762_v15 }
 0x5ad   : > { %16111 = vmatpush3.xpose.msk.msra.mxu0 %vm300_vm0, %v21739_v43 }
 0x5ae   : > { %16145 = vmatpush3.xpose.msk.msra.mxu1 %vm300_vm0, %v21742_v14  ;;  %16112 = vmatprep.subr.msk.mxu0 %vm300_vm0, %v21745_v18  ;;  %v21776_v18 = vld [vmem:[%s16630_s30 + $0x481] sm:$0xff] }
 0x5af   : > { %16146 = vmatprep.subr.msk.mxu1 %vm300_vm0, %v21044_v28  ;;  %v21773_v28 = vld [vmem:[%s16630_s30 + $0x201] sm:$0xff]  ;;  %23701 = vst [vmem:[#allocation10_spill] sm:$0xff] %v21776_v18 }
 0x5b0   : > { %23700 = vst [vmem:[#allocation40_spill] sm:$0xff] %v21773_v28 }
 0x5b1   : > { %16113 = vmatpush3.xpose.msk.msra.mxu0 %vm300_vm0, %v21756_v27 }
 0x5b2   : > { %16147 = vmatpush3.xpose.msk.msra.mxu1 %vm300_vm0, %v21759_v37  ;;  %16114 = vmatprep.subr.msk.mxu0 %vm300_vm0, %v21762_v15  ;;  %v21790_v15 = vld [vmem:[%s16630_s30 + $0x581] sm:$0xff] }
 0x5b3   : > { %16148 = vmatprep.subr.msk.mxu1 %vm300_vm0, %v21055_v4  ;;  %v21787_v4 = vld [vmem:[%s16630_s30 + $0x301] sm:$0xff]  ;;  %23703 = vst [vmem:[#allocation12_spill] sm:$0xff] %v21790_v15 }
 0x5b4   : > { %23702 = vst [vmem:[#allocation11_spill] sm:$0xff] %v21787_v4 }
 0x5b5   : > { %16115 = vmatpush3.xpose.msk.msra.mxu0 %vm300_vm0, %v21773_v28  ;;  %v21810_v28 = vld [vmem:[%s16630_s30 + $0x571] sm:$0xff] }
 0x5b6   : > { %16149 = vmatpush3.xpose.msk.msra.mxu1 %vm300_vm0, %v21776_v18  ;;  %16116 = vmatprep.subr.msk.mxu0 %vm300_vm0, %v21066_v3  ;;  %v21801_v3 = vld [vmem:[%s16630_s30 + $0x1c1] sm:$0xff]  ;;  %v21807_v18 = vld [vmem:[%s16630_s30 + $0x2f1] sm:$0xff]  ;;  %23707 = vst [vmem:[#allocation16_spill] sm:$0xff] %v21810_v28 }
 0x5b7   : > { %16150 = vmatprep.subr.msk.mxu1 %vm300_vm0, %v21069_v10  ;;  %23704 = vst [vmem:[#allocation13_spill] sm:$0xff] %v21801_v3  ;;  %v21804_v10 = vld [vmem:[%s16630_s30 + $0x441] sm:$0xff]  ;;  %23706 = vst [vmem:[#allocation15_spill] sm:$0xff] %v21807_v18 }
 0x5b8   : > { %23705 = vst [vmem:[#allocation14_spill] sm:$0xff] %v21804_v10 }
 0x5b9   : > { %16117 = vmatpush3.xpose.msk.msra.mxu0 %vm300_vm0, %v21080_v54  ;;  %v21821_v54 = vld [vmem:[%s16630_s30 + $0x1b1] sm:$0xff] }
 0x5ba   : > { %16151 = vmatpush3.xpose.msk.msra.mxu1 %vm300_vm0, %v21083_v11  ;;  %16118 = vmatprep.subr.msk.mxu0 %vm300_vm0, %v21787_v4  ;;  %23708 = vst [vmem:[#allocation17_spill] sm:$0xff] %v21821_v54  ;;  %v21824_v11 = vld [vmem:[%s16630_s30 + $0x431] sm:$0xff]  ;;  %v21830_v4 = vld [vmem:[%s16630_s30 + $0x561] sm:$0xff] }
 0x5bb   : > { %16152 = vmatprep.subr.msk.mxu1 %vm300_vm0, %v21790_v15  ;;  %23709 = vst [vmem:[#allocation18_spill] sm:$0xff] %v21824_v11  ;;  %v21827_v15 = vld [vmem:[%s16630_s30 + $0x2e1] sm:$0xff]  ;;  %23711 = vst [vmem:[#allocation20_spill] sm:$0xff] %v21830_v4 }
 0x5bc   : > { %23710 = vst [vmem:[#allocation19_spill] sm:$0xff] %v21827_v15 }
 0x5bd   : > { %16119 = vmatpush3.xpose.msk.msra.mxu0 %vm300_vm0, %v21801_v3  ;;  %v21850_v3 = vld [vmem:[%s16630_s30 + $0x551] sm:$0xff] }
 0x5be   : > { %16153 = vmatpush3.xpose.msk.msra.mxu1 %vm300_vm0, %v21804_v10  ;;  %16120 = vmatprep.subr.msk.mxu0 %vm300_vm0, %v21807_v18  ;;  %v21844_v18 = vld [vmem:[%s16630_s30 + $0x421] sm:$0xff]  ;;  %v21847_v10 = vld [vmem:[%s16630_s30 + $0x2d1] sm:$0xff]  ;;  %23715 = vst [vmem:[#allocation24_spill] sm:$0xff] %v21850_v3 }
 0x5bf   : > { %16154 = vmatprep.subr.msk.mxu1 %vm300_vm0, %v21810_v28  ;;  %v21841_v28 = vld [vmem:[%s16630_s30 + $0x1a1] sm:$0xff]  ;;  %23713 = vst [vmem:[#allocation22_spill] sm:$0xff] %v21844_v18  ;;  %23714 = vst [vmem:[#allocation23_spill] sm:$0xff] %v21847_v10 }
 0x5c0   : > { %23712 = vst [vmem:[#allocation21_spill] sm:$0xff] %v21841_v28 }
 0x5c1   : > { %16121 = vmatpush3.xpose.msk.msra.mxu0 %vm300_vm0, %v21821_v54  ;;  %v21870_v54 = vld [vmem:[%s16630_s30 + $0x541] sm:$0xff] }
 0x5c2   : > { %16155 = vmatpush3.xpose.msk.msra.mxu1 %vm300_vm0, %v21824_v11  ;;  %16122 = vmatprep.subr.msk.mxu0 %vm300_vm0, %v21827_v15  ;;  %v21864_v15 = vld [vmem:[%s16630_s30 + $0x411] sm:$0xff]  ;;  %v21867_v11 = vld [vmem:[%s16630_s30 + $0x2c1] sm:$0xff]  ;;  %23719 = vst [vmem:[#allocation28_spill] sm:$0xff] %v21870_v54 }
 0x5c3   : > { %16156 = vmatprep.subr.msk.mxu1 %vm300_vm0, %v21830_v4  ;;  %v21861_v4 = vld [vmem:[%s16630_s30 + $0x191] sm:$0xff]  ;;  %23717 = vst [vmem:[#allocation26_spill] sm:$0xff] %v21864_v15  ;;  %23718 = vst [vmem:[#allocation27_spill] sm:$0xff] %v21867_v11 }
 0x5c4   : > { %23716 = vst [vmem:[#allocation25_spill] sm:$0xff] %v21861_v4 }
 0x5c5   : > { %16123 = vmatpush3.xpose.msk.msra.mxu0 %vm300_vm0, %v21841_v28  ;;  %v21890_v28 = vld [vmem:[%s16630_s30 + $0x531] sm:$0xff] }
 0x5c6   : > { %16157 = vmatpush3.xpose.msk.msra.mxu1 %vm300_vm0, %v21844_v18  ;;  %16124 = vmatprep.subr.msk.mxu0 %vm300_vm0, %v21847_v10  ;;  %v21884_v10 = vld [vmem:[%s16630_s30 + $0x401] sm:$0xff]  ;;  %v21887_v18 = vld [vmem:[%s16630_s30 + $0x2b1] sm:$0xff]  ;;  %23721 = vst [vmem:[#allocation30_spill] sm:$0xff] %v21890_v28 }
 0x5c7   : > { %16158 = vmatprep.subr.msk.mxu1 %vm300_vm0, %v21850_v3  ;;  %v21881_v3 = vld [vmem:[%s16630_s30 + $0x181] sm:$0xff]  ;;  %23720 = vst [vmem:[#allocation29_spill] sm:$0xff] %v21887_v18 }
 0x5c9   : > { %16125 = vmatpush3.xpose.msk.msra.mxu0 %vm300_vm0, %v21861_v4  ;;  %v21910_v4 = vld [vmem:[%s16630_s30 + $0x521] sm:$0xff] }
 0x5ca   : > { %16159 = vmatpush3.xpose.msk.msra.mxu1 %vm300_vm0, %v21864_v15  ;;  %16126 = vmatprep.subr.msk.mxu0 %vm300_vm0, %v21867_v11  ;;  %v21904_v11 = vld [vmem:[%s16630_s30 + $0x3f1] sm:$0xff]  ;;  %v21907_v15 = vld [vmem:[%s16630_s30 + $0x2a1] sm:$0xff] }
 0x5cb   : > { %16160 = vmatprep.subr.msk.mxu1 %vm300_vm0, %v21870_v54  ;;  %v21901_v54 = vld [vmem:[%s16630_s30 + $0x171] sm:$0xff]  ;;  %23722 = vst [vmem:[#allocation31_spill] sm:$0xff] %v21904_v11  ;;  %23723 = vst [vmem:[#allocation32_spill] sm:$0xff] %v21907_v15 }
 0x5cd   : > { %16127 = vmatpush3.xpose.msk.msra.mxu0 %vm300_vm0, %v21881_v3 }
 0x5ce   : > { %16161 = vmatpush3.xpose.msk.msra.mxu1 %vm300_vm0, %v21884_v10  ;;  %16128 = vmatprep.subr.msk.mxu0 %vm300_vm0, %v21887_v18  ;;  %v21924_v18 = vld [vmem:[%s16630_s30 + $0x3e1] sm:$0xff] }
 0x5cf   : > { %16162 = vmatprep.subr.msk.mxu1 %vm300_vm0, %v21890_v28  ;;  %v21921_v28 = vld [vmem:[%s16630_s30 + $0x161] sm:$0xff]  ;;  %23724 = vst [vmem:[#allocation33_spill] sm:$0xff] %v21924_v18 }
 0x5d1   : > { %16129 = vmatpush3.xpose.msk.msra.mxu0 %vm300_vm0, %v21901_v54 }
 0x5d2   : > { %16163 = vmatpush3.xpose.msk.msra.mxu1 %vm300_vm0, %v21904_v11  ;;  %16130 = vmatprep.subr.msk.mxu0 %vm300_vm0, %v21907_v15  ;;  %v21935_v15 = vld [vmem:[%s16630_s30 + $0x3a2] sm:$0xff] }
 0x5d3   : > { %16164 = vmatprep.subr.msk.mxu1 %vm300_vm0, %v21910_v4  ;;  %v21938_v11 = vld [vmem:[%s16630_s30 + $0x622] sm:$0xff] }
 0x5d5   : > { %16131 = vmatpush3.xpose.msk.msra.mxu0 %vm300_vm0, %v21921_v28 }
 0x5d6   : > { %16165 = vmatpush3.xpose.msk.msra.mxu1 %vm300_vm0, %v21924_v18  ;;  %16132 = vmatprep.subr.msk.mxu0 %vm300_vm0, %v21142_v35  ;;  %v21949_v35 = vld [vmem:[%s16630_s30 + $0x262] sm:$0xff] }
 0x5d7   : > { %16166 = vmatprep.subr.msk.mxu1 %vm300_vm0, %v21145_v0  ;;  %v21952_v18 = vld [vmem:[%s16630_s30 + $0x4e2] sm:$0xff]  ;;  %v21961_v0 = vld [vmem:[%s22842_s1 + $0xb8] sm:$0xff] }
 0x5d9   : > { %16133 = vmatpush3.xpose.msk.msra.mxu0 %vm300_vm0, %v21156_v9  ;;  %v23725_v9 = vld [vmem:[#allocation52_spill] sm:$0xff] }
 0x5da   : > { %16167 = vmatpush3.xpose.msk.msra.mxu1 %vm300_vm0, %v21159_v25  ;;  %16170 = vmatprep.subr.msk.mxu0 %vm300_vm0, %v21935_v15  ;;  %v23726_v25 = vld [vmem:[#allocation53_spill] sm:$0xff] }
 0x5db   : > { %16204 = vmatprep.subr.msk.mxu1 %vm300_vm0, %v21938_v11 }
 0x5dc   : > { %16135 = vmatmul.mubr.msk.f32.vlgmr.msra.gmra.mxu0 %vm300_vm0, %v21673_v49 }
 0x5dd   : > { %16169 = vmatmul.mubr.msk.f32.vlgmr.msra.gmra.mxu1 %vm300_vm0, %v21673_v49  ;;  %16171 = vmatpush3.xpose.msk.msra.mxu0 %vm300_vm0, %v21949_v35  ;;  %v23743_v49 = vld [vmem:[#allocation69_spill] sm:$0xff] }
 0x5de   : > { %16205 = vmatpush3.xpose.msk.msra.mxu1 %vm300_vm0, %v21952_v18  ;;  %16172 = vmatprep.subr.msk.mxu0 %vm300_vm0, %v21172_v46  ;;  %v23727_v46 = vld [vmem:[#allocation54_spill] sm:$0xff] }
 0x5df   : > { %16206 = vmatprep.subr.msk.mxu1 %vm300_vm0, %v21175_v7  ;;  %16202 = vmatprep.mubr.msk.f32.mxu0 %vm300_vm0, %v21961_v0  ;;  %v23728_v7 = vld [vmem:[#allocation55_spill] sm:$0xff] }
 0x5e0   : > { %16236 = vmatprep.mubr.msk.f32.mxu1 %vm300_vm0, %v21961_v0 }
 0x5e1   : > { %16173 = vmatpush3.xpose.msk.msra.mxu0 %vm300_vm0, %v21184_v19  ;;  %v23729_v19 = vld [vmem:[#allocation56_spill] sm:$0xff] }
 0x5e2   : > { %16207 = vmatpush3.xpose.msk.msra.mxu1 %vm300_vm0, %v21187_v29  ;;  %16174 = vmatprep.subr.msk.mxu0 %vm300_vm0, %v21190_v60  ;;  %v22024_v29 = vld [vmem:[%s16630_s30 + $0x302] sm:$0xff] }
 0x5e3   : > { %16208 = vmatprep.subr.msk.mxu1 %vm300_vm0, %v21193_v1  ;;  %v22027_v60 = vld [vmem:[%s16630_s30 + $0x582] sm:$0xff] }
 0x5e4   : > { %v23730_v1 = vld [vmem:[#allocation57_spill] sm:$0xff] }
 0x5e5   : > { %16175 = vmatpush3.xpose.msk.msra.mxu0 %vm300_vm0, %v21213_v41  ;;  %v22038_v41 = vld [vmem:[%s16630_s30 + $0x1c2] sm:$0xff] }
 0x5e6   : > { %16209 = vmatpush3.xpose.msk.msra.mxu1 %vm300_vm0, %v21216_v31  ;;  %16176 = vmatprep.subr.msk.mxu0 %vm300_vm0, %v21219_v58  ;;  %v22041_v31 = vld [vmem:[%s16630_s30 + $0x442] sm:$0xff]  ;;  %v22044_v58 = vld [vmem:[%s16630_s30 + $0x572] sm:$0xff] }
 0x5e7   : > { %16210 = vmatprep.subr.msk.mxu1 %vm300_vm0, %v21222_v45  ;;  %v22055_v45 = vld [vmem:[%s16630_s30 + $0x562] sm:$0xff] }
 0x5e9   : > { %16177 = vmatpush3.xpose.msk.msra.mxu0 %vm300_vm0, %v21237_v50  ;;  %v23731_v50 = vld [vmem:[#allocation58_spill] sm:$0xff] }
 0x5ea   : > { %16211 = vmatpush3.xpose.msk.msra.mxu1 %vm300_vm0, %v21240_v38  ;;  %16178 = vmatprep.subr.msk.mxu0 %vm300_vm0, %v21243_v47  ;;  %v23732_v38 = vld [vmem:[#allocation59_spill] sm:$0xff] }
 0x5eb   : > { %16212 = vmatprep.subr.msk.mxu1 %vm300_vm0, %v21246_v23  ;;  %v22066_v47 = vld [vmem:[%s16630_s30 + $0x552] sm:$0xff] }
 0x5ec   : > { %v23733_v23 = vld [vmem:[#allocation60_spill] sm:$0xff] }
 0x5ed   : > { %16179 = vmatpush3.xpose.msk.msra.mxu0 %vm300_vm0, %v21257_v57  ;;  %v23734_v57 = vld [vmem:[#allocation5_spill] sm:$0xff] }
 0x5ee   : > { %16213 = vmatpush3.xpose.msk.msra.mxu1 %vm300_vm0, %v21260_v59  ;;  %16180 = vmatprep.subr.msk.mxu0 %vm300_vm0, %v21263_v55  ;;  %v22077_v59 = vld [vmem:[%s16630_s30 + $0x542] sm:$0xff] }
 0x5ef   : > { %16214 = vmatprep.subr.msk.mxu1 %vm300_vm0, %v21266_v56  ;;  %v23735_v55 = vld [vmem:[#allocation61_spill] sm:$0xff]  ;;  %v23736_v56 = vld [vmem:[#allocation62_spill] sm:$0xff] }
 0x5f1   : > { %16181 = vmatpush3.xpose.msk.msra.mxu0 %vm300_vm0, %v21277_v42  ;;  %v22088_v42 = vld [vmem:[%s16630_s30 + $0x532] sm:$0xff] }
 0x5f2   : > { %16215 = vmatpush3.xpose.msk.msra.mxu1 %vm300_vm0, %v21280_v63  ;;  %16182 = vmatprep.subr.msk.mxu0 %vm300_vm0, %v23725_v9  ;;  %v23737_v63 = vld [vmem:[#allocation63_spill] sm:$0xff]  ;;  %v23744_v9 = vld [vmem:[#allocation70_spill] sm:$0xff] }
 0x5f3   : > { %16216 = vmatprep.subr.msk.mxu1 %vm300_vm0, %v23726_v25  ;;  %v23745_v25 = vld [vmem:[#allocation71_spill] sm:$0xff] }
 0x5f5   : > { %16183 = vmatpush3.xpose.msk.msra.mxu0 %vm300_vm0, %v21297_v5  ;;  %v23738_v5 = vld [vmem:[#allocation64_spill] sm:$0xff] }
 0x5f6   : > { %16217 = vmatpush3.xpose.msk.msra.mxu1 %vm300_vm0, %v23727_v46  ;;  %16184 = vmatprep.subr.msk.mxu0 %vm300_vm0, %v23728_v7  ;;  %v23746_v46 = vld [vmem:[#allocation72_spill] sm:$0xff]  ;;  %v14238_v7 = vld [vmem:[%s16630_s30 + $0x3b0] sm:$0xff] }
 0x5f7   : > { %16218 = vmatprep.subr.msk.mxu1 %vm300_vm0, %v23729_v19  ;;  %v14270_v19 = vld [vmem:[%s16630_s30 + $0x630] sm:$0xff] }
 0x5f9   : > { %16185 = vmatpush3.xpose.msk.msra.mxu0 %vm300_vm0, %v21317_v26  ;;  %v22099_v26 = vld [vmem:[%s16630_s30 + $0x522] sm:$0xff] }
 0x5fa   : > { %16219 = vmatpush3.xpose.msk.msra.mxu1 %vm300_vm0, %v23730_v1  ;;  %16186 = vmatprep.subr.msk.mxu0 %vm300_vm0, %v22024_v29  ;;  %v23747_v1 = vld [vmem:[#allocation73_spill] sm:$0xff] }
 0x5fb   : > { %16220 = vmatprep.subr.msk.mxu1 %vm300_vm0, %v22027_v60 }
 0x5fd   : > { %16187 = vmatpush3.xpose.msk.msra.mxu0 %vm300_vm0, %v22038_v41 }
 0x5fe   : > { %16221 = vmatpush3.xpose.msk.msra.mxu1 %vm300_vm0, %v22041_v31  ;;  %16188 = vmatprep.subr.msk.mxu0 %vm300_vm0, %v21333_v16  ;;  %v23739_v16 = vld [vmem:[#allocation65_spill] sm:$0xff] }
 0x5ff   : > { %16222 = vmatprep.subr.msk.mxu1 %vm300_vm0, %v22044_v58 }
 0x601   : > { %16189 = vmatpush3.xpose.msk.msra.mxu0 %vm300_vm0, %v21342_v20  ;;  %v23740_v20 = vld [vmem:[#allocation66_spill] sm:$0xff] }
 0x602   : > { %16223 = vmatpush3.xpose.msk.msra.mxu1 %vm300_vm0, %v23731_v50  ;;  %16190 = vmatprep.subr.msk.mxu0 %vm300_vm0, %v23732_v38  ;;  %v14222_v50 = vld [vmem:[%s16630_s30 + $0x270] sm:$0xff] }
 0x603   : > { %16224 = vmatprep.subr.msk.mxu1 %vm300_vm0, %v22055_v45  ;;  %v14254_v38 = vld [vmem:[%s16630_s30 + $0x4f0] sm:$0xff] }
 0x605   : > { %16191 = vmatpush3.xpose.msk.msra.mxu0 %vm300_vm0, %v21359_v51  ;;  %v23741_v51 = vld [vmem:[#allocation67_spill] sm:$0xff] }
 0x606   : > { %16225 = vmatpush3.xpose.msk.msra.mxu1 %vm300_vm0, %v23733_v23  ;;  %16192 = vmatprep.subr.msk.mxu0 %vm300_vm0, %v23734_v57  ;;  %v14236_v23 = vld [vmem:[%s16630_s30 + $0x390] sm:$0xff]  ;;  %v14235_v57 = vld [vmem:[%s16630_s30 + $0x380] sm:$0xff] }
 0x607   : > { %16226 = vmatprep.subr.msk.mxu1 %vm300_vm0, %v22066_v47 }
 0x609   : > { %16193 = vmatpush3.xpose.msk.msra.mxu0 %vm300_vm0, %v21376_v21  ;;  %v23742_v21 = vld [vmem:[#allocation68_spill] sm:$0xff] }
 0x60a   : > { %16227 = vmatpush3.xpose.msk.msra.mxu1 %vm300_vm0, %v23735_v55  ;;  %16194 = vmatprep.subr.msk.mxu0 %vm300_vm0, %v23736_v56  ;;  %v14267_v55 = vld [vmem:[%s16630_s30 + $0x600] sm:$0xff]  ;;  %v14234_v56 = vld [vmem:[%s16630_s30 + $0x370] sm:$0xff] }
 0x60b   : > { %16228 = vmatprep.subr.msk.mxu1 %vm300_vm0, %v22077_v59 }
 0x60d   : > { %16195 = vmatpush3.xpose.msk.msra.mxu0 %vm300_vm0, %v23737_v63  ;;  %v14266_v63 = vld [vmem:[%s16630_s30 + $0x5f0] sm:$0xff] }
 0x60e   : > { %16229 = vmatpush3.xpose.msk.msra.mxu1 %vm300_vm0, %v23738_v5  ;;  %16196 = vmatprep.subr.msk.mxu0 %vm300_vm0, %v23739_v16  ;;  %v14218_v5 = vld [vmem:[%s16630_s30 + $0x230] sm:$0xff] }
 0x60f   : > { %16230 = vmatprep.subr.msk.mxu1 %vm300_vm0, %v22088_v42  ;;  %v14250_v16 = vld [vmem:[%s16630_s30 + $0x4b0] sm:$0xff] }
 0x611   : > { %16197 = vmatpush3.xpose.msk.msra.mxu0 %vm300_vm0, %v23740_v20  ;;  %v14233_v20 = vld [vmem:[%s16630_s30 + $0x360] sm:$0xff] }
 0x612   : > { %16231 = vmatpush3.xpose.msk.msra.mxu1 %vm300_vm0, %v23741_v51  ;;  %16198 = vmatprep.subr.msk.mxu0 %vm300_vm0, %v23742_v21  ;;  %v14265_v51 = vld [vmem:[%s16630_s30 + $0x5e0] sm:$0xff] }
 0x613   : > { %16232 = vmatprep.subr.msk.mxu1 %vm300_vm0, %v22099_v26  ;;  %v14217_v21 = vld [vmem:[%s16630_s30 + $0x220] sm:$0xff] }
 0x615   : > { %16199 = vmatpush3.xpose.msk.msra.mxu0 %vm300_vm0, %v23743_v49  ;;  %v14249_v49 = vld [vmem:[%s16630_s30 + $0x4a0] sm:$0xff] }
 0x616   : > { %16233 = vmatpush3.xpose.msk.msra.mxu1 %vm300_vm0, %v23744_v9  ;;  %16200 = vmatprep.subr.msk.mxu0 %vm300_vm0, %v23745_v25  ;;  %v14232_v9 = vld [vmem:[%s16630_s30 + $0x350] sm:$0xff] }
 0x617   : > { %16234 = vmatprep.subr.msk.mxu1 %vm300_vm0, %v23746_v46  ;;  %v14264_v25 = vld [vmem:[%s16630_s30 + $0x5d0] sm:$0xff] }
 0x618   : > { %v14216_v46 = vld [vmem:[%s16630_s30 + $0x210] sm:$0xff] }
 0x619   : > { %16201 = vmatpush3.xpose.msk.msra.mxu0 %vm300_vm0, %v21447_v62  ;;  %v22134_v62 = vld [vmem:[%s22842_s1 + $0xc0] sm:$0xff] }
 0x61a   : > { %16235 = vmatpush3.xpose.msk.msra.mxu1 %vm300_vm0, %v23747_v1  ;;  %16238 = vmatprep.subr.msk.mxu0 %vm300_vm0, %v14238_v7  ;;  %v14248_v7 = vld [vmem:[%s16630_s30 + $0x490] sm:$0xff]  ;;  %v14263_v1 = vld [vmem:[%s16630_s30 + $0x5c0] sm:$0xff] }
 0x61b   : > { %16272 = vmatprep.subr.msk.mxu1 %vm300_vm0, %v14270_v19  ;;  %v14231_v19 = vld [vmem:[%s16630_s30 + $0x340] sm:$0xff] }
 0x61c   : > { %16203 = vmatmul.mubr.msk.f32.vlgmr.msra.gmra.mxu0 %vm300_vm0, %v21961_v0 }
 0x61d   : > { %16237 = vmatmul.mubr.msk.f32.vlgmr.msra.gmra.mxu1 %vm300_vm0, %v21961_v0  ;;  %16239 = vmatpush3.xpose.msk.msra.mxu0 %vm300_vm0, %v14222_v50  ;;  %v14268_v0 = vld [vmem:[%s16630_s30 + $0x610] sm:$0xff]  ;;  %v14215_v50 = vld [vmem:[%s16630_s30 + $0x200] sm:$0xff] }
 0x61e   : > { %16273 = vmatpush3.xpose.msk.msra.mxu1 %vm300_vm0, %v14254_v38  ;;  %16240 = vmatprep.subr.msk.mxu0 %vm300_vm0, %v21463_v39  ;;  %v14220_v39 = vld [vmem:[%s16630_s30 + $0x250] sm:$0xff]  ;;  %v14247_v38 = vld [vmem:[%s16630_s30 + $0x480] sm:$0xff] }
 0x61f   : > { %16274 = vmatprep.subr.msk.mxu1 %vm300_vm0, %v21466_v53  ;;  %16270 = vmatprep.mubr.msk.f32.mxu0 %vm300_vm0, %v22134_v62  ;;  %v14252_v53 = vld [vmem:[%s16630_s30 + $0x4d0] sm:$0xff] }
 0x620   : > { %16304 = vmatprep.mubr.msk.f32.mxu1 %vm300_vm0, %v22134_v62 }
 0x621   : > { %16241 = vmatpush3.xpose.msk.msra.mxu0 %vm300_vm0, %v21475_v22  ;;  %v14219_v22 = vld [vmem:[%s16630_s30 + $0x240] sm:$0xff] }
 0x622   : > { %16275 = vmatpush3.xpose.msk.msra.mxu1 %vm300_vm0, %v21478_v30  ;;  %16242 = vmatprep.subr.msk.mxu0 %vm300_vm0, %v14236_v23  ;;  %v14251_v30 = vld [vmem:[%s16630_s30 + $0x4c0] sm:$0xff]  ;;  %v14230_v23 = vld [vmem:[%s16630_s30 + $0x310] sm:$0xff] }
 0x623   : > { %16276 = vmatprep.subr.msk.mxu1 %vm300_vm0, %v14268_v0  ;;  %v14262_v0 = vld [vmem:[%s16630_s30 + $0x590] sm:$0xff] }
 0x625   : > { %16243 = vmatpush3.xpose.msk.msra.mxu0 %vm300_vm0, %v14220_v39  ;;  %v14214_v39 = vld [vmem:[%s16630_s30 + $0x1d0] sm:$0xff] }
 0x626   : > { %16277 = vmatpush3.xpose.msk.msra.mxu1 %vm300_vm0, %v14252_v53  ;;  %16244 = vmatprep.subr.msk.mxu0 %vm300_vm0, %v14235_v57  ;;  %v14246_v53 = vld [vmem:[%s16630_s30 + $0x450] sm:$0xff] }
 0x627   : > { %16278 = vmatprep.subr.msk.mxu1 %vm300_vm0, %v14267_v55  ;;  %v14228_v57 = vld [vmem:[%s16630_s30 + $0x2f0] sm:$0xff] }
 0x628   : > { %v14212_v55 = vld [vmem:[%s16630_s30 + $0x1b0] sm:$0xff] }
 0x629   : > { %16245 = vmatpush3.xpose.msk.msra.mxu0 %vm300_vm0, %v14219_v22  ;;  %v14227_v22 = vld [vmem:[%s16630_s30 + $0x2e0] sm:$0xff] }
 0x62a   : > { %16279 = vmatpush3.xpose.msk.msra.mxu1 %vm300_vm0, %v14251_v30  ;;  %16246 = vmatprep.subr.msk.mxu0 %vm300_vm0, %v14234_v56  ;;  %v14242_v30 = vld [vmem:[%s16630_s30 + $0x410] sm:$0xff]  ;;  %v14209_v56 = vld [vmem:[%s16630_s30 + $0x180] sm:$0xff] }
 0x62b   : > { %16280 = vmatprep.subr.msk.mxu1 %vm300_vm0, %v14266_v63  ;;  %v14241_v63 = vld [vmem:[%s16630_s30 + $0x400] sm:$0xff] }
 0x62d   : > { %16247 = vmatpush3.xpose.msk.msra.mxu0 %vm300_vm0, %v14218_v5  ;;  %v14208_v5 = vld [vmem:[%s16630_s30 + $0x170] sm:$0xff] }
 0x62e   : > { %16281 = vmatpush3.xpose.msk.msra.mxu1 %vm300_vm0, %v14250_v16  ;;  %16248 = vmatprep.subr.msk.mxu0 %vm300_vm0, %v14233_v20  ;;  %v14240_v16 = vld [vmem:[%s16630_s30 + $0x3f0] sm:$0xff]  ;;  %v14207_v20 = vld [vmem:[%s16630_s30 + $0x160] sm:$0xff] }
 0x62f   : > { %16282 = vmatprep.subr.msk.mxu1 %vm300_vm0, %v14265_v51  ;;  %v14239_v51 = vld [vmem:[%s16630_s30 + $0x3e0] sm:$0xff] }
 0x631   : > { %16249 = vmatpush3.xpose.msk.msra.mxu0 %vm300_vm0, %v14217_v21  ;;  %v14369_v21 = vld [vmem:[%s16630_s30 + $0x3b1] sm:$0xff] }
 0x632   : > { %16283 = vmatpush3.xpose.msk.msra.mxu1 %vm300_vm0, %v14249_v49  ;;  %16250 = vmatprep.subr.msk.mxu0 %vm300_vm0, %v14232_v9  ;;  %v14401_v49 = vld [vmem:[%s16630_s30 + $0x631] sm:$0xff] }
 0x633   : > { %16284 = vmatprep.subr.msk.mxu1 %vm300_vm0, %v14264_v25  ;;  %v14385_v9 = vld [vmem:[%s16630_s30 + $0x4f1] sm:$0xff] }
 0x634   : > { %v14399_v25 = vld [vmem:[%s16630_s30 + $0x611] sm:$0xff] }
 0x635   : > { %16251 = vmatpush3.xpose.msk.msra.mxu0 %vm300_vm0, %v14216_v46  ;;  %v23749_v46 = vld [vmem:[#allocation7_spill] sm:$0xff] }
 0x636   : > { %16285 = vmatpush3.xpose.msk.msra.mxu1 %vm300_vm0, %v14248_v7  ;;  %16252 = vmatprep.subr.msk.mxu0 %vm300_vm0, %v14231_v19  ;;  %v23751_v7 = vld [vmem:[#allocation9_spill] sm:$0xff]  ;;  %v23752_v19 = vld [vmem:[#allocation36_spill] sm:$0xff] }
 0x637   : > { %16286 = vmatprep.subr.msk.mxu1 %vm300_vm0, %v14263_v1  ;;  %v23753_v1 = vld [vmem:[#allocation34_spill] sm:$0xff] }
 0x639   : > { %16253 = vmatpush3.xpose.msk.msra.mxu0 %vm300_vm0, %v14215_v50  ;;  %v23754_v50 = vld [vmem:[#allocation35_spill] sm:$0xff] }
 0x63a   : > { %16287 = vmatpush3.xpose.msk.msra.mxu1 %vm300_vm0, %v14247_v38  ;;  %16254 = vmatprep.subr.msk.mxu0 %vm300_vm0, %v14230_v23  ;;  %v23755_v38 = vld [vmem:[#allocation39_spill] sm:$0xff]  ;;  %v23756_v23 = vld [vmem:[#allocation37_spill] sm:$0xff] }
 0x63b   : > { %16288 = vmatprep.subr.msk.mxu1 %vm300_vm0, %v14262_v0  ;;  %v23757_v0 = vld [vmem:[#allocation38_spill] sm:$0xff] }
 0x63d   : > { %16255 = vmatpush3.xpose.msk.msra.mxu0 %vm300_vm0, %v14214_v39  ;;  %v14393_v39 = vld [vmem:[%s16630_s30 + $0x591] sm:$0xff] }
 0x63e   : > { %16289 = vmatpush3.xpose.msk.msra.mxu1 %vm300_vm0, %v14246_v53  ;;  %16256 = vmatprep.subr.msk.mxu0 %vm300_vm0, %v21550_v32  ;;  %v14244_v32 = vld [vmem:[%s16630_s30 + $0x430] sm:$0xff]  ;;  %v23759_v53 = vld [vmem:[#allocation10_spill] sm:$0xff] }
 0x63f   : > { %16290 = vmatprep.subr.msk.mxu1 %vm300_vm0, %v21553_v33  ;;  %v14211_v33 = vld [vmem:[%s16630_s30 + $0x1a0] sm:$0xff] }
 0x641   : > { %16257 = vmatpush3.xpose.msk.msra.mxu0 %vm300_vm0, %v21564_v8  ;;  %v14243_v8 = vld [vmem:[%s16630_s30 + $0x420] sm:$0xff] }
 0x642   : > { %16291 = vmatpush3.xpose.msk.msra.mxu1 %vm300_vm0, %v21567_v17  ;;  %16258 = vmatprep.subr.msk.mxu0 %vm300_vm0, %v14228_v57  ;;  %v14226_v17 = vld [vmem:[%s16630_s30 + $0x2d0] sm:$0xff] }
 0x643   : > { %16292 = vmatprep.subr.msk.mxu1 %vm300_vm0, %v21570_v36  ;;  %v14210_v36 = vld [vmem:[%s16630_s30 + $0x190] sm:$0xff] }
 0x644   : > { %v14377_v57 = vld [vmem:[%s16630_s30 + $0x451] sm:$0xff] }
 0x645   : > { %16259 = vmatpush3.xpose.msk.msra.mxu0 %vm300_vm0, %v14212_v55  ;;  %v23761_v55 = vld [vmem:[#allocation12_spill] sm:$0xff] }
 0x646   : > { %16293 = vmatpush3.xpose.msk.msra.mxu1 %vm300_vm0, %v14244_v32  ;;  %16260 = vmatprep.subr.msk.mxu0 %vm300_vm0, %v14227_v22  ;;  %v23762_v32 = vld [vmem:[#allocation13_spill] sm:$0xff]  ;;  %v23763_v22 = vld [vmem:[#allocation14_spill] sm:$0xff] }
 0x647   : > { %16294 = vmatprep.subr.msk.mxu1 %vm300_vm0, %v21581_v52  ;;  %v14225_v52 = vld [vmem:[%s16630_s30 + $0x2c0] sm:$0xff] }
 0x649   : > { %16261 = vmatpush3.xpose.msk.msra.mxu0 %vm300_vm0, %v14211_v33  ;;  %v23764_v33 = vld [vmem:[#allocation15_spill] sm:$0xff] }
 0x64a   : > { %16295 = vmatpush3.xpose.msk.msra.mxu1 %vm300_vm0, %v14243_v8  ;;  %16262 = vmatprep.subr.msk.mxu0 %vm300_vm0, %v14226_v17  ;;  %v23765_v8 = vld [vmem:[#allocation16_spill] sm:$0xff]  ;;  %v23766_v17 = vld [vmem:[#allocation17_spill] sm:$0xff] }
 0x64b   : > { %16296 = vmatprep.subr.msk.mxu1 %vm300_vm0, %v21592_v12  ;;  %v14224_v12 = vld [vmem:[%s16630_s30 + $0x2b0] sm:$0xff] }
 0x64d   : > { %16263 = vmatpush3.xpose.msk.msra.mxu0 %vm300_vm0, %v14210_v36  ;;  %v23767_v36 = vld [vmem:[#allocation18_spill] sm:$0xff] }
 0x64e   : > { %16297 = vmatpush3.xpose.msk.msra.mxu1 %vm300_vm0, %v14242_v30  ;;  %16264 = vmatprep.subr.msk.mxu0 %vm300_vm0, %v14225_v52  ;;  %v23768_v30 = vld [vmem:[#allocation19_spill] sm:$0xff]  ;;  %v23769_v52 = vld [vmem:[#allocation20_spill] sm:$0xff] }
 0x64f   : > { %16298 = vmatprep.subr.msk.mxu1 %vm300_vm0, %v21603_v40  ;;  %v14223_v40 = vld [vmem:[%s16630_s30 + $0x2a0] sm:$0xff] }
 0x651   : > { %16265 = vmatpush3.xpose.msk.msra.mxu0 %vm300_vm0, %v14209_v56  ;;  %v23770_v56 = vld [vmem:[#allocation21_spill] sm:$0xff] }
 0x652   : > { %16299 = vmatpush3.xpose.msk.msra.mxu1 %vm300_vm0, %v14241_v63  ;;  %16266 = vmatprep.subr.msk.mxu0 %vm300_vm0, %v14224_v12  ;;  %v23771_v63 = vld [vmem:[#allocation22_spill] sm:$0xff]  ;;  %v23772_v12 = vld [vmem:[#allocation23_spill] sm:$0xff] }
 0x653   : > { %16300 = vmatprep.subr.msk.mxu1 %vm300_vm0, %v21614_v34  ;;  %v14353_v34 = vld [vmem:[%s16630_s30 + $0x271] sm:$0xff] }
 0x655   : > { %16267 = vmatpush3.xpose.msk.msra.mxu0 %vm300_vm0, %v14208_v5  ;;  %v23773_v5 = vld [vmem:[#allocation24_spill] sm:$0xff] }
 0x656   : > { %16301 = vmatpush3.xpose.msk.msra.mxu1 %vm300_vm0, %v14240_v16  ;;  %16268 = vmatprep.subr.msk.mxu0 %vm300_vm0, %v14223_v40  ;;  %v23774_v16 = vld [vmem:[#allocation25_spill] sm:$0xff]  ;;  %v23775_v40 = vld [vmem:[#allocation26_spill] sm:$0xff] }
 0x657   : > { %16302 = vmatprep.subr.msk.mxu1 %vm300_vm0, %v21625_v13  ;;  %v22275_v13 = vld [vmem:[%s22842_s1 + $0xc8] sm:$0xff] }
 0x659   : > { %16269 = vmatpush3.xpose.msk.msra.mxu0 %vm300_vm0, %v14207_v20  ;;  %v23776_v20 = vld [vmem:[#allocation27_spill] sm:$0xff] }
 0x65a   : > { %16303 = vmatpush3.xpose.msk.msra.mxu1 %vm300_vm0, %v14239_v51  ;;  %16306 = vmatprep.subr.msk.mxu0 %vm300_vm0, %v14369_v21  ;;  %v23777_v51 = vld [vmem:[#allocation28_spill] sm:$0xff]  ;;  %v23778_v21 = vld [vmem:[#allocation29_spill] sm:$0xff] }
 0x65b   : > { %16340 = vmatprep.subr.msk.mxu1 %vm300_vm0, %v14401_v49  ;;  %v23779_v49 = vld [vmem:[#allocation30_spill] sm:$0xff] }
 0x65c   : > { %16271 = vmatmul.mubr.msk.f32.vlgmr.msra.gmra.mxu0 %vm300_vm0, %v22134_v62 }
 0x65d   : > { %16305 = vmatmul.mubr.msk.f32.vlgmr.msra.gmra.mxu1 %vm300_vm0, %v22134_v62  ;;  %16307 = vmatpush3.xpose.msk.msra.mxu0 %vm300_vm0, %v14353_v34  ;;  %v23748_v62 = vld [vmem:[#allocation6_spill] sm:$0xff]  ;;  %v23780_v34 = vld [vmem:[#allocation31_spill] sm:$0xff] }
 0x65e   : > { %16341 = vmatpush3.xpose.msk.msra.mxu1 %vm300_vm0, %v14385_v9  ;;  %16308 = vmatprep.subr.msk.mxu0 %vm300_vm0, %v21644_v24  ;;  %v14398_v24 = vld [vmem:[%s16630_s30 + $0x601] sm:$0xff]  ;;  %v23781_v9 = vld [vmem:[#allocation32_spill] sm:$0xff] }
 0x65f   : > { %16342 = vmatprep.subr.msk.mxu1 %vm300_vm0, %v21647_v61  ;;  %16338 = vmatprep.mubr.msk.f32.mxu0 %vm300_vm0, %v22275_v13  ;;  %v23750_v61 = vld [vmem:[#allocation8_spill] sm:$0xff] }
 0x660   : > { %16372 = vmatprep.mubr.msk.f32.mxu1 %vm300_vm0, %v22275_v13 }
 0x661   : > { %16309 = vmatpush3.xpose.msk.msra.mxu0 %vm300_vm0, %v21658_v48  ;;  %v14397_v48 = vld [vmem:[%s16630_s30 + $0x5f1] sm:$0xff] }
 0x662   : > { %16343 = vmatpush3.xpose.msk.msra.mxu1 %vm300_vm0, %v23748_v62  ;;  %16310 = vmatprep.subr.msk.mxu0 %vm300_vm0, %v23749_v46  ;;  %v14516_v62 = vld [vmem:[%s16630_s30 + $0x4f2] sm:$0xff]  ;;  %v16546_v46 = vmov 0  }
 0x663   : > { %16344 = vmatprep.subr.msk.mxu1 %vm300_vm0, %v14399_v25  ;;  %v23782_v25 = vld [vmem:[#allocation33_spill] sm:$0xff]  ;;  %16483 = vset.pattern.permute.xlu0 %v16546_v46 }
 0x665   : > { %16311 = vmatpush3.xpose.msk.msra.mxu0 %vm300_vm0, %v21684_v44  ;;  %v14396_v44 = vld [vmem:[%s16630_s30 + $0x5e1] sm:$0xff] }
 0x666   : > { %16345 = vmatpush3.xpose.msk.msra.mxu1 %vm300_vm0, %v23750_v61  ;;  %16312 = vmatprep.subr.msk.mxu0 %vm300_vm0, %v23751_v7  ;;  %v14497_v61 = vld [vmem:[%s16630_s30 + $0x382] sm:$0xff] }
 0x667   : > { %16346 = vmatprep.subr.msk.mxu1 %vm300_vm0, %v14398_v24  ;;  %v14514_v24 = vld [vmem:[%s16630_s30 + $0x4d2] sm:$0xff]  ;;  %v14529_v7 = vld [vmem:[%s16630_s30 + $0x602] sm:$0xff] }
 0x669   : > { %16313 = vmatpush3.xpose.msk.msra.mxu0 %vm300_vm0, %v21705_v2  ;;  %v14395_v2 = vld [vmem:[%s16630_s30 + $0x5d1] sm:$0xff] }
 0x66a   : > { %16347 = vmatpush3.xpose.msk.msra.mxu1 %vm300_vm0, %v23752_v19  ;;  %16314 = vmatprep.subr.msk.mxu0 %vm300_vm0, %v23753_v1  ;;  %v14528_v19 = vld [vmem:[%s16630_s30 + $0x5f2] sm:$0xff] }
 0x66b   : > { %16348 = vmatprep.subr.msk.mxu1 %vm300_vm0, %v14397_v48  ;;  %v14496_v48 = vld [vmem:[%s16630_s30 + $0x372] sm:$0xff] }
 0x66c   : > { %v14480_v1 = vld [vmem:[%s16630_s30 + $0x232] sm:$0xff] }
 0x66d   : > { %16315 = vmatpush3.xpose.msk.msra.mxu0 %vm300_vm0, %v21722_v6  ;;  %v14394_v6 = vld [vmem:[%s16630_s30 + $0x5c1] sm:$0xff] }
 0x66e   : > { %16349 = vmatpush3.xpose.msk.msra.mxu1 %vm300_vm0, %v23754_v50  ;;  %16316 = vmatprep.subr.msk.mxu0 %vm300_vm0, %v23755_v38  ;;  %v14495_v50 = vld [vmem:[%s16630_s30 + $0x362] sm:$0xff] }
 0x66f   : > { %16350 = vmatprep.subr.msk.mxu1 %vm300_vm0, %v14396_v44  ;;  %v14512_v44 = vld [vmem:[%s16630_s30 + $0x4b2] sm:$0xff]  ;;  %v14527_v38 = vld [vmem:[%s16630_s30 + $0x5e2] sm:$0xff] }
 0x671   : > { %16317 = vmatpush3.xpose.msk.msra.mxu0 %vm300_vm0, %v21739_v43  ;;  %v14361_v43 = vld [vmem:[%s16630_s30 + $0x311] sm:$0xff] }
 0x672   : > { %16351 = vmatpush3.xpose.msk.msra.mxu1 %vm300_vm0, %v21742_v14  ;;  %16318 = vmatprep.subr.msk.mxu0 %vm300_vm0, %v23756_v23  ;;  %v23758_v14 = vld [vmem:[#allocation40_spill] sm:$0xff]  ;;  %v14511_v23 = vld [vmem:[%s16630_s30 + $0x4a2] sm:$0xff] }
 0x673   : > { %16352 = vmatprep.subr.msk.mxu1 %vm300_vm0, %v14395_v2  ;;  %v14479_v2 = vld [vmem:[%s16630_s30 + $0x222] sm:$0xff] }
 0x675   : > { %16319 = vmatpush3.xpose.msk.msra.mxu0 %vm300_vm0, %v21756_v27  ;;  %v14345_v27 = vld [vmem:[%s16630_s30 + $0x1d1] sm:$0xff] }
 0x676   : > { %16353 = vmatpush3.xpose.msk.msra.mxu1 %vm300_vm0, %v21759_v37  ;;  %16320 = vmatprep.subr.msk.mxu0 %vm300_vm0, %v23757_v0  ;;  %v23760_v37 = vld [vmem:[#allocation11_spill] sm:$0xff] }
 0x677   : > { %16354 = vmatprep.subr.msk.mxu1 %vm300_vm0, %v14394_v6  ;;  %v14494_v6 = vld [vmem:[%s16630_s30 + $0x352] sm:$0xff] }
 0x678   : > { %v14526_v0 = vld [vmem:[%s16630_s30 + $0x5d2] sm:$0xff] }
 0x679   : > { %16321 = vmatpush3.xpose.msk.msra.mxu0 %vm300_vm0, %v23758_v14  ;;  %v14493_v14 = vld [vmem:[%s16630_s30 + $0x342] sm:$0xff] }
 0x67a   : > { %16355 = vmatpush3.xpose.msk.msra.mxu1 %vm300_vm0, %v23759_v53  ;;  %16322 = vmatprep.subr.msk.mxu0 %vm300_vm0, %v14361_v43  ;;  %v14478_v43 = vld [vmem:[%s16630_s30 + $0x212] sm:$0xff]  ;;  %v14525_v53 = vld [vmem:[%s16630_s30 + $0x5c2] sm:$0xff] }
 0x67b   : > { %16356 = vmatprep.subr.msk.mxu1 %vm300_vm0, %v14393_v39  ;;  %v14510_v39 = vld [vmem:[%s16630_s30 + $0x492] sm:$0xff] }
 0x67d   : > { %16323 = vmatpush3.xpose.msk.msra.mxu0 %vm300_vm0, %v14345_v27  ;;  %v14477_v27 = vld [vmem:[%s16630_s30 + $0x202] sm:$0xff] }
 0x67e   : > { %16357 = vmatpush3.xpose.msk.msra.mxu1 %vm300_vm0, %v14377_v57  ;;  %16324 = vmatprep.subr.msk.mxu0 %vm300_vm0, %v23760_v37  ;;  %v14509_v57 = vld [vmem:[%s16630_s30 + $0x482] sm:$0xff]  ;;  %v14492_v37 = vld [vmem:[%s16630_s30 + $0x312] sm:$0xff] }
 0x67f   : > { %16358 = vmatprep.subr.msk.mxu1 %vm300_vm0, %v23761_v55  ;;  %v14524_v55 = vld [vmem:[%s16630_s30 + $0x592] sm:$0xff] }
 0x681   : > { %16325 = vmatpush3.xpose.msk.msra.mxu0 %vm300_vm0, %v23762_v32  ;;  %v14476_v32 = vld [vmem:[%s16630_s30 + $0x1d2] sm:$0xff] }
 0x682   : > { %16359 = vmatpush3.xpose.msk.msra.mxu1 %vm300_vm0, %v23763_v22  ;;  %16326 = vmatprep.subr.msk.mxu0 %vm300_vm0, %v23764_v33  ;;  %v14508_v22 = vld [vmem:[%s16630_s30 + $0x452] sm:$0xff] }
 0x683   : > { %16360 = vmatprep.subr.msk.mxu1 %vm300_vm0, %v23765_v8  ;;  %v14490_v33 = vld [vmem:[%s16630_s30 + $0x2f2] sm:$0xff] }
 0x684   : > { %v14474_v8 = vld [vmem:[%s16630_s30 + $0x1b2] sm:$0xff] }
 0x685   : > { %16327 = vmatpush3.xpose.msk.msra.mxu0 %vm300_vm0, %v23766_v17  ;;  %v14489_v17 = vld [vmem:[%s16630_s30 + $0x2e2] sm:$0xff] }
 0x686   : > { %16361 = vmatpush3.xpose.msk.msra.mxu1 %vm300_vm0, %v23767_v36  ;;  %16328 = vmatprep.subr.msk.mxu0 %vm300_vm0, %v23768_v30  ;;  %v14504_v36 = vld [vmem:[%s16630_s30 + $0x412] sm:$0xff]  ;;  %v14471_v30 = vld [vmem:[%s16630_s30 + $0x182] sm:$0xff] }
 0x687   : > { %16362 = vmatprep.subr.msk.mxu1 %vm300_vm0, %v23769_v52  ;;  %v14503_v52 = vld [vmem:[%s16630_s30 + $0x402] sm:$0xff] }
 0x689   : > { %16329 = vmatpush3.xpose.msk.msra.mxu0 %vm300_vm0, %v23770_v56  ;;  %v14486_v56 = vld [vmem:[%s16630_s30 + $0x2b2] sm:$0xff] }
 0x68a   : > { %16363 = vmatpush3.xpose.msk.msra.mxu1 %vm300_vm0, %v23771_v63  ;;  %16330 = vmatprep.subr.msk.mxu0 %vm300_vm0, %v23772_v12  ;;  %v14502_v63 = vld [vmem:[%s16630_s30 + $0x3f2] sm:$0xff]  ;;  %v14485_v12 = vld [vmem:[%s16630_s30 + $0x2a2] sm:$0xff] }
 0x68b   : > { %16364 = vmatprep.subr.msk.mxu1 %vm300_vm0, %v23773_v5  ;;  %v14501_v5 = vld [vmem:[%s16630_s30 + $0x3e2] sm:$0xff] }
 0x68d   : > { %16331 = vmatpush3.xpose.msk.msra.mxu0 %vm300_vm0, %v23774_v16  ;;  %v22553_v16 = vpop.f32.mrf.mxu1 }
 0x68e   : > { %16365 = vmatpush3.xpose.msk.msra.mxu1 %vm300_vm0, %v23775_v40  ;;  %16332 = vmatprep.subr.msk.mxu0 %vm300_vm0, %v23776_v20 }
 0x68f   : > { %16366 = vmatprep.subr.msk.mxu1 %vm300_vm0, %v23777_v51  ;;  %v22557_v20 = vpop.f32.mrf.mxu1 }
 0x691   : > { %16333 = vmatpush3.xpose.msk.msra.mxu0 %vm300_vm0, %v21881_v3  ;;  %v14500_v3 = vld [vmem:[%s16630_s30 + $0x3b2] sm:$0xff]  ;;  %v22561_v51 = vpop.f32.mrf.mxu1 }
 0x692   : > { %16367 = vmatpush3.xpose.msk.msra.mxu1 %vm300_vm0, %v21884_v10  ;;  %16334 = vmatprep.subr.msk.mxu0 %vm300_vm0, %v23778_v21  ;;  %v14532_v10 = vld [vmem:[%s16630_s30 + $0x632] sm:$0xff] }
 0x693   : > { %16368 = vmatprep.subr.msk.mxu1 %vm300_vm0, %v23779_v49  ;;  %v22565_v49 = vpop.f32.mrf.mxu1 }
 0x695   : > { %16335 = vmatpush3.xpose.msk.msra.mxu0 %vm300_vm0, %v21901_v54  ;;  %v14484_v54 = vld [vmem:[%s16630_s30 + $0x272] sm:$0xff] }
 0x696   : > { %16369 = vmatpush3.xpose.msk.msra.mxu1 %vm300_vm0, %v23780_v34  ;;  %16336 = vmatprep.subr.msk.mxu0 %vm300_vm0, %v23781_v9  ;;  %v22569_v9 = vpop.f32.mrf.mxu1 }
 0x697   : > { %16370 = vmatprep.subr.msk.mxu1 %vm300_vm0, %v21910_v4  ;;  %v22416_v4 = vld [vmem:[%s22842_s1 + $0xd0] sm:$0xff] }
 0x699   : > { %16337 = vmatpush3.xpose.msk.msra.mxu0 %vm300_vm0, %v21921_v28  ;;  %v14498_v28 = vld [vmem:[%s16630_s30 + $0x392] sm:$0xff] }
 0x69a   : > { %16371 = vmatpush3.xpose.msk.msra.mxu1 %vm300_vm0, %v23782_v25  ;;  %16374 = vmatprep.subr.msk.mxu0 %vm300_vm0, %v14500_v3 }
 0x69b   : > { %16408 = vmatprep.subr.msk.mxu1 %vm300_vm0, %v14532_v10  ;;  %v22573_v10 = vpop.f32.mrf.mxu1 }
 0x69c   : > { %16339 = vmatmul.mubr.msk.f32.vlgmr.msra.gmra.mxu0 %vm300_vm0, %v22275_v13 }
 0x69d   : > { %16373 = vmatmul.mubr.msk.f32.vlgmr.msra.gmra.mxu1 %vm300_vm0, %v22275_v13  ;;  %16375 = vmatpush3.xpose.msk.msra.mxu0 %vm300_vm0, %v14484_v54  ;;  %v14530_v13 = vld [vmem:[%s16630_s30 + $0x612] sm:$0xff]  ;;  %v22577_v54 = vpop.f32.mrf.mxu1 }
 0x69e   : > { %16409 = vmatpush3.xpose.msk.msra.mxu1 %vm300_vm0, %v14516_v62  ;;  %16376 = vmatprep.subr.msk.mxu0 %vm300_vm0, %v21935_v15  ;;  %v11158_v15 = vld [vmem:[%s22843_s2] sm:$0xff] }
 0x69f   : > { %16410 = vmatprep.subr.msk.mxu1 %vm300_vm0, %v21938_v11  ;;  %16406 = vmatprep.mubr.msk.f32.mxu0 %vm300_vm0, %v22416_v4  ;;  %v14482_v11 = vld [vmem:[%s16630_s30 + $0x252] sm:$0xff] }
 0x6a0   : > { %16440 = vmatprep.mubr.msk.f32.mxu1 %vm300_vm0, %v22416_v4  ;;  %11161 = vperm.xlu0 %16483, %v11158_v15  }
 0x6a1   : > { %16377 = vmatpush3.xpose.msk.msra.mxu0 %vm300_vm0, %v21949_v35  ;;  %v14513_v35 = vld [vmem:[%s16630_s30 + $0x4c2] sm:$0xff] }
 0x6a2   : > { %16411 = vmatpush3.xpose.msk.msra.mxu1 %vm300_vm0, %v21952_v18  ;;  %16378 = vmatprep.subr.msk.mxu0 %vm300_vm0, %v14498_v28  ;;  %v14481_v18 = vld [vmem:[%s16630_s30 + $0x242] sm:$0xff] }
 0x6a3   : > { %16412 = vmatprep.subr.msk.mxu1 %vm300_vm0, %v14530_v13 }
 0x6a5   : > { %16379 = vmatpush3.xpose.msk.msra.mxu0 %vm300_vm0, %v14482_v11 }
 0x6a6   : > { %16413 = vmatpush3.xpose.msk.msra.mxu1 %vm300_vm0, %v14514_v24  ;;  %16380 = vmatprep.subr.msk.mxu0 %vm300_vm0, %v14497_v61 }
 0x6a7   : > { %16414 = vmatprep.subr.msk.mxu1 %vm300_vm0, %v14529_v7 }
 0x6a9   : > { %16381 = vmatpush3.xpose.msk.msra.mxu0 %vm300_vm0, %v14481_v18 }
 0x6aa   : > { %16415 = vmatpush3.xpose.msk.msra.mxu1 %vm300_vm0, %v14513_v35  ;;  %16382 = vmatprep.subr.msk.mxu0 %vm300_vm0, %v14496_v48 }
 0x6ab   : > { %16416 = vmatprep.subr.msk.mxu1 %vm300_vm0, %v14528_v19 }
 0x6ad   : > { %16383 = vmatpush3.xpose.msk.msra.mxu0 %vm300_vm0, %v14480_v1 }
 0x6ae   : > { %16417 = vmatpush3.xpose.msk.msra.mxu1 %vm300_vm0, %v14512_v44  ;;  %16384 = vmatprep.subr.msk.mxu0 %vm300_vm0, %v14495_v50 }
 0x6af   : > { %16418 = vmatprep.subr.msk.mxu1 %vm300_vm0, %v14527_v38 }
 0x6b1   : > { %16385 = vmatpush3.xpose.msk.msra.mxu0 %vm300_vm0, %v14479_v2 }
 0x6b2   : > { %16419 = vmatpush3.xpose.msk.msra.mxu1 %vm300_vm0, %v14511_v23  ;;  %16386 = vmatprep.subr.msk.mxu0 %vm300_vm0, %v14494_v6 }
 0x6b3   : > { %16420 = vmatprep.subr.msk.mxu1 %vm300_vm0, %v14526_v0 }
 0x6b5   : > { %16387 = vmatpush3.xpose.msk.msra.mxu0 %vm300_vm0, %v14478_v43 }
 0x6b6   : > { %16421 = vmatpush3.xpose.msk.msra.mxu1 %vm300_vm0, %v14510_v39  ;;  %16388 = vmatprep.subr.msk.mxu0 %vm300_vm0, %v14493_v14 }
 0x6b7   : > { %16422 = vmatprep.subr.msk.mxu1 %vm300_vm0, %v14525_v53 }
 0x6b9   : > { %16389 = vmatpush3.xpose.msk.msra.mxu0 %vm300_vm0, %v14477_v27 }
 0x6ba   : > { %16423 = vmatpush3.xpose.msk.msra.mxu1 %vm300_vm0, %v14509_v57  ;;  %16390 = vmatprep.subr.msk.mxu0 %vm300_vm0, %v14492_v37 }
 0x6bb   : > { %16424 = vmatprep.subr.msk.mxu1 %vm300_vm0, %v14524_v55 }
 0x6bd   : > { %16391 = vmatpush3.xpose.msk.msra.mxu0 %vm300_vm0, %v14476_v32 }
 0x6be   : > { %16425 = vmatpush3.xpose.msk.msra.mxu1 %vm300_vm0, %v14508_v22  ;;  %16392 = vmatprep.subr.msk.mxu0 %vm300_vm0, %v22024_v29  ;;  %v14506_v29 = vld [vmem:[%s16630_s30 + $0x432] sm:$0xff] }
 0x6bf   : > { %16426 = vmatprep.subr.msk.mxu1 %vm300_vm0, %v22027_v60  ;;  %v14473_v60 = vld [vmem:[%s16630_s30 + $0x1a2] sm:$0xff] }
 0x6c1   : > { %16393 = vmatpush3.xpose.msk.msra.mxu0 %vm300_vm0, %v22038_v41  ;;  %v14505_v41 = vld [vmem:[%s16630_s30 + $0x422] sm:$0xff] }
 0x6c2   : > { %16427 = vmatpush3.xpose.msk.msra.mxu1 %vm300_vm0, %v22041_v31  ;;  %16394 = vmatprep.subr.msk.mxu0 %vm300_vm0, %v14490_v33  ;;  %v14488_v31 = vld [vmem:[%s16630_s30 + $0x2d2] sm:$0xff] }
 0x6c3   : > { %16428 = vmatprep.subr.msk.mxu1 %vm300_vm0, %v22044_v58  ;;  %v14472_v58 = vld [vmem:[%s16630_s30 + $0x192] sm:$0xff] }
 0x6c5   : > { %16395 = vmatpush3.xpose.msk.msra.mxu0 %vm300_vm0, %v14474_v8 }
 0x6c6   : > { %16429 = vmatpush3.xpose.msk.msra.mxu1 %vm300_vm0, %v14506_v29  ;;  %16396 = vmatprep.subr.msk.mxu0 %vm300_vm0, %v14489_v17 }
 0x6c7   : > { %16430 = vmatprep.subr.msk.mxu1 %vm300_vm0, %v22055_v45  ;;  %v14487_v45 = vld [vmem:[%s16630_s30 + $0x2c2] sm:$0xff] }
 0x6c9   : > { %16397 = vmatpush3.xpose.msk.msra.mxu0 %vm300_vm0, %v14473_v60 }
 0x6ca   : > { %16431 = vmatpush3.xpose.msk.msra.mxu1 %vm300_vm0, %v14505_v41  ;;  %16398 = vmatprep.subr.msk.mxu0 %vm300_vm0, %v14488_v31 }
 0x6cb   : > { %16432 = vmatprep.subr.msk.mxu1 %vm300_vm0, %v22066_v47  ;;  %v14470_v47 = vld [vmem:[%s16630_s30 + $0x172] sm:$0xff] }
 0x6cd   : > { %16399 = vmatpush3.xpose.msk.msra.mxu0 %vm300_vm0, %v14472_v58 }
 0x6ce   : > { %16433 = vmatpush3.xpose.msk.msra.mxu1 %vm300_vm0, %v14504_v36  ;;  %16400 = vmatprep.subr.msk.mxu0 %vm300_vm0, %v14487_v45 }
 0x6cf   : > { %16434 = vmatprep.subr.msk.mxu1 %vm300_vm0, %v22077_v59  ;;  %v14469_v59 = vld [vmem:[%s16630_s30 + $0x162] sm:$0xff]  ;;  %s161_s30 = sand.u32 1, %s16536_s13  }
 0x6d0   : > { %s11254_s7 = sshll.u32 %s161_s30, 5  ;;  %s11177_s16 = scalar_lea.sflag [#allocation3], %s161_s30 }
 0x6d1   : > { %16401 = vmatpush3.xpose.msk.msra.mxu0 %vm300_vm0, %v14471_v30  ;;  %s163_s9 = scalar_lea.vmem [#allocation2], %s11254_s7 }
 0x6d2   : > { %16435 = vmatpush3.xpose.msk.msra.mxu1 %vm300_vm0, %v14503_v52  ;;  %16402 = vmatprep.subr.msk.mxu0 %vm300_vm0, %v14486_v56  ;;  %s11191_s10 = sshll.u32 %s163_s9, 4  ;;  %s11192_s10 = int_to_ptr.vmem [resolvable:$true] %s11191_s10 }
 0x6d3   : > { %16436 = vmatprep.subr.msk.mxu1 %vm300_vm0, %v22088_v42  ;;  %v22551_v42 = vpop.f32.mrf.mxu0  ;;  %s16484_s20 = scalar_lea.vmem %s11192_s10, 512  ;;  %p16491_p0 = scmp.lt.s32.totalorder %s11192_s10, %s16489_s25 }
 0x6d4   : > { %p16485_p11 = scmp.ne.s32.totalorder %s11192_s10, %s16484_s20  ;;  %p16492_p1 = scmp.lt.s32.totalorder %s16490_s26, %s16484_s20 }
 0x6d5   : > { %16403 = vmatpush3.xpose.msk.msra.mxu0 %vm300_vm0, %v14470_v47  ;;  %v22555_v40 = vpop.f32.mrf.mxu0 }
 0x6d6   : > { %16437 = vmatpush3.xpose.msk.msra.mxu1 %vm300_vm0, %v14502_v63  ;;  %16404 = vmatprep.subr.msk.mxu0 %vm300_vm0, %v14485_v12  ;;  %p16486_p12 = pnand %p16485_p11, %p16606_p5  ;;  %p16493_p2 = por %p16492_p1, %p16491_p0 }
 0x6d7   : > { %16438 = vmatprep.subr.msk.mxu1 %vm300_vm0, %v22099_v26  ;;  %v22559_v26 = vpop.f32.mrf.mxu0 }
 0x6d8   : > { %p16487_p13 = pneg %p16486_p12 }
 0x6d9   : > { %16405 = vmatpush3.xpose.msk.msra.mxu0 %vm300_vm0, %v14469_v59  ;;  %v22563_v21 = vpop.f32.mrf.mxu0 }
 0x6da   : > { %16439 = vmatpush3.xpose.msk.msra.mxu1 %vm300_vm0, %v14501_v5  ;;  %p16494_p3 = pnand %p16493_p2, %p16487_p13 }
 0x6db   : > { %v22567_v34 = vpop.f32.mrf.mxu0 }
 0x6dc   : > { %16407 = vmatmul.mubr.msk.f32.vlgmr.msra.gmra.mxu0 %vm300_vm0, %v22416_v4 }
 0x6dd   : > { %16441 = vmatmul.mubr.msk.f32.vlgmr.msra.gmra.mxu1 %vm300_vm0, %v22416_v4  ;;  %v22571_v3 = vpop.f32.mrf.mxu0  ;;  %v22581_v4 = vpop.f32.mrf.mxu1 }
 0x6df   : > { %v22575_v25 = vpop.f32.mrf.mxu0  ;;  %v22585_v13 = vpop.f32.mrf.mxu1 }
 0x6e1   : > { %v22579_v62 = vpop.f32.mrf.mxu0  ;;  %v22589_v15 = vpop.f32.mrf.mxu1 }
 0x6e3   : > { %v22583_v28 = vpop.f32.mrf.mxu0  ;;  %v22593_v24 = vpop.f32.mrf.mxu1 }
 0x6e5   : > { %v22587_v46 = vpop.f32.mrf.mxu0  ;;  %v22597_v7 = vpop.f32.mrf.mxu1 }
 0x6e7   : > { %v22591_v11 = vpop.f32.mrf.mxu0  ;;  %v22601_v35 = vpop.f32.mrf.mxu1 }
 0x6e9   : > { %v22595_v61 = vpop.f32.mrf.mxu0  ;;  %v22605_v19 = vpop.f32.mrf.mxu1 }
 0x6eb   : > { %v22599_v18 = vpop.f32.mrf.mxu0  ;;  %v22609_v44 = vpop.f32.mrf.mxu1 }
 0x6ed   : > { %v22603_v48 = vpop.f32.mrf.mxu0  ;;  %v22613_v38 = vpop.f32.mrf.mxu1 }
 0x6ef   : > { %v22607_v1 = vpop.f32.mrf.mxu0  ;;  %v22617_v23 = vpop.f32.mrf.mxu1 }
 0x6f1   : > { %v22611_v50 = vpop.f32.mrf.mxu0  ;;  %v22621_v0 = vpop.f32.mrf.mxu1 }
 0x6f3   : > { %v22615_v2 = vpop.f32.mrf.mxu0  ;;  %v22625_v39 = vpop.f32.mrf.mxu1 }
 0x6f5   : > { %v22619_v6 = vpop.f32.mrf.mxu0  ;;  %v22629_v53 = vpop.f32.mrf.mxu1 }
 0x6f7   : > { %v22623_v43 = vpop.f32.mrf.mxu0  ;;  %v22633_v57 = vpop.f32.mrf.mxu1 }
 0x6f9   : > { %v22627_v14 = vpop.f32.mrf.mxu0  ;;  %v22637_v55 = vpop.f32.mrf.mxu1 }
 0x6fb   : > { %v22631_v27 = vpop.f32.mrf.mxu0  ;;  %v22641_v22 = vpop.f32.mrf.mxu1 }
 0x6fd   : > { %v22635_v37 = vpop.f32.mrf.mxu0  ;;  %v22645_v8 = vpop.f32.mrf.mxu1 }
 0x6ff   : > { %v22639_v32 = vpop.f32.mrf.mxu0  ;;  %v22649_v17 = vpop.f32.mrf.mxu1 }
 0x701   : > { %v22643_v33 = vpop.f32.mrf.mxu0  ;;  %v22653_v41 = vpop.f32.mrf.mxu1 }
 0x703   : > { %v22647_v29 = vpop.f32.mrf.mxu0  ;;  %v22657_v58 = vpop.f32.mrf.mxu1 }
 0x704   : > { %23783 = vst [vmem:[#allocation41_spill] sm:$0xff] %v22657_v58 }
 0x705   : > { %v22651_v60 = vpop.f32.mrf.mxu0  ;;  %v22661_v45 = vpop.f32.mrf.mxu1 }
 0x706   : > { %23785 = vst [vmem:[#allocation43_spill] sm:$0xff] %v22661_v45 }
 0x707   : > { %v22655_v31 = vpop.f32.mrf.mxu0  ;;  %v22665_v52 = vpop.f32.mrf.mxu1 }
 0x708   : > { %23787 = vst [vmem:[#allocation45_spill] sm:$0xff] %v22665_v52 }
 0x709   : > { %v22659_v36 = vpop.f32.mrf.mxu0  ;;  %v22669_v47 = vpop.f32.mrf.mxu1 }
 0x70a   : > { %23784 = vst [vmem:[#allocation42_spill] sm:$0xff] %v22659_v36  ;;  %23789 = vst [vmem:[#allocation47_spill] sm:$0xff] %v22669_v47 }
 0x70b   : > { %v22663_v30 = vpop.f32.mrf.mxu0  ;;  %v22673_v12 = vpop.f32.mrf.mxu1 }
 0x70c   : > { %23786 = vst [vmem:[#allocation44_spill] sm:$0xff] %v22663_v30 }
 0x70d   : > { %v22667_v56 = vpop.f32.mrf.mxu0  ;;  %v22677_v5 = vpop.f32.mrf.mxu1 }
 0x70e   : > { %23788 = vst [vmem:[#allocation46_spill] sm:$0xff] %v22667_v56  ;;  %23792 = vst [vmem:[#allocation50_spill] sm:$0xff] %v22677_v5 }
 0x70f   : > { %v22671_v63 = vpop.f32.mrf.mxu0  ;;  %v22681_v36 = vpop.f32.mrf.mxu1 }
 0x710   : > { %23790 = vst [vmem:[#allocation48_spill] sm:$0xff] %v22671_v63  ;;  %23794 = vst [vmem:[#allocation52_spill] sm:$0xff] %v22681_v36 }
 0x711   : > { %v22675_v59 = vpop.f32.mrf.mxu0  ;;  %v22685_v30 = vpop.f32.mrf.mxu1 }
 0x712   : > { %23791 = vst [vmem:[#allocation49_spill] sm:$0xff] %v22675_v59  ;;  %23795 = vst [vmem:[#allocation53_spill] sm:$0xff] %v22685_v30  ;;  %v900_v59 = vadd.f32 %v22559_v26, %v22551_v42  ;;  %v902_v30 = vadd.f32 %v22563_v21, %v22555_v40 }
 0x713   : > { %v22679_v58 = vpop.f32.mrf.mxu0  ;;  %v22689_v56 = vpop.f32.mrf.mxu1 }
 0x714   : > { %23793 = vst [vmem:[#allocation51_spill] sm:$0xff] %v22679_v58  ;;  %23797 = vst [vmem:[#allocation55_spill] sm:$0xff] %v22689_v56  ;;  %v971_v58 = vadd.f32 %v22561_v51, %v22553_v16  ;;  %v973_v56 = vadd.f32 %v22565_v49, %v22557_v20 }
 0x715   : > { %v22683_v45 = vpop.f32.mrf.mxu0  ;;  %v22693_v63 = vpop.f32.mrf.mxu1 }
 0x716   : > { %23799 = vst [vmem:[#allocation57_spill] sm:$0xff] %v22693_v63  ;;  %v1380_v63 = vadd.f32 %v22569_v9, %v971_v58  ;;  %v1381_v42 = vadd.f32 %v22573_v10, %v973_v56 }
 0x717   : > { %v22687_v52 = vpop.f32.mrf.mxu0  ;;  %v22701_v36 = vpop.f32.mrf.mxu1 }
 0x718   : > { %23796 = vst [vmem:[#allocation54_spill] sm:$0xff] %v22687_v52  ;;  %23800 = vst [vmem:[#allocation58_spill] sm:$0xff] %v22701_v36  ;;  %v1379_v52 = vadd.f32 %v22571_v3, %v902_v30  ;;  %v1788_v26 = vadd.f32 %v22577_v54, %v1380_v63  ;;  %v1789_v20 = vadd.f32 %v22581_v4, %v1381_v42 }
 0x719   : > { %v22691_v47 = vpop.f32.mrf.mxu0  ;;  %v22715_v36 = vpop.f32.mrf.mxu1 }
 0x71a   : > { %23798 = vst [vmem:[#allocation56_spill] sm:$0xff] %v22691_v47  ;;  %v1378_v47 = vadd.f32 %v22567_v34, %v900_v59  ;;  %v1787_v40 = vadd.f32 %v22579_v62, %v1379_v52  ;;  %v2195_v49 = vadd.f32 %v22585_v13, %v1788_v26  ;;  %v2196_v10 = vadd.f32 %v22589_v15, %v1789_v20  ;;  %v23801_v20 = vld [vmem:[#allocation41_spill] sm:$0xff] }
 0x71b   : > { %v22699_v5 = vpop.f32.mrf.mxu0  ;;  %v22723_v9 = vpop.f32.mrf.mxu1 }
 0x71c   : > { %v1786_v16 = vadd.f32 %v22575_v25, %v1378_v47  ;;  %v2194_v3 = vadd.f32 %v22587_v46, %v1787_v40  ;;  %v2602_v54 = vadd.f32 %v22593_v24, %v2195_v49  ;;  %v2603_v4 = vadd.f32 %v22597_v7, %v2196_v10  ;;  %v23802_v49 = vld [vmem:[#allocation42_spill] sm:$0xff]  ;;  %v23804_v10 = vld [vmem:[#allocation44_spill] sm:$0xff] }
 0x71d   : > { %v22713_v51 = vpop.f32.mrf.mxu0  ;;  %v22735_v30 = vpop.f32.mrf.mxu1 }
 0x71e   : > { %v2193_v21 = vadd.f32 %v22583_v28, %v1786_v16  ;;  %v2601_v62 = vadd.f32 %v22595_v61, %v2194_v3  ;;  %v3010_v13 = vadd.f32 %v22601_v35, %v2602_v54  ;;  %v3011_v15 = vadd.f32 %v22605_v19, %v2603_v4  ;;  %v23803_v3 = vld [vmem:[#allocation43_spill] sm:$0xff]  ;;  %v23806_v54 = vld [vmem:[#allocation46_spill] sm:$0xff] }
 0x71f   : > { %v22721_v34 = vpop.f32.mrf.mxu0  ;;  %v22743_v61 = vpop.f32.mrf.mxu1  ;;  %v23807_v4 = vld [vmem:[#allocation47_spill] sm:$0xff] }
 0x720   : > { %v2600_v25 = vadd.f32 %v22591_v11, %v2193_v21  ;;  %v3009_v46 = vadd.f32 %v22603_v48, %v2601_v62  ;;  %v3417_v24 = vadd.f32 %v22609_v44, %v3010_v13 }
 0x721   : > { %v22733_v58 = vpop.f32.mrf.mxu0  ;;  %v8707_v63 = vpop.f32.mrf.mxu1 }
 0x722   : > { %v3008_v28 = vadd.f32 %v22599_v18, %v2600_v25  ;;  %v3416_v7 = vadd.f32 %v22611_v50, %v3009_v46  ;;  %v3418_v18 = vadd.f32 %v22613_v38, %v3011_v15  ;;  %v3824_v56 = vadd.f32 %v22617_v23, %v3417_v24  ;;  %v23805_v25 = vld [vmem:[#allocation45_spill] sm:$0xff]  ;;  %v23810_v24 = vld [vmem:[#allocation50_spill] sm:$0xff] }
 0x723   : > { %v22741_v52 = vpop.f32.mrf.mxu0  ;;  %v9113_v23 = vpop.f32.mrf.mxu1  ;;  %v23809_v15 = vld [vmem:[#allocation49_spill] sm:$0xff] }
 0x724   : > { %v3415_v11 = vadd.f32 %v22607_v1, %v3008_v28  ;;  %v3823_v48 = vadd.f32 %v22619_v6, %v3416_v7  ;;  %v3825_v19 = vadd.f32 %v22621_v0, %v3418_v18  ;;  %v4232_v44 = vadd.f32 %v22625_v39, %v3824_v56  ;;  %v23808_v28 = vld [vmem:[#allocation48_spill] sm:$0xff]  ;;  %v23811_v18 = vld [vmem:[#allocation51_spill] sm:$0xff] }
 0x725   : > { %v8636_v47 = vpop.f32.mrf.mxu0  ;;  %v23812_v56 = vld [vmem:[#allocation52_spill] sm:$0xff] }
 0x726   : > { %v3822_v35 = vadd.f32 %v22615_v2, %v3415_v11  ;;  %v4231_v59 = vadd.f32 %v22627_v14, %v3823_v48  ;;  %v4233_v50 = vadd.f32 %v22629_v53, %v3825_v19  ;;  %v4639_v2 = vadd.f32 %v22633_v57, %v4232_v44  ;;  %v9115_v57 = vpop.f32.mrf.mxu1 }
 0x727   : > { %v9042_v42 = vpop.f32.mrf.mxu0 }
 0x728   : > { %v4230_v1 = vadd.f32 %v22623_v43, %v3822_v35  ;;  %v4638_v6 = vadd.f32 %v22635_v37, %v4231_v59  ;;  %v4640_v0 = vadd.f32 %v22637_v55, %v4233_v50  ;;  %v5046_v39 = vadd.f32 %v22641_v22, %v4639_v2  ;;  %v9520_v22 = vpop.f32.mrf.mxu1  ;;  %v23813_v59 = vld [vmem:[#allocation53_spill] sm:$0xff] }
 0x729   : > { %v9044_v26 = vpop.f32.mrf.mxu0 }
 0x72a   : > { %v4637_v38 = vadd.f32 %v22631_v27, %v4230_v1  ;;  %v5045_v16 = vadd.f32 %v22643_v33, %v4638_v6  ;;  %v5047_v14 = vadd.f32 %v22645_v8, %v4640_v0  ;;  %v5454_v27 = vadd.f32 %v22649_v17, %v5046_v39  ;;  %v9522_v46 = vpop.f32.mrf.mxu1  ;;  %v23815_v6 = vld [vmem:[#allocation55_spill] sm:$0xff]  ;;  %v23816_v0 = vld [vmem:[#allocation56_spill] sm:$0xff]  ;;  %v23817_v39 = vld [vmem:[#allocation57_spill] sm:$0xff] }
 0x72b   : > { %v9449_v21 = vpop.f32.mrf.mxu0 }
 0x72c   : > { %v5044_v43 = vadd.f32 %v22639_v32, %v4637_v38  ;;  %v5453_v40 = vadd.f32 %v22651_v60, %v5045_v16  ;;  %v5455_v37 = vadd.f32 %v22653_v41, %v5047_v14  ;;  %v5861_v32 = vadd.f32 %v23801_v20, %v5454_v27  ;;  %v9927_v1 = vpop.f32.mrf.mxu1  ;;  %v23814_v38 = vld [vmem:[#allocation54_spill] sm:$0xff] }
 0x72d   : > { %v9451_v13 = vpop.f32.mrf.mxu0 }
 0x72e   : > { %v5452_v53 = vadd.f32 %v22647_v29, %v5044_v43  ;;  %v5860_v33 = vadd.f32 %v23802_v49, %v5453_v40  ;;  %v5862_v8 = vadd.f32 %v23803_v3, %v5455_v37  ;;  %v6268_v17 = vadd.f32 %v23805_v25, %v5861_v32  ;;  %v9929_v37 = vpop.f32.mrf.mxu1 }
 0x72f   : > { %v9856_v19 = vpop.f32.mrf.mxu0 }
 0x730   : > { %v5859_v55 = vadd.f32 %v22655_v31, %v5452_v53  ;;  %v6267_v62 = vadd.f32 %v23806_v54, %v5860_v33  ;;  %v6269_v60 = vadd.f32 %v23807_v4, %v5862_v8  ;;  %v6676_v31 = vadd.f32 %v22673_v12, %v6268_v17  ;;  %v23818_v53 = vld [vmem:[#allocation58_spill] sm:$0xff]  ;;  %v10335_v33 = vpop.f32.mrf.mxu1 }
 0x731   : > { %v9858_v40 = vpop.f32.mrf.mxu0 }
 0x732   : > { %v6266_v29 = vadd.f32 %v23804_v10, %v5859_v55  ;;  %v6675_v11 = vadd.f32 %v23809_v15, %v6267_v62  ;;  %v6677_v7 = vadd.f32 %v23810_v24, %v6269_v60  ;;  %v7083_v48 = vadd.f32 %v23812_v56, %v6676_v31  ;;  %v10337_v54 = vpop.f32.mrf.mxu1  ;;  %v11162_v15 = vpop.permute.xlu0 %11161 }
 0x733   : > { %v10264_v49 = vpop.f32.mrf.mxu0 }
 0x734   : > { %v6674_v41 = vadd.f32 %v23808_v28, %v6266_v29  ;;  %v7082_v44 = vadd.f32 %v22683_v45, %v6675_v11  ;;  %v7084_v50 = vadd.f32 %v23813_v59, %v6677_v7  ;;  %v7490_v12 = vadd.f32 %v23815_v6, %v7083_v48 }
 0x736   : > { %v7081_v35 = vadd.f32 %v23811_v18, %v6674_v41  ;;  %v7489_v43 = vadd.f32 %v23816_v0, %v7082_v44  ;;  %v7491_v16 = vadd.f32 %v23817_v39, %v7084_v50  ;;  %v7898_v27 = vadd.f32 %v23818_v53, %v7490_v12 }
 0x738   : > { %v7488_v2 = vadd.f32 %v23814_v38, %v7081_v35  ;;  %v7897_v55 = vadd.f32 %v22713_v51, %v7489_v43  ;;  %v7899_v45 = vadd.f32 %v22715_v36, %v7491_v16  ;;  %v8305_v32 = vadd.f32 %v22723_v9, %v7898_v27  ;;  %v10266_v36 = vpop.f32.mrf.mxu0 }
 0x73a   : > { %v7896_v14 = vadd.f32 %v22699_v5, %v7488_v2  ;;  %v8304_v3 = vadd.f32 %v22733_v58, %v7897_v55  ;;  %v8306_v8 = vadd.f32 %v22735_v30, %v7899_v45  ;;  %v8712_v10 = vadd.f32 %v22743_v61, %v8305_v32 }
 0x73c   : > { %v8303_v20 = vadd.f32 %v22721_v34, %v7896_v14  ;;  %v8711_v29 = vadd.f32 %v8636_v47, %v8304_v3  ;;  %v8713_v25 = vadd.f32 %v8707_v63, %v8306_v8  ;;  %v9120_v17 = vadd.f32 %v9113_v23, %v8712_v10 }
 0x73e   : > { %v8710_v5 = vadd.f32 %v22741_v52, %v8303_v20  ;;  %v9119_v34 = vadd.f32 %v9044_v26, %v8711_v29  ;;  %v9121_v62 = vadd.f32 %v9115_v57, %v8713_v25  ;;  %v9527_v4 = vadd.f32 %v9520_v22, %v9120_v17 }
 0x740   : > { %v9118_v51 = vadd.f32 %v9042_v42, %v8710_v5  ;;  %v9526_v28 = vadd.f32 %v9451_v13, %v9119_v34  ;;  %v9528_v30 = vadd.f32 %v9522_v46, %v9121_v62  ;;  %v9934_v52 = vadd.f32 %v9927_v1, %v9527_v4 }
 0x742   : > { %v9525_v9 = vadd.f32 %v9449_v21, %v9118_v51  ;;  %v9933_v61 = vadd.f32 %v9858_v40, %v9526_v28  ;;  %v9935_v47 = vadd.f32 %v9929_v37, %v9528_v30  ;;  %v10342_v63 = vadd.f32 %v10335_v33, %v9934_v52 }
 0x744   : > { %v9932_v41 = vadd.f32 %v9856_v19, %v9525_v9  ;;  %v10341_v26 = vadd.f32 %v10266_v36, %v9933_v61  ;;  %v10343_v57 = vadd.f32 %v10337_v54, %v9935_v47 }
 0x746   : > { %v10340_v31 = vadd.f32 %v10264_v49, %v9932_v41 }
 0x75c   : > { %v10671_v60 = vpop.f32.mrf.mxu0 }
 0x75d   : > { %v10742_v58 = vpop.f32.mrf.mxu1  ;;  %v10747_v21 = vadd.f32 %v10671_v60, %v10340_v31 }
 0x75e   : > { %v10673_v42 = vpop.f32.mrf.mxu0  ;;  %v10749_v22 = vadd.f32 %v10742_v58, %v10342_v63 }
 0x75f   : > { %v10744_v23 = vpop.f32.mrf.mxu1  ;;  %v10748_v46 = vadd.f32 %v10673_v42, %v10341_v26 }
 0x760   : > { %v10750_v24 = vadd.f32 %v10744_v23, %v10343_v57 }
 0x79c   : > { %v11078_v11 = vpop.f32.mrf.mxu0 }
 0x79d   : > { %v11149_v13 = vpop.f32.mrf.mxu1  ;;  %v11154_v7 = vadd.f32 %v11078_v11, %v10747_v21 }
 0x79e   : > { %v11156_v18 = vadd.f32 %v11149_v13, %v10749_v22  ;;  %v11080_v35 = vpop.f32.mrf.mxu0 }
 0x79f   : > { %v11151_v56 = vpop.f32.mrf.mxu1  ;;  %v11164_v48 = vadd.f32 %v11162_v15, %v11154_v7  ;;  %v11155_v1 = vadd.f32 %v11080_v35, %v10748_v46 }
 0x7a0   : > { %v11166_v19 = vadd.f32 %v11162_v15, %v11156_v18  ;;  %v11157_v44 = vadd.f32 %v11151_v56, %v10750_v24 }
 0x7a1   : > { %v11168_v59 = vmax.f32 %v11164_v48, 0.0  ;;  %v11165_v38 = vadd.f32 %v11162_v15, %v11155_v1 }
 0x7a2   : > { %v11170_v50 = vmax.f32 %v11166_v19, 0.0  ;;  %v11167_v2 = vadd.f32 %v11162_v15, %v11157_v44 }
 0x7a3   : > { %11172 = vst [vmem:[%s163_s9] sm:$0xff] %v11168_v59  ;;  %v11169_v6 = vmax.f32 %v11165_v38, 0.0 }
 0x7a4   : > { %11174 = vst [vmem:[%s163_s9 + $0x10] sm:$0xff] %v11170_v50  ;;  %v11171_v12 = vmax.f32 %v11167_v2, 0.0 }
 0x7a5   : > { %11173 = vst [vmem:[%s163_s9 + $0x8] sm:$0xff] %v11169_v6 }
 0x7a6   : > { %11175 = vst [vmem:[%s163_s9 + $0x18] sm:$0xff] %v11171_v12 }
 0x7a7   : > { %16497 = shalt.err (!%p16494_p3)
}
 0x7a8   : > { %s16498_s27 = scalar_lea.hbm %s22804_s19, 512  ;;  %s16502_s4 = scalar_lea.hbm %s22844_s3, 1024 }
 0x7a9   : > { %p16499_p4 = scmp.ne.s32.totalorder %s22804_s19, %s16498_s27  ;;  %p16503_p9 = scmp.lt.s32.totalorder %s22804_s19, %s22844_s3 }
 0x7aa   : > { %p16504_p10 = scmp.lt.s32.totalorder %s16502_s4, %s16498_s27 }
 0x7ab   : > { %p16500_p7 = pnand %p16499_p4, %p16606_p5 }
 0x7ac   : > { %p16505_p11 = por %p16504_p10, %p16503_p9 }
 0x7ad   : > { %p16501_p8 = pneg %p16500_p7 }
 0x7af   : > { %p16506_p12 = pnand %p16505_p11, %p16501_p8 }
 0x7b1   : > { %16509 = shalt.err (!%p16506_p12)
}
 0x7b2   : > { %16443 = dma.vmem_to_hbm [thread:$0]  (%p16606_p5), %s11192_s10, 512, %s22804_s19, %s11177_s16  }
 0x7b3 PF: > { %p16449_p13 = scmp.ge.s32.totalorder %s16544_s15, 2  ;;  %s11203_s30 = sand.u32 1, %s16532_s12  }
 0x7b4   : > { %s11204_s7 = scalar_lea.sflag [#allocation3], %s11203_s30 }
 0x7b5   : > { %p16446_p0 = pnand %p16449_p13, %p16610_p6 }
 0x7b7   : > { %p16447_p1 = pneg %p16446_p0 }
 0x7b9   : > { %16527 = dma.done.wait (%p16447_p1), %s11204_s7, 512  }
 0x7ba   : > { %16529 = vsyncadd (%p16447_p1), %s11204_s7, 4294966784  ;;  %p13_p2 = scmp.ge.s32.totalorder %s16593_s18, 4   ;;  %s23819_s12 = smov %s16536_s13 }
 0x7bb   : > { %s23820_s13 = smov %s16540_s14  ;;  %s23821_s14 = smov %s16604_s21 }
 0x7bc   : > { %s23822_s15 = smov %s16593_s18  ;;  %15 = sbr.rel (!%p13_p2) target bundleno = 3 (0x3), region = 101 }
 0x7c1   :  { %11209 = vsyncpa [#allocation3], 1 }
 0x7c2   :  { %11211 = vsyncpa [#allocation3 + $0x1], 1 }

</bundles_post_ra>
